<compile_context>
chip_gen: v5e
topology: v5e:2x2
jax: 0.10.0
libtpu: 0.0.40
codegen_flags: <defaults>
</compile_context>

<pallas_src>
import functools

import jax
import jax.numpy as jnp
from jax import lax
from jax.experimental import pallas as pl
from jax.experimental.pallas import tpu as pltpu


def _largest_divisor_leq(n, cap):
    t = min(n, cap)
    while t > 1:
        if n % t == 0:
            return t
        t -= 1
    return 1


def _pick_batch_block(bsz, cap=128):
    """Batch tile must be a multiple of 8 (sublane) or the full extent."""
    if bsz % 8 == 0:
        t = min(bsz, cap)
        t -= t % 8
        while t >= 8:
            if bsz % t == 0:
                return t
            t -= 8
    return bsz


# --------- Kernel 1: pool + folded affine projection, time-major output ----- #
def frame_proj_kernel(x_ref, w_fold_ref, b_fold_ref, xproj_ref):
    # x_ref:      (B, 1, C, HW) f32   all batch rows for one time step
    # w_fold_ref: (C, 4H)       f32   w_base @ w_ih (base Linear folded into
    #                                 the LSTM input projection)
    # b_fold_ref: (1, 4H)       f32   b_base @ w_ih + b_ih + b_hh
    # xproj_ref:  (1, B, 4H)    bf16  time-major output (transpose folded here)
    c = w_fold_ref.shape[0]
    bsz = xproj_ref.shape[1]
    g4 = xproj_ref.shape[2]
    # TODO(synk): if upstream can hand over bf16 frames, take x in bf16 here to
    # halve the HBM traffic of this mem-bound kernel (biggest win on v5e).
    xt = x_ref[...][:, 0]                                      # (B, C, HW) f32
    acc = jnp.zeros((bsz, g4), jnp.float32)
    # K = C is tiny (e.g. 4): do the contraction as C broadcast FMAs on the VPU
    # instead of feeding a K=4 matmul to the MXU (kernel is HBM-bound anyway).
    for ci in range(c):
        pool_c = jnp.mean(xt[:, ci, :], axis=-1, keepdims=True)   # (B, 1)  XLU
        acc = acc + pool_c * w_fold_ref[ci:ci + 1, :]              # (B, 4H) VPU
    xproj_ref[0] = (acc + b_fold_ref[...]).astype(xproj_ref.dtype)


def run_frame_proj(x4, w_fold, b_fold):
    b, s, c, hw = x4.shape
    g4 = w_fold.shape[1]
    return pl.pallas_call(
        frame_proj_kernel,
        out_shape=jax.ShapeDtypeStruct((s, b, g4), jnp.bfloat16),
        grid=(s,),
        in_specs=[
            pl.BlockSpec((b, 1, c, hw), lambda t: (0, t, 0, 0)),
            pl.BlockSpec((c, g4), lambda t: (0, 0)),
            pl.BlockSpec((1, g4), lambda t: (0, 0)),
        ],
        out_specs=pl.BlockSpec((1, b, g4), lambda t: (t, 0, 0)),
        compiler_params=pltpu.CompilerParams(
            dimension_semantics=("parallel",),
            vmem_limit_bytes=32 * 1024 * 1024,   # << v7x's 64 MiB/TC
        ),
    )(x4, w_fold, b_fold)


# --------------------------- Kernel 2: LSTM + FC ---------------------------- #
def lstm_fc_kernel(xproj_ref, w_hh_ref, w_fc_ref, b_fc_ref, out_ref,
                   h_ref, c_ref, *, hidden_size, time_block):
    # xproj_ref: (Ts, Bt, 4H) bf16   time-major block of x_t @ W_ih + biases
    # w_hh_ref:  (H, 4H)      bf16   resident across all grid steps
    # w_fc_ref:  (H, 128)     bf16   lane-padded FC weight
    # b_fc_ref:  (1, 128)     f32
    # out_ref:   (Bt, 128)    f32    revisited across the time grid axis
    # h_ref/c_ref: (Bt, H)    f32    recurrent state carried across time blocks
    H = hidden_size
    t_blk = pl.program_id(1)

    @pl.when(t_blk == 0)
    def _():
        h_ref[...] = jnp.zeros_like(h_ref)
        c_ref[...] = jnp.zeros_like(c_ref)

    def step(j, carry):
        # Only the recurrent matmul sits on the serial chain.
        gates = xproj_ref[j].astype(jnp.float32) + jnp.dot(
            h_ref[...].astype(jnp.bfloat16), w_hh_ref[...],
            preferred_element_type=jnp.float32)
        # PyTorch gate order i, f, g, o.  One sigmoid over the full slab + one
        # tanh on the g slice (EUP); gate math stays f32 (v5e has no bf16 VPU).
        sig = jax.nn.sigmoid(gates)
        g_g = jnp.tanh(gates[:, 2 * H:3 * H])
        c_new = sig[:, 1 * H:2 * H] * c_ref[...] + sig[:, 0 * H:1 * H] * g_g
        c_ref[...] = c_new
        h_ref[...] = sig[:, 3 * H:4 * H] * jnp.tanh(c_new)
        return carry

    lax.fori_loop(0, time_block, step, 0, unroll=True)

    @pl.when(t_blk == pl.num_programs(1) - 1)
    def _():
        out_ref[...] = (
            jnp.dot(h_ref[...].astype(jnp.bfloat16), w_fc_ref[...],
                    preferred_element_type=jnp.float32) + b_fc_ref[...])


def run_lstm_fc(xproj_sbg, w_hh, w_fc_pad, b_fc_pad, hidden_size,
                *, max_time_block=8, max_batch_block=128):
    s, bsz, g4 = xproj_sbg.shape
    nc_pad = w_fc_pad.shape[1]
    ts = _largest_divisor_leq(s, max_time_block)   # time steps per grid block
    bt = _pick_batch_block(bsz, max_batch_block)   # batch rows per grid block
    grid = (bsz // bt, s // ts)
    kernel = functools.partial(lstm_fc_kernel, hidden_size=hidden_size,
                               time_block=ts)
    return pl.pallas_call(
        kernel,
        out_shape=jax.ShapeDtypeStruct((bsz, nc_pad), jnp.float32),
        grid=grid,
        in_specs=[
            pl.BlockSpec((ts, bt, g4), lambda b, t: (t, b, 0)),
            pl.BlockSpec((hidden_size, g4), lambda b, t: (0, 0)),
            pl.BlockSpec((hidden_size, nc_pad), lambda b, t: (0, 0)),
            pl.BlockSpec((1, nc_pad), lambda b, t: (0, 0)),
        ],
        out_specs=pl.BlockSpec((bt, nc_pad), lambda b, t: (b, 0)),
        scratch_shapes=[
            pltpu.VMEM((bt, hidden_size), jnp.float32),  # h
            pltpu.VMEM((bt, hidden_size), jnp.float32),  # c
        ],
        compiler_params=pltpu.CompilerParams(
            dimension_semantics=("parallel", "arbitrary"),
            vmem_limit_bytes=32 * 1024 * 1024,   # << v7x's 64 MiB/TC
        ),
    )(xproj_sbg, w_hh, w_fc_pad, b_fc_pad)


# ------------------------------- Full forward ------------------------------- #
def lstm_model_forward(x, params, hidden_size, num_classes):
    b, s, c, h, w = x.shape
    x4 = x.reshape(b, s, c, h * w)   # contiguous -> free reshape
    # Kernel 1 writes xproj time-major directly, so no XLA transpose here.
    # TODO(synk): at tiny B*S the two dispatches + the (small, bf16) xproj HBM
    # bounce could be removed by fusing both phases into one pallas_call; kept
    # split so kernel 1 still pipelines/parallelizes for large B*S.
    xproj = run_frame_proj(x4, params["w_fold"], params["b_fold"])   # (S,B,4H)
    out_pad = run_lstm_fc(xproj, params["w_hh"], params["w_fc_pad"],
                          params["b_fc_pad"], hidden_size)           # (B, 128)
    return out_pad[:, :num_classes]


def init_params(key, c, h, w, feat_dim=512, hidden_size=256, num_classes=2,
                lane_pad=128):
    ks = jax.random.split(key, 8)
    sb = 1.0 / jnp.sqrt(c)
    sl = 1.0 / jnp.sqrt(hidden_size)
    sf = 1.0 / jnp.sqrt(hidden_size)

    # Synthetic base model: global-avg-pool over HxW + Linear(C -> feat_dim).
    w_base = jax.random.uniform(ks[0], (c, feat_dim), jnp.float32, -sb, sb)
    b_base = jax.random.uniform(ks[1], (1, feat_dim), jnp.float32, -sb, sb)

    # PyTorch LSTM weights are (4H, D)/(4H, H); stored transposed here.
    w_ih = jax.random.uniform(ks[2], (feat_dim, 4 * hidden_size), jnp.float32,
                              -sl, sl)
    w_hh = jax.random.uniform(ks[3], (hidden_size, 4 * hidden_size),
                              jnp.float32, -sl, sl)
    b_ih = jax.random.uniform(ks[4], (1, 4 * hidden_size), jnp.float32, -sl, sl)
    b_hh = jax.random.uniform(ks[5], (1, 4 * hidden_size), jnp.float32, -sl, sl)

    # Fold base Linear + LSTM input projection (both affine, identical math):
    #   (mean_hw(x) @ w_base + b_base) @ w_ih + b_ih + b_hh
    # == mean_hw(x) @ (w_base @ w_ih) + (b_base @ w_ih + b_ih + b_hh)
    w_fold = w_base @ w_ih                      # (C, 4H) f32 — tiny
    b_fold = b_base @ w_ih + b_ih + b_hh        # (1, 4H) f32

    w_fc = jax.random.uniform(ks[6], (hidden_size, num_classes), jnp.float32,
                              -sf, sf)
    b_fc = jax.random.uniform(ks[7], (1, num_classes), jnp.float32, -sf, sf)
    nc_pad = max(lane_pad, num_classes)
    w_fc_pad = (jnp.zeros((hidden_size, nc_pad), jnp.float32)
                .at[:, :num_classes].set(w_fc)).astype(jnp.bfloat16)
    b_fc_pad = jnp.zeros((1, nc_pad), jnp.float32).at[:, :num_classes].set(b_fc)

    return {
        "w_fold": w_fold,                          # (C, 4H)  f32
        "b_fold": b_fold,                          # (1, 4H)  f32
        "w_hh": w_hh.astype(jnp.bfloat16),         # (H, 4H)  bf16
        "w_fc_pad": w_fc_pad,                      # (H, 128) bf16
        "b_fc_pad": b_fc_pad,                      # (1, 128) f32
    }


if __name__ == "__main__":
    B, S, C, H, W = 2, 8, 4, 16, 16
    HIDDEN = 256
    NUM_CLASSES = 2

    key = jax.random.PRNGKey(0)
    k_x, k_p = jax.random.split(key)
    x = jax.random.normal(k_x, (B, S, C, H, W), dtype=jnp.float32)
    params = init_params(k_p, C, H, W, feat_dim=512, hidden_size=HIDDEN,
                         num_classes=NUM_CLASSES)

    fwd = jax.jit(functools.partial(lstm_model_forward, hidden_size=HIDDEN,
                                    num_classes=NUM_CLASSES))
    out = fwd(x, params)
    out = jax.block_until_ready(out)
    assert out.shape == (B, NUM_CLASSES), out.shape
    print("KERNEL_OK")
</pallas_src>

<mosaic_0001>
module attributes {stable_mosaic.version = 11 : i64} {
  func.func @frame_proj_kernel(%arg0: i32, %arg1: memref<2x1x4x256xf32, #tpu.memory_space<vmem>>, %arg2: memref<4x1024xf32, #tpu.memory_space<vmem>>, %arg3: memref<1x1024xf32, #tpu.memory_space<vmem>>, %arg4: memref<1x2x1024xbf16, #tpu.memory_space<vmem>>) attributes {dimension_semantics = [#tpu.dimension_semantics<parallel>], iteration_bounds = array<i64: 8>, scalar_prefetch = 0 : i64, scratch_operands = 0 : i64, tpu.core_type = #tpu.core_type<tc>, window_params = [{transform_indices = @transform_0, window_bounds = array<i64: 2, 1, 4, 256>}, {pipeline_mode = #tpu.pipeline_mode<synchronous>, transform_indices = @transform_1, window_bounds = array<i64: 4, 1024>}, {pipeline_mode = #tpu.pipeline_mode<synchronous>, transform_indices = @transform_2, window_bounds = array<i64: 1, 1024>}, {transform_indices = @transform_3, window_bounds = array<i64: 1, 2, 1024>}]} {
    %c0 = arith.constant 0 : index
    %c0_0 = arith.constant 0 : index
    %c0_1 = arith.constant 0 : index
    %c0_2 = arith.constant 0 : index
    %0 = vector.load %arg1[%c0, %c0_0, %c0_1, %c0_2] : memref<2x1x4x256xf32, #tpu.memory_space<vmem>>, vector<2x1x4x256xf32>
    %1 = vector.shape_cast %0 : vector<2x1x4x256xf32> to vector<2x4x256xf32>
    %cst = arith.constant 0.000000e+00 : f32
    %2 = vector.broadcast %cst : f32 to vector<2x1024xf32>
    %3 = vector.extract_strided_slice %1 {offsets = [0, 0, 0], sizes = [2, 1, 256], strides = [1, 1, 1]} : vector<2x4x256xf32> to vector<2x1x256xf32>
    %4 = vector.shape_cast %3 : vector<2x1x256xf32> to vector<2x256xf32>
    %cst_3 = arith.constant dense<0.000000e+00> : vector<2xf32>
    %5 = vector.multi_reduction <add>, %4, %cst_3 [1] : vector<2x256xf32> to vector<2xf32>
    %6 = vector.shape_cast %5 : vector<2xf32> to vector<2x1xf32>
    %cst_4 = arith.constant 2.560000e+02 : f32
    %7 = vector.broadcast %cst_4 : f32 to vector<2x1xf32>
    %8 = arith.divf %6, %7 : vector<2x1xf32>
    %c0_5 = arith.constant 0 : index
    %c0_6 = arith.constant 0 : index
    %9 = vector.load %arg2[%c0_5, %c0_6] : memref<4x1024xf32, #tpu.memory_space<vmem>>, vector<1x1024xf32>
    %10 = vector.broadcast %8 : vector<2x1xf32> to vector<2x1024xf32>
    %11 = vector.broadcast %9 : vector<1x1024xf32> to vector<2x1024xf32>
    %12 = arith.mulf %10, %11 : vector<2x1024xf32>
    %13 = arith.addf %2, %12 : vector<2x1024xf32>
    %14 = vector.extract_strided_slice %1 {offsets = [0, 1, 0], sizes = [2, 1, 256], strides = [1, 1, 1]} : vector<2x4x256xf32> to vector<2x1x256xf32>
    %15 = vector.shape_cast %14 : vector<2x1x256xf32> to vector<2x256xf32>
    %cst_7 = arith.constant dense<0.000000e+00> : vector<2xf32>
    %16 = vector.multi_reduction <add>, %15, %cst_7 [1] : vector<2x256xf32> to vector<2xf32>
    %17 = vector.shape_cast %16 : vector<2xf32> to vector<2x1xf32>
    %cst_8 = arith.constant 2.560000e+02 : f32
    %18 = vector.broadcast %cst_8 : f32 to vector<2x1xf32>
    %19 = arith.divf %17, %18 : vector<2x1xf32>
    %c1 = arith.constant 1 : index
    %c0_9 = arith.constant 0 : index
    %20 = vector.load %arg2[%c1, %c0_9] : memref<4x1024xf32, #tpu.memory_space<vmem>>, vector<1x1024xf32>
    %21 = vector.broadcast %19 : vector<2x1xf32> to vector<2x1024xf32>
    %22 = vector.broadcast %20 : vector<1x1024xf32> to vector<2x1024xf32>
    %23 = arith.mulf %21, %22 : vector<2x1024xf32>
    %24 = arith.addf %13, %23 : vector<2x1024xf32>
    %25 = vector.extract_strided_slice %1 {offsets = [0, 2, 0], sizes = [2, 1, 256], strides = [1, 1, 1]} : vector<2x4x256xf32> to vector<2x1x256xf32>
    %26 = vector.shape_cast %25 : vector<2x1x256xf32> to vector<2x256xf32>
    %cst_10 = arith.constant dense<0.000000e+00> : vector<2xf32>
    %27 = vector.multi_reduction <add>, %26, %cst_10 [1] : vector<2x256xf32> to vector<2xf32>
    %28 = vector.shape_cast %27 : vector<2xf32> to vector<2x1xf32>
    %cst_11 = arith.constant 2.560000e+02 : f32
    %29 = vector.broadcast %cst_11 : f32 to vector<2x1xf32>
    %30 = arith.divf %28, %29 : vector<2x1xf32>
    %c2 = arith.constant 2 : index
    %c0_12 = arith.constant 0 : index
    %31 = vector.load %arg2[%c2, %c0_12] : memref<4x1024xf32, #tpu.memory_space<vmem>>, vector<1x1024xf32>
    %32 = vector.broadcast %30 : vector<2x1xf32> to vector<2x1024xf32>
    %33 = vector.broadcast %31 : vector<1x1024xf32> to vector<2x1024xf32>
    %34 = arith.mulf %32, %33 : vector<2x1024xf32>
    %35 = arith.addf %24, %34 : vector<2x1024xf32>
    %36 = vector.extract_strided_slice %1 {offsets = [0, 3, 0], sizes = [2, 1, 256], strides = [1, 1, 1]} : vector<2x4x256xf32> to vector<2x1x256xf32>
    %37 = vector.shape_cast %36 : vector<2x1x256xf32> to vector<2x256xf32>
    %cst_13 = arith.constant dense<0.000000e+00> : vector<2xf32>
    %38 = vector.multi_reduction <add>, %37, %cst_13 [1] : vector<2x256xf32> to vector<2xf32>
    %39 = vector.shape_cast %38 : vector<2xf32> to vector<2x1xf32>
    %cst_14 = arith.constant 2.560000e+02 : f32
    %40 = vector.broadcast %cst_14 : f32 to vector<2x1xf32>
    %41 = arith.divf %39, %40 : vector<2x1xf32>
    %c3 = arith.constant 3 : index
    %c0_15 = arith.constant 0 : index
    %42 = vector.load %arg2[%c3, %c0_15] : memref<4x1024xf32, #tpu.memory_space<vmem>>, vector<1x1024xf32>
    %43 = vector.broadcast %41 : vector<2x1xf32> to vector<2x1024xf32>
    %44 = vector.broadcast %42 : vector<1x1024xf32> to vector<2x1024xf32>
    %45 = arith.mulf %43, %44 : vector<2x1024xf32>
    %46 = arith.addf %35, %45 : vector<2x1024xf32>
    %c0_16 = arith.constant 0 : index
    %c0_17 = arith.constant 0 : index
    %47 = vector.load %arg3[%c0_16, %c0_17] : memref<1x1024xf32, #tpu.memory_space<vmem>>, vector<1x1024xf32>
    %48 = vector.broadcast %47 : vector<1x1024xf32> to vector<2x1024xf32>
    %49 = arith.addf %46, %48 : vector<2x1024xf32>
    %50 = arith.truncf %49 : vector<2x1024xf32> to vector<2x1024xbf16>
    %c0_18 = arith.constant 0 : index
    %c0_19 = arith.constant 0 : index
    %c0_20 = arith.constant 0 : index
    %51 = vector.load %arg4[%c0_18, %c0_19, %c0_20] : memref<1x2x1024xbf16, #tpu.memory_space<vmem>>, vector<1x2x1024xbf16>
    %52 = vector.shape_cast %51 : vector<1x2x1024xbf16> to vector<2x1024xbf16>
    %53 = vector.shape_cast %50 : vector<2x1024xbf16> to vector<1x2x1024xbf16>
    tpu.vector_store %arg4[%c0_18, %c0_19, %c0_20], %53 {strides = array<i32>} : memref<1x2x1024xbf16, #tpu.memory_space<vmem>>, vector<1x2x1024xbf16>,
    return
  }
  func.func @transform_0(%arg0: i32) -> (i32, i32, i32, i32) {
    %c0_i32 = arith.constant 0 : i32
    %c0_i32_0 = arith.constant 0 : i32
    %c0_i32_1 = arith.constant 0 : i32
    %c0_i32_2 = arith.constant 0 : i32
    return %c0_i32, %arg0, %c0_i32_0, %c0_i32_1 : i32, i32, i32, i32
  }
  func.func @transform_1(%arg0: i32) -> (i32, i32) {
    %c0_i32 = arith.constant 0 : i32
    %c0_i32_0 = arith.constant 0 : i32
    %c0_i32_1 = arith.constant 0 : i32
    return %c0_i32, %c0_i32_0 : i32, i32
  }
  func.func @transform_2(%arg0: i32) -> (i32, i32) {
    %c0_i32 = arith.constant 0 : i32
    %c0_i32_0 = arith.constant 0 : i32
    %c0_i32_1 = arith.constant 0 : i32
    return %c0_i32, %c0_i32_0 : i32, i32
  }
  func.func @transform_3(%arg0: i32) -> (i32, i32, i32) {
    %c0_i32 = arith.constant 0 : i32
    %c0_i32_0 = arith.constant 0 : i32
    %c0_i32_1 = arith.constant 0 : i32
    return %arg0, %c0_i32, %c0_i32_0 : i32, i32, i32
  }
}

module attributes {stable_mosaic.version = 11 : i64} {
  func.func @lstm_fc_kernel(%arg0: i32, %arg1: i32, %arg2: memref<8x2x1024xbf16, #tpu.memory_space<vmem>>, %arg3: memref<256x1024xbf16, #tpu.memory_space<vmem>>, %arg4: memref<256x128xbf16, #tpu.memory_space<vmem>>, %arg5: memref<1x128xf32, #tpu.memory_space<vmem>>, %arg6: memref<2x128xf32, #tpu.memory_space<vmem>>, %arg7: memref<2x256xf32, #tpu.memory_space<vmem>>, %arg8: memref<2x256xf32, #tpu.memory_space<vmem>>) attributes {dimension_semantics = [#tpu.dimension_semantics<parallel>, #tpu.dimension_semantics<arbitrary>], iteration_bounds = array<i64: 1, 1>, scalar_prefetch = 0 : i64, scratch_operands = 2 : i64, tpu.core_type = #tpu.core_type<tc>, window_params = [{transform_indices = @transform_0, window_bounds = array<i64: 8, 2, 1024>}, {pipeline_mode = #tpu.pipeline_mode<synchronous>, transform_indices = @transform_1, window_bounds = array<i64: 256, 1024>}, {pipeline_mode = #tpu.pipeline_mode<synchronous>, transform_indices = @transform_2, window_bounds = array<i64: 256, 128>}, {pipeline_mode = #tpu.pipeline_mode<synchronous>, transform_indices = @transform_3, window_bounds = array<i64: 1, 128>}, {transform_indices = @transform_4, window_bounds = array<i64: 2, 128>}]} {
    %c0_i32 = arith.constant 0 : i32
    %0 = arith.cmpi eq, %arg1, %c0_i32 : i32
    %1 = arith.extui %0 : i1 to i32
    %c0_i32_0 = arith.constant 0 : i32
    %2 = arith.cmpi ne, %1, %c0_i32_0 : i32
    scf.if %2 {
      %cst_114 = arith.constant 0.000000e+00 : f32
      %222 = vector.broadcast %cst_114 : f32 to vector<2x256xf32>
      %c0_115 = arith.constant 0 : index
      %c0_116 = arith.constant 0 : index
      %223 = vector.load %arg7[%c0_115, %c0_116] : memref<2x256xf32, #tpu.memory_space<vmem>>, vector<2x256xf32>
      tpu.vector_store %arg7[%c0_115, %c0_116], %222 {strides = array<i32>} : memref<2x256xf32, #tpu.memory_space<vmem>>, vector<2x256xf32>,
      %cst_117 = arith.constant 0.000000e+00 : f32
      %224 = vector.broadcast %cst_117 : f32 to vector<2x256xf32>
      %c0_118 = arith.constant 0 : index
      %c0_119 = arith.constant 0 : index
      %225 = vector.load %arg8[%c0_118, %c0_119] : memref<2x256xf32, #tpu.memory_space<vmem>>, vector<2x256xf32>
      tpu.vector_store %arg8[%c0_118, %c0_119], %224 {strides = array<i32>} : memref<2x256xf32, #tpu.memory_space<vmem>>, vector<2x256xf32>,
    } else {
    }
    %c0_i32_1 = arith.constant 0 : i32
    %3 = arith.index_cast %c0_i32_1 : i32 to index
    %c0 = arith.constant 0 : index
    %c0_2 = arith.constant 0 : index
    %4 = vector.load %arg2[%3, %c0, %c0_2] : memref<8x2x1024xbf16, #tpu.memory_space<vmem>>, vector<1x2x1024xbf16>
    %5 = vector.shape_cast %4 : vector<1x2x1024xbf16> to vector<2x1024xbf16>
    %6 = arith.extf %5 : vector<2x1024xbf16> to vector<2x1024xf32>
    %c0_3 = arith.constant 0 : index
    %c0_4 = arith.constant 0 : index
    %7 = vector.load %arg7[%c0_3, %c0_4] : memref<2x256xf32, #tpu.memory_space<vmem>>, vector<2x256xf32>
    %8 = arith.truncf %7 : vector<2x256xf32> to vector<2x256xbf16>
    %c0_5 = arith.constant 0 : index
    %c0_6 = arith.constant 0 : index
    %9 = vector.load %arg3[%c0_5, %c0_6] : memref<256x1024xbf16, #tpu.memory_space<vmem>>, vector<256x1024xbf16>
    %cst = arith.constant dense<0.000000e+00> : vector<2x1024xf32>
    %10 = tpu.matmul %8, %9, %cst {dimension_numbers = #tpu.dot_dimension_numbers<[1], [0], [0], [1], [0, 0, 1, 1], [], []>} : vector<2x256xbf16>, vector<256x1024xbf16>, vector<2x1024xf32> -> vector<2x1024xf32>
    %11 = arith.addf %6, %10 : vector<2x1024xf32>
    %12 = arith.negf %11 : vector<2x1024xf32>
    %13 = math.exp %12 : vector<2x1024xf32>
    %cst_7 = arith.constant 1.000000e+00 : f32
    %14 = vector.broadcast %cst_7 : f32 to vector<2x1024xf32>
    %15 = arith.addf %14, %13 : vector<2x1024xf32>
    %16 = arith.divf %14, %15 : vector<2x1024xf32>
    %17 = vector.extract_strided_slice %11 {offsets = [0, 512], sizes = [2, 256], strides = [1, 1]} : vector<2x1024xf32> to vector<2x256xf32>
    %18 = math.tanh %17 : vector<2x256xf32>
    %19 = vector.extract_strided_slice %16 {offsets = [0, 256], sizes = [2, 256], strides = [1, 1]} : vector<2x1024xf32> to vector<2x256xf32>
    %c0_8 = arith.constant 0 : index
    %c0_9 = arith.constant 0 : index
    %20 = vector.load %arg8[%c0_8, %c0_9] : memref<2x256xf32, #tpu.memory_space<vmem>>, vector<2x256xf32>
    %21 = arith.mulf %19, %20 : vector<2x256xf32>
    %22 = vector.extract_strided_slice %16 {offsets = [0, 0], sizes = [2, 256], strides = [1, 1]} : vector<2x1024xf32> to vector<2x256xf32>
    %23 = arith.mulf %22, %18 : vector<2x256xf32>
    %24 = arith.addf %21, %23 : vector<2x256xf32>
    %c0_10 = arith.constant 0 : index
    %c0_11 = arith.constant 0 : index
    %25 = vector.load %arg8[%c0_10, %c0_11] : memref<2x256xf32, #tpu.memory_space<vmem>>, vector<2x256xf32>
    tpu.vector_store %arg8[%c0_10, %c0_11], %24 {strides = array<i32>} : memref<2x256xf32, #tpu.memory_space<vmem>>, vector<2x256xf32>,
    %26 = vector.extract_strided_slice %16 {offsets = [0, 768], sizes = [2, 256], strides = [1, 1]} : vector<2x1024xf32> to vector<2x256xf32>
    %27 = math.tanh %24 : vector<2x256xf32>
    %28 = arith.mulf %26, %27 : vector<2x256xf32>
    %c0_12 = arith.constant 0 : index
    %c0_13 = arith.constant 0 : index
    %29 = vector.load %arg7[%c0_12, %c0_13] : memref<2x256xf32, #tpu.memory_space<vmem>>, vector<2x256xf32>
    tpu.vector_store %arg7[%c0_12, %c0_13], %28 {strides = array<i32>} : memref<2x256xf32, #tpu.memory_space<vmem>>, vector<2x256xf32>,
    %c1_i32 = arith.constant 1 : i32
    %30 = arith.index_cast %c1_i32 : i32 to index
    %c0_14 = arith.constant 0 : index
    %c0_15 = arith.constant 0 : index
    %31 = vector.load %arg2[%30, %c0_14, %c0_15] : memref<8x2x1024xbf16, #tpu.memory_space<vmem>>, vector<1x2x1024xbf16>
    %32 = vector.shape_cast %31 : vector<1x2x1024xbf16> to vector<2x1024xbf16>
    %33 = arith.extf %32 : vector<2x1024xbf16> to vector<2x1024xf32>
    %c0_16 = arith.constant 0 : index
    %c0_17 = arith.constant 0 : index
    %34 = vector.load %arg7[%c0_16, %c0_17] : memref<2x256xf32, #tpu.memory_space<vmem>>, vector<2x256xf32>
    %35 = arith.truncf %34 : vector<2x256xf32> to vector<2x256xbf16>
    %c0_18 = arith.constant 0 : index
    %c0_19 = arith.constant 0 : index
    %36 = vector.load %arg3[%c0_18, %c0_19] : memref<256x1024xbf16, #tpu.memory_space<vmem>>, vector<256x1024xbf16>
    %cst_20 = arith.constant dense<0.000000e+00> : vector<2x1024xf32>
    %37 = tpu.matmul %35, %36, %cst_20 {dimension_numbers = #tpu.dot_dimension_numbers<[1], [0], [0], [1], [0, 0, 1, 1], [], []>} : vector<2x256xbf16>, vector<256x1024xbf16>, vector<2x1024xf32> -> vector<2x1024xf32>
    %38 = arith.addf %33, %37 : vector<2x1024xf32>
    %39 = arith.negf %38 : vector<2x1024xf32>
    %40 = math.exp %39 : vector<2x1024xf32>
    %cst_21 = arith.constant 1.000000e+00 : f32
    %41 = vector.broadcast %cst_21 : f32 to vector<2x1024xf32>
    %42 = arith.addf %41, %40 : vector<2x1024xf32>
    %43 = arith.divf %41, %42 : vector<2x1024xf32>
    %44 = vector.extract_strided_slice %38 {offsets = [0, 512], sizes = [2, 256], strides = [1, 1]} : vector<2x1024xf32> to vector<2x256xf32>
    %45 = math.tanh %44 : vector<2x256xf32>
    %46 = vector.extract_strided_slice %43 {offsets = [0, 256], sizes = [2, 256], strides = [1, 1]} : vector<2x1024xf32> to vector<2x256xf32>
    %c0_22 = arith.constant 0 : index
    %c0_23 = arith.constant 0 : index
    %47 = vector.load %arg8[%c0_22, %c0_23] : memref<2x256xf32, #tpu.memory_space<vmem>>, vector<2x256xf32>
    %48 = arith.mulf %46, %47 : vector<2x256xf32>
    %49 = vector.extract_strided_slice %43 {offsets = [0, 0], sizes = [2, 256], strides = [1, 1]} : vector<2x1024xf32> to vector<2x256xf32>
    %50 = arith.mulf %49, %45 : vector<2x256xf32>
    %51 = arith.addf %48, %50 : vector<2x256xf32>
    %c0_24 = arith.constant 0 : index
    %c0_25 = arith.constant 0 : index
    %52 = vector.load %arg8[%c0_24, %c0_25] : memref<2x256xf32, #tpu.memory_space<vmem>>, vector<2x256xf32>
    tpu.vector_store %arg8[%c0_24, %c0_25], %51 {strides = array<i32>} : memref<2x256xf32, #tpu.memory_space<vmem>>, vector<2x256xf32>,
    %53 = vector.extract_strided_slice %43 {offsets = [0, 768], sizes = [2, 256], strides = [1, 1]} : vector<2x1024xf32> to vector<2x256xf32>
    %54 = math.tanh %51 : vector<2x256xf32>
    %55 = arith.mulf %53, %54 : vector<2x256xf32>
    %c0_26 = arith.constant 0 : index
    %c0_27 = arith.constant 0 : index
    %56 = vector.load %arg7[%c0_26, %c0_27] : memref<2x256xf32, #tpu.memory_space<vmem>>, vector<2x256xf32>
    tpu.vector_store %arg7[%c0_26, %c0_27], %55 {strides = array<i32>} : memref<2x256xf32, #tpu.memory_space<vmem>>, vector<2x256xf32>,
    %c2_i32 = arith.constant 2 : i32
    %57 = arith.index_cast %c2_i32 : i32 to index
    %c0_28 = arith.constant 0 : index
    %c0_29 = arith.constant 0 : index
    %58 = vector.load %arg2[%57, %c0_28, %c0_29] : memref<8x2x1024xbf16, #tpu.memory_space<vmem>>, vector<1x2x1024xbf16>
    %59 = vector.shape_cast %58 : vector<1x2x1024xbf16> to vector<2x1024xbf16>
    %60 = arith.extf %59 : vector<2x1024xbf16> to vector<2x1024xf32>
    %c0_30 = arith.constant 0 : index
    %c0_31 = arith.constant 0 : index
    %61 = vector.load %arg7[%c0_30, %c0_31] : memref<2x256xf32, #tpu.memory_space<vmem>>, vector<2x256xf32>
    %62 = arith.truncf %61 : vector<2x256xf32> to vector<2x256xbf16>
    %c0_32 = arith.constant 0 : index
    %c0_33 = arith.constant 0 : index
    %63 = vector.load %arg3[%c0_32, %c0_33] : memref<256x1024xbf16, #tpu.memory_space<vmem>>, vector<256x1024xbf16>
    %cst_34 = arith.constant dense<0.000000e+00> : vector<2x1024xf32>
    %64 = tpu.matmul %62, %63, %cst_34 {dimension_numbers = #tpu.dot_dimension_numbers<[1], [0], [0], [1], [0, 0, 1, 1], [], []>} : vector<2x256xbf16>, vector<256x1024xbf16>, vector<2x1024xf32> -> vector<2x1024xf32>
    %65 = arith.addf %60, %64 : vector<2x1024xf32>
    %66 = arith.negf %65 : vector<2x1024xf32>
    %67 = math.exp %66 : vector<2x1024xf32>
    %cst_35 = arith.constant 1.000000e+00 : f32
    %68 = vector.broadcast %cst_35 : f32 to vector<2x1024xf32>
    %69 = arith.addf %68, %67 : vector<2x1024xf32>
    %70 = arith.divf %68, %69 : vector<2x1024xf32>
    %71 = vector.extract_strided_slice %65 {offsets = [0, 512], sizes = [2, 256], strides = [1, 1]} : vector<2x1024xf32> to vector<2x256xf32>
    %72 = math.tanh %71 : vector<2x256xf32>
    %73 = vector.extract_strided_slice %70 {offsets = [0, 256], sizes = [2, 256], strides = [1, 1]} : vector<2x1024xf32> to vector<2x256xf32>
    %c0_36 = arith.constant 0 : index
    %c0_37 = arith.constant 0 : index
    %74 = vector.load %arg8[%c0_36, %c0_37] : memref<2x256xf32, #tpu.memory_space<vmem>>, vector<2x256xf32>
    %75 = arith.mulf %73, %74 : vector<2x256xf32>
    %76 = vector.extract_strided_slice %70 {offsets = [0, 0], sizes = [2, 256], strides = [1, 1]} : vector<2x1024xf32> to vector<2x256xf32>
    %77 = arith.mulf %76, %72 : vector<2x256xf32>
    %78 = arith.addf %75, %77 : vector<2x256xf32>
    %c0_38 = arith.constant 0 : index
    %c0_39 = arith.constant 0 : index
    %79 = vector.load %arg8[%c0_38, %c0_39] : memref<2x256xf32, #tpu.memory_space<vmem>>, vector<2x256xf32>
    tpu.vector_store %arg8[%c0_38, %c0_39], %78 {strides = array<i32>} : memref<2x256xf32, #tpu.memory_space<vmem>>, vector<2x256xf32>,
    %80 = vector.extract_strided_slice %70 {offsets = [0, 768], sizes = [2, 256], strides = [1, 1]} : vector<2x1024xf32> to vector<2x256xf32>
    %81 = math.tanh %78 : vector<2x256xf32>
    %82 = arith.mulf %80, %81 : vector<2x256xf32>
    %c0_40 = arith.constant 0 : index
    %c0_41 = arith.constant 0 : index
    %83 = vector.load %arg7[%c0_40, %c0_41] : memref<2x256xf32, #tpu.memory_space<vmem>>, vector<2x256xf32>
    tpu.vector_store %arg7[%c0_40, %c0_41], %82 {strides = array<i32>} : memref<2x256xf32, #tpu.memory_space<vmem>>, vector<2x256xf32>,
    %c3_i32 = arith.constant 3 : i32
    %84 = arith.index_cast %c3_i32 : i32 to index
    %c0_42 = arith.constant 0 : index
    %c0_43 = arith.constant 0 : index
    %85 = vector.load %arg2[%84, %c0_42, %c0_43] : memref<8x2x1024xbf16, #tpu.memory_space<vmem>>, vector<1x2x1024xbf16>
    %86 = vector.shape_cast %85 : vector<1x2x1024xbf16> to vector<2x1024xbf16>
    %87 = arith.extf %86 : vector<2x1024xbf16> to vector<2x1024xf32>
    %c0_44 = arith.constant 0 : index
    %c0_45 = arith.constant 0 : index
    %88 = vector.load %arg7[%c0_44, %c0_45] : memref<2x256xf32, #tpu.memory_space<vmem>>, vector<2x256xf32>
    %89 = arith.truncf %88 : vector<2x256xf32> to vector<2x256xbf16>
    %c0_46 = arith.constant 0 : index
    %c0_47 = arith.constant 0 : index
    %90 = vector.load %arg3[%c0_46, %c0_47] : memref<256x1024xbf16, #tpu.memory_space<vmem>>, vector<256x1024xbf16>
    %cst_48 = arith.constant dense<0.000000e+00> : vector<2x1024xf32>
    %91 = tpu.matmul %89, %90, %cst_48 {dimension_numbers = #tpu.dot_dimension_numbers<[1], [0], [0], [1], [0, 0, 1, 1], [], []>} : vector<2x256xbf16>, vector<256x1024xbf16>, vector<2x1024xf32> -> vector<2x1024xf32>
    %92 = arith.addf %87, %91 : vector<2x1024xf32>
    %93 = arith.negf %92 : vector<2x1024xf32>
    %94 = math.exp %93 : vector<2x1024xf32>
    %cst_49 = arith.constant 1.000000e+00 : f32
    %95 = vector.broadcast %cst_49 : f32 to vector<2x1024xf32>
    %96 = arith.addf %95, %94 : vector<2x1024xf32>
    %97 = arith.divf %95, %96 : vector<2x1024xf32>
    %98 = vector.extract_strided_slice %92 {offsets = [0, 512], sizes = [2, 256], strides = [1, 1]} : vector<2x1024xf32> to vector<2x256xf32>
    %99 = math.tanh %98 : vector<2x256xf32>
    %100 = vector.extract_strided_slice %97 {offsets = [0, 256], sizes = [2, 256], strides = [1, 1]} : vector<2x1024xf32> to vector<2x256xf32>
    %c0_50 = arith.constant 0 : index
    %c0_51 = arith.constant 0 : index
    %101 = vector.load %arg8[%c0_50, %c0_51] : memref<2x256xf32, #tpu.memory_space<vmem>>, vector<2x256xf32>
    %102 = arith.mulf %100, %101 : vector<2x256xf32>
    %103 = vector.extract_strided_slice %97 {offsets = [0, 0], sizes = [2, 256], strides = [1, 1]} : vector<2x1024xf32> to vector<2x256xf32>
    %104 = arith.mulf %103, %99 : vector<2x256xf32>
    %105 = arith.addf %102, %104 : vector<2x256xf32>
    %c0_52 = arith.constant 0 : index
    %c0_53 = arith.constant 0 : index
    %106 = vector.load %arg8[%c0_52, %c0_53] : memref<2x256xf32, #tpu.memory_space<vmem>>, vector<2x256xf32>
    tpu.vector_store %arg8[%c0_52, %c0_53], %105 {strides = array<i32>} : memref<2x256xf32, #tpu.memory_space<vmem>>, vector<2x256xf32>,
    %107 = vector.extract_strided_slice %97 {offsets = [0, 768], sizes = [2, 256], strides = [1, 1]} : vector<2x1024xf32> to vector<2x256xf32>
    %108 = math.tanh %105 : vector<2x256xf32>
    %109 = arith.mulf %107, %108 : vector<2x256xf32>
    %c0_54 = arith.constant 0 : index
    %c0_55 = arith.constant 0 : index
    %110 = vector.load %arg7[%c0_54, %c0_55] : memref<2x256xf32, #tpu.memory_space<vmem>>, vector<2x256xf32>
    tpu.vector_store %arg7[%c0_54, %c0_55], %109 {strides = array<i32>} : memref<2x256xf32, #tpu.memory_space<vmem>>, vector<2x256xf32>,
    %c4_i32 = arith.constant 4 : i32
    %111 = arith.index_cast %c4_i32 : i32 to index
    %c0_56 = arith.constant 0 : index
    %c0_57 = arith.constant 0 : index
    %112 = vector.load %arg2[%111, %c0_56, %c0_57] : memref<8x2x1024xbf16, #tpu.memory_space<vmem>>, vector<1x2x1024xbf16>
    %113 = vector.shape_cast %112 : vector<1x2x1024xbf16> to vector<2x1024xbf16>
    %114 = arith.extf %113 : vector<2x1024xbf16> to vector<2x1024xf32>
    %c0_58 = arith.constant 0 : index
    %c0_59 = arith.constant 0 : index
    %115 = vector.load %arg7[%c0_58, %c0_59] : memref<2x256xf32, #tpu.memory_space<vmem>>, vector<2x256xf32>
    %116 = arith.truncf %115 : vector<2x256xf32> to vector<2x256xbf16>
    %c0_60 = arith.constant 0 : index
    %c0_61 = arith.constant 0 : index
    %117 = vector.load %arg3[%c0_60, %c0_61] : memref<256x1024xbf16, #tpu.memory_space<vmem>>, vector<256x1024xbf16>
    %cst_62 = arith.constant dense<0.000000e+00> : vector<2x1024xf32>
    %118 = tpu.matmul %116, %117, %cst_62 {dimension_numbers = #tpu.dot_dimension_numbers<[1], [0], [0], [1], [0, 0, 1, 1], [], []>} : vector<2x256xbf16>, vector<256x1024xbf16>, vector<2x1024xf32> -> vector<2x1024xf32>
    %119 = arith.addf %114, %118 : vector<2x1024xf32>
    %120 = arith.negf %119 : vector<2x1024xf32>
    %121 = math.exp %120 : vector<2x1024xf32>
    %cst_63 = arith.constant 1.000000e+00 : f32
    %122 = vector.broadcast %cst_63 : f32 to vector<2x1024xf32>
    %123 = arith.addf %122, %121 : vector<2x1024xf32>
    %124 = arith.divf %122, %123 : vector<2x1024xf32>
    %125 = vector.extract_strided_slice %119 {offsets = [0, 512], sizes = [2, 256], strides = [1, 1]} : vector<2x1024xf32> to vector<2x256xf32>
    %126 = math.tanh %125 : vector<2x256xf32>
    %127 = vector.extract_strided_slice %124 {offsets = [0, 256], sizes = [2, 256], strides = [1, 1]} : vector<2x1024xf32> to vector<2x256xf32>
    %c0_64 = arith.constant 0 : index
    %c0_65 = arith.constant 0 : index
    %128 = vector.load %arg8[%c0_64, %c0_65] : memref<2x256xf32, #tpu.memory_space<vmem>>, vector<2x256xf32>
    %129 = arith.mulf %127, %128 : vector<2x256xf32>
    %130 = vector.extract_strided_slice %124 {offsets = [0, 0], sizes = [2, 256], strides = [1, 1]} : vector<2x1024xf32> to vector<2x256xf32>
    %131 = arith.mulf %130, %126 : vector<2x256xf32>
    %132 = arith.addf %129, %131 : vector<2x256xf32>
    %c0_66 = arith.constant 0 : index
    %c0_67 = arith.constant 0 : index
    %133 = vector.load %arg8[%c0_66, %c0_67] : memref<2x256xf32, #tpu.memory_space<vmem>>, vector<2x256xf32>
    tpu.vector_store %arg8[%c0_66, %c0_67], %132 {strides = array<i32>} : memref<2x256xf32, #tpu.memory_space<vmem>>, vector<2x256xf32>,
    %134 = vector.extract_strided_slice %124 {offsets = [0, 768], sizes = [2, 256], strides = [1, 1]} : vector<2x1024xf32> to vector<2x256xf32>
    %135 = math.tanh %132 : vector<2x256xf32>
    %136 = arith.mulf %134, %135 : vector<2x256xf32>
    %c0_68 = arith.constant 0 : index
    %c0_69 = arith.constant 0 : index
    %137 = vector.load %arg7[%c0_68, %c0_69] : memref<2x256xf32, #tpu.memory_space<vmem>>, vector<2x256xf32>
    tpu.vector_store %arg7[%c0_68, %c0_69], %136 {strides = array<i32>} : memref<2x256xf32, #tpu.memory_space<vmem>>, vector<2x256xf32>,
    %c5_i32 = arith.constant 5 : i32
    %138 = arith.index_cast %c5_i32 : i32 to index
    %c0_70 = arith.constant 0 : index
    %c0_71 = arith.constant 0 : index
    %139 = vector.load %arg2[%138, %c0_70, %c0_71] : memref<8x2x1024xbf16, #tpu.memory_space<vmem>>, vector<1x2x1024xbf16>
    %140 = vector.shape_cast %139 : vector<1x2x1024xbf16> to vector<2x1024xbf16>
    %141 = arith.extf %140 : vector<2x1024xbf16> to vector<2x1024xf32>
    %c0_72 = arith.constant 0 : index
    %c0_73 = arith.constant 0 : index
    %142 = vector.load %arg7[%c0_72, %c0_73] : memref<2x256xf32, #tpu.memory_space<vmem>>, vector<2x256xf32>
    %143 = arith.truncf %142 : vector<2x256xf32> to vector<2x256xbf16>
    %c0_74 = arith.constant 0 : index
    %c0_75 = arith.constant 0 : index
    %144 = vector.load %arg3[%c0_74, %c0_75] : memref<256x1024xbf16, #tpu.memory_space<vmem>>, vector<256x1024xbf16>
    %cst_76 = arith.constant dense<0.000000e+00> : vector<2x1024xf32>
    %145 = tpu.matmul %143, %144, %cst_76 {dimension_numbers = #tpu.dot_dimension_numbers<[1], [0], [0], [1], [0, 0, 1, 1], [], []>} : vector<2x256xbf16>, vector<256x1024xbf16>, vector<2x1024xf32> -> vector<2x1024xf32>
    %146 = arith.addf %141, %145 : vector<2x1024xf32>
    %147 = arith.negf %146 : vector<2x1024xf32>
    %148 = math.exp %147 : vector<2x1024xf32>
    %cst_77 = arith.constant 1.000000e+00 : f32
    %149 = vector.broadcast %cst_77 : f32 to vector<2x1024xf32>
    %150 = arith.addf %149, %148 : vector<2x1024xf32>
    %151 = arith.divf %149, %150 : vector<2x1024xf32>
    %152 = vector.extract_strided_slice %146 {offsets = [0, 512], sizes = [2, 256], strides = [1, 1]} : vector<2x1024xf32> to vector<2x256xf32>
    %153 = math.tanh %152 : vector<2x256xf32>
    %154 = vector.extract_strided_slice %151 {offsets = [0, 256], sizes = [2, 256], strides = [1, 1]} : vector<2x1024xf32> to vector<2x256xf32>
    %c0_78 = arith.constant 0 : index
    %c0_79 = arith.constant 0 : index
    %155 = vector.load %arg8[%c0_78, %c0_79] : memref<2x256xf32, #tpu.memory_space<vmem>>, vector<2x256xf32>
    %156 = arith.mulf %154, %155 : vector<2x256xf32>
    %157 = vector.extract_strided_slice %151 {offsets = [0, 0], sizes = [2, 256], strides = [1, 1]} : vector<2x1024xf32> to vector<2x256xf32>
    %158 = arith.mulf %157, %153 : vector<2x256xf32>
    %159 = arith.addf %156, %158 : vector<2x256xf32>
    %c0_80 = arith.constant 0 : index
    %c0_81 = arith.constant 0 : index
    %160 = vector.load %arg8[%c0_80, %c0_81] : memref<2x256xf32, #tpu.memory_space<vmem>>, vector<2x256xf32>
    tpu.vector_store %arg8[%c0_80, %c0_81], %159 {strides = array<i32>} : memref<2x256xf32, #tpu.memory_space<vmem>>, vector<2x256xf32>,
    %161 = vector.extract_strided_slice %151 {offsets = [0, 768], sizes = [2, 256], strides = [1, 1]} : vector<2x1024xf32> to vector<2x256xf32>
    %162 = math.tanh %159 : vector<2x256xf32>
    %163 = arith.mulf %161, %162 : vector<2x256xf32>
    %c0_82 = arith.constant 0 : index
    %c0_83 = arith.constant 0 : index
    %164 = vector.load %arg7[%c0_82, %c0_83] : memref<2x256xf32, #tpu.memory_space<vmem>>, vector<2x256xf32>
    tpu.vector_store %arg7[%c0_82, %c0_83], %163 {strides = array<i32>} : memref<2x256xf32, #tpu.memory_space<vmem>>, vector<2x256xf32>,
    %c6_i32 = arith.constant 6 : i32
    %165 = arith.index_cast %c6_i32 : i32 to index
    %c0_84 = arith.constant 0 : index
    %c0_85 = arith.constant 0 : index
    %166 = vector.load %arg2[%165, %c0_84, %c0_85] : memref<8x2x1024xbf16, #tpu.memory_space<vmem>>, vector<1x2x1024xbf16>
    %167 = vector.shape_cast %166 : vector<1x2x1024xbf16> to vector<2x1024xbf16>
    %168 = arith.extf %167 : vector<2x1024xbf16> to vector<2x1024xf32>
    %c0_86 = arith.constant 0 : index
    %c0_87 = arith.constant 0 : index
    %169 = vector.load %arg7[%c0_86, %c0_87] : memref<2x256xf32, #tpu.memory_space<vmem>>, vector<2x256xf32>
    %170 = arith.truncf %169 : vector<2x256xf32> to vector<2x256xbf16>
    %c0_88 = arith.constant 0 : index
    %c0_89 = arith.constant 0 : index
    %171 = vector.load %arg3[%c0_88, %c0_89] : memref<256x1024xbf16, #tpu.memory_space<vmem>>, vector<256x1024xbf16>
    %cst_90 = arith.constant dense<0.000000e+00> : vector<2x1024xf32>
    %172 = tpu.matmul %170, %171, %cst_90 {dimension_numbers = #tpu.dot_dimension_numbers<[1], [0], [0], [1], [0, 0, 1, 1], [], []>} : vector<2x256xbf16>, vector<256x1024xbf16>, vector<2x1024xf32> -> vector<2x1024xf32>
    %173 = arith.addf %168, %172 : vector<2x1024xf32>
    %174 = arith.negf %173 : vector<2x1024xf32>
    %175 = math.exp %174 : vector<2x1024xf32>
    %cst_91 = arith.constant 1.000000e+00 : f32
    %176 = vector.broadcast %cst_91 : f32 to vector<2x1024xf32>
    %177 = arith.addf %176, %175 : vector<2x1024xf32>
    %178 = arith.divf %176, %177 : vector<2x1024xf32>
    %179 = vector.extract_strided_slice %173 {offsets = [0, 512], sizes = [2, 256], strides = [1, 1]} : vector<2x1024xf32> to vector<2x256xf32>
    %180 = math.tanh %179 : vector<2x256xf32>
    %181 = vector.extract_strided_slice %178 {offsets = [0, 256], sizes = [2, 256], strides = [1, 1]} : vector<2x1024xf32> to vector<2x256xf32>
    %c0_92 = arith.constant 0 : index
    %c0_93 = arith.constant 0 : index
    %182 = vector.load %arg8[%c0_92, %c0_93] : memref<2x256xf32, #tpu.memory_space<vmem>>, vector<2x256xf32>
    %183 = arith.mulf %181, %182 : vector<2x256xf32>
    %184 = vector.extract_strided_slice %178 {offsets = [0, 0], sizes = [2, 256], strides = [1, 1]} : vector<2x1024xf32> to vector<2x256xf32>
    %185 = arith.mulf %184, %180 : vector<2x256xf32>
    %186 = arith.addf %183, %185 : vector<2x256xf32>
    %c0_94 = arith.constant 0 : index
    %c0_95 = arith.constant 0 : index
    %187 = vector.load %arg8[%c0_94, %c0_95] : memref<2x256xf32, #tpu.memory_space<vmem>>, vector<2x256xf32>
    tpu.vector_store %arg8[%c0_94, %c0_95], %186 {strides = array<i32>} : memref<2x256xf32, #tpu.memory_space<vmem>>, vector<2x256xf32>,
    %188 = vector.extract_strided_slice %178 {offsets = [0, 768], sizes = [2, 256], strides = [1, 1]} : vector<2x1024xf32> to vector<2x256xf32>
    %189 = math.tanh %186 : vector<2x256xf32>
    %190 = arith.mulf %188, %189 : vector<2x256xf32>
    %c0_96 = arith.constant 0 : index
    %c0_97 = arith.constant 0 : index
    %191 = vector.load %arg7[%c0_96, %c0_97] : memref<2x256xf32, #tpu.memory_space<vmem>>, vector<2x256xf32>
    tpu.vector_store %arg7[%c0_96, %c0_97], %190 {strides = array<i32>} : memref<2x256xf32, #tpu.memory_space<vmem>>, vector<2x256xf32>,
    %c7_i32 = arith.constant 7 : i32
    %192 = arith.index_cast %c7_i32 : i32 to index
    %c0_98 = arith.constant 0 : index
    %c0_99 = arith.constant 0 : index
    %193 = vector.load %arg2[%192, %c0_98, %c0_99] : memref<8x2x1024xbf16, #tpu.memory_space<vmem>>, vector<1x2x1024xbf16>
    %194 = vector.shape_cast %193 : vector<1x2x1024xbf16> to vector<2x1024xbf16>
    %195 = arith.extf %194 : vector<2x1024xbf16> to vector<2x1024xf32>
    %c0_100 = arith.constant 0 : index
    %c0_101 = arith.constant 0 : index
    %196 = vector.load %arg7[%c0_100, %c0_101] : memref<2x256xf32, #tpu.memory_space<vmem>>, vector<2x256xf32>
    %197 = arith.truncf %196 : vector<2x256xf32> to vector<2x256xbf16>
    %c0_102 = arith.constant 0 : index
    %c0_103 = arith.constant 0 : index
    %198 = vector.load %arg3[%c0_102, %c0_103] : memref<256x1024xbf16, #tpu.memory_space<vmem>>, vector<256x1024xbf16>
    %cst_104 = arith.constant dense<0.000000e+00> : vector<2x1024xf32>
    %199 = tpu.matmul %197, %198, %cst_104 {dimension_numbers = #tpu.dot_dimension_numbers<[1], [0], [0], [1], [0, 0, 1, 1], [], []>} : vector<2x256xbf16>, vector<256x1024xbf16>, vector<2x1024xf32> -> vector<2x1024xf32>
    %200 = arith.addf %195, %199 : vector<2x1024xf32>
    %201 = arith.negf %200 : vector<2x1024xf32>
    %202 = math.exp %201 : vector<2x1024xf32>
    %cst_105 = arith.constant 1.000000e+00 : f32
    %203 = vector.broadcast %cst_105 : f32 to vector<2x1024xf32>
    %204 = arith.addf %203, %202 : vector<2x1024xf32>
    %205 = arith.divf %203, %204 : vector<2x1024xf32>
    %206 = vector.extract_strided_slice %200 {offsets = [0, 512], sizes = [2, 256], strides = [1, 1]} : vector<2x1024xf32> to vector<2x256xf32>
    %207 = math.tanh %206 : vector<2x256xf32>
    %208 = vector.extract_strided_slice %205 {offsets = [0, 256], sizes = [2, 256], strides = [1, 1]} : vector<2x1024xf32> to vector<2x256xf32>
    %c0_106 = arith.constant 0 : index
    %c0_107 = arith.constant 0 : index
    %209 = vector.load %arg8[%c0_106, %c0_107] : memref<2x256xf32, #tpu.memory_space<vmem>>, vector<2x256xf32>
    %210 = arith.mulf %208, %209 : vector<2x256xf32>
    %211 = vector.extract_strided_slice %205 {offsets = [0, 0], sizes = [2, 256], strides = [1, 1]} : vector<2x1024xf32> to vector<2x256xf32>
    %212 = arith.mulf %211, %207 : vector<2x256xf32>
    %213 = arith.addf %210, %212 : vector<2x256xf32>
    %c0_108 = arith.constant 0 : index
    %c0_109 = arith.constant 0 : index
    %214 = vector.load %arg8[%c0_108, %c0_109] : memref<2x256xf32, #tpu.memory_space<vmem>>, vector<2x256xf32>
    tpu.vector_store %arg8[%c0_108, %c0_109], %213 {strides = array<i32>} : memref<2x256xf32, #tpu.memory_space<vmem>>, vector<2x256xf32>,
    %215 = vector.extract_strided_slice %205 {offsets = [0, 768], sizes = [2, 256], strides = [1, 1]} : vector<2x1024xf32> to vector<2x256xf32>
    %216 = math.tanh %213 : vector<2x256xf32>
    %217 = arith.mulf %215, %216 : vector<2x256xf32>
    %c0_110 = arith.constant 0 : index
    %c0_111 = arith.constant 0 : index
    %218 = vector.load %arg7[%c0_110, %c0_111] : memref<2x256xf32, #tpu.memory_space<vmem>>, vector<2x256xf32>
    tpu.vector_store %arg7[%c0_110, %c0_111], %217 {strides = array<i32>} : memref<2x256xf32, #tpu.memory_space<vmem>>, vector<2x256xf32>,
    %c8_i32 = arith.constant 8 : i32
    %c0_i32_112 = arith.constant 0 : i32
    %219 = arith.cmpi eq, %arg1, %c0_i32_112 : i32
    %220 = arith.extui %219 : i1 to i32
    %c0_i32_113 = arith.constant 0 : i32
    %221 = arith.cmpi ne, %220, %c0_i32_113 : i32
    scf.if %221 {
      %c0_114 = arith.constant 0 : index
      %c0_115 = arith.constant 0 : index
      %222 = vector.load %arg7[%c0_114, %c0_115] : memref<2x256xf32, #tpu.memory_space<vmem>>, vector<2x256xf32>
      %223 = arith.truncf %222 : vector<2x256xf32> to vector<2x256xbf16>
      %c0_116 = arith.constant 0 : index
      %c0_117 = arith.constant 0 : index
      %224 = vector.load %arg4[%c0_116, %c0_117] : memref<256x128xbf16, #tpu.memory_space<vmem>>, vector<256x128xbf16>
      %cst_118 = arith.constant dense<0.000000e+00> : vector<2x128xf32>
      %225 = tpu.matmul %223, %224, %cst_118 {dimension_numbers = #tpu.dot_dimension_numbers<[1], [0], [0], [1], [0, 0, 1, 1], [], []>} : vector<2x256xbf16>, vector<256x128xbf16>, vector<2x128xf32> -> vector<2x128xf32>
      %c0_119 = arith.constant 0 : index
      %c0_120 = arith.constant 0 : index
      %226 = vector.load %arg5[%c0_119, %c0_120] : memref<1x128xf32, #tpu.memory_space<vmem>>, vector<1x128xf32>
      %227 = vector.broadcast %226 : vector<1x128xf32> to vector<2x128xf32>
      %228 = arith.addf %225, %227 : vector<2x128xf32>
      %c0_121 = arith.constant 0 : index
      %c0_122 = arith.constant 0 : index
      %229 = vector.load %arg6[%c0_121, %c0_122] : memref<2x128xf32, #tpu.memory_space<vmem>>, vector<2x128xf32>
      tpu.vector_store %arg6[%c0_121, %c0_122], %228 {strides = array<i32>} : memref<2x128xf32, #tpu.memory_space<vmem>>, vector<2x128xf32>,
    } else {
    }
    return
  }
  func.func @transform_0(%arg0: i32, %arg1: i32) -> (i32, i32, i32) {
    %c0_i32 = arith.constant 0 : i32
    %c0_i32_0 = arith.constant 0 : i32
    return %arg1, %arg0, %c0_i32 : i32, i32, i32
  }
  func.func @transform_1(%arg0: i32, %arg1: i32) -> (i32, i32) {
    %c0_i32 = arith.constant 0 : i32
    %c0_i32_0 = arith.constant 0 : i32
    %c0_i32_1 = arith.constant 0 : i32
    return %c0_i32, %c0_i32_0 : i32, i32
  }
  func.func @transform_2(%arg0: i32, %arg1: i32) -> (i32, i32) {
    %c0_i32 = arith.constant 0 : i32
    %c0_i32_0 = arith.constant 0 : i32
    %c0_i32_1 = arith.constant 0 : i32
    return %c0_i32, %c0_i32_0 : i32, i32
  }
  func.func @transform_3(%arg0: i32, %arg1: i32) -> (i32, i32) {
    %c0_i32 = arith.constant 0 : i32
    %c0_i32_0 = arith.constant 0 : i32
    %c0_i32_1 = arith.constant 0 : i32
    return %c0_i32, %c0_i32_0 : i32, i32
  }
  func.func @transform_4(%arg0: i32, %arg1: i32) -> (i32, i32) {
    %c0_i32 = arith.constant 0 : i32
    %c0_i32_0 = arith.constant 0 : i32
    return %arg0, %c0_i32 : i32, i32
  }
}

</mosaic_0001>

<bundles_post_ra>
// kernel: lstm_model_forward.2
= control target key start
LH: loop header
LB: loop body
LE: loop exit
PB: predicated region body
PF: predicated region fallthrough
CT: control target
= control target key end

     0   :  { %8 = vsyncpa [#allocation4], 0  ;;  %s1047_s0 = inlined_call_operand.vmem [shape: f32[2,8,4,256], index: 0, kind: input, shape index: {}]   ;;  %s1048_s1 = inlined_call_operand.hbm [shape: f32[4,1024], index: 1, kind: input, shape index: {}]   ;;  %s1049_s2 = inlined_call_operand.hbm [shape: f32[1,1024], index: 2, kind: input, shape index: {}]   ;;  %s1050_s3 = inlined_call_operand.vmem [shape: bf16[8,2,1024], index: 3, kind: output, shape index: {}]  }
   0x1   :  { %9 = vsyncpa [#allocation6], 0  ;;  %s848_s12 = smov 0   ;;  %s850_s13 = smov 0  }
   0x2   :  { %s852_s14 = smov 0  }
   0x3 LB: > { %s864_s15 = sadd.s32 4294967295, %s823_s14   ;;  %s867_s16 = sadd.s32 1, %s823_s14   ;;  %s823_s14 = sphi %s852_s14, %s1057_s14   ;;  %s819_s13 = sphi %s850_s13, %s1056_s13   ;;  %s815_s12 = sphi %s848_s12, %s1055_s12  }
   0x4   : > { %s19_s17 = ssub.s32 %s823_s14, %s867_s16  ;;  %s22_s18 = sadd.s32 1, %s819_s13 }
   0x5   : > { %p20_p0 = scmp.eq.s32.totalorder %s19_s17, 0  ;;  %p29_p1 = scmp.ne.s32.totalorder %s819_s13, %s815_s12 }
   0x6   : > { %p30_p2 = scmp.eq.s32.totalorder %s823_s14, 0  ;;  %p670_p3 = scmp.ge.s32.totalorder %s823_s14, 1 }
   0x7   : > { %s877_s19 = scalar_select %p20_p0, %s819_s13, %s22_s18  }
   0x8   : > { %p879_p4 = por %p30_p2, %p29_p1  ;;  %p114_p5 = scmp.lt.s32.totalorder %s823_s14, 9 }
   0x9   : > { %p700_p6 = scmp.eq.s32.totalorder %s864_s15, 0  ;;  %s126_s24 = sshll.u32 %s1048_s1, 4  ;;  %s127_s24 = int_to_ptr.hbm [resolvable:$true] %s126_s24 }
   0xa   : > { %p885_p7 = pnand %p670_p3, %p114_p5  ;;  %s825_s25 = smov [#allocation3]  }
   0xb   : > { %s128_s26 = sshll.u32 %s825_s25, 4  ;;  %s138_s29 = sshll.u32 %s1049_s2, 4  ;;  %s129_s26 = int_to_ptr.vmem [resolvable:$true] %s128_s26  ;;  %s139_s29 = int_to_ptr.hbm [resolvable:$true] %s138_s29 }
   0xc   : > { %p693_p8 = pneg %p885_p7  ;;  %s826_s30 = smov [#allocation5]  }
   0xd   : > { %s140_s4 = sshll.u32 %s826_s30, 4  ;;  %p673_p10 = scmp.ge.s32.totalorder %s823_s14, 8  ;;  %s141_s4 = int_to_ptr.vmem [resolvable:$true] %s140_s4 }
   0xe   : > { %p694_p9 = pnand %p700_p6, %p693_p8 }
   0xf   : > { %147 = sbr.rel (%p673_p10) target bundleno = 26 (0x1a), region = 24 }
  0x10   : > { %696 = dma.hbm_to_vmem [thread:$0]  (!%p694_p9), %s127_s24, 512, %s129_s26, [#allocation4]  }
  0x11   : > { %699 = dma.hbm_to_vmem [thread:$0]  (!%p694_p9), %s139_s29, 128, %s141_s4, [#allocation6]  }
  0x14   : > { %150 = sbr.rel (!%p879_p4) target bundleno = 26 (0x1a), region = 28  ;;  %s152_s5 = sand.u32 (%p879_p4), 1, %s819_s13  }
  0x15   : > { %s684_s6 = sshll.u32 (%p879_p4), %s823_s14, 3  ;;  %s674_s7 = sshll.u32 (%p879_p4), %s152_s5, 4 }
  0x16   : > { %s157_s10 = scalar_lea.vmem (%p879_p4), %s1047_s0, %s684_s6  ;;  %s154_s11 = scalar_lea.vmem (%p879_p4), [#allocation2], %s674_s7 }
  0x17   : > { %v188_v0 = vld [vmem:[%s157_s10] sm:$0xff] (%p879_p4) }
  0x18   : > { %v190_v1 = vld [vmem:[%s157_s10 + $0x40] sm:$0xff] (%p879_p4)  ;;  %189 = vst [vmem:[%s154_s11] sm:$0xff] (%p879_p4), %v188_v0 }
  0x19   : > { %191 = vst [vmem:[%s154_s11 + $0x8] sm:$0xff] %v190_v1 }
  0x1a PF: > { %200 = sbr.rel (%p885_p7) target bundleno = 194 (0xc2), region = 66  ;;  %s203_s17 = sand.u32 (!%p885_p7), 1, %s815_s12  }
  0x1b   : > { %s678_s18 = sshll.u32 (!%p885_p7), %s203_s17, 4 }
  0x1c   : > { %s205_s14 = scalar_lea.vmem (!%p885_p7), [#allocation2], %s678_s18 }
  0x1f   : > { %806 = dma.done.wait (%p700_p6), [#allocation4], 512  }
  0x20   : > { %808 = vsyncadd (%p700_p6), [#allocation4], 4294966784 }
  0x21   : > { %810 = dma.done.wait (%p700_p6), [#allocation6], 128  }
  0x22   : > { %812 = vsyncadd (%p700_p6), [#allocation6], 4294967168  ;;  %vm304_vm0 = vcmask 1042434   ;;  %vm309_vm1 = vcmask 1042433   ;;  %vm379_vm2 = vcmask 1043459   ;;  %v239_v2 = vld [vmem:[%s205_s14] sm:$0xff] }
  0x23   : > { %v240_v3 = vld [vmem:[%s205_s14 + $0x8] sm:$0xff]  ;;  %vm384_vm3 = vcmask 1043458   ;;  %vm247_vm4 = vcmask 1041409   ;;  %vm252_vm5 = vcmask 1041408   ;;  %vm454_vm6 = vcmask 1044484   ;;  %p235_p11 = scmp.lt.s32.totalorder %s864_s15, 7 }
  0x24   : > { %v300_v4 = vperm.slane %v239_v2, 1  ;;  %v301_v5 = vperm.slane %v239_v2, 5  ;;  %v302_v6 = vperm.slane %v240_v3, 1  ;;  %v303_v7 = vperm.slane %v240_v3, 5  ;;  %v317_v45 = vld [vmem:[#allocation3 + $0x1] ss:$4 sm:$0xff] }
  0x25   : > { %v375_v8 = vperm.slane %v239_v2, 2  ;;  %v376_v9 = vperm.slane %v239_v2, 6  ;;  %v377_v10 = vperm.slane %v240_v3, 2  ;;  %v378_v11 = vperm.slane %v240_v3, 6  ;;  %v932_v48 = vld [vmem:[#allocation3 + $0x2] ss:$4 sm:$0xff] }
  0x26   : > { %v305_v12 = vsel %vm304_vm0, %v302_v6, %v300_v4  ;;  %v306_v13 = vsel %vm304_vm0, %v303_v7, %v301_v5  ;;  %v243_v14 = vperm.slane %v239_v2, 0  ;;  %v244_v15 = vperm.slane %v239_v2, 4  ;;  %v936_v57 = vld [vmem:[#allocation3] ss:$4 sm:$0xff]  ;;  %s1059_s15 = smov (!%p235_p11, %s864_s15), 7 }
  0x27   : > { %v310_v16 = vsel %vm309_vm1, %v305_v12, 0.0  ;;  %v311_v17 = vsel %vm309_vm1, %v306_v13, 0.0  ;;  %v380_v18 = vsel %vm379_vm2, %v377_v10, %v375_v8  ;;  %v381_v19 = vsel %vm379_vm2, %v378_v11, %v376_v9  ;;  %v956_v11 = vld [vmem:[#allocation5] sm:$0xff]  ;;  %s681_s12 = sshll.u32 %s1059_s15, 3 }
  0x28   : > { %v312_v20 = vadd.f32 %v311_v17, %v310_v16  ;;  %v385_v21 = vsel %vm384_vm3, %v380_v18, 0.0  ;;  %v386_v22 = vsel %vm384_vm3, %v381_v19, 0.0  ;;  %v245_v23 = vperm.slane %v240_v3, 0  ;;  %s238_s22 = scalar_lea.vmem %s1050_s3, %s681_s12 }
  0x29   : > { %v387_v24 = vadd.f32 %v386_v22, %v385_v21  ;;  %v246_v25 = vperm.slane %v240_v3, 4  ;;  %v450_v26 = vperm.slane %v239_v2, 3  ;;  %v451_v27 = vperm.slane %v239_v2, 7  ;;  %v946_v2 = vld [vmem:[#allocation3 + $0x3] ss:$4 sm:$0xff] }
  0x2a   : > { %313 = vadd.xlane.f32.xlu0 %v312_v20  ;;  %v248_v28 = vsel %vm247_vm4, %v245_v23, %v243_v14  ;;  %v452_v29 = vperm.slane %v240_v3, 3  ;;  %v453_v30 = vperm.slane %v240_v3, 7  ;;  %vm459_vm7 = vcmask 1044483  }
  0x2b   : > { %388 = vadd.xlane.f32.xlu1 %v387_v24  ;;  %v249_v31 = vsel %vm247_vm4, %v246_v25, %v244_v15  ;;  %v253_v32 = vsel %vm252_vm5, %v248_v28, 0.0  ;;  %v827_v40 = vmov 256.0   ;;  %v319_v47 = vperm.slane %v317_v45, 0 }
  0x2c   : > { %v254_v33 = vsel %vm252_vm5, %v249_v31, 0.0  ;;  %v455_v34 = vsel %vm454_vm6, %v452_v29, %v450_v26  ;;  %v456_v35 = vsel %vm454_vm6, %v453_v30, %v451_v27  ;;  %731 = vrcp.f32 %v827_v40 }
  0x2d   : > { %v460_v36 = vsel %vm459_vm7, %v455_v34, 0.0  ;;  %v461_v37 = vsel %vm459_vm7, %v456_v35, 0.0  ;;  %v255_v38 = vadd.f32 %v254_v33, %v253_v32  ;;  %v320_v49 = vperm.slane %v317_v45, 1 }
  0x2e   : > { %v462_v39 = vadd.f32 %v461_v37, %v460_v36  ;;  %v321_v50 = vperm.slane %v317_v45, 2  ;;  %v322_v51 = vperm.slane %v317_v45, 3  ;;  %v323_v52 = vperm.slane %v317_v45, 4 }
  0x2f   : > { %v324_v54 = vperm.slane %v317_v45, 5  ;;  %v325_v55 = vperm.slane %v317_v45, 6  ;;  %v326_v56 = vperm.slane %v317_v45, 7  ;;  %v394_v58 = vperm.slane %v932_v48, 0 }
  0x30   : > { %v395_v59 = vperm.slane %v932_v48, 1  ;;  %v396_v60 = vperm.slane %v932_v48, 2  ;;  %v397_v61 = vperm.slane %v932_v48, 3  ;;  %v398_v62 = vperm.slane %v932_v48, 4 }
  0x31   : > { %v399_v63 = vperm.slane %v932_v48, 5  ;;  %v400_v0 = vperm.slane %v932_v48, 6  ;;  %v401_v1 = vperm.slane %v932_v48, 7  ;;  %v268_v3 = vperm.slane %v936_v57, 0 }
  0x32   : > { %256 = vadd.xlane.f32.xlu0 %v255_v38  ;;  %v732_v41 = vpop.eup %731  ;;  %v269_v4 = vperm.slane %v936_v57, 1  ;;  %v270_v5 = vperm.slane %v936_v57, 2  ;;  %v271_v6 = vperm.slane %v936_v57, 3  ;;  %v272_v7 = vperm.slane %v936_v57, 4 }
  0x33   : > { %463 = vadd.xlane.f32.xlu1 %v462_v39  ;;  %v259_v42 = vmul.f32 256.0, %v732_v41  ;;  %vm263_vm8 = vweird.f32 %v732_v41  ;;  %v273_v8 = vperm.slane %v936_v57, 5  ;;  %v274_v9 = vperm.slane %v936_v57, 6 }
  0x34   : > { %v275_v10 = vperm.slane %v936_v57, 7  ;;  %v469_v13 = vperm.slane %v946_v2, 0  ;;  %v470_v14 = vperm.slane %v946_v2, 1  ;;  %v471_v15 = vperm.slane %v946_v2, 2 }
  0x35   : > { %v260_v43 = vsub.f32 1.0, %v259_v42  ;;  %v472_v16 = vperm.slane %v946_v2, 3  ;;  %v473_v19 = vperm.slane %v946_v2, 4  ;;  %v474_v20 = vperm.slane %v946_v2, 5 }
  0x36   : > { %v475_v21 = vperm.slane %v946_v2, 6  ;;  %v476_v22 = vperm.slane %v946_v2, 7  ;;  %v527_v23 = vperm.slane %v956_v11, 0  ;;  %v528_v24 = vperm.slane %v956_v11, 1 }
  0x37   : > { %v261_v44 = vmul.f32 %v732_v41, %v260_v43  ;;  %v529_v25 = vperm.slane %v956_v11, 2  ;;  %v530_v29 = vperm.slane %v956_v11, 3  ;;  %v531_v30 = vperm.slane %v956_v11, 4 }
  0x38   : > { %v532_v31 = vperm.slane %v956_v11, 5  ;;  %vm566_vm9 = vcmask 1040384   ;;  %vm577_vm10 = vcmask 1046534   ;;  %vm581_vm11 = vcmask 1045508  }
  0x39   : > { %v262_v46 = vadd.f32 %v732_v41, %v261_v44  ;;  %vm583_vm12 = vcmask 1043456  }
  0x3b   : > { %v934_v53 = vsel %vm263_vm8, %v732_v41, %v262_v46 }
  0x9d   : > { %v314_v12 = vpop.xlane.xlu0 %313 }
  0x9e   : > { %v315_v17 = vmul.f32 %v314_v12, %v934_v53  ;;  %v389_v18 = vpop.xlane.xlu1 %388 }
  0x9f   : > { %v390_v28 = vmul.f32 %v389_v18, %v934_v53 }
  0xa0   : > { %v335_v26 = vmul.f32 %v319_v47, %v315_v17  ;;  %v336_v27 = vmul.f32 %v320_v49, %v315_v17  ;;  %v337_v34 = vmul.f32 %v321_v50, %v315_v17  ;;  %v338_v35 = vmul.f32 %v322_v51, %v315_v17 }
  0xa1   : > { %v339_v36 = vmul.f32 %v323_v52, %v315_v17  ;;  %v340_v37 = vmul.f32 %v324_v54, %v315_v17  ;;  %v341_v38 = vmul.f32 %v325_v55, %v315_v17  ;;  %v342_v39 = vmul.f32 %v326_v56, %v315_v17 }
  0xa2   : > { %v351_v40 = vrot.slane %v335_v26, 1  ;;  %v352_v41 = vrot.slane %v336_v27, 1  ;;  %v410_v42 = vmul.f32 %v394_v58, %v390_v28  ;;  %v411_v43 = vmul.f32 %v395_v59, %v390_v28 }
  0xa3   : > { %v412_v44 = vmul.f32 %v396_v60, %v390_v28  ;;  %v413_v45 = vmul.f32 %v397_v61, %v390_v28  ;;  %v414_v46 = vmul.f32 %v398_v62, %v390_v28  ;;  %v415_v47 = vmul.f32 %v399_v63, %v390_v28 }
  0xa4   : > { %v416_v48 = vmul.f32 %v400_v0, %v390_v28  ;;  %v417_v49 = vmul.f32 %v401_v1, %v390_v28  ;;  %v353_v18 = vrot.slane %v337_v34, 1  ;;  %v354_v32 = vrot.slane %v338_v35, 1 }
  0xa5   : > { %v257_v12 = vpop.xlane.xlu0 %256  ;;  %v355_v33 = vrot.slane %v339_v36, 1  ;;  %v356_v50 = vrot.slane %v340_v37, 1  ;;  %v357_v52 = vrot.slane %v341_v38, 1  ;;  %v358_v54 = vrot.slane %v342_v39, 1 }
  0xa6   : > { %v464_v51 = vpop.xlane.xlu1 %463  ;;  %v426_v55 = vrot.slane %v410_v42, 2  ;;  %v427_v56 = vrot.slane %v411_v43, 2  ;;  %v428_v17 = vrot.slane %v412_v44, 2  ;;  %v429_v26 = vrot.slane %v413_v45, 2 }
  0xa7   : > { %v430_v58 = vrot.slane %v414_v46, 2  ;;  %v265_v59 = vmul.f32 %v934_v53, %v257_v12  ;;  %v431_v60 = vrot.slane %v415_v47, 2  ;;  %v432_v61 = vrot.slane %v416_v48, 2 }
  0xa8   : > { %v433_v62 = vrot.slane %v417_v49, 2  ;;  %v465_v63 = vmul.f32 %v464_v51, %v934_v53 }
  0xa9   : > { %v284_v0 = vmul.f32 %v268_v3, %v265_v59  ;;  %v285_v1 = vmul.f32 %v269_v4, %v265_v59  ;;  %v286_v27 = vmul.f32 %v270_v5, %v265_v59  ;;  %v287_v28 = vmul.f32 %v271_v6, %v265_v59 }
  0xaa   : > { %v288_v34 = vmul.f32 %v272_v7, %v265_v59  ;;  %v289_v35 = vmul.f32 %v273_v8, %v265_v59  ;;  %v290_v53 = vmul.f32 %v274_v9, %v265_v59  ;;  %v291_v3 = vmul.f32 %v275_v10, %v265_v59 }
  0xab   : > { %v367_v36 = vadd.f32 %v351_v40, %v284_v0  ;;  %v368_v4 = vadd.f32 %v352_v41, %v285_v1  ;;  %v369_v37 = vadd.f32 %v353_v18, %v286_v27  ;;  %v370_v38 = vadd.f32 %v354_v32, %v287_v28 }
  0xac   : > { %v371_v5 = vadd.f32 %v355_v33, %v288_v34  ;;  %v372_v39 = vadd.f32 %v356_v50, %v289_v35  ;;  %v373_v42 = vadd.f32 %v357_v52, %v290_v53  ;;  %v374_v6 = vadd.f32 %v358_v54, %v291_v3 }
  0xad   : > { %v442_v43 = vadd.f32 %v426_v55, %v367_v36  ;;  %v443_v7 = vadd.f32 %v427_v56, %v368_v4  ;;  %v444_v44 = vadd.f32 %v428_v17, %v369_v37  ;;  %v445_v45 = vadd.f32 %v429_v26, %v370_v38 }
  0xae   : > { %v446_v8 = vadd.f32 %v430_v58, %v371_v5  ;;  %v447_v46 = vadd.f32 %v431_v60, %v372_v39  ;;  %v448_v47 = vadd.f32 %v432_v61, %v373_v42  ;;  %v449_v9 = vadd.f32 %v433_v62, %v374_v6 }
  0xaf   : > { %v485_v57 = vmul.f32 %v469_v13, %v465_v63  ;;  %v486_v10 = vmul.f32 %v470_v14, %v465_v63  ;;  %v487_v32 = vmul.f32 %v471_v15, %v465_v63  ;;  %v488_v33 = vmul.f32 %v472_v16, %v465_v63 }
  0xb0   : > { %v489_v40 = vmul.f32 %v473_v19, %v465_v63  ;;  %v490_v41 = vmul.f32 %v474_v20, %v465_v63  ;;  %v491_v48 = vmul.f32 %v475_v21, %v465_v63  ;;  %v492_v13 = vmul.f32 %v476_v22, %v465_v63 }
  0xb1   : > { %v501_v14 = vrot.slane %v485_v57, 3  ;;  %v502_v15 = vrot.slane %v486_v10, 3  ;;  %v503_v49 = vrot.slane %v487_v32, 3  ;;  %v504_v12 = vrot.slane %v488_v33, 3 }
  0xb2   : > { %v505_v16 = vrot.slane %v489_v40, 3  ;;  %v506_v18 = vrot.slane %v490_v41, 3  ;;  %v507_v50 = vrot.slane %v491_v48, 3  ;;  %v508_v19 = vrot.slane %v492_v13, 3 }
  0xb3   : > { %v517_v51 = vadd.f32 %v501_v14, %v442_v43  ;;  %v518_v52 = vadd.f32 %v502_v15, %v443_v7  ;;  %v519_v20 = vadd.f32 %v503_v49, %v444_v44  ;;  %v520_v54 = vadd.f32 %v504_v12, %v445_v45 }
  0xb4   : > { %v521_v55 = vadd.f32 %v505_v16, %v446_v8  ;;  %v522_v21 = vadd.f32 %v506_v18, %v447_v46  ;;  %v523_v56 = vadd.f32 %v507_v50, %v448_v47  ;;  %v524_v2 = vadd.f32 %v508_v19, %v449_v9 }
  0xb5   : > { %v543_v22 = vadd.f32 %v527_v23, %v517_v51  ;;  %v544_v17 = vadd.f32 %v528_v24, %v518_v52  ;;  %v545_v26 = vadd.f32 %v529_v25, %v519_v20  ;;  %v546_v58 = vadd.f32 %v530_v29, %v520_v54 }
  0xb6   : > { %v547_v59 = vadd.f32 %v531_v30, %v521_v55  ;;  %v548_v60 = vadd.f32 %v532_v31, %v522_v21  ;;  %v1053_v61 = vperm.slane %v956_v11, 6  ;;  %v1054_v23 = vperm.slane %v956_v11, 7 }
  0xb7   : > { %v551_v0 = vpack.c.bf16 %v544_v17, %v543_v22  ;;  %v552_v24 = vpack.c.bf16 %v546_v58, %v545_v26 }
  0xb8   : > { %v549_v62 = vadd.f32 %v1053_v61, %v523_v56  ;;  %v550_v63 = vadd.f32 %v1054_v23, %v524_v2  ;;  %v553_v25 = vpack.c.bf16 %v548_v60, %v547_v59 }
  0xb9   : > { %v559_v29 = vrot.slane %v551_v0, 3  ;;  %v560_v27 = vrot.slane %v552_v24, 6  ;;  %v561_v30 = vrot.slane %v552_v24, 1 }
  0xba   : > { %v554_v1 = vpack.c.bf16 %v550_v63, %v549_v62  ;;  %v562_v28 = vrot.slane %v553_v25, 4  ;;  %v563_v34 = vrot.slane %v553_v25, 7 }
  0xbb   : > { %v569_v53 = vsel %vm566_vm9, %v551_v0, %v559_v29  ;;  %v572_v11 = vsel %vm304_vm0, %v560_v27, %v561_v30 }
  0xbc   : > { %v564_v31 = vrot.slane %v554_v1, 2  ;;  %v565_v35 = vrot.slane %v554_v1, 5  ;;  %v573_v3 = vsel %vm252_vm5, %v569_v53, %v572_v11  ;;  %v576_v36 = vsel %vm454_vm6, %v562_v28, %v563_v34 }
  0xbe   : > { %v580_v4 = vsel %vm577_vm10, %v564_v31, %v565_v35 }
  0xbf   : > { %v582_v37 = vsel %vm581_vm11, %v576_v36, %v580_v4 }
  0xc0   : > { %v584_v38 = vsel %vm583_vm12, %v573_v3, %v582_v37 }
  0xc1   : > { %586 = vst [vmem:[%s238_s22] sm:$0xff] %v584_v38 }
  0xc2 PF: > { %p12_p12 = scmp.ge.s32.totalorder %s867_s16, 10   ;;  %s1055_s12 = smov %s819_s13 }
  0xc3   : > { %s1056_s13 = smov %s877_s19  ;;  %s1057_s14 = smov %s867_s16 }
  0xc4   :  { %14 = sbr.rel (!%p12_p12) target bundleno = 3 (0x3), region = 117 }
  0xc9   :  { %606 = vsyncpa [#allocation4], 1 }
  0xca   :  { %608 = vsyncpa [#allocation4 + $0x1], 1 }
  0xcb   :  { %609 = vsyncpa [#allocation6], 1 }

// kernel: lstm_model_forward.3
= control target key start
LH: loop header
LB: loop body
LE: loop exit
PB: predicated region body
PF: predicated region fallthrough
CT: control target
= control target key end

     0   :  { %s20866_s0 = inlined_call_operand.vmem [shape: bf16[8,2,1024], index: 0, kind: input, shape index: {}]   ;;  %s20867_s1 = inlined_call_operand.vmem [shape: bf16[256,1024], index: 1, kind: input, shape index: {}]   ;;  %s20868_s2 = inlined_call_operand.vmem [shape: bf16[256,128], index: 2, kind: input, shape index: {}]   ;;  %s20869_s3 = inlined_call_operand.vmem [shape: f32[1,128], index: 3, kind: input, shape index: {}]   ;;  %s20870_s4 = inlined_call_operand.hbm [shape: f32[2,128], index: 4, kind: output, shape index: {}]  }
   0x1   :  { %v8967_v0 = vld [vmem:[%s20867_s1 + $0x1c0] sm:$0xf]  ;;  %v12980_v5 = vld [vmem:[%s20867_s1 + $0x1c4] sm:$0xf] }
   0x2   :  { %v12984_v1 = vld [vmem:[%s20867_s1 + $0x1dc] sm:$0xf0]  ;;  %v8969_v6 = vld [vmem:[%s20867_s1 + $0x1e0] sm:$0xf0] }
   0x3   :  { %v9223_v2 = vld [vmem:[%s20867_s1 + $0x3c0] sm:$0xf]  ;;  %v8968_v3 = vor.u32 %v12984_v1, %v8967_v0  ;;  %v8972_v8 = vor.u32 %v12980_v5, %v8969_v6  ;;  %v13044_v9 = vld [vmem:[%s20867_s1 + $0x3c4] sm:$0xf] }
   0x4   :  { %v13048_v4 = vld [vmem:[%s20867_s1 + $0x3dc] sm:$0xf0]  ;;  %v9225_v10 = vld [vmem:[%s20867_s1 + $0x3e0] sm:$0xf0] }
   0x5   :  { %v9224_v7 = vor.u32 %v13048_v4, %v9223_v2  ;;  %v8935_v11 = vld [vmem:[%s20867_s1 + $0x180] sm:$0xf]  ;;  %804 = vmatpush.bf16.msra.mxu0 %v8968_v3  ;;  %v9228_v12 = vor.u32 %v13044_v9, %v9225_v10  ;;  %830 = vmatpush.bf16.msra.mxu2 %v8972_v8  ;;  %v12972_v18 = vld [vmem:[%s20867_s1 + $0x184] sm:$0xf] }
   0x6   :  { %v12976_v13 = vld [vmem:[%s20867_s1 + $0x19c] sm:$0xf0]  ;;  %v8937_v19 = vld [vmem:[%s20867_s1 + $0x1a0] sm:$0xf0] }
   0x7   :  { %v9191_v14 = vld [vmem:[%s20867_s1 + $0x380] sm:$0xf]  ;;  %817 = vmatpush.bf16.msra.mxu1 %v9224_v7  ;;  %v8936_v16 = vor.u32 %v12976_v13, %v8935_v11  ;;  %v13036_v20 = vld [vmem:[%s20867_s1 + $0x384] sm:$0xf]  ;;  %843 = vmatpush.bf16.msra.mxu3 %v9228_v12  ;;  %v8940_v21 = vor.u32 %v12972_v18, %v8937_v19 }
   0x8   :  { %v13040_v15 = vld [vmem:[%s20867_s1 + $0x39c] sm:$0xf0]  ;;  %v9193_v22 = vld [vmem:[%s20867_s1 + $0x3a0] sm:$0xf0] }
   0x9   :  { %v9192_v17 = vor.u32 %v13040_v15, %v9191_v14  ;;  %v8903_v23 = vld [vmem:[%s20867_s1 + $0x140] sm:$0xf]  ;;  %v9196_v25 = vor.u32 %v13036_v20, %v9193_v22  ;;  %v12964_v28 = vld [vmem:[%s20867_s1 + $0x144] sm:$0xf]  ;;  %805 = vmatpush.bf16.msra.mxu0 %v8936_v16  ;;  %831 = vmatpush.bf16.msra.mxu2 %v8940_v21 }
   0xa   :  { %v12968_v24 = vld [vmem:[%s20867_s1 + $0x15c] sm:$0xf0]  ;;  %v8905_v30 = vld [vmem:[%s20867_s1 + $0x160] sm:$0xf0] }
   0xb   :  { %v9159_v26 = vld [vmem:[%s20867_s1 + $0x340] sm:$0xf]  ;;  %v8904_v29 = vor.u32 %v12968_v24, %v8903_v23  ;;  %v13028_v31 = vld [vmem:[%s20867_s1 + $0x344] sm:$0xf]  ;;  %818 = vmatpush.bf16.msra.mxu1 %v9192_v17  ;;  %v8908_v34 = vor.u32 %v12964_v28, %v8905_v30  ;;  %844 = vmatpush.bf16.msra.mxu3 %v9196_v25  ;;  %v8975_v28 = vld [vmem:[%s20867_s1 + $0x1c8] sm:$0xf] }
   0xc   :  { %v13032_v27 = vld [vmem:[%s20867_s1 + $0x35c] sm:$0xf0]  ;;  %v9161_v32 = vld [vmem:[%s20867_s1 + $0x360] sm:$0xf0]  ;;  %v9231_v30 = vld [vmem:[%s20867_s1 + $0x3c8] sm:$0xf] }
   0xd   :  { %v9160_v33 = vor.u32 %v13032_v27, %v9159_v26  ;;  %v8871_v35 = vld [vmem:[%s20867_s1 + $0x100] sm:$0xf]  ;;  %v9164_v38 = vor.u32 %v13028_v31, %v9161_v32  ;;  %v12956_v40 = vld [vmem:[%s20867_s1 + $0x104] sm:$0xf]  ;;  %806 = vmatpush.bf16.msra.mxu0 %v8904_v29  ;;  %832 = vmatpush.bf16.msra.mxu2 %v8908_v34  ;;  %v12985_v29 = vld [vmem:[%s20867_s1 + $0x1e4] sm:$0xf0] }
   0xe   :  { %v12960_v36 = vld [vmem:[%s20867_s1 + $0x11c] sm:$0xf0]  ;;  %v8873_v41 = vld [vmem:[%s20867_s1 + $0x120] sm:$0xf0]  ;;  %v13049_v32 = vld [vmem:[%s20867_s1 + $0x3e4] sm:$0xf0] }
   0xf   :  { %v9127_v37 = vld [vmem:[%s20867_s1 + $0x300] sm:$0xf]  ;;  %v13020_v42 = vld [vmem:[%s20867_s1 + $0x304] sm:$0xf]  ;;  %v8872_v44 = vor.u32 %v12960_v36, %v8871_v35  ;;  %819 = vmatpush.bf16.msra.mxu1 %v9160_v33  ;;  %v8876_v46 = vor.u32 %v12956_v40, %v8873_v41  ;;  %845 = vmatpush.bf16.msra.mxu3 %v9164_v38  ;;  %v12981_v33 = vld [vmem:[%s20867_s1 + $0x1cc] sm:$0xf]  ;;  %v8976_v40 = vor.u32 %v12985_v29, %v8975_v28 }
  0x10   :  { %v13024_v39 = vld [vmem:[%s20867_s1 + $0x31c] sm:$0xf0]  ;;  %v9129_v43 = vld [vmem:[%s20867_s1 + $0x320] sm:$0xf0]  ;;  %v8977_v34 = vld [vmem:[%s20867_s1 + $0x1e8] sm:$0xf0]  ;;  %v9232_v41 = vor.u32 %v13049_v32, %v9231_v30 }
  0x11   :  { %v9128_v45 = vor.u32 %v13024_v39, %v9127_v37  ;;  %v8839_v47 = vld [vmem:[%s20867_s1 + $0xc0] sm:$0xf]  ;;  %v9132_v50 = vor.u32 %v13020_v42, %v9129_v43  ;;  %v12948_v52 = vld [vmem:[%s20867_s1 + $0xc4] sm:$0xf]  ;;  %807 = vmatpush.bf16.msra.mxu0 %v8872_v44  ;;  %833 = vmatpush.bf16.msra.mxu2 %v8876_v46  ;;  %v13045_v37 = vld [vmem:[%s20867_s1 + $0x3cc] sm:$0xf]  ;;  %v8980_v42 = vor.u32 %v12981_v33, %v8977_v34 }
  0x12   :  { %v12952_v48 = vld [vmem:[%s20867_s1 + $0xdc] sm:$0xf0]  ;;  %v8841_v53 = vld [vmem:[%s20867_s1 + $0xe0] sm:$0xf0]  ;;  %v9233_v38 = vld [vmem:[%s20867_s1 + $0x3e8] sm:$0xf0] }
  0x13   :  { %v9095_v49 = vld [vmem:[%s20867_s1 + $0x2c0] sm:$0xf]  ;;  %v13012_v54 = vld [vmem:[%s20867_s1 + $0x2c4] sm:$0xf]  ;;  %v8840_v56 = vor.u32 %v12952_v48, %v8839_v47  ;;  %820 = vmatpush.bf16.msra.mxu1 %v9128_v45  ;;  %v8844_v58 = vor.u32 %v12948_v52, %v8841_v53  ;;  %846 = vmatpush.bf16.msra.mxu3 %v9132_v50  ;;  %v8943_v43 = vld [vmem:[%s20867_s1 + $0x188] sm:$0xf]  ;;  %v9236_v46 = vor.u32 %v13045_v37, %v9233_v38 }
  0x14   :  { %v13016_v51 = vld [vmem:[%s20867_s1 + $0x2dc] sm:$0xf0]  ;;  %v9097_v55 = vld [vmem:[%s20867_s1 + $0x2e0] sm:$0xf0]  ;;  %v12977_v44 = vld [vmem:[%s20867_s1 + $0x1a4] sm:$0xf0] }
  0x15   :  { %v9096_v57 = vor.u32 %v13016_v51, %v9095_v49  ;;  %v8807_v59 = vld [vmem:[%s20867_s1 + $0x80] sm:$0xf]  ;;  %v9100_v62 = vor.u32 %v13012_v54, %v9097_v55  ;;  %v12940_v0 = vld [vmem:[%s20867_s1 + $0x84] sm:$0xf]  ;;  %808 = vmatpush.bf16.msra.mxu0 %v8840_v56  ;;  %834 = vmatpush.bf16.msra.mxu2 %v8844_v58  ;;  %v9199_v45 = vld [vmem:[%s20867_s1 + $0x388] sm:$0xf]  ;;  %v8944_v52 = vor.u32 %v12977_v44, %v8943_v43 }
  0x16   :  { %v12944_v60 = vld [vmem:[%s20867_s1 + $0x9c] sm:$0xf0]  ;;  %v8809_v1 = vld [vmem:[%s20867_s1 + $0xa0] sm:$0xf0]  ;;  %v13041_v47 = vld [vmem:[%s20867_s1 + $0x3a4] sm:$0xf0] }
  0x17   :  { %v9063_v61 = vld [vmem:[%s20867_s1 + $0x280] sm:$0xf]  ;;  %v13004_v2 = vld [vmem:[%s20867_s1 + $0x284] sm:$0xf]  ;;  %v8808_v4 = vor.u32 %v12944_v60, %v8807_v59  ;;  %821 = vmatpush.bf16.msra.mxu1 %v9096_v57  ;;  %v8812_v6 = vor.u32 %v12940_v0, %v8809_v1  ;;  %847 = vmatpush.bf16.msra.mxu3 %v9100_v62  ;;  %v12973_v48 = vld [vmem:[%s20867_s1 + $0x18c] sm:$0xf]  ;;  %v9200_v55 = vor.u32 %v13041_v47, %v9199_v45 }
  0x18   :  { %v13008_v63 = vld [vmem:[%s20867_s1 + $0x29c] sm:$0xf0]  ;;  %v9065_v3 = vld [vmem:[%s20867_s1 + $0x2a0] sm:$0xf0]  ;;  %v8945_v49 = vld [vmem:[%s20867_s1 + $0x1a8] sm:$0xf0] }
  0x19   :  { %v9064_v5 = vor.u32 %v13008_v63, %v9063_v61  ;;  %v8775_v7 = vld [vmem:[%s20867_s1 + $0x40] sm:$0xf]  ;;  %v9068_v10 = vor.u32 %v13004_v2, %v9065_v3  ;;  %v12932_v12 = vld [vmem:[%s20867_s1 + $0x44] sm:$0xf]  ;;  %809 = vmatpush.bf16.msra.mxu0 %v8808_v4  ;;  %835 = vmatpush.bf16.msra.mxu2 %v8812_v6  ;;  %v13037_v50 = vld [vmem:[%s20867_s1 + $0x38c] sm:$0xf]  ;;  %v8948_v56 = vor.u32 %v12973_v48, %v8945_v49 }
  0x1a   :  { %v12936_v8 = vld [vmem:[%s20867_s1 + $0x5c] sm:$0xf0]  ;;  %v8777_v13 = vld [vmem:[%s20867_s1 + $0x60] sm:$0xf0]  ;;  %v9201_v51 = vld [vmem:[%s20867_s1 + $0x3a8] sm:$0xf0] }
  0x1b   :  { %v9031_v9 = vld [vmem:[%s20867_s1 + $0x240] sm:$0xf]  ;;  %v12996_v14 = vld [vmem:[%s20867_s1 + $0x244] sm:$0xf]  ;;  %v8776_v16 = vor.u32 %v12936_v8, %v8775_v7  ;;  %822 = vmatpush.bf16.msra.mxu1 %v9064_v5  ;;  %v8780_v20 = vor.u32 %v12932_v12, %v8777_v13  ;;  %848 = vmatpush.bf16.msra.mxu3 %v9068_v10  ;;  %v8911_v53 = vld [vmem:[%s20867_s1 + $0x148] sm:$0xf]  ;;  %v9204_v59 = vor.u32 %v13037_v50, %v9201_v51 }
  0x1c   :  { %v13000_v11 = vld [vmem:[%s20867_s1 + $0x25c] sm:$0xf0]  ;;  %v9033_v15 = vld [vmem:[%s20867_s1 + $0x260] sm:$0xf0]  ;;  %v14089_v54 = vmov 0.0  }
  0x1d   :  { %v8743_v17 = vld [vmem:[%s20867_s1] sm:$0xf]  ;;  %v9032_v19 = vor.u32 %v13000_v11, %v9031_v9  ;;  %v12924_v23 = vld [vmem:[%s20867_s1 + $0x4] sm:$0xf]  ;;  %v9036_v24 = vor.u32 %v12996_v14, %v9033_v15  ;;  %810 = vmatpush.bf16.msra.mxu0 %v8776_v16  ;;  %836 = vmatpush.bf16.msra.mxu2 %v8780_v20  ;;  %22 = vst [vmem:[#allocation2] sm:$0xf] %v14089_v54 }
  0x1e   :  { %v12928_v18 = vld [vmem:[%s20867_s1 + $0x1c] sm:$0xf0]  ;;  %v8745_v25 = vld [vmem:[%s20867_s1 + $0x20] sm:$0xf0]  ;;  %v12969_v57 = vld [vmem:[%s20867_s1 + $0x164] sm:$0xf0] }
  0x1f   :  { %v8999_v21 = vld [vmem:[%s20867_s1 + $0x200] sm:$0xf]  ;;  %v12988_v26 = vld [vmem:[%s20867_s1 + $0x204] sm:$0xf]  ;;  %v8744_v31 = vor.u32 %v12928_v18, %v8743_v17  ;;  %823 = vmatpush.bf16.msra.mxu1 %v9032_v19  ;;  %v8748_v36 = vor.u32 %v12924_v23, %v8745_v25  ;;  %849 = vmatpush.bf16.msra.mxu3 %v9036_v24  ;;  %v9167_v58 = vld [vmem:[%s20867_s1 + $0x348] sm:$0xf]  ;;  %v8912_v1 = vor.u32 %v12969_v57, %v8911_v53 }
  0x20   :  { %v12992_v22 = vld [vmem:[%s20867_s1 + $0x21c] sm:$0xf0]  ;;  %v9001_v27 = vld [vmem:[%s20867_s1 + $0x220] sm:$0xf0]  ;;  %23 = vst [vmem:[#allocation3] sm:$0xf] %v14089_v54 }
  0x21   :  { %v9000_v35 = vor.u32 %v12992_v22, %v8999_v21  ;;  %v9004_v39 = vor.u32 %v12988_v26, %v9001_v27  ;;  %811 = vmatpush.bf16.msra.mxu0 %v8744_v31  ;;  %837 = vmatpush.bf16.msra.mxu2 %v8748_v36  ;;  %v13033_v60 = vld [vmem:[%s20867_s1 + $0x364] sm:$0xf0]  ;;  %v12965_v61 = vld [vmem:[%s20867_s1 + $0x14c] sm:$0xf] }
  0x22   :  { %v8913_v62 = vld [vmem:[%s20867_s1 + $0x168] sm:$0xf0]  ;;  %v9168_v2 = vor.u32 %v13033_v60, %v9167_v58  ;;  %v8879_v4 = vld [vmem:[%s20867_s1 + $0x108] sm:$0xf] }
  0x23   :  { %824 = vmatpush.bf16.msra.mxu1 %v9000_v35  ;;  %850 = vmatpush.bf16.msra.mxu3 %v9004_v39  ;;  %v13029_v63 = vld [vmem:[%s20867_s1 + $0x34c] sm:$0xf]  ;;  %v8916_v3 = vor.u32 %v12965_v61, %v8913_v62  ;;  %v12961_v5 = vld [vmem:[%s20867_s1 + $0x124] sm:$0xf0] }
  0x24   :  { %v9169_v0 = vld [vmem:[%s20867_s1 + $0x368] sm:$0xf0]  ;;  %v9135_v6 = vld [vmem:[%s20867_s1 + $0x308] sm:$0xf]  ;;  %v8880_v14 = vor.u32 %v12961_v5, %v8879_v4  ;;  %v13050_v4 = vld [vmem:[%s20867_s1 + $0x3ec] sm:$0xf0] }
  0x25   :  { %856 = vmatpush.bf16.msrb.mxu0 %v8976_v40  ;;  %882 = vmatpush.bf16.msrb.mxu2 %v8980_v42  ;;  %v9172_v7 = vor.u32 %v13029_v63, %v9169_v0  ;;  %v13025_v8 = vld [vmem:[%s20867_s1 + $0x324] sm:$0xf0]  ;;  %v12957_v9 = vld [vmem:[%s20867_s1 + $0x10c] sm:$0xf]  ;;  %v8983_v0 = vld [vmem:[%s20867_s1 + $0x1d0] sm:$0xf] }
  0x26   :  { %v8881_v10 = vld [vmem:[%s20867_s1 + $0x128] sm:$0xf0]  ;;  %v27_v13 = vld [vmem:[#allocation2] sm:$0xf]  ;;  %v9136_v15 = vor.u32 %v13025_v8, %v9135_v6  ;;  %v8985_v8 = vld [vmem:[%s20867_s1 + $0x1f0] sm:$0xf0] }
  0x27   :  { %869 = vmatpush.bf16.msrb.mxu1 %v9232_v41  ;;  %895 = vmatpush.bf16.msrb.mxu3 %v9236_v46  ;;  %v13021_v11 = vld [vmem:[%s20867_s1 + $0x30c] sm:$0xf]  ;;  %29 = vst [vmem:[#allocation1] ss:$4 sm:$0xff] %v27_v13  ;;  %v8884_v16 = vor.u32 %v12957_v9, %v8881_v10  ;;  %v8847_v17 = vld [vmem:[%s20867_s1 + $0xc8] sm:$0xf] }
  0x28   :  { %v9137_v12 = vld [vmem:[%s20867_s1 + $0x328] sm:$0xf0]  ;;  %v12953_v18 = vld [vmem:[%s20867_s1 + $0xe4] sm:$0xf0] }
  0x29   :  { %857 = vmatpush.bf16.msrb.mxu0 %v8944_v52  ;;  %883 = vmatpush.bf16.msrb.mxu2 %v8948_v56  ;;  %v9103_v19 = vld [vmem:[%s20867_s1 + $0x2c8] sm:$0xf]  ;;  %v9140_v20 = vor.u32 %v13021_v11, %v9137_v12  ;;  %v12949_v22 = vld [vmem:[%s20867_s1 + $0xcc] sm:$0xf]  ;;  %v8848_v24 = vor.u32 %v12953_v18, %v8847_v17  ;;  %v13046_v11 = vld [vmem:[%s20867_s1 + $0x3d4] sm:$0xf] }
  0x2a   :  { %v13017_v21 = vld [vmem:[%s20867_s1 + $0x2e4] sm:$0xf0]  ;;  %v8849_v23 = vld [vmem:[%s20867_s1 + $0xe8] sm:$0xf0]  ;;  %v9241_v12 = vld [vmem:[%s20867_s1 + $0x3f0] sm:$0xf0] }
  0x2b   :  { %870 = vmatpush.bf16.msrb.mxu1 %v9200_v55  ;;  %896 = vmatpush.bf16.msrb.mxu3 %v9204_v59  ;;  %v13013_v25 = vld [vmem:[%s20867_s1 + $0x2cc] sm:$0xf]  ;;  %v9104_v27 = vor.u32 %v13017_v21, %v9103_v19  ;;  %v8852_v28 = vor.u32 %v12949_v22, %v8849_v23  ;;  %v8815_v29 = vld [vmem:[%s20867_s1 + $0x88] sm:$0xf]  ;;  %v8951_v17 = vld [vmem:[%s20867_s1 + $0x190] sm:$0xf]  ;;  %v9244_v19 = vor.u32 %v13046_v11, %v9241_v12 }
  0x2c   :  { %v9105_v26 = vld [vmem:[%s20867_s1 + $0x2e8] sm:$0xf0]  ;;  %v12945_v30 = vld [vmem:[%s20867_s1 + $0xa4] sm:$0xf0]  ;;  %v12978_v18 = vld [vmem:[%s20867_s1 + $0x1ac] sm:$0xf0] }
  0x2d   :  { %858 = vmatpush.bf16.msrb.mxu0 %v8912_v1  ;;  %884 = vmatpush.bf16.msrb.mxu2 %v8916_v3  ;;  %v9071_v31 = vld [vmem:[%s20867_s1 + $0x288] sm:$0xf]  ;;  %v12941_v33 = vld [vmem:[%s20867_s1 + $0x8c] sm:$0xf]  ;;  %v9108_v37 = vor.u32 %v13013_v25, %v9105_v26  ;;  %v8816_v40 = vor.u32 %v12945_v30, %v8815_v29  ;;  %v9239_v3 = vld [vmem:[%s20867_s1 + $0x3d0] sm:$0xf]  ;;  %v8952_v26 = vor.u32 %v12978_v18, %v8951_v17 }
  0x2e   :  { %v13009_v32 = vld [vmem:[%s20867_s1 + $0x2a4] sm:$0xf0]  ;;  %v8817_v34 = vld [vmem:[%s20867_s1 + $0xa8] sm:$0xf0]  ;;  %v13042_v21 = vld [vmem:[%s20867_s1 + $0x3ac] sm:$0xf0] }
  0x2f   :  { %871 = vmatpush.bf16.msrb.mxu1 %v9168_v2  ;;  %897 = vmatpush.bf16.msrb.mxu3 %v9172_v7  ;;  %v30_v35 = vld.sshfl [vmem:[#allocation1] sm:$0xff pattern:$0x73625140]  ;;  %v31_v36 = vld.sshfl [vmem:[#allocation1 + $0x8] sm:$0xff pattern:$0x73625140]  ;;  %v9072_v43 = vor.u32 %v13009_v32, %v9071_v31  ;;  %v8820_v44 = vor.u32 %v12941_v33, %v8817_v34 }
  0x30   :  { %v14446_v38 = vpack.c.bf16 %v30_v35, %v30_v35  ;;  %v14448_v39 = vpack.c.bf16 %v31_v36, %v31_v36  ;;  %v13005_v41 = vld [vmem:[%s20867_s1 + $0x28c] sm:$0xf]  ;;  %v8783_v45 = vld [vmem:[%s20867_s1 + $0x48] sm:$0xf]  ;;  %v12986_v2 = vld [vmem:[%s20867_s1 + $0x1ec] sm:$0xf0] }
  0x31   :  { %859 = vmatpush.bf16.msrb.mxu0 %v8880_v14  ;;  %885 = vmatpush.bf16.msrb.mxu2 %v8884_v16  ;;  %v9073_v42 = vld [vmem:[%s20867_s1 + $0x2a8] sm:$0xf0]  ;;  %v12937_v46 = vld [vmem:[%s20867_s1 + $0x64] sm:$0xf0]  ;;  %v12982_v7 = vld [vmem:[%s20867_s1 + $0x1d4] sm:$0xf]  ;;  %v8984_v13 = vor.u32 %v12986_v2, %v8983_v0  ;;  %v9240_v14 = vor.u32 %v13050_v4, %v9239_v3 }
  0x32   :  { %v9039_v47 = vld [vmem:[%s20867_s1 + $0x248] sm:$0xf]  ;;  %838 = vmatmul.bf16.vlgmr.msra.gmra.mxu2 %v14446_v38  ;;  %851 = vmatmul.bf16.vlgmr.msra.gmra.mxu3 %v14448_v39  ;;  %v12933_v49 = vld [vmem:[%s20867_s1 + $0x4c] sm:$0xf]  ;;  %v9076_v51 = vor.u32 %v13005_v41, %v9073_v42  ;;  %v8784_v53 = vor.u32 %v12937_v46, %v8783_v45  ;;  %v8988_v16 = vor.u32 %v12982_v7, %v8985_v8  ;;  %v12974_v22 = vld [vmem:[%s20867_s1 + $0x194] sm:$0xf] }
  0x33   :  { %872 = vmatpush.bf16.msrb.mxu1 %v9136_v15  ;;  %898 = vmatpush.bf16.msrb.mxu3 %v9140_v20  ;;  %v13001_v48 = vld [vmem:[%s20867_s1 + $0x264] sm:$0xf0]  ;;  %v8785_v50 = vld [vmem:[%s20867_s1 + $0x68] sm:$0xf0]  ;;  %v9207_v20 = vld [vmem:[%s20867_s1 + $0x390] sm:$0xf] }
  0x34   :  { %812 = vmatmul.bf16.vlgmr.msra.gmra.mxu0 %v14446_v38  ;;  %v12997_v52 = vld [vmem:[%s20867_s1 + $0x24c] sm:$0xf]  ;;  %825 = vmatmul.bf16.vlgmr.msra.gmra.mxu1 %v14448_v39  ;;  %v8751_v55 = vld [vmem:[%s20867_s1 + $0x8] sm:$0xf]  ;;  %v9040_v57 = vor.u32 %v13001_v48, %v9039_v47  ;;  %v8788_v58 = vor.u32 %v12933_v49, %v8785_v50  ;;  %v8953_v23 = vld [vmem:[%s20867_s1 + $0x1b0] sm:$0xf0] }
  0x35   :  { %860 = vmatpush.bf16.msrb.mxu0 %v8848_v24  ;;  %886 = vmatpush.bf16.msrb.mxu2 %v8852_v28  ;;  %v9041_v54 = vld [vmem:[%s20867_s1 + $0x268] sm:$0xf0]  ;;  %v12929_v56 = vld [vmem:[%s20867_s1 + $0x24] sm:$0xf0]  ;;  %v13038_v24 = vld [vmem:[%s20867_s1 + $0x394] sm:$0xf]  ;;  %v8956_v30 = vor.u32 %v12974_v22, %v8953_v23 }
  0x36   :  { %v9007_v59 = vld [vmem:[%s20867_s1 + $0x208] sm:$0xf]  ;;  %v12925_v61 = vld [vmem:[%s20867_s1 + $0xc] sm:$0xf]  ;;  %v9044_v1 = vor.u32 %v12997_v52, %v9041_v54  ;;  %v8752_v5 = vor.u32 %v12929_v56, %v8751_v55  ;;  %v9209_v25 = vld [vmem:[%s20867_s1 + $0x3b0] sm:$0xf0] }
  0x37   :  { %873 = vmatpush.bf16.msrb.mxu1 %v9104_v27  ;;  %899 = vmatpush.bf16.msrb.mxu3 %v9108_v37  ;;  %v12993_v60 = vld [vmem:[%s20867_s1 + $0x224] sm:$0xf0]  ;;  %v8753_v62 = vld [vmem:[%s20867_s1 + $0x28] sm:$0xf0]  ;;  %v9208_v27 = vor.u32 %v13042_v21, %v9207_v20  ;;  %v8919_v28 = vld [vmem:[%s20867_s1 + $0x150] sm:$0xf]  ;;  %v9212_v31 = vor.u32 %v13038_v24, %v9209_v25 }
  0x38   :  { %v12989_v63 = vld [vmem:[%s20867_s1 + $0x20c] sm:$0xf]  ;;  %v9008_v9 = vor.u32 %v12993_v60, %v9007_v59  ;;  %v8756_v10 = vor.u32 %v12925_v61, %v8753_v62  ;;  %v12970_v29 = vld [vmem:[%s20867_s1 + $0x16c] sm:$0xf0]  ;;  %v12966_v34 = vld [vmem:[%s20867_s1 + $0x154] sm:$0xf] }
  0x39   :  { %861 = vmatpush.bf16.msrb.mxu0 %v8816_v40  ;;  %887 = vmatpush.bf16.msrb.mxu2 %v8820_v44  ;;  %v9009_v6 = vld [vmem:[%s20867_s1 + $0x228] sm:$0xf0]  ;;  %v9175_v32 = vld [vmem:[%s20867_s1 + $0x350] sm:$0xf]  ;;  %v8921_v35 = vld [vmem:[%s20867_s1 + $0x170] sm:$0xf0]  ;;  %v8920_v40 = vor.u32 %v12970_v29, %v8919_v28 }
  0x3a   :  { %v9012_v15 = vor.u32 %v12989_v63, %v9009_v6  ;;  %v13034_v33 = vld [vmem:[%s20867_s1 + $0x36c] sm:$0xf0]  ;;  %v13030_v36 = vld [vmem:[%s20867_s1 + $0x354] sm:$0xf]  ;;  %v8924_v44 = vor.u32 %v12966_v34, %v8921_v35 }
  0x3b   :  { %874 = vmatpush.bf16.msrb.mxu1 %v9072_v43  ;;  %900 = vmatpush.bf16.msrb.mxu3 %v9076_v51  ;;  %v9177_v37 = vld [vmem:[%s20867_s1 + $0x370] sm:$0xf0]  ;;  %v9176_v41 = vor.u32 %v13034_v33, %v9175_v32  ;;  %v8887_v42 = vld [vmem:[%s20867_s1 + $0x110] sm:$0xf] }
  0x3c   :  { %v12962_v43 = vld [vmem:[%s20867_s1 + $0x12c] sm:$0xf0]  ;;  %v9180_v45 = vor.u32 %v13030_v36, %v9177_v37  ;;  %v12958_v48 = vld [vmem:[%s20867_s1 + $0x114] sm:$0xf] }
  0x3d   :  { %862 = vmatpush.bf16.msrb.mxu0 %v8784_v53  ;;  %888 = vmatpush.bf16.msrb.mxu2 %v8788_v58  ;;  %v9143_v46 = vld [vmem:[%s20867_s1 + $0x310] sm:$0xf]  ;;  %v8889_v49 = vld [vmem:[%s20867_s1 + $0x130] sm:$0xf0]  ;;  %v8888_v52 = vor.u32 %v12962_v43, %v8887_v42 }
  0x3e   :  { %v13026_v47 = vld [vmem:[%s20867_s1 + $0x32c] sm:$0xf0]  ;;  %v13022_v50 = vld [vmem:[%s20867_s1 + $0x314] sm:$0xf]  ;;  %v8892_v56 = vor.u32 %v12958_v48, %v8889_v49 }
  0x3f   :  { %875 = vmatpush.bf16.msrb.mxu1 %v9040_v57  ;;  %901 = vmatpush.bf16.msrb.mxu3 %v9044_v1  ;;  %v9145_v51 = vld [vmem:[%s20867_s1 + $0x330] sm:$0xf0]  ;;  %v9144_v53 = vor.u32 %v13026_v47, %v9143_v46  ;;  %v8855_v54 = vld [vmem:[%s20867_s1 + $0xd0] sm:$0xf] }
  0x40   :  { %v12954_v55 = vld [vmem:[%s20867_s1 + $0xec] sm:$0xf0]  ;;  %v9148_v57 = vor.u32 %v13022_v50, %v9145_v51  ;;  %v12950_v60 = vld [vmem:[%s20867_s1 + $0xd4] sm:$0xf] }
  0x41   :  { %863 = vmatpush.bf16.msrb.mxu0 %v8752_v5  ;;  %889 = vmatpush.bf16.msrb.mxu2 %v8756_v10  ;;  %v9111_v58 = vld [vmem:[%s20867_s1 + $0x2d0] sm:$0xf]  ;;  %v8857_v61 = vld [vmem:[%s20867_s1 + $0xf0] sm:$0xf0]  ;;  %v8856_v0 = vor.u32 %v12954_v55, %v8855_v54 }
  0x42   :  { %v13018_v59 = vld [vmem:[%s20867_s1 + $0x2ec] sm:$0xf0]  ;;  %v13014_v62 = vld [vmem:[%s20867_s1 + $0x2d4] sm:$0xf]  ;;  %v8860_v4 = vor.u32 %v12950_v60, %v8857_v61 }
  0x43   :  { %876 = vmatpush.bf16.msrb.mxu1 %v9008_v9  ;;  %902 = vmatpush.bf16.msrb.mxu3 %v9012_v15  ;;  %v9113_v63 = vld [vmem:[%s20867_s1 + $0x2f0] sm:$0xf0]  ;;  %v9112_v1 = vor.u32 %v13018_v59, %v9111_v58  ;;  %v8823_v2 = vld [vmem:[%s20867_s1 + $0x90] sm:$0xf] }
  0x44   :  { %890 = vmatmul.bf16.vlgmr.msrb.gmra.mxu2 %v14446_v38  ;;  %864 = vmatmul.bf16.vlgmr.msrb.gmra.mxu0 %v14446_v38  ;;  %v12946_v3 = vld [vmem:[%s20867_s1 + $0xac] sm:$0xf0]  ;;  %v9116_v5 = vor.u32 %v13014_v62, %v9113_v63  ;;  %v12942_v8 = vld [vmem:[%s20867_s1 + $0x94] sm:$0xf] }
  0x45   :  { %908 = vmatpush.bf16.msra.mxu0 %v8984_v13  ;;  %934 = vmatpush.bf16.msra.mxu2 %v8988_v16  ;;  %v9079_v6 = vld [vmem:[%s20867_s1 + $0x290] sm:$0xf]  ;;  %v8825_v9 = vld [vmem:[%s20867_s1 + $0xb0] sm:$0xf0]  ;;  %v8824_v12 = vor.u32 %v12946_v3, %v8823_v2 }
  0x46   :  { %903 = vmatmul.bf16.vlgmr.msrb.gmra.mxu3 %v14448_v39  ;;  %877 = vmatmul.bf16.vlgmr.msrb.gmra.mxu1 %v14448_v39  ;;  %v13010_v7 = vld [vmem:[%s20867_s1 + $0x2ac] sm:$0xf0]  ;;  %v13006_v10 = vld [vmem:[%s20867_s1 + $0x294] sm:$0xf]  ;;  %v8828_v17 = vor.u32 %v12942_v8, %v8825_v9 }
  0x47   :  { %921 = vmatpush.bf16.msra.mxu1 %v9240_v14  ;;  %947 = vmatpush.bf16.msra.mxu3 %v9244_v19  ;;  %v9081_v11 = vld [vmem:[%s20867_s1 + $0x2b0] sm:$0xf0]  ;;  %v9080_v13 = vor.u32 %v13010_v7, %v9079_v6  ;;  %v8791_v14 = vld [vmem:[%s20867_s1 + $0x50] sm:$0xf] }
  0x48   :  { %v12938_v15 = vld [vmem:[%s20867_s1 + $0x6c] sm:$0xf0]  ;;  %v9084_v18 = vor.u32 %v13006_v10, %v9081_v11  ;;  %v12934_v20 = vld [vmem:[%s20867_s1 + $0x54] sm:$0xf] }
  0x49   :  { %909 = vmatpush.bf16.msra.mxu0 %v8952_v26  ;;  %935 = vmatpush.bf16.msra.mxu2 %v8956_v30  ;;  %v9047_v16 = vld [vmem:[%s20867_s1 + $0x250] sm:$0xf]  ;;  %v8793_v21 = vld [vmem:[%s20867_s1 + $0x70] sm:$0xf0] }
  0x4a   :  { %v13002_v19 = vld [vmem:[%s20867_s1 + $0x26c] sm:$0xf0]  ;;  %v12998_v22 = vld [vmem:[%s20867_s1 + $0x254] sm:$0xf] }
  0x4b   :  { %922 = vmatpush.bf16.msra.mxu1 %v9208_v27  ;;  %948 = vmatpush.bf16.msra.mxu3 %v9212_v31  ;;  %v9049_v23 = vld [vmem:[%s20867_s1 + $0x270] sm:$0xf0]  ;;  %v8759_v24 = vld [vmem:[%s20867_s1 + $0x10] sm:$0xf] }
  0x4d   :  { %910 = vmatpush.bf16.msra.mxu0 %v8920_v40  ;;  %936 = vmatpush.bf16.msra.mxu2 %v8924_v44 }
  0x4f   :  { %923 = vmatpush.bf16.msra.mxu1 %v9176_v41  ;;  %949 = vmatpush.bf16.msra.mxu3 %v9180_v45 }
  0x51   :  { %911 = vmatpush.bf16.msra.mxu0 %v8888_v52  ;;  %937 = vmatpush.bf16.msra.mxu2 %v8892_v56 }
  0x53   :  { %924 = vmatpush.bf16.msra.mxu1 %v9144_v53  ;;  %950 = vmatpush.bf16.msra.mxu3 %v9148_v57 }
  0x55   :  { %912 = vmatpush.bf16.msra.mxu0 %v8856_v0  ;;  %938 = vmatpush.bf16.msra.mxu2 %v8860_v4 }
  0x57   :  { %925 = vmatpush.bf16.msra.mxu1 %v9112_v1  ;;  %951 = vmatpush.bf16.msra.mxu3 %v9116_v5 }
  0x58   :  { %9 = vsyncpa [#allocation5], 0  ;;  %v8792_v25 = vor.u32 %v12938_v15, %v8791_v14  ;;  %v9048_v26 = vor.u32 %v13002_v19, %v9047_v16  ;;  %v12930_v27 = vld [vmem:[%s20867_s1 + $0x2c] sm:$0xf0]  ;;  %v8796_v30 = vor.u32 %v12934_v20, %v8793_v21  ;;  %v9052_v31 = vor.u32 %v12998_v22, %v9049_v23  ;;  %v12926_v32 = vld [vmem:[%s20867_s1 + $0x14] sm:$0xf] }
  0x59   :  { %913 = vmatpush.bf16.msra.mxu0 %v8824_v12  ;;  %v9015_v28 = vld [vmem:[%s20867_s1 + $0x210] sm:$0xf]  ;;  %939 = vmatpush.bf16.msra.mxu2 %v8828_v17  ;;  %v8761_v33 = vld [vmem:[%s20867_s1 + $0x30] sm:$0xf0]  ;;  %v8991_v36 = vld [vmem:[%s20867_s1 + $0x1d8] sm:$0xf]  ;;  %v8760_v43 = vor.u32 %v12930_v27, %v8759_v24 }
  0x5a   :  { %v12994_v29 = vld [vmem:[%s20867_s1 + $0x22c] sm:$0xf0]  ;;  %v12990_v34 = vld [vmem:[%s20867_s1 + $0x214] sm:$0xf]  ;;  %v12987_v37 = vld [vmem:[%s20867_s1 + $0x1f4] sm:$0xf0]  ;;  %v8764_v48 = vor.u32 %v12926_v32, %v8761_v33 }
  0x5b   :  { %926 = vmatpush.bf16.msra.mxu1 %v9080_v13  ;;  %952 = vmatpush.bf16.msra.mxu3 %v9084_v18  ;;  %v9017_v35 = vld [vmem:[%s20867_s1 + $0x230] sm:$0xf0]  ;;  %v9247_v40 = vld [vmem:[%s20867_s1 + $0x3d8] sm:$0xf]  ;;  %v12983_v42 = vld [vmem:[%s20867_s1 + $0x1dc] sm:$0xf]  ;;  %v9016_v44 = vor.u32 %v12994_v29, %v9015_v28  ;;  %v8992_v50 = vor.u32 %v12987_v37, %v8991_v36 }
  0x5c   :  { %v13051_v41 = vld [vmem:[%s20867_s1 + $0x3f4] sm:$0xf0]  ;;  %v8993_v45 = vld [vmem:[%s20867_s1 + $0x1f8] sm:$0xf0]  ;;  %v9020_v49 = vor.u32 %v12990_v34, %v9017_v35  ;;  %vm1028_vm0 = vcmask 1045508   ;;  %vm1026_vm1 = vcmask 1041408  }
  0x5d   :  { %914 = vmatpush.bf16.msra.mxu0 %v8792_v25  ;;  %v13047_v46 = vld [vmem:[%s20867_s1 + $0x3dc] sm:$0xf]  ;;  %940 = vmatpush.bf16.msra.mxu2 %v8796_v30  ;;  %v9248_v51 = vor.u32 %v13051_v41, %v9247_v40  ;;  %v8959_v52 = vld [vmem:[%s20867_s1 + $0x198] sm:$0xf]  ;;  %v8996_v54 = vor.u32 %v12983_v42, %v8993_v45  ;;  %vm1030_vm2 = vcmask 1043456   ;;  %s14090_s22 = smov [#allocation4]  }
  0x5e   :  { %v9249_v47 = vld [vmem:[%s20867_s1 + $0x3f8] sm:$0xf0]  ;;  %v12979_v53 = vld [vmem:[%s20867_s1 + $0x1b4] sm:$0xf0]  ;;  %s8730_s23 = sshll.u32 %s14090_s22, 4  ;;  %s8732_s26 = sshll.u32 %s20870_s4, 4  ;;  %s8731_s23 = int_to_ptr.vmem [resolvable:$true] %s8730_s23  ;;  %s8733_s26 = int_to_ptr.hbm [resolvable:$true] %s8732_s26 }
  0x5f   :  { %927 = vmatpush.bf16.msra.mxu1 %v9048_v26  ;;  %953 = vmatpush.bf16.msra.mxu3 %v9052_v31  ;;  %v9252_v55 = vor.u32 %v13047_v46, %v9249_v47  ;;  %v9215_v56 = vld [vmem:[%s20867_s1 + $0x398] sm:$0xf]  ;;  %v12975_v58 = vld [vmem:[%s20867_s1 + $0x19c] sm:$0xf]  ;;  %v8960_v62 = vor.u32 %v12979_v53, %v8959_v52 }
  0x60   :  { %v13043_v57 = vld [vmem:[%s20867_s1 + $0x3b4] sm:$0xf0]  ;;  %v8961_v59 = vld [vmem:[%s20867_s1 + $0x1b8] sm:$0xf0] }
  0x61   :  { %915 = vmatpush.bf16.msra.mxu0 %v8760_v43  ;;  %v13039_v60 = vld [vmem:[%s20867_s1 + $0x39c] sm:$0xf]  ;;  %941 = vmatpush.bf16.msra.mxu2 %v8764_v48  ;;  %v9216_v63 = vor.u32 %v13043_v57, %v9215_v56  ;;  %v8927_v0 = vld [vmem:[%s20867_s1 + $0x158] sm:$0xf]  ;;  %v8964_v2 = vor.u32 %v12975_v58, %v8961_v59 }
  0x62   :  { %v9217_v61 = vld [vmem:[%s20867_s1 + $0x3b8] sm:$0xf0]  ;;  %v12971_v1 = vld [vmem:[%s20867_s1 + $0x174] sm:$0xf0] }
  0x63   :  { %928 = vmatpush.bf16.msra.mxu1 %v9016_v44  ;;  %954 = vmatpush.bf16.msra.mxu3 %v9020_v49  ;;  %v9220_v3 = vor.u32 %v13039_v60, %v9217_v61  ;;  %v9183_v4 = vld [vmem:[%s20867_s1 + $0x358] sm:$0xf]  ;;  %v12967_v6 = vld [vmem:[%s20867_s1 + $0x15c] sm:$0xf]  ;;  %v8928_v10 = vor.u32 %v12971_v1, %v8927_v0 }
  0x64   :  { %v13035_v5 = vld [vmem:[%s20867_s1 + $0x374] sm:$0xf0]  ;;  %942 = vmatmul.bf16.vlgmr.msra.gmra.mxu2 %v14446_v38  ;;  %v8929_v7 = vld [vmem:[%s20867_s1 + $0x178] sm:$0xf0]  ;;  %916 = vmatmul.bf16.vlgmr.msra.gmra.mxu0 %v14446_v38 }
  0x65   :  { %960 = vmatpush.bf16.msrb.mxu0 %v8992_v50  ;;  %986 = vmatpush.bf16.msrb.mxu2 %v8996_v54  ;;  %v13031_v8 = vld [vmem:[%s20867_s1 + $0x35c] sm:$0xf]  ;;  %v9184_v11 = vor.u32 %v13035_v5, %v9183_v4  ;;  %v8895_v12 = vld [vmem:[%s20867_s1 + $0x118] sm:$0xf]  ;;  %v8932_v14 = vor.u32 %v12967_v6, %v8929_v7 }
  0x66   :  { %955 = vmatmul.bf16.vlgmr.msra.gmra.mxu3 %v14448_v39  ;;  %v9185_v9 = vld [vmem:[%s20867_s1 + $0x378] sm:$0xf0]  ;;  %929 = vmatmul.bf16.vlgmr.msra.gmra.mxu1 %v14448_v39  ;;  %v12963_v13 = vld [vmem:[%s20867_s1 + $0x134] sm:$0xf0] }
  0x67   :  { %973 = vmatpush.bf16.msrb.mxu1 %v9248_v51  ;;  %999 = vmatpush.bf16.msrb.mxu3 %v9252_v55  ;;  %v9188_v15 = vor.u32 %v13031_v8, %v9185_v9  ;;  %v9151_v16 = vld [vmem:[%s20867_s1 + $0x318] sm:$0xf]  ;;  %v12959_v18 = vld [vmem:[%s20867_s1 + $0x11c] sm:$0xf]  ;;  %v8896_v22 = vor.u32 %v12963_v13, %v8895_v12 }
  0x68   :  { %v13027_v17 = vld [vmem:[%s20867_s1 + $0x334] sm:$0xf0]  ;;  %v8897_v19 = vld [vmem:[%s20867_s1 + $0x138] sm:$0xf0] }
  0x69   :  { %961 = vmatpush.bf16.msrb.mxu0 %v8960_v62  ;;  %987 = vmatpush.bf16.msrb.mxu2 %v8964_v2  ;;  %v13023_v20 = vld [vmem:[%s20867_s1 + $0x31c] sm:$0xf]  ;;  %v9152_v23 = vor.u32 %v13027_v17, %v9151_v16  ;;  %v8863_v24 = vld [vmem:[%s20867_s1 + $0xd8] sm:$0xf]  ;;  %v8900_v26 = vor.u32 %v12959_v18, %v8897_v19 }
  0x6a   :  { %v9153_v21 = vld [vmem:[%s20867_s1 + $0x338] sm:$0xf0]  ;;  %v12955_v25 = vld [vmem:[%s20867_s1 + $0xf4] sm:$0xf0] }
  0x6b   :  { %974 = vmatpush.bf16.msrb.mxu1 %v9216_v63  ;;  %1000 = vmatpush.bf16.msrb.mxu3 %v9220_v3  ;;  %v9156_v27 = vor.u32 %v13023_v20, %v9153_v21  ;;  %v9119_v28 = vld [vmem:[%s20867_s1 + $0x2d8] sm:$0xf]  ;;  %v12951_v30 = vld [vmem:[%s20867_s1 + $0xdc] sm:$0xf]  ;;  %v8864_v34 = vor.u32 %v12955_v25, %v8863_v24 }
  0x6c   :  { %v13019_v29 = vld [vmem:[%s20867_s1 + $0x2f4] sm:$0xf0]  ;;  %v8865_v31 = vld [vmem:[%s20867_s1 + $0xf8] sm:$0xf0] }
  0x6d   :  { %962 = vmatpush.bf16.msrb.mxu0 %v8928_v10  ;;  %988 = vmatpush.bf16.msrb.mxu2 %v8932_v14  ;;  %v13015_v32 = vld [vmem:[%s20867_s1 + $0x2dc] sm:$0xf]  ;;  %v9120_v35 = vor.u32 %v13019_v29, %v9119_v28  ;;  %v8831_v36 = vld [vmem:[%s20867_s1 + $0x98] sm:$0xf]  ;;  %v8868_v40 = vor.u32 %v12951_v30, %v8865_v31 }
  0x6e   :  { %v9121_v33 = vld [vmem:[%s20867_s1 + $0x2f8] sm:$0xf0]  ;;  %v12947_v37 = vld [vmem:[%s20867_s1 + $0xb4] sm:$0xf0] }
  0x6f   :  { %975 = vmatpush.bf16.msrb.mxu1 %v9184_v11  ;;  %1001 = vmatpush.bf16.msrb.mxu3 %v9188_v15  ;;  %v9124_v41 = vor.u32 %v13015_v32, %v9121_v33  ;;  %v9087_v42 = vld [vmem:[%s20867_s1 + $0x298] sm:$0xf]  ;;  %v12943_v44 = vld [vmem:[%s20867_s1 + $0x9c] sm:$0xf]  ;;  %v8832_v48 = vor.u32 %v12947_v37, %v8831_v36  ;;  %v14907_v33 = vld [vmem:[%s20866_s0] sm:$0xff] }
  0x70   :  { %v13011_v43 = vld [vmem:[%s20867_s1 + $0x2b4] sm:$0xf0]  ;;  %v8833_v45 = vld [vmem:[%s20867_s1 + $0xb8] sm:$0xf0]  ;;  %v25_v36 = vunpack.c.l.bf16 %v14907_v33 }
  0x71   :  { %963 = vmatpush.bf16.msrb.mxu0 %v8896_v22  ;;  %989 = vmatpush.bf16.msrb.mxu2 %v8900_v26  ;;  %v13007_v46 = vld [vmem:[%s20867_s1 + $0x29c] sm:$0xf]  ;;  %v9088_v49 = vor.u32 %v13011_v43, %v9087_v42  ;;  %v8799_v50 = vld [vmem:[%s20867_s1 + $0x58] sm:$0xf]  ;;  %v8836_v52 = vor.u32 %v12943_v44, %v8833_v45  ;;  %v9482_v44 = vld [vmem:[%s20867_s1 + $0x1c0] sm:$0xf] }
  0x72   :  { %v9089_v47 = vld [vmem:[%s20867_s1 + $0x2b8] sm:$0xf0]  ;;  %v12939_v51 = vld [vmem:[%s20867_s1 + $0x74] sm:$0xf0]  ;;  %v13112_v45 = vld [vmem:[%s20867_s1 + $0x1dc] sm:$0xf0] }
  0x73   :  { %976 = vmatpush.bf16.msrb.mxu1 %v9152_v23  ;;  %1002 = vmatpush.bf16.msrb.mxu3 %v9156_v27  ;;  %v9092_v53 = vor.u32 %v13007_v46, %v9089_v47  ;;  %v9055_v54 = vld [vmem:[%s20867_s1 + $0x258] sm:$0xf]  ;;  %v12935_v56 = vld [vmem:[%s20867_s1 + $0x5c] sm:$0xf]  ;;  %v8800_v60 = vor.u32 %v12939_v51, %v8799_v50  ;;  %v9738_v46 = vld [vmem:[%s20867_s1 + $0x3c0] sm:$0xf]  ;;  %v9483_v47 = vor.u32 %v13112_v45, %v9482_v44 }
  0x74   :  { %v13003_v55 = vld [vmem:[%s20867_s1 + $0x274] sm:$0xf0]  ;;  %v8801_v57 = vld [vmem:[%s20867_s1 + $0x78] sm:$0xf0]  ;;  %v9484_v50 = vld [vmem:[%s20867_s1 + $0x1e0] sm:$0xf0] }
  0x75   :  { %964 = vmatpush.bf16.msrb.mxu0 %v8864_v34  ;;  %990 = vmatpush.bf16.msrb.mxu2 %v8868_v40  ;;  %v12999_v58 = vld [vmem:[%s20867_s1 + $0x25c] sm:$0xf]  ;;  %v9056_v61 = vor.u32 %v13003_v55, %v9055_v54  ;;  %v8767_v62 = vld [vmem:[%s20867_s1 + $0x18] sm:$0xf]  ;;  %v8804_v0 = vor.u32 %v12935_v56, %v8801_v57  ;;  %v9740_v54 = vld [vmem:[%s20867_s1 + $0x3e0] sm:$0xf0] }
  0x76   :  { %v9057_v59 = vld [vmem:[%s20867_s1 + $0x278] sm:$0xf0]  ;;  %v12931_v63 = vld [vmem:[%s20867_s1 + $0x34] sm:$0xf0]  ;;  %v13076_v44 = vld [vmem:[%s20867_s1 + $0xc4] sm:$0xf] }
  0x77   :  { %977 = vmatpush.bf16.msrb.mxu1 %v9120_v35  ;;  %1003 = vmatpush.bf16.msrb.mxu3 %v9124_v41  ;;  %v9060_v1 = vor.u32 %v12999_v58, %v9057_v59  ;;  %v9023_v2 = vld [vmem:[%s20867_s1 + $0x218] sm:$0xf]  ;;  %v12927_v4 = vld [vmem:[%s20867_s1 + $0x1c] sm:$0xf]  ;;  %v8768_v8 = vor.u32 %v12931_v63, %v8767_v62  ;;  %v9450_v59 = vld [vmem:[%s20867_s1 + $0x180] sm:$0xf] }
  0x78   :  { %v12995_v3 = vld [vmem:[%s20867_s1 + $0x234] sm:$0xf0]  ;;  %v8769_v5 = vld [vmem:[%s20867_s1 + $0x38] sm:$0xf0]  ;;  %v13168_v63 = vld [vmem:[%s20867_s1 + $0x39c] sm:$0xf0] }
  0x79   :  { %965 = vmatpush.bf16.msrb.mxu0 %v8832_v48  ;;  %991 = vmatpush.bf16.msrb.mxu2 %v8836_v52  ;;  %v12991_v6 = vld [vmem:[%s20867_s1 + $0x21c] sm:$0xf]  ;;  %v9024_v9 = vor.u32 %v12995_v3, %v9023_v2  ;;  %v8772_v10 = vor.u32 %v12927_v4, %v8769_v5  ;;  %v13176_v48 = vld [vmem:[%s20867_s1 + $0x3dc] sm:$0xf0]  ;;  %v9356_v45 = vld [vmem:[%s20867_s1 + $0xe0] sm:$0xf0] }
  0x7a   :  { %v9025_v7 = vld [vmem:[%s20867_s1 + $0x238] sm:$0xf0]  ;;  %v9739_v51 = vor.u32 %v13176_v48, %v9738_v46  ;;  %v13140_v48 = vld [vmem:[%s20867_s1 + $0x2c4] sm:$0xf] }
  0x7b   :  { %978 = vmatpush.bf16.msrb.mxu1 %v9088_v49  ;;  %1004 = vmatpush.bf16.msrb.mxu3 %v9092_v53  ;;  %v9028_v11 = vor.u32 %v12991_v6, %v9025_v7  ;;  %v13108_v49 = vld [vmem:[%s20867_s1 + $0x1c4] sm:$0xf] }
  0x7c   :  { %v9487_v52 = vor.u32 %v13108_v49, %v9484_v50  ;;  %v13172_v53 = vld [vmem:[%s20867_s1 + $0x3c4] sm:$0xf] }
  0x7d   :  { %966 = vmatpush.bf16.msrb.mxu0 %v8800_v60  ;;  %992 = vmatpush.bf16.msrb.mxu2 %v8804_v0  ;;  %v9743_v57 = vor.u32 %v13172_v53, %v9740_v54  ;;  %v13104_v60 = vld [vmem:[%s20867_s1 + $0x19c] sm:$0xf0]  ;;  %v13100_v0 = vld [vmem:[%s20867_s1 + $0x184] sm:$0xf] }
  0x7e   :  { %v9451_v62 = vor.u32 %v13104_v60, %v9450_v59  ;;  %v13164_v6 = vld [vmem:[%s20867_s1 + $0x384] sm:$0xf]  ;;  %v13072_v53 = vld [vmem:[%s20867_s1 + $0x9c] sm:$0xf0] }
  0x7f   :  { %979 = vmatpush.bf16.msrb.mxu1 %v9056_v61  ;;  %1005 = vmatpush.bf16.msrb.mxu3 %v9060_v1  ;;  %v9706_v61 = vld [vmem:[%s20867_s1 + $0x380] sm:$0xf]  ;;  %v9452_v1 = vld [vmem:[%s20867_s1 + $0x1a0] sm:$0xf0] }
  0x80   :  { %v9707_v4 = vor.u32 %v13168_v63, %v9706_v61  ;;  %v9455_v5 = vor.u32 %v13100_v0, %v9452_v1  ;;  %v9708_v7 = vld [vmem:[%s20867_s1 + $0x3a0] sm:$0xf0]  ;;  %v9578_v54 = vld [vmem:[%s20867_s1 + $0x280] sm:$0xf] }
  0x81   :  { %967 = vmatpush.bf16.msrb.mxu0 %v8768_v8  ;;  %993 = vmatpush.bf16.msrb.mxu2 %v8772_v10  ;;  %v9418_v10 = vld [vmem:[%s20867_s1 + $0x140] sm:$0xf]  ;;  %v9612_v49 = vld [vmem:[%s20867_s1 + $0x2e0] sm:$0xf0] }
  0x82   :  { %v13068_v59 = vld [vmem:[%s20867_s1 + $0x84] sm:$0xf] }
  0x83   :  { %980 = vmatpush.bf16.msrb.mxu1 %v9024_v9  ;;  %1006 = vmatpush.bf16.msrb.mxu3 %v9028_v11  ;;  %v9711_v9 = vor.u32 %v13164_v6, %v9708_v7  ;;  %v13096_v11 = vld [vmem:[%s20867_s1 + $0x15c] sm:$0xf0]  ;;  %v9324_v60 = vld [vmem:[%s20867_s1 + $0xa0] sm:$0xf0] }
  0x84   :  { %968 = vmatmul.bf16.vlgmr.msrb.gmra.mxu0 %v14446_v38  ;;  %994 = vmatmul.bf16.vlgmr.msrb.gmra.mxu2 %v14446_v38  ;;  %v9327_v63 = vor.u32 %v13068_v59, %v9324_v60  ;;  %v13132_v0 = vld [vmem:[%s20867_s1 + $0x284] sm:$0xf] }
  0x85   :  { %1873 = vmatpush.bf16.msra.mxu0 %v9483_v47  ;;  %1899 = vmatpush.bf16.msra.mxu2 %v9487_v52  ;;  %v9359_v47 = vor.u32 %v13076_v44, %v9356_v45  ;;  %v9322_v52 = vld [vmem:[%s20867_s1 + $0x80] sm:$0xf]  ;;  %v9580_v1 = vld [vmem:[%s20867_s1 + $0x2a0] sm:$0xf0]  ;;  %v9492_v44 = vld [vmem:[%s20867_s1 + $0x1e8] sm:$0xf0] }
  0x86   :  { %981 = vmatmul.bf16.vlgmr.msrb.gmra.mxu1 %v14448_v39  ;;  %1007 = vmatmul.bf16.vlgmr.msrb.gmra.mxu3 %v14448_v39 }
  0x87   :  { %1886 = vmatpush.bf16.msra.mxu1 %v9739_v51  ;;  %1912 = vmatpush.bf16.msra.mxu3 %v9743_v57  ;;  %v9615_v51 = vor.u32 %v13140_v48, %v9612_v49  ;;  %v9323_v57 = vor.u32 %v13072_v53, %v9322_v52  ;;  %v13173_v49 = vld [vmem:[%s20867_s1 + $0x3cc] sm:$0xf]  ;;  %v9458_v52 = vld [vmem:[%s20867_s1 + $0x188] sm:$0xf] }
  0x89   :  { %1874 = vmatpush.bf16.msra.mxu0 %v9451_v62  ;;  %1900 = vmatpush.bf16.msra.mxu2 %v9455_v5  ;;  %v9546_v5 = vld [vmem:[%s20867_s1 + $0x240] sm:$0xf] }
  0x8b   :  { %1887 = vmatpush.bf16.msra.mxu1 %v9707_v4  ;;  %1913 = vmatpush.bf16.msra.mxu3 %v9711_v9  ;;  %v13064_v4 = vld [vmem:[%s20867_s1 + $0x5c] sm:$0xf0] }
  0x8c   :  { %v13128_v9 = vld [vmem:[%s20867_s1 + $0x25c] sm:$0xf0] }
  0xb1   :  { %v813_v12 = vpop.f32.mrf.mxu0  ;;  %v826_v13 = vpop.f32.mrf.mxu1 }
  0xb2   :  { %v827_v39 = vadd.f32 %v826_v13, %v813_v12  ;;  %v9674_v12 = vld [vmem:[%s20867_s1 + $0x340] sm:$0xf]  ;;  %v9419_v13 = vor.u32 %v13096_v11, %v9418_v10  ;;  %v13060_v10 = vld [vmem:[%s20867_s1 + $0x44] sm:$0xf] }
  0xb3   :  { %v9292_v11 = vld [vmem:[%s20867_s1 + $0x60] sm:$0xf0] }
  0xb4   :  { %1875 = vmatpush.bf16.msra.mxu0 %v9419_v13 }
  0xb5   :  { %v839_v14 = vpop.f32.mrf.mxu2  ;;  %v852_v15 = vpop.f32.mrf.mxu3 }
  0xb6   :  { %v853_v26 = vadd.f32 %v852_v15, %v839_v14  ;;  %v13160_v14 = vld [vmem:[%s20867_s1 + $0x35c] sm:$0xf0]  ;;  %v13092_v15 = vld [vmem:[%s20867_s1 + $0x144] sm:$0xf] }
  0xb8   :  { %v1020_v30 = vrot.slane %v853_v26, 6  ;;  %v9642_v26 = vld [vmem:[%s20867_s1 + $0x300] sm:$0xf] }
  0xb9   :  { %v815_v16 = vpop.f32.mrf.mxu0  ;;  %v828_v17 = vpop.f32.mrf.mxu1 }
  0xba   :  { %v1027_v35 = vsel %vm1026_vm1, %v827_v39, %v1020_v30  ;;  %v9420_v16 = vld [vmem:[%s20867_s1 + $0x160] sm:$0xf0]  ;;  %v9675_v17 = vor.u32 %v13160_v14, %v9674_v12 }
  0xbc   :  { %1888 = vmatpush.bf16.msra.mxu1 %v9675_v17 }
  0xbd   :  { %v841_v18 = vpop.f32.mrf.mxu2  ;;  %v854_v19 = vpop.f32.mrf.mxu3 }
  0xbe   :  { %v9423_v18 = vor.u32 %v13092_v15, %v9420_v16  ;;  %v13156_v19 = vld [vmem:[%s20867_s1 + $0x344] sm:$0xf]  ;;  %v9547_v15 = vor.u32 %v13128_v9, %v9546_v5  ;;  %v9716_v9 = vld [vmem:[%s20867_s1 + $0x3a8] sm:$0xf0] }
  0xbf   :  { %v9548_v16 = vld [vmem:[%s20867_s1 + $0x260] sm:$0xf0] }
  0xc0   :  { %1901 = vmatpush.bf16.msra.mxu2 %v9423_v18 }
  0xc1   :  { %v865_v20 = vpop.f32.mrf.mxu0 }
  0xc3   :  { %v878_v21 = vpop.f32.mrf.mxu1 }
  0xc4   :  { %v879_v24 = vadd.f32 %v878_v21, %v865_v20  ;;  %v9676_v20 = vld [vmem:[%s20867_s1 + $0x360] sm:$0xf0] }
  0xc6   :  { %v1021_v38 = vrot.slane %v879_v24, 4  ;;  %v9386_v24 = vld [vmem:[%s20867_s1 + $0x100] sm:$0xf] }
  0xc7   :  { %v891_v22 = vpop.f32.mrf.mxu2 }
  0xc9   :  { %v904_v23 = vpop.f32.mrf.mxu3  ;;  %v867_v27 = vpop.f32.mrf.mxu0 }
  0xca   :  { %v905_v25 = vadd.f32 %v904_v23, %v891_v22  ;;  %v9679_v23 = vor.u32 %v13156_v19, %v9676_v20  ;;  %v9258_v20 = vld [vmem:[%s20867_s1] sm:$0xf] }
  0xcb   :  { %v880_v28 = vpop.f32.mrf.mxu1 }
  0xcc   :  { %v1022_v29 = vrot.slane %v905_v25, 2  ;;  %v13088_v25 = vld [vmem:[%s20867_s1 + $0x11c] sm:$0xf0]  ;;  %1914 = vmatpush.bf16.msra.mxu3 %v9679_v23 }
  0xcd   :  { %v9387_v27 = vor.u32 %v13088_v25, %v9386_v24  ;;  %v13152_v28 = vld [vmem:[%s20867_s1 + $0x31c] sm:$0xf0] }
  0xce   :  { %v1029_v34 = vsel %vm1028_vm0, %v1021_v38, %v1022_v29  ;;  %v13084_v38 = vld [vmem:[%s20867_s1 + $0x104] sm:$0xf]  ;;  %v9643_v39 = vor.u32 %v13152_v28, %v9642_v26  ;;  %v13120_v26 = vld [vmem:[%s20867_s1 + $0x21c] sm:$0xf0] }
  0xcf   :  { %v893_v31 = vpop.f32.mrf.mxu2  ;;  %v1031_v37 = vsel %vm1030_vm2, %v1027_v35, %v1029_v34  ;;  %v9388_v29 = vld [vmem:[%s20867_s1 + $0x120] sm:$0xf0]  ;;  %1876 = vmatpush.bf16.msra.mxu0 %v9387_v27  ;;  %v9354_v35 = vld [vmem:[%s20867_s1 + $0xc0] sm:$0xf] }
  0xd0   :  { %v1037_v40 = vadd.f32 %v1031_v37, %v25_v36  ;;  %v9391_v30 = vor.u32 %v13084_v38, %v9388_v29  ;;  %v13148_v31 = vld [vmem:[%s20867_s1 + $0x304] sm:$0xf]  ;;  %1889 = vmatpush.bf16.msra.mxu1 %v9643_v39  ;;  %v13080_v36 = vld [vmem:[%s20867_s1 + $0xdc] sm:$0xf0] }
  0xd1   :  { %v906_v32 = vpop.f32.mrf.mxu3  ;;  %v9610_v37 = vld [vmem:[%s20867_s1 + $0x2c0] sm:$0xf]  ;;  %v13052_v27 = vld [vmem:[%s20867_s1 + $0x4] sm:$0xf] }
  0xd2   :  { %v9253_v41 = vmul.f32 -1.442695, %v1037_v40  ;;  %v9644_v32 = vld [vmem:[%s20867_s1 + $0x320] sm:$0xf0]  ;;  %1902 = vmatpush.bf16.msra.mxu2 %v9391_v30  ;;  %v9355_v40 = vor.u32 %v13080_v36, %v9354_v35  ;;  %v13113_v35 = vld [vmem:[%s20867_s1 + $0x1e4] sm:$0xf0] }
  0xd3   :  { %v9647_v34 = vor.u32 %v13148_v31, %v9644_v32  ;;  %v9260_v29 = vld [vmem:[%s20867_s1 + $0x20] sm:$0xf0]  ;;  %v9746_v36 = vld [vmem:[%s20867_s1 + $0x3c8] sm:$0xf] }
  0xd4   :  { %13967 = vpow2.f32 %v9253_v41  ;;  %v13144_v41 = vld [vmem:[%s20867_s1 + $0x2dc] sm:$0xf0]  ;;  %1877 = vmatpush.bf16.msra.mxu0 %v9355_v40  ;;  %v13116_v39 = vld [vmem:[%s20867_s1 + $0x204] sm:$0xf]  ;;  %v9263_v31 = vor.u32 %v13052_v27, %v9260_v29  ;;  %v13177_v40 = vld [vmem:[%s20867_s1 + $0x3e4] sm:$0xf0] }
  0xd5   :  { %1915 = vmatpush.bf16.msra.mxu3 %v9647_v34  ;;  %v9611_v46 = vor.u32 %v13144_v41, %v9610_v37  ;;  %v9516_v30 = vld [vmem:[%s20867_s1 + $0x220] sm:$0xf0]  ;;  %v9490_v34 = vld [vmem:[%s20867_s1 + $0x1c8] sm:$0xf]  ;;  %v13109_v41 = vld [vmem:[%s20867_s1 + $0x1cc] sm:$0xf] }
  0xd6   :  { %1903 = vmatpush.bf16.msra.mxu2 %v9359_v47  ;;  %v9519_v32 = vor.u32 %v13116_v39, %v9516_v30  ;;  %v9491_v37 = vor.u32 %v13113_v35, %v9490_v34  ;;  %v9747_v47 = vor.u32 %v13177_v40, %v9746_v36  ;;  %v9495_v48 = vor.u32 %v13109_v41, %v9492_v44  ;;  %v13153_v30 = vld [vmem:[%s20867_s1 + $0x324] sm:$0xf0]  ;;  %v9396_v34 = vld [vmem:[%s20867_s1 + $0x128] sm:$0xf0] }
  0xd7   :  { %1890 = vmatpush.bf16.msra.mxu1 %v9611_v46  ;;  %v13149_v35 = vld [vmem:[%s20867_s1 + $0x30c] sm:$0xf] }
  0xd8   :  { %1878 = vmatpush.bf16.msra.mxu0 %v9323_v57  ;;  %v9652_v36 = vld [vmem:[%s20867_s1 + $0x328] sm:$0xf0] }
  0xd9   :  { %1916 = vmatpush.bf16.msra.mxu3 %v9615_v51  ;;  %v9748_v51 = vld [vmem:[%s20867_s1 + $0x3e8] sm:$0xf0]  ;;  %v9655_v44 = vor.u32 %v13149_v35, %v9652_v36 }
  0xda   :  { %v13968_v58 = vpop.eup %13967  ;;  %1904 = vmatpush.bf16.msra.mxu2 %v9327_v63  ;;  %v9751_v60 = vor.u32 %v13173_v49, %v9748_v51  ;;  %v13169_v63 = vld [vmem:[%s20867_s1 + $0x3a4] sm:$0xf0]  ;;  %v13077_v51 = vld [vmem:[%s20867_s1 + $0xcc] sm:$0xf] }
  0xdb   :  { %v14969_v8 = vadd.f32 1.0, %v13968_v58  ;;  %v13136_v58 = vld [vmem:[%s20867_s1 + $0x29c] sm:$0xf0]  ;;  %v13145_v49 = vld [vmem:[%s20867_s1 + $0x2e4] sm:$0xf0] }
  0xdc   :  { %v9579_v62 = vor.u32 %v13136_v58, %v9578_v54 }
  0xdd   :  { %13969 = vrcp.f32 %v14969_v8  ;;  %v1058_v18 = vand.u32 2147483648, %v14969_v8  ;;  %vm1052_vm4 = vweird.f32 %v14969_v8 }
  0xde   :  { %1891 = vmatpush.bf16.msra.mxu1 %v9579_v62  ;;  %v9714_v62 = vld [vmem:[%s20867_s1 + $0x388] sm:$0xf] }
  0xe1   :  { %v14913_v42 = vpop.f32.mrf.mxu0 }
  0xe2   :  { %1892 = vmatpush.bf16.msra.mxu1 %v9547_v15 }
  0xe3   :  { %v14915_v43 = vpop.f32.mrf.mxu1  ;;  %v15044_v50 = vpop.eup %13969 }
  0xe4   :  { %v1048_v61 = vmul.f32 %v15044_v50, %v14969_v8  ;;  %vm1053_vm3 = vweird.f32 %v15044_v50  ;;  %v931_v53 = vadd.f32 %v14915_v43, %v14913_v42  ;;  %v9715_v43 = vor.u32 %v13169_v63, %v9714_v62  ;;  %v9330_v63 = vld [vmem:[%s20867_s1 + $0x88] sm:$0xf] }
  0xe5   :  { %vm15183_vm5 = vmor %vm1052_vm4, %vm1053_vm3 }
  0xe6   :  { %v1049_v12 = vsub.f32 1.0, %v1048_v61  ;;  %v13105_v61 = vld [vmem:[%s20867_s1 + $0x1a4] sm:$0xf0] }
  0xe7   :  { %v14941_v55 = vpop.f32.mrf.mxu2  ;;  %v9459_v42 = vor.u32 %v13105_v61, %v9458_v52  ;;  %v9364_v52 = vld [vmem:[%s20867_s1 + $0xe8] sm:$0xf0] }
  0xe8   :  { %v1050_v28 = vmul.f32 %v15044_v50, %v1049_v12  ;;  %v9682_v12 = vld [vmem:[%s20867_s1 + $0x348] sm:$0xf] }
  0xe9   :  { %v14943_v56 = vpop.f32.mrf.mxu3  ;;  %v919_v2 = vpop.f32.mrf.mxu0 }
  0xea   :  { %v9583_v2 = vor.u32 %v13132_v0, %v9580_v1  ;;  %v15083_v6 = vadd.f32 %v14943_v56, %v14941_v55  ;;  %v9295_v55 = vor.u32 %v13060_v10, %v9292_v11  ;;  %v13124_v56 = vld [vmem:[%s20867_s1 + $0x244] sm:$0xf]  ;;  %v1051_v57 = vadd.f32 %v15044_v50, %v1050_v28  ;;  %v13101_v0 = vld [vmem:[%s20867_s1 + $0x18c] sm:$0xf]  ;;  %v13097_v11 = vld [vmem:[%s20867_s1 + $0x164] sm:$0xf0] }
  0xeb   :  { %v932_v3 = vpop.f32.mrf.mxu1  ;;  %v9551_v19 = vor.u32 %v13124_v56, %v9548_v16  ;;  %v9460_v1 = vld [vmem:[%s20867_s1 + $0x1a8] sm:$0xf0]  ;;  %v13161_v56 = vld [vmem:[%s20867_s1 + $0x364] sm:$0xf0] }
  0xec   :  { %v9290_v3 = vld [vmem:[%s20867_s1 + $0x40] sm:$0xf]  ;;  %1917 = vmatpush.bf16.msra.mxu3 %v9583_v2  ;;  %1905 = vmatpush.bf16.msra.mxu2 %v9295_v55  ;;  %v1023_v23 = vrot.slane %v15083_v6, 6  ;;  %v13165_v2 = vld [vmem:[%s20867_s1 + $0x38c] sm:$0xf]  ;;  %v1055_v15 = vsel %vm15183_vm5, %v15044_v50, %v1051_v57  ;;  %v9683_v50 = vor.u32 %v13161_v56, %v9682_v12 }
  0xed   :  { %v9291_v7 = vor.u32 %v13064_v4, %v9290_v3  ;;  %v26_v3 = vunpack.c.h.bf16 %v14907_v33  ;;  %v1056_v6 = vand.u32 2147483647, %v14969_v8  ;;  %v9719_v10 = vor.u32 %v13165_v2, %v9716_v9  ;;  %v9426_v33 = vld [vmem:[%s20867_s1 + $0x148] sm:$0xf]  ;;  %v13093_v16 = vld [vmem:[%s20867_s1 + $0x14c] sm:$0xf] }
  0xee   :  { %v9427_v55 = vor.u32 %v13097_v11, %v9426_v33  ;;  %v13089_v28 = vld [vmem:[%s20867_s1 + $0x124] sm:$0xf0]  ;;  %v13141_v57 = vld [vmem:[%s20867_s1 + $0x2cc] sm:$0xf] }
  0xef   :  { %v945_v21 = vpop.f32.mrf.mxu2  ;;  %1879 = vmatpush.bf16.msra.mxu0 %v9291_v7  ;;  %v9463_v7 = vor.u32 %v13101_v0, %v9460_v1  ;;  %vm1057_vm6 = vcmp.eq.f32.partialorder %v1056_v6, 8.507059e+37  ;;  %v13137_v2 = vld [vmem:[%s20867_s1 + $0x2a4] sm:$0xf0]  ;;  %v9588_v33 = vld [vmem:[%s20867_s1 + $0x2a8] sm:$0xf0] }
  0xf0   :  { %v13056_v21 = vld [vmem:[%s20867_s1 + $0x1c] sm:$0xf0]  ;;  %1918 = vmatpush.bf16.msra.mxu3 %v9551_v19  ;;  %1906 = vmatpush.bf16.msra.mxu2 %v9263_v31  ;;  %v13085_v31 = vld [vmem:[%s20867_s1 + $0x10c] sm:$0xf]  ;;  %v9298_v12 = vld [vmem:[%s20867_s1 + $0x48] sm:$0xf] }
  0xf1   :  { %v958_v22 = vpop.f32.mrf.mxu3  ;;  %v9259_v25 = vor.u32 %v13056_v21, %v9258_v20  ;;  %v1059_v20 = vor.u32 1.1754944e-38, %v1058_v18  ;;  %v9394_v18 = vld [vmem:[%s20867_s1 + $0x108] sm:$0xf]  ;;  %v9399_v41 = vor.u32 %v13085_v31, %v9396_v34  ;;  %v13061_v56 = vld [vmem:[%s20867_s1 + $0x4c] sm:$0xf] }
  0xf2   :  { %v9514_v22 = vld [vmem:[%s20867_s1 + $0x200] sm:$0xf]  ;;  %v9395_v39 = vor.u32 %v13089_v28, %v9394_v18  ;;  %v13117_v18 = vld [vmem:[%s20867_s1 + $0x20c] sm:$0xf] }
  0xf3   :  { %v9515_v38 = vor.u32 %v13120_v26, %v9514_v22  ;;  %1880 = vmatpush.bf16.msra.mxu0 %v9259_v25  ;;  %v13157_v22 = vld [vmem:[%s20867_s1 + $0x34c] sm:$0xf]  ;;  %v1060_v26 = vsel %vm1057_vm6, %v1059_v20, %v1055_v15 }
  0xf4   :  { %1919 = vmatpush.bf16.msra.mxu3 %v9519_v32  ;;  %1951 = vmatpush.bf16.msrb.mxu2 %v9495_v48  ;;  %v1080_v40 = vrot.slane %v1060_v26, 4  ;;  %v13125_v20 = vld [vmem:[%s20867_s1 + $0x24c] sm:$0xf] }
  0xf5   :  { %1893 = vmatpush.bf16.msra.mxu1 %v9515_v38  ;;  %v9650_v38 = vld [vmem:[%s20867_s1 + $0x308] sm:$0xf]  ;;  %v9524_v28 = vld [vmem:[%s20867_s1 + $0x228] sm:$0xf0] }
  0xf6   :  { %v9651_v32 = vor.u32 %v13153_v30, %v9650_v38  ;;  %v9527_v31 = vor.u32 %v13117_v18, %v9524_v28  ;;  %v9404_v18 = vld [vmem:[%s20867_s1 + $0x130] sm:$0xf0] }
  0xf7   :  { %1925 = vmatpush.bf16.msrb.mxu0 %v9491_v37  ;;  %v1078_v37 = vld [vmem:[#allocation3] sm:$0xf]  ;;  %v13150_v28 = vld [vmem:[%s20867_s1 + $0x314] sm:$0xf] }
  0xf8   :  { %1964 = vmatpush.bf16.msrb.mxu3 %v9751_v60  ;;  %1952 = vmatpush.bf16.msrb.mxu2 %v9463_v7  ;;  %v1082_v61 = vmul.f32 %v1080_v40, %v1078_v37 }
  0xf9   :  { %1938 = vmatpush.bf16.msrb.mxu1 %v9747_v47  ;;  %v9618_v47 = vld [vmem:[%s20867_s1 + $0x2c8] sm:$0xf] }
  0xfb   :  { %1926 = vmatpush.bf16.msrb.mxu0 %v9459_v42  ;;  %v13073_v42 = vld [vmem:[%s20867_s1 + $0xa4] sm:$0xf0] }
  0xfc   :  { %1965 = vmatpush.bf16.msrb.mxu3 %v9719_v10  ;;  %v9331_v1 = vor.u32 %v13073_v42, %v9330_v63  ;;  %v13133_v10 = vld [vmem:[%s20867_s1 + $0x28c] sm:$0xf] }
  0xfd   :  { %1939 = vmatpush.bf16.msrb.mxu1 %v9715_v43  ;;  %v9586_v43 = vld [vmem:[%s20867_s1 + $0x288] sm:$0xf]  ;;  %v9591_v11 = vor.u32 %v13133_v10, %v9588_v33  ;;  %v9724_v10 = vld [vmem:[%s20867_s1 + $0x3b0] sm:$0xf0] }
  0xfe   :  { %v9587_v7 = vor.u32 %v13137_v2, %v9586_v43 }
  0xff   :  { %1927 = vmatpush.bf16.msrb.mxu0 %v9427_v55  ;;  %v13129_v55 = vld [vmem:[%s20867_s1 + $0x264] sm:$0xf0] }
 0x101   :  { %v969_v13 = vpop.f32.mrf.mxu0  ;;  %1940 = vmatpush.bf16.msrb.mxu1 %v9683_v50  ;;  %v9556_v50 = vld [vmem:[%s20867_s1 + $0x268] sm:$0xf0] }
 0x103   :  { %v982_v14 = vpop.f32.mrf.mxu1  ;;  %1928 = vmatpush.bf16.msrb.mxu0 %v9395_v39 }
 0x104   :  { %v15100_v17 = vadd.f32 %v982_v14, %v969_v13  ;;  %v1032_v13 = vsel %vm1026_vm1, %v931_v53, %v1023_v23  ;;  %v9684_v23 = vld [vmem:[%s20867_s1 + $0x368] sm:$0xf0]  ;;  %v9619_v53 = vor.u32 %v13145_v49, %v9618_v47  ;;  %v9498_v49 = vld [vmem:[%s20867_s1 + $0x1d0] sm:$0xf] }
 0x105   :  { %v9687_v25 = vor.u32 %v13157_v22, %v9684_v23  ;;  %1941 = vmatpush.bf16.msrb.mxu1 %v9651_v32  ;;  %v9266_v22 = vld [vmem:[%s20867_s1 + $0x8] sm:$0xf] }
 0x106   :  { %v1024_v24 = vrot.slane %v15100_v17, 4  ;;  %v9428_v17 = vld [vmem:[%s20867_s1 + $0x168] sm:$0xf0]  ;;  %v13057_v23 = vld [vmem:[%s20867_s1 + $0x24] sm:$0xf0] }
 0x107   :  { %v995_v45 = vpop.f32.mrf.mxu2  ;;  %v9431_v21 = vor.u32 %v13093_v16, %v9428_v17  ;;  %1966 = vmatpush.bf16.msrb.mxu3 %v9687_v25  ;;  %v9300_v16 = vld [vmem:[%s20867_s1 + $0x68] sm:$0xf0]  ;;  %v13121_v25 = vld [vmem:[%s20867_s1 + $0x224] sm:$0xf0] }
 0x109   :  { %v1008_v46 = vpop.f32.mrf.mxu3  ;;  %v971_v58 = vpop.f32.mrf.mxu0  ;;  %1953 = vmatpush.bf16.msrb.mxu2 %v9431_v21  ;;  %1942 = vmatpush.bf16.msrb.mxu1 %v9619_v53  ;;  %v9559_v21 = vor.u32 %v13125_v20, %v9556_v50  ;;  %v13178_v53 = vld [vmem:[%s20867_s1 + $0x3ec] sm:$0xf0]  ;;  %v9692_v20 = vld [vmem:[%s20867_s1 + $0x370] sm:$0xf0] }
 0x10a   :  { %v1009_v54 = vadd.f32 %v1008_v46, %v995_v45  ;;  %v9362_v45 = vld [vmem:[%s20867_s1 + $0xc8] sm:$0xf]  ;;  %v9620_v58 = vld [vmem:[%s20867_s1 + $0x2e8] sm:$0xf0] }
 0x10b   :  { %v984_v59 = vpop.f32.mrf.mxu1  ;;  %v13081_v46 = vld [vmem:[%s20867_s1 + $0xe4] sm:$0xf0]  ;;  %1967 = vmatpush.bf16.msrb.mxu3 %v9655_v44  ;;  %v9623_v60 = vor.u32 %v13141_v57, %v9620_v58  ;;  %v9500_v57 = vld [vmem:[%s20867_s1 + $0x1f0] sm:$0xf0] }
 0x10c   :  { %v1025_v4 = vrot.slane %v1009_v54, 2  ;;  %v9363_v48 = vor.u32 %v13081_v46, %v9362_v45  ;;  %v9367_v54 = vor.u32 %v13077_v51, %v9364_v52  ;;  %v13114_v51 = vld [vmem:[%s20867_s1 + $0x1ec] sm:$0xf0]  ;;  %v13174_v58 = vld [vmem:[%s20867_s1 + $0x3d4] sm:$0xf] }
 0x10d   :  { %1954 = vmatpush.bf16.msrb.mxu2 %v9399_v41  ;;  %1943 = vmatpush.bf16.msrb.mxu1 %v9587_v7  ;;  %v9754_v52 = vld [vmem:[%s20867_s1 + $0x3d0] sm:$0xf]  ;;  %v9499_v42 = vor.u32 %v13114_v51, %v9498_v49  ;;  %v9468_v7 = vld [vmem:[%s20867_s1 + $0x1b0] sm:$0xf0] }
 0x10e   :  { %v1033_v14 = vsel %vm1028_vm0, %v1024_v24, %v1025_v4  ;;  %1929 = vmatpush.bf16.msrb.mxu0 %v9363_v48  ;;  %v9332_v4 = vld [vmem:[%s20867_s1 + $0xa8] sm:$0xf0]  ;;  %v9755_v43 = vor.u32 %v13178_v53, %v9754_v52  ;;  %v9594_v52 = vld [vmem:[%s20867_s1 + $0x290] sm:$0xf] }
 0x10f   :  { %v1034_v19 = vsel %vm1030_vm2, %v1032_v13, %v1033_v14  ;;  %v997_v27 = vpop.f32.mrf.mxu2  ;;  %1968 = vmatpush.bf16.msrb.mxu3 %v9623_v60  ;;  %v13065_v13 = vld [vmem:[%s20867_s1 + $0x64] sm:$0xf0]  ;;  %v13138_v53 = vld [vmem:[%s20867_s1 + $0x2ac] sm:$0xf0] }
 0x110   :  { %v1038_v24 = vadd.f32 %v1034_v19, %v26_v3  ;;  %v13069_v3 = vld [vmem:[%s20867_s1 + $0x8c] sm:$0xf]  ;;  %v9554_v14 = vld [vmem:[%s20867_s1 + $0x248] sm:$0xf]  ;;  %v9299_v15 = vor.u32 %v13065_v13, %v9298_v12  ;;  %v9303_v19 = vor.u32 %v13061_v56, %v9300_v16  ;;  %v9434_v12 = vld [vmem:[%s20867_s1 + $0x150] sm:$0xf] }
 0x111   :  { %v1010_v8 = vpop.f32.mrf.mxu3  ;;  %1955 = vmatpush.bf16.msrb.mxu2 %v9367_v54  ;;  %v9335_v9 = vor.u32 %v13069_v3, %v9332_v4  ;;  %v9555_v17 = vor.u32 %v13129_v55, %v9554_v14  ;;  %v9268_v27 = vld [vmem:[%s20867_s1 + $0x28] sm:$0xf0]  ;;  %v13110_v54 = vld [vmem:[%s20867_s1 + $0x1d4] sm:$0xf]  ;;  %v9722_v4 = vld [vmem:[%s20867_s1 + $0x390] sm:$0xf] }
 0x112   :  { %v9254_v29 = vmul.f32 -1.442695, %v1038_v24  ;;  %13971 = vtanh.f32 %v1038_v24  ;;  %1930 = vmatpush.bf16.msrb.mxu0 %v9331_v1  ;;  %v9522_v24 = vld [vmem:[%s20867_s1 + $0x208] sm:$0xf]  ;;  %v9267_v8 = vor.u32 %v13057_v23, %v9266_v22  ;;  %v13106_v1 = vld [vmem:[%s20867_s1 + $0x1ac] sm:$0xf0]  ;;  %v9503_v2 = vor.u32 %v13110_v54, %v9500_v57 }
 0x113   :  { %1969 = vmatpush.bf16.msrb.mxu3 %v9591_v11  ;;  %1944 = vmatpush.bf16.msrb.mxu1 %v9555_v17  ;;  %v13098_v13 = vld [vmem:[%s20867_s1 + $0x16c] sm:$0xf0]  ;;  %v13094_v16 = vld [vmem:[%s20867_s1 + $0x154] sm:$0xf] }
 0x114   :  { %13973 = vpow2.f32 %v9254_v29  ;;  %v9523_v29 = vor.u32 %v13121_v25, %v9522_v24  ;;  %v9690_v55 = vld [vmem:[%s20867_s1 + $0x350] sm:$0xf]  ;;  %v9436_v17 = vld [vmem:[%s20867_s1 + $0x170] sm:$0xf0]  ;;  %v9435_v50 = vor.u32 %v13098_v13, %v9434_v12 }
 0x115   :  { %1956 = vmatpush.bf16.msrb.mxu2 %v9335_v9  ;;  %v13166_v9 = vld [vmem:[%s20867_s1 + $0x394] sm:$0xf]  ;;  %v13162_v56 = vld [vmem:[%s20867_s1 + $0x36c] sm:$0xf0]  ;;  %v9439_v24 = vor.u32 %v13094_v16, %v9436_v17 }
 0x116   :  { %1931 = vmatpush.bf16.msrb.mxu0 %v9299_v15  ;;  %v9727_v15 = vor.u32 %v13166_v9, %v9724_v10  ;;  %v9402_v22 = vld [vmem:[%s20867_s1 + $0x110] sm:$0xf]  ;;  %v13070_v54 = vld [vmem:[%s20867_s1 + $0x94] sm:$0xf] }
 0x117   :  { %1970 = vmatpush.bf16.msrb.mxu3 %v9559_v21  ;;  %1945 = vmatpush.bf16.msrb.mxu1 %v9523_v29  ;;  %v9691_v21 = vor.u32 %v13162_v56, %v9690_v55  ;;  %v13090_v23 = vld [vmem:[%s20867_s1 + $0x12c] sm:$0xf0]  ;;  %v9340_v57 = vld [vmem:[%s20867_s1 + $0xb0] sm:$0xf0] }
 0x118   :  { %v13972_v59 = vpop.eup %13971  ;;  %v9403_v29 = vor.u32 %v13090_v23, %v9402_v22  ;;  %v9274_v9 = vld [vmem:[%s20867_s1 + $0x10] sm:$0xf]  ;;  %v13054_v55 = vld [vmem:[%s20867_s1 + $0x14] sm:$0xf]  ;;  %v13111_v22 = vld [vmem:[%s20867_s1 + $0x1dc] sm:$0xf] }
 0x119   :  { %v1083_v62 = vmul.f32 %v13972_v59, %v1060_v26  ;;  %v13053_v26 = vld [vmem:[%s20867_s1 + $0xc] sm:$0xf]  ;;  %1957 = vmatpush.bf16.msrb.mxu2 %v9303_v19  ;;  %v9756_v59 = vld [vmem:[%s20867_s1 + $0x3f0] sm:$0xf0]  ;;  %v9530_v12 = vld [vmem:[%s20867_s1 + $0x210] sm:$0xf] }
 0x11a   :  { %v13974_v0 = vpop.eup %13973  ;;  %v9271_v39 = vor.u32 %v13053_v26, %v9268_v27  ;;  %1932 = vmatpush.bf16.msrb.mxu0 %v9267_v8  ;;  %v9759_v3 = vor.u32 %v13174_v58, %v9756_v59  ;;  %v13158_v19 = vld [vmem:[%s20867_s1 + $0x354] sm:$0xf]  ;;  %v9658_v26 = vld [vmem:[%s20867_s1 + $0x310] sm:$0xf] }
 0x11b   :  { %v1046_v5 = vadd.f32 1.0, %v13974_v0  ;;  %v1084_v6 = vadd.f32 %v1083_v62, %v1082_v61  ;;  %1971 = vmatpush.bf16.msrb.mxu3 %v9527_v31  ;;  %v9466_v0 = vld [vmem:[%s20867_s1 + $0x190] sm:$0xf]  ;;  %v9695_v25 = vor.u32 %v13158_v19, %v9692_v20  ;;  %v13086_v8 = vld [vmem:[%s20867_s1 + $0x114] sm:$0xf] }
 0x11c   :  { %v9467_v33 = vor.u32 %v13106_v1, %v9466_v0  ;;  %v13154_v27 = vld [vmem:[%s20867_s1 + $0x32c] sm:$0xf0]  ;;  %v13134_v58 = vld [vmem:[%s20867_s1 + $0x294] sm:$0xf]  ;;  %v9343_v0 = vor.u32 %v13070_v54, %v9340_v57  ;;  %v9506_v19 = vld [vmem:[%s20867_s1 + $0x1d8] sm:$0xf] }
 0x11d   :  { %13975 = vrcp.f32 %v1046_v5  ;;  %1085 = vst [vmem:[#allocation3] sm:$0xf] %v1084_v6  ;;  %v1073_v34 = vand.u32 2147483648, %v1046_v5  ;;  %1958 = vmatpush.bf16.msrb.mxu2 %v9271_v39  ;;  %v1071_v36 = vand.u32 2147483647, %v1046_v5  ;;  %vm1067_vm8 = vweird.f32 %v1046_v5 }
 0x11e   :  { %13977 = vtanh.f32 %v1084_v6  ;;  %v13102_v6 = vld [vmem:[%s20867_s1 + $0x194] sm:$0xf]  ;;  %v9659_v39 = vor.u32 %v13154_v27, %v9658_v26  ;;  %v13082_v31 = vld [vmem:[%s20867_s1 + $0xec] sm:$0xf0]  ;;  %v13115_v20 = vld [vmem:[%s20867_s1 + $0x1f4] sm:$0xf0] }
 0x11f   :  { %v1074_v40 = vor.u32 1.1754944e-38, %v1073_v34  ;;  %vm1072_vm10 = vcmp.eq.f32.partialorder %v1071_v36, 8.507059e+37  ;;  %v9471_v14 = vor.u32 %v13102_v6, %v9468_v7  ;;  %v13146_v36 = vld [vmem:[%s20867_s1 + $0x2ec] sm:$0xf0]  ;;  %v9596_v59 = vld [vmem:[%s20867_s1 + $0x2b0] sm:$0xf0] }
 0x120   :  { %v9599_v1 = vor.u32 %v13134_v58, %v9596_v59  ;;  %v13126_v6 = vld [vmem:[%s20867_s1 + $0x254] sm:$0xf]  ;;  %v13122_v13 = vld [vmem:[%s20867_s1 + $0x22c] sm:$0xf0]  ;;  %v13175_v26 = vld [vmem:[%s20867_s1 + $0x3dc] sm:$0xf] }
 0x121   :  { %v9564_v7 = vld [vmem:[%s20867_s1 + $0x270] sm:$0xf0]  ;;  %v9764_v27 = vld [vmem:[%s20867_s1 + $0x3f8] sm:$0xf0] }
 0x122   :  { %v9276_v56 = vld [vmem:[%s20867_s1 + $0x30] sm:$0xf0]  ;;  %v13159_v54 = vld [vmem:[%s20867_s1 + $0x35c] sm:$0xf] }
 0x123   :  { %v13976_v38 = vpop.eup %13975  ;;  %v13118_v16 = vld [vmem:[%s20867_s1 + $0x214] sm:$0xf]  ;;  %v9700_v57 = vld [vmem:[%s20867_s1 + $0x378] sm:$0xf0] }
 0x124   :  { %v1063_v30 = vmul.f32 %v13976_v38, %v1046_v5  ;;  %vm1068_vm7 = vweird.f32 %v13976_v38  ;;  %v13978_v46 = vpop.eup %13977  ;;  %v13170_v5 = vld [vmem:[%s20867_s1 + $0x3ac] sm:$0xf0]  ;;  %v9532_v17 = vld [vmem:[%s20867_s1 + $0x230] sm:$0xf0] }
 0x125   :  { %vm1069_vm9 = vmor %vm1067_vm8, %vm1068_vm7  ;;  %v9723_v11 = vor.u32 %v13170_v5, %v9722_v4  ;;  %v13062_v4 = vld [vmem:[%s20867_s1 + $0x54] sm:$0xf] }
 0x126   :  { %v1064_v32 = vsub.f32 1.0, %v1063_v30  ;;  %v9370_v30 = vld [vmem:[%s20867_s1 + $0xd0] sm:$0xf]  ;;  %v9308_v5 = vld [vmem:[%s20867_s1 + $0x70] sm:$0xf0] }
 0x128   :  { %v1065_v35 = vmul.f32 %v13976_v38, %v1064_v32  ;;  %v9407_v32 = vor.u32 %v13086_v8, %v9404_v18  ;;  %v9279_v8 = vor.u32 %v13054_v55, %v9276_v56  ;;  %v9535_v18 = vor.u32 %v13118_v16, %v9532_v17  ;;  %v13143_v55 = vld [vmem:[%s20867_s1 + $0x2dc] sm:$0xf] }
 0x129   :  { %v9636_v56 = vld [vmem:[%s20867_s1 + $0x2f8] sm:$0xf0] }
 0x12a   :  { %v1066_v37 = vadd.f32 %v13976_v38, %v1065_v35  ;;  %v9626_v35 = vld [vmem:[%s20867_s1 + $0x2d0] sm:$0xf] }
 0x12c   :  { %v1070_v41 = vsel %vm1069_vm9, %v13976_v38, %v1066_v37  ;;  %v9660_v38 = vld [vmem:[%s20867_s1 + $0x330] sm:$0xf0] }
 0x12d   :  { %v1075_v44 = vsel %vm1072_vm10, %v1074_v40, %v1070_v41  ;;  %v9663_v34 = vor.u32 %v13150_v28, %v9660_v38  ;;  %v13078_v37 = vld [vmem:[%s20867_s1 + $0xd4] sm:$0xf]  ;;  %v9507_v28 = vor.u32 %v13115_v20, %v9506_v19  ;;  %v9346_v19 = vld [vmem:[%s20867_s1 + $0x98] sm:$0xf] }
 0x12e   :  { %v1088_v45 = vrot.slane %v1075_v44, 4  ;;  %v9372_v40 = vld [vmem:[%s20867_s1 + $0xf0] sm:$0xf0]  ;;  %v13075_v20 = vld [vmem:[%s20867_s1 + $0xb4] sm:$0xf0] }
 0x12f   :  { %v13142_v41 = vld [vmem:[%s20867_s1 + $0x2d4] sm:$0xf]  ;;  %v9375_v49 = vor.u32 %v13078_v37, %v9372_v40  ;;  %v13167_v37 = vld [vmem:[%s20867_s1 + $0x39c] sm:$0xf] }
 0x130   :  { %v1090_v47 = vmul.f32 %v13978_v46, %v1088_v45  ;;  %v9628_v44 = vld [vmem:[%s20867_s1 + $0x2f0] sm:$0xf0]  ;;  %v9371_v45 = vor.u32 %v13082_v31, %v9370_v30  ;;  %v9627_v46 = vor.u32 %v13146_v36, %v9626_v35  ;;  %v9767_v31 = vor.u32 %v13175_v26, %v9764_v27  ;;  %v13103_v35 = vld [vmem:[%s20867_s1 + $0x19c] sm:$0xf] }
 0x131   :  { %v9631_v51 = vor.u32 %v13142_v41, %v9628_v44  ;;  %v9476_v36 = vld [vmem:[%s20867_s1 + $0x1b8] sm:$0xf0] }
 0x132   :  { %1091 = vst [vmem:[#allocation2] sm:$0xf] %v1090_v47  ;;  %v9338_v47 = vld [vmem:[%s20867_s1 + $0x90] sm:$0xf]  ;;  %v9732_v40 = vld [vmem:[%s20867_s1 + $0x3b8] sm:$0xf0] }
 0x133   :  { %v13135_v26 = vld [vmem:[%s20867_s1 + $0x29c] sm:$0xf] }
 0x134   :  { %v9604_v27 = vld [vmem:[%s20867_s1 + $0x2b8] sm:$0xf0] }
 0x139   :  { %v1096_v48 = vld [vmem:[#allocation2] sm:$0xf] }
 0x13a   :  { %1098 = vst [vmem:[#allocation1] ss:$4 sm:$0xff] %v1096_v48  ;;  %v13074_v48 = vld [vmem:[%s20867_s1 + $0xac] sm:$0xf0] }
 0x141   :  { %v1099_v60 = vld.sshfl [vmem:[#allocation1] sm:$0xff pattern:$0x73625140]  ;;  %v1100_v61 = vld.sshfl [vmem:[#allocation1 + $0x8] sm:$0xff pattern:$0x73625140] }
 0x142   :  { %v15367_v62 = vpack.c.bf16 %v1099_v60, %v1099_v60  ;;  %v15369_v63 = vpack.c.bf16 %v1100_v61, %v1100_v61  ;;  %v9339_v60 = vor.u32 %v13074_v48, %v9338_v47  ;;  %v9595_v61 = vor.u32 %v13138_v53, %v9594_v52  ;;  %v13095_v52 = vld [vmem:[%s20867_s1 + $0x15c] sm:$0xf] }
 0x143   :  { %v9479_v47 = vor.u32 %v13103_v35, %v9476_v36  ;;  %v9735_v48 = vor.u32 %v13167_v37, %v9732_v40  ;;  %v9444_v53 = vld [vmem:[%s20867_s1 + $0x178] sm:$0xf0] }
 0x144   :  { %1881 = vmatmul.bf16.vlgmr.msra.gmra.mxu0 %v15367_v62  ;;  %1894 = vmatmul.bf16.vlgmr.msra.gmra.mxu1 %v15369_v63  ;;  %v13127_v35 = vld [vmem:[%s20867_s1 + $0x25c] sm:$0xf] }
 0x145   :  { %1907 = vmatmul.bf16.vlgmr.msra.gmra.mxu2 %v15367_v62  ;;  %1920 = vmatmul.bf16.vlgmr.msra.gmra.mxu3 %v15369_v63  ;;  %v9572_v36 = vld [vmem:[%s20867_s1 + $0x278] sm:$0xf0] }
 0x146   :  { %1977 = vmatpush.bf16.msra.mxu0 %v9499_v42  ;;  %1990 = vmatpush.bf16.msra.mxu1 %v9755_v43  ;;  %v9306_v42 = vld [vmem:[%s20867_s1 + $0x50] sm:$0xf] }
 0x147   :  { %2003 = vmatpush.bf16.msra.mxu2 %v9503_v2  ;;  %2016 = vmatpush.bf16.msra.mxu3 %v9759_v3  ;;  %v13066_v43 = vld [vmem:[%s20867_s1 + $0x6c] sm:$0xf0] }
 0x148   :  { %v9562_v2 = vld [vmem:[%s20867_s1 + $0x250] sm:$0xf]  ;;  %v9307_v10 = vor.u32 %v13066_v43, %v9306_v42  ;;  %v9447_v42 = vor.u32 %v13095_v52, %v9444_v53  ;;  %v9703_v43 = vor.u32 %v13159_v54, %v9700_v57  ;;  %v13119_v52 = vld [vmem:[%s20867_s1 + $0x21c] sm:$0xf] }
 0x149   :  { %v13130_v3 = vld [vmem:[%s20867_s1 + $0x26c] sm:$0xf0]  ;;  %v9540_v53 = vld [vmem:[%s20867_s1 + $0x238] sm:$0xf0] }
 0x14a   :  { %1978 = vmatpush.bf16.msra.mxu0 %v9467_v33  ;;  %1991 = vmatpush.bf16.msra.mxu1 %v9723_v11  ;;  %v9563_v33 = vor.u32 %v13130_v3, %v9562_v2  ;;  %v13058_v11 = vld [vmem:[%s20867_s1 + $0x2c] sm:$0xf0]  ;;  %v13087_v2 = vld [vmem:[%s20867_s1 + $0x11c] sm:$0xf] }
 0x14b   :  { %2004 = vmatpush.bf16.msra.mxu2 %v9471_v14  ;;  %2017 = vmatpush.bf16.msra.mxu3 %v9727_v15  ;;  %v9311_v14 = vor.u32 %v13062_v4, %v9308_v5  ;;  %v9567_v15 = vor.u32 %v13126_v6, %v9564_v7  ;;  %v9275_v23 = vor.u32 %v13058_v11, %v9274_v9  ;;  %v9412_v3 = vld [vmem:[%s20867_s1 + $0x138] sm:$0xf0]  ;;  %v9378_v9 = vld [vmem:[%s20867_s1 + $0xd8] sm:$0xf] }
 0x14c   :  { %v13151_v4 = vld [vmem:[%s20867_s1 + $0x31c] sm:$0xf] }
 0x14d   :  { %v9668_v5 = vld [vmem:[%s20867_s1 + $0x338] sm:$0xf0] }
 0x14e   :  { %1979 = vmatpush.bf16.msra.mxu0 %v9435_v50  ;;  %1992 = vmatpush.bf16.msra.mxu1 %v9691_v21  ;;  %v9762_v50 = vld [vmem:[%s20867_s1 + $0x3d8] sm:$0xf]  ;;  %v9671_v11 = vor.u32 %v13151_v4, %v9668_v5 }
 0x14f   :  { %2005 = vmatpush.bf16.msra.mxu2 %v9439_v24  ;;  %2018 = vmatpush.bf16.msra.mxu3 %v9695_v25  ;;  %v13179_v21 = vld [vmem:[%s20867_s1 + $0x3f4] sm:$0xf0]  ;;  %v9531_v24 = vor.u32 %v13122_v13, %v9530_v12  ;;  %v9508_v25 = vld [vmem:[%s20867_s1 + $0x1f8] sm:$0xf0] }
 0x150   :  { %v9763_v38 = vor.u32 %v13179_v21, %v9762_v50  ;;  %v9511_v30 = vor.u32 %v13111_v22, %v9508_v25  ;;  %v9634_v12 = vld [vmem:[%s20867_s1 + $0x2d8] sm:$0xf]  ;;  %v9639_v21 = vor.u32 %v13143_v55, %v9636_v56  ;;  %v9348_v25 = vld [vmem:[%s20867_s1 + $0xb8] sm:$0xf0] }
 0x151   :  { %v13147_v13 = vld [vmem:[%s20867_s1 + $0x2f4] sm:$0xf0] }
 0x152   :  { %1980 = vmatpush.bf16.msra.mxu0 %v9403_v29  ;;  %1993 = vmatpush.bf16.msra.mxu1 %v9659_v39  ;;  %v9474_v29 = vld [vmem:[%s20867_s1 + $0x198] sm:$0xf]  ;;  %v9635_v17 = vor.u32 %v13147_v13, %v9634_v12 }
 0x153   :  { %2006 = vmatpush.bf16.msra.mxu2 %v9407_v32  ;;  %2019 = vmatpush.bf16.msra.mxu3 %v9663_v34  ;;  %v13107_v39 = vld [vmem:[%s20867_s1 + $0x1b4] sm:$0xf0] }
 0x154   :  { %1933 = vmatmul.bf16.vlgmr.msrb.gmra.mxu0 %v15367_v62  ;;  %1946 = vmatmul.bf16.vlgmr.msrb.gmra.mxu1 %v15369_v63  ;;  %v9730_v32 = vld [vmem:[%s20867_s1 + $0x398] sm:$0xf]  ;;  %v9475_v41 = vor.u32 %v13107_v39, %v9474_v29  ;;  %v9607_v39 = vor.u32 %v13135_v26, %v9604_v27  ;;  %v10253_v26 = vld [vmem:[%s20867_s1 + $0x3c0] sm:$0xf] }
 0x155   :  { %1959 = vmatmul.bf16.vlgmr.msrb.gmra.mxu2 %v15367_v62  ;;  %1972 = vmatmul.bf16.vlgmr.msrb.gmra.mxu3 %v15369_v63  ;;  %v13171_v34 = vld [vmem:[%s20867_s1 + $0x3b4] sm:$0xf0] }
 0x156   :  { %1981 = vmatpush.bf16.msra.mxu0 %v9371_v45  ;;  %1994 = vmatpush.bf16.msra.mxu1 %v9627_v46  ;;  %v9731_v44 = vor.u32 %v13171_v34, %v9730_v32  ;;  %v9442_v45 = vld [vmem:[%s20867_s1 + $0x158] sm:$0xf]  ;;  %v13063_v32 = vld [vmem:[%s20867_s1 + $0x5c] sm:$0xf] }
 0x157   :  { %2007 = vmatpush.bf16.msra.mxu2 %v9375_v49  ;;  %2020 = vmatpush.bf16.msra.mxu3 %v9631_v51  ;;  %v13099_v46 = vld [vmem:[%s20867_s1 + $0x174] sm:$0xf0]  ;;  %v9316_v34 = vld [vmem:[%s20867_s1 + $0x78] sm:$0xf0] }
 0x158   :  { %v9698_v49 = vld [vmem:[%s20867_s1 + $0x358] sm:$0xf]  ;;  %v9443_v58 = vor.u32 %v13099_v46, %v9442_v45  ;;  %v9319_v45 = vor.u32 %v13063_v32, %v9316_v34  ;;  %v9575_v46 = vor.u32 %v13127_v35, %v9572_v36  ;;  %v9965_v35 = vld [vmem:[%s20867_s1 + $0x180] sm:$0xf] }
 0x159   :  { %v13163_v51 = vld [vmem:[%s20867_s1 + $0x374] sm:$0xf0]  ;;  %v13232_v36 = vld [vmem:[%s20867_s1 + $0x19c] sm:$0xf0] }
 0x15a   :  { %1982 = vmatpush.bf16.msra.mxu0 %v9339_v60  ;;  %1995 = vmatpush.bf16.msra.mxu1 %v9595_v61  ;;  %v9699_v59 = vor.u32 %v13163_v51, %v9698_v49  ;;  %v9410_v60 = vld [vmem:[%s20867_s1 + $0x118] sm:$0xf]  ;;  %v13055_v49 = vld [vmem:[%s20867_s1 + $0x1c] sm:$0xf] }
 0x15b   :  { %2008 = vmatpush.bf16.msra.mxu2 %v9343_v0  ;;  %2021 = vmatpush.bf16.msra.mxu3 %v9599_v1  ;;  %v13091_v61 = vld [vmem:[%s20867_s1 + $0x134] sm:$0xf0]  ;;  %v9284_v51 = vld [vmem:[%s20867_s1 + $0x38] sm:$0xf0] }
 0x15c   :  { %v9666_v0 = vld [vmem:[%s20867_s1 + $0x318] sm:$0xf]  ;;  %v9411_v6 = vor.u32 %v13091_v61, %v9410_v60 }
 0x15d   :  { %v13155_v1 = vld [vmem:[%s20867_s1 + $0x334] sm:$0xf0] }
 0x15e   :  { %1983 = vmatpush.bf16.msra.mxu0 %v9307_v10  ;;  %1996 = vmatpush.bf16.msra.mxu1 %v9563_v33  ;;  %v9667_v7 = vor.u32 %v13155_v1, %v9666_v0  ;;  %v13083_v10 = vld [vmem:[%s20867_s1 + $0xf4] sm:$0xf0]  ;;  %v9415_v33 = vor.u32 %v13087_v2, %v9412_v3 }
 0x15f   :  { %2009 = vmatpush.bf16.msra.mxu2 %v9311_v14  ;;  %2022 = vmatpush.bf16.msra.mxu3 %v9567_v15  ;;  %v13079_v14 = vld [vmem:[%s20867_s1 + $0xdc] sm:$0xf]  ;;  %v9379_v16 = vor.u32 %v13083_v10, %v9378_v9  ;;  %v9602_v22 = vld [vmem:[%s20867_s1 + $0x298] sm:$0xf]  ;;  %v15750_v10 = vld [vmem:[%s20866_s0 + $0x8] sm:$0xff] }
 0x160   :  { %v9380_v15 = vld [vmem:[%s20867_s1 + $0xf8] sm:$0xf0] }
 0x161   :  { %v9383_v50 = vor.u32 %v13079_v14, %v9380_v15  ;;  %v1094_v15 = vunpack.c.l.bf16 %v15750_v10 }
 0x162   :  { %1984 = vmatpush.bf16.msra.mxu0 %v9275_v23  ;;  %1997 = vmatpush.bf16.msra.mxu1 %v9531_v24  ;;  %v13139_v23 = vld [vmem:[%s20867_s1 + $0x2b4] sm:$0xf0]  ;;  %v13071_v24 = vld [vmem:[%s20867_s1 + $0x9c] sm:$0xf] }
 0x163   :  { %2010 = vmatpush.bf16.msra.mxu2 %v9279_v8  ;;  %2023 = vmatpush.bf16.msra.mxu3 %v9535_v18  ;;  %v9347_v8 = vor.u32 %v13075_v20, %v9346_v19  ;;  %v9603_v18 = vor.u32 %v13139_v23, %v9602_v22  ;;  %v9351_v29 = vor.u32 %v13071_v24, %v9348_v25  ;;  %v9997_v24 = vld [vmem:[%s20867_s1 + $0x1c0] sm:$0xf] }
 0x164   :  { %v13240_v25 = vld [vmem:[%s20867_s1 + $0x1dc] sm:$0xf0] }
 0x165   :  { %1985 = vmatmul.bf16.vlgmr.msra.gmra.mxu0 %v15367_v62  ;;  %1998 = vmatmul.bf16.vlgmr.msra.gmra.mxu1 %v15369_v63  ;;  %v9998_v27 = vor.u32 %v13240_v25, %v9997_v24  ;;  %v13204_v24 = vld [vmem:[%s20867_s1 + $0xc4] sm:$0xf] }
 0x166   :  { %2029 = vmatpush.bf16.msrb.mxu0 %v9507_v28  ;;  %2042 = vmatpush.bf16.msrb.mxu1 %v9763_v38  ;;  %v9314_v28 = vld [vmem:[%s20867_s1 + $0x58] sm:$0xf]  ;;  %v9871_v25 = vld [vmem:[%s20867_s1 + $0xe0] sm:$0xf0] }
 0x167   :  { %2055 = vmatpush.bf16.msrb.mxu2 %v9511_v30  ;;  %2068 = vmatpush.bf16.msrb.mxu3 %v9767_v31  ;;  %v13067_v38 = vld [vmem:[%s20867_s1 + $0x74] sm:$0xf0] }
 0x168   :  { %2011 = vmatmul.bf16.vlgmr.msra.gmra.mxu2 %v15367_v62  ;;  %2024 = vmatmul.bf16.vlgmr.msra.gmra.mxu3 %v15369_v63  ;;  %v9570_v30 = vld [vmem:[%s20867_s1 + $0x258] sm:$0xf]  ;;  %v9315_v37 = vor.u32 %v13067_v38, %v9314_v28  ;;  %v9999_v28 = vld [vmem:[%s20867_s1 + $0x1e0] sm:$0xf0] }
 0x169   :  { %v13131_v31 = vld [vmem:[%s20867_s1 + $0x274] sm:$0xf0] }
 0x16a   :  { %2030 = vmatpush.bf16.msrb.mxu0 %v9475_v41  ;;  %2043 = vmatpush.bf16.msrb.mxu1 %v9731_v44  ;;  %v9571_v40 = vor.u32 %v13131_v31, %v9570_v30  ;;  %v9282_v41 = vld [vmem:[%s20867_s1 + $0x18] sm:$0xf]  ;;  %v10255_v30 = vld [vmem:[%s20867_s1 + $0x3e0] sm:$0xf0] }
 0x16b   :  { %2056 = vmatpush.bf16.msrb.mxu2 %v9479_v47  ;;  %2069 = vmatpush.bf16.msrb.mxu3 %v9735_v48  ;;  %v13059_v44 = vld [vmem:[%s20867_s1 + $0x34] sm:$0xf0] }
 0x16c   :  { %v9538_v47 = vld [vmem:[%s20867_s1 + $0x218] sm:$0xf]  ;;  %v9283_v54 = vor.u32 %v13059_v44, %v9282_v41  ;;  %v9966_v44 = vor.u32 %v13232_v36, %v9965_v35  ;;  %v13264_v35 = vld [vmem:[%s20867_s1 + $0x29c] sm:$0xf0]  ;;  %v13196_v36 = vld [vmem:[%s20867_s1 + $0x84] sm:$0xf] }
 0x16d   :  { %v13123_v48 = vld [vmem:[%s20867_s1 + $0x234] sm:$0xf0] }
 0x16e   :  { %2031 = vmatpush.bf16.msrb.mxu0 %v9443_v58  ;;  %2044 = vmatpush.bf16.msrb.mxu1 %v9699_v59  ;;  %v9539_v57 = vor.u32 %v13123_v48, %v9538_v47  ;;  %v9287_v58 = vor.u32 %v13055_v49, %v9284_v51  ;;  %v9543_v59 = vor.u32 %v13119_v52, %v9540_v53  ;;  %v13228_v47 = vld [vmem:[%s20867_s1 + $0x184] sm:$0xf] }
 0x16f   :  { %2057 = vmatpush.bf16.msrb.mxu2 %v9447_v42  ;;  %2070 = vmatpush.bf16.msrb.mxu3 %v9703_v43  ;;  %v9967_v48 = vld [vmem:[%s20867_s1 + $0x1a0] sm:$0xf0] }
 0x170   :  { %v9970_v51 = vor.u32 %v13228_v47, %v9967_v48  ;;  %v13292_v52 = vld [vmem:[%s20867_s1 + $0x384] sm:$0xf]  ;;  %v9805_v48 = vld [vmem:[%s20867_s1 + $0x40] sm:$0xf] }
 0x171   :  { %v10223_v53 = vld [vmem:[%s20867_s1 + $0x3a0] sm:$0xf0] }
 0x172   :  { %2032 = vmatpush.bf16.msrb.mxu0 %v9411_v6  ;;  %2045 = vmatpush.bf16.msrb.mxu1 %v9667_v7 }
 0x173   :  { %2058 = vmatpush.bf16.msrb.mxu2 %v9415_v33  ;;  %2071 = vmatpush.bf16.msrb.mxu3 %v9671_v11 }
 0x176   :  { %2033 = vmatpush.bf16.msrb.mxu0 %v9379_v16  ;;  %2046 = vmatpush.bf16.msrb.mxu1 %v9635_v17 }
 0x177   :  { %2059 = vmatpush.bf16.msrb.mxu2 %v9383_v50  ;;  %2072 = vmatpush.bf16.msrb.mxu3 %v9639_v21 }
 0x17a   :  { %2034 = vmatpush.bf16.msrb.mxu0 %v9347_v8  ;;  %2047 = vmatpush.bf16.msrb.mxu1 %v9603_v18  ;;  %v13304_v8 = vld [vmem:[%s20867_s1 + $0x3dc] sm:$0xf0]  ;;  %v13236_v18 = vld [vmem:[%s20867_s1 + $0x1c4] sm:$0xf] }
 0x17b   :  { %2060 = vmatpush.bf16.msrb.mxu2 %v9351_v29  ;;  %2073 = vmatpush.bf16.msrb.mxu3 %v9607_v39  ;;  %v10254_v38 = vor.u32 %v13304_v8, %v10253_v26  ;;  %v10002_v29 = vor.u32 %v13236_v18, %v9999_v28  ;;  %v13300_v39 = vld [vmem:[%s20867_s1 + $0x3c4] sm:$0xf] }
 0x17c   :  { %v10258_v31 = vor.u32 %v13300_v39, %v10255_v30  ;;  %v13268_v8 = vld [vmem:[%s20867_s1 + $0x2c4] sm:$0xf]  ;;  %v13200_v39 = vld [vmem:[%s20867_s1 + $0x9c] sm:$0xf0] }
 0x17d   :  { %v10127_v18 = vld [vmem:[%s20867_s1 + $0x2e0] sm:$0xf0]  ;;  %v10093_v30 = vld [vmem:[%s20867_s1 + $0x280] sm:$0xf] }
 0x17e   :  { %2035 = vmatpush.bf16.msrb.mxu0 %v9315_v37  ;;  %2048 = vmatpush.bf16.msrb.mxu1 %v9571_v40 }
 0x17f   :  { %2061 = vmatpush.bf16.msrb.mxu2 %v9319_v45  ;;  %2074 = vmatpush.bf16.msrb.mxu3 %v9575_v46  ;;  %v10221_v45 = vld [vmem:[%s20867_s1 + $0x380] sm:$0xf] }
 0x180   :  { %v13296_v46 = vld [vmem:[%s20867_s1 + $0x39c] sm:$0xf0] }
 0x181   :  { %v10222_v49 = vor.u32 %v13296_v46, %v10221_v45  ;;  %v13260_v45 = vld [vmem:[%s20867_s1 + $0x284] sm:$0xf] }
 0x182   :  { %2036 = vmatpush.bf16.msrb.mxu0 %v9283_v54  ;;  %2049 = vmatpush.bf16.msrb.mxu1 %v9539_v57  ;;  %v10226_v57 = vor.u32 %v13292_v52, %v10223_v53  ;;  %v10095_v46 = vld [vmem:[%s20867_s1 + $0x2a0] sm:$0xf0] }
 0x183   :  { %2062 = vmatpush.bf16.msrb.mxu2 %v9287_v58  ;;  %2075 = vmatpush.bf16.msrb.mxu3 %v9543_v59  ;;  %v9933_v58 = vld [vmem:[%s20867_s1 + $0x140] sm:$0xf]  ;;  %v10098_v47 = vor.u32 %v13260_v45, %v10095_v46  ;;  %v13229_v45 = vld [vmem:[%s20867_s1 + $0x18c] sm:$0xf] }
 0x184   :  { %v13224_v59 = vld [vmem:[%s20867_s1 + $0x15c] sm:$0xf0]  ;;  %v9975_v46 = vld [vmem:[%s20867_s1 + $0x1a8] sm:$0xf0] }
 0x185   :  { %2037 = vmatmul.bf16.vlgmr.msrb.gmra.mxu0 %v15367_v62  ;;  %2050 = vmatmul.bf16.vlgmr.msrb.gmra.mxu1 %v15369_v63 }
 0x186   :  { %2063 = vmatmul.bf16.vlgmr.msrb.gmra.mxu2 %v15367_v62  ;;  %2076 = vmatmul.bf16.vlgmr.msrb.gmra.mxu3 %v15369_v63 }
 0x187   :  { %2939 = vmatpush.bf16.msra.mxu0 %v9998_v27  ;;  %2952 = vmatpush.bf16.msra.mxu1 %v10254_v38  ;;  %v9874_v27 = vor.u32 %v13204_v24, %v9871_v25  ;;  %v10130_v38 = vor.u32 %v13268_v8, %v10127_v18  ;;  %v13301_v18 = vld [vmem:[%s20867_s1 + $0x3cc] sm:$0xf] }
 0x188   :  { %2965 = vmatpush.bf16.msra.mxu2 %v10002_v29  ;;  %2978 = vmatpush.bf16.msra.mxu3 %v10258_v31  ;;  %v9837_v29 = vld [vmem:[%s20867_s1 + $0x80] sm:$0xf] }
 0x189   :  { %v9838_v31 = vor.u32 %v13200_v39, %v9837_v29 }
 0x18b   :  { %2940 = vmatpush.bf16.msra.mxu0 %v9966_v44  ;;  %2953 = vmatpush.bf16.msra.mxu1 %v10222_v49  ;;  %v13192_v49 = vld [vmem:[%s20867_s1 + $0x5c] sm:$0xf0] }
 0x18c   :  { %2966 = vmatpush.bf16.msra.mxu2 %v9970_v51  ;;  %2979 = vmatpush.bf16.msra.mxu3 %v10226_v57  ;;  %v10061_v51 = vld [vmem:[%s20867_s1 + $0x240] sm:$0xf]  ;;  %v9806_v53 = vor.u32 %v13192_v49, %v9805_v48 }
 0x18d   :  { %v13256_v57 = vld [vmem:[%s20867_s1 + $0x25c] sm:$0xf0] }
 0x1c1   :  { %v1882_v60 = vpop.f32.mrf.mxu0  ;;  %v1895_v61 = vpop.f32.mrf.mxu1 }
 0x1c2   :  { %v1896_v13 = vadd.f32 %v1895_v61, %v1882_v60  ;;  %v9934_v60 = vor.u32 %v13224_v59, %v9933_v58  ;;  %v10189_v61 = vld [vmem:[%s20867_s1 + $0x340] sm:$0xf]  ;;  %v13188_v58 = vld [vmem:[%s20867_s1 + $0x44] sm:$0xf] }
 0x1c3   :  { %v9807_v59 = vld [vmem:[%s20867_s1 + $0x60] sm:$0xf0] }
 0x1c4   :  { %2941 = vmatpush.bf16.msra.mxu0 %v9934_v60 }
 0x1c8   :  { %v1908_v42 = vpop.f32.mrf.mxu2  ;;  %v1921_v43 = vpop.f32.mrf.mxu3 }
 0x1c9   :  { %v1884_v0 = vpop.f32.mrf.mxu0  ;;  %v1897_v1 = vpop.f32.mrf.mxu1  ;;  %v1922_v6 = vadd.f32 %v1921_v43, %v1908_v42  ;;  %v13288_v42 = vld [vmem:[%s20867_s1 + $0x35c] sm:$0xf0]  ;;  %v13220_v43 = vld [vmem:[%s20867_s1 + $0x144] sm:$0xf] }
 0x1ca   :  { %v10190_v0 = vor.u32 %v13288_v42, %v10189_v61  ;;  %v9935_v1 = vld [vmem:[%s20867_s1 + $0x160] sm:$0xf0] }
 0x1cb   :  { %v2089_v63 = vrot.slane %v1922_v6, 6 }
 0x1cc   :  { %2954 = vmatpush.bf16.msra.mxu1 %v10190_v0  ;;  %v10063_v0 = vld [vmem:[%s20867_s1 + $0x260] sm:$0xf0] }
 0x1cd   :  { %v2095_v56 = vsel %vm1026_vm1, %v1896_v13, %v2089_v63  ;;  %v10157_v63 = vld [vmem:[%s20867_s1 + $0x300] sm:$0xf]  ;;  %v9903_v13 = vld [vmem:[%s20867_s1 + $0x120] sm:$0xf0] }
 0x1d0   :  { %v1910_v2 = vpop.f32.mrf.mxu2  ;;  %v1923_v3 = vpop.f32.mrf.mxu3 }
 0x1d1   :  { %v1934_v4 = vpop.f32.mrf.mxu0  ;;  %v1947_v5 = vpop.f32.mrf.mxu1  ;;  %v13284_v2 = vld [vmem:[%s20867_s1 + $0x344] sm:$0xf] }
 0x1d2   :  { %v1948_v7 = vadd.f32 %v1947_v5, %v1934_v4  ;;  %v10191_v3 = vld [vmem:[%s20867_s1 + $0x360] sm:$0xf0]  ;;  %v9938_v4 = vor.u32 %v13220_v43, %v9935_v1 }
 0x1d3   :  { %v10194_v5 = vor.u32 %v13284_v2, %v10191_v3  ;;  %v13252_v43 = vld [vmem:[%s20867_s1 + $0x244] sm:$0xf]  ;;  %v9773_v2 = vld [vmem:[%s20867_s1] sm:$0xf] }
 0x1d4   :  { %v2090_v14 = vrot.slane %v1948_v7, 4  ;;  %2967 = vmatpush.bf16.msra.mxu2 %v9938_v4  ;;  %v10066_v1 = vor.u32 %v13252_v43, %v10063_v0  ;;  %v13184_v3 = vld [vmem:[%s20867_s1 + $0x1c] sm:$0xf0]  ;;  %v13289_v0 = vld [vmem:[%s20867_s1 + $0x364] sm:$0xf0] }
 0x1d5   :  { %2980 = vmatpush.bf16.msra.mxu3 %v10194_v5  ;;  %v10029_v4 = vld [vmem:[%s20867_s1 + $0x200] sm:$0xf] }
 0x1d8   :  { %v1960_v9 = vpop.f32.mrf.mxu2  ;;  %v1973_v62 = vpop.f32.mrf.mxu3 }
 0x1d9   :  { %v1974_v33 = vadd.f32 %v1973_v62, %v1960_v9  ;;  %v1936_v11 = vpop.f32.mrf.mxu0  ;;  %v1949_v12 = vpop.f32.mrf.mxu1  ;;  %v9901_v9 = vld [vmem:[%s20867_s1 + $0x100] sm:$0xf] }
 0x1da   :  { %v13216_v62 = vld [vmem:[%s20867_s1 + $0x11c] sm:$0xf0]  ;;  %v13212_v12 = vld [vmem:[%s20867_s1 + $0x104] sm:$0xf] }
 0x1db   :  { %v2091_v55 = vrot.slane %v1974_v33, 2  ;;  %v9902_v33 = vor.u32 %v13216_v62, %v9901_v9  ;;  %v13280_v11 = vld [vmem:[%s20867_s1 + $0x31c] sm:$0xf0]  ;;  %v13180_v62 = vld [vmem:[%s20867_s1 + $0x4] sm:$0xf] }
 0x1dc   :  { %v13248_v9 = vld [vmem:[%s20867_s1 + $0x21c] sm:$0xf0] }
 0x1dd   :  { %v2096_v16 = vsel %vm1028_vm0, %v2090_v14, %v2091_v55  ;;  %v10158_v14 = vor.u32 %v13280_v11, %v10157_v63  ;;  %v13276_v55 = vld [vmem:[%s20867_s1 + $0x304] sm:$0xf]  ;;  %2942 = vmatpush.bf16.msra.mxu0 %v9902_v33  ;;  %v10030_v33 = vor.u32 %v13248_v9, %v10029_v4 }
 0x1de   :  { %v2097_v17 = vsel %vm1030_vm2, %v2095_v56, %v2096_v16  ;;  %v10159_v56 = vld [vmem:[%s20867_s1 + $0x320] sm:$0xf0] }
 0x1df   :  { %v2103_v19 = vadd.f32 %v2097_v17, %v1094_v15  ;;  %v9906_v15 = vor.u32 %v13212_v12, %v9903_v13  ;;  %v10162_v16 = vor.u32 %v13276_v55, %v10159_v56  ;;  %v9869_v17 = vld [vmem:[%s20867_s1 + $0xc0] sm:$0xf]  ;;  %2955 = vmatpush.bf16.msra.mxu1 %v10158_v14  ;;  %v9775_v11 = vld [vmem:[%s20867_s1 + $0x20] sm:$0xf0]  ;;  %v10005_v55 = vld [vmem:[%s20867_s1 + $0x1c8] sm:$0xf] }
 0x1e0   :  { %v1962_v20 = vpop.f32.mrf.mxu2  ;;  %v1975_v50 = vpop.f32.mrf.mxu3  ;;  %v13244_v12 = vld [vmem:[%s20867_s1 + $0x204] sm:$0xf]  ;;  %v9778_v14 = vor.u32 %v13180_v62, %v9775_v11  ;;  %v13241_v56 = vld [vmem:[%s20867_s1 + $0x1e4] sm:$0xf0] }
 0x1e1   :  { %v9768_v21 = vmul.f32 -1.442695, %v2103_v19  ;;  %v13208_v19 = vld [vmem:[%s20867_s1 + $0xdc] sm:$0xf0]  ;;  %2968 = vmatpush.bf16.msra.mxu2 %v9906_v15  ;;  %2981 = vmatpush.bf16.msra.mxu3 %v10162_v16  ;;  %v10031_v13 = vld [vmem:[%s20867_s1 + $0x220] sm:$0xf0] }
 0x1e2   :  { %v15756_v22 = vpop.f32.mrf.mxu0  ;;  %v15758_v23 = vpop.f32.mrf.mxu1  ;;  %v10125_v20 = vld [vmem:[%s20867_s1 + $0x2c0] sm:$0xf]  ;;  %v9870_v50 = vor.u32 %v13208_v19, %v9869_v17  ;;  %v10034_v15 = vor.u32 %v13244_v12, %v10031_v13  ;;  %v10261_v16 = vld [vmem:[%s20867_s1 + $0x3c8] sm:$0xf]  ;;  %v10006_v19 = vor.u32 %v13241_v56, %v10005_v55  ;;  %v13213_v55 = vld [vmem:[%s20867_s1 + $0x10c] sm:$0xf] }
 0x1e3   :  { %13979 = vpow2.f32 %v9768_v21  ;;  %v13272_v21 = vld [vmem:[%s20867_s1 + $0x2dc] sm:$0xf0]  ;;  %v2000_v24 = vadd.f32 %v15758_v23, %v15756_v22  ;;  %v9973_v22 = vld [vmem:[%s20867_s1 + $0x188] sm:$0xf] }
 0x1e4   :  { %v10126_v26 = vor.u32 %v13272_v21, %v10125_v20  ;;  %2943 = vmatpush.bf16.msra.mxu0 %v9870_v50  ;;  %v13305_v20 = vld [vmem:[%s20867_s1 + $0x3e4] sm:$0xf0]  ;;  %v13237_v50 = vld [vmem:[%s20867_s1 + $0x1cc] sm:$0xf] }
 0x1e5   :  { %2969 = vmatpush.bf16.msra.mxu2 %v9874_v27  ;;  %2982 = vmatpush.bf16.msra.mxu3 %v10130_v38  ;;  %v10007_v21 = vld [vmem:[%s20867_s1 + $0x1e8] sm:$0xf0]  ;;  %v10262_v27 = vor.u32 %v13305_v20, %v10261_v16  ;;  %v13217_v11 = vld [vmem:[%s20867_s1 + $0x124] sm:$0xf0] }
 0x1e6   :  { %2956 = vmatpush.bf16.msra.mxu1 %v10126_v26  ;;  %v10010_v8 = vor.u32 %v13237_v50, %v10007_v21  ;;  %v10263_v38 = vld [vmem:[%s20867_s1 + $0x3e8] sm:$0xf0]  ;;  %v10165_v12 = vld [vmem:[%s20867_s1 + $0x308] sm:$0xf] }
 0x1e7   :  { %v9911_v16 = vld [vmem:[%s20867_s1 + $0x128] sm:$0xf0] }
 0x1e8   :  { %2944 = vmatpush.bf16.msra.mxu0 %v9838_v31  ;;  %v10266_v31 = vor.u32 %v13301_v18, %v10263_v38  ;;  %v9914_v50 = vor.u32 %v13213_v55, %v9911_v16  ;;  %v13205_v18 = vld [vmem:[%s20867_s1 + $0xcc] sm:$0xf] }
 0x1e9   :  { %v13980_v37 = vpop.eup %13979  ;;  %2983 = vmatpush.bf16.msra.mxu3 %v10098_v47  ;;  %v13293_v47 = vld [vmem:[%s20867_s1 + $0x38c] sm:$0xf] }
 0x1ea   :  { %v1988_v40 = vpop.f32.mrf.mxu0  ;;  %v2001_v41 = vpop.f32.mrf.mxu1  ;;  %v15812_v54 = vadd.f32 1.0, %v13980_v37  ;;  %v9839_v37 = vld [vmem:[%s20867_s1 + $0xa0] sm:$0xf0]  ;;  %v9879_v38 = vld [vmem:[%s20867_s1 + $0xe8] sm:$0xf0] }
 0x1eb   :  { %v15784_v32 = vpop.f32.mrf.mxu2  ;;  %v15786_v34 = vpop.f32.mrf.mxu3  ;;  %v10094_v41 = vor.u32 %v13264_v35, %v10093_v30  ;;  %v9842_v44 = vor.u32 %v13196_v36, %v9839_v37  ;;  %v13233_v35 = vld [vmem:[%s20867_s1 + $0x1a4] sm:$0xf0] }
 0x1ec   :  { %13981 = vrcp.f32 %v15812_v54  ;;  %v15926_v52 = vadd.f32 %v15786_v34, %v15784_v32  ;;  %v10062_v32 = vor.u32 %v13256_v57, %v10061_v51  ;;  %v9810_v34 = vor.u32 %v13188_v58, %v9807_v59  ;;  %2945 = vmatpush.bf16.msra.mxu0 %v9806_v53  ;;  %v10229_v36 = vld [vmem:[%s20867_s1 + $0x388] sm:$0xf]  ;;  %v10231_v57 = vld [vmem:[%s20867_s1 + $0x3a8] sm:$0xf0] }
 0x1ed   :  { %2957 = vmatpush.bf16.msra.mxu1 %v10094_v41  ;;  %2970 = vmatpush.bf16.msra.mxu2 %v9842_v44  ;;  %v13297_v37 = vld [vmem:[%s20867_s1 + $0x3a4] sm:$0xf0]  ;;  %vm2118_vm12 = vweird.f32 %v15812_v54  ;;  %v9974_v41 = vor.u32 %v13233_v35, %v9973_v22  ;;  %v2122_v51 = vand.u32 2147483647, %v15812_v54  ;;  %v9978_v53 = vor.u32 %v13229_v45, %v9975_v46 }
 0x1ee   :  { %v2092_v5 = vrot.slane %v15926_v52, 6  ;;  %2984 = vmatpush.bf16.msra.mxu3 %v10066_v1  ;;  %v10230_v44 = vor.u32 %v13297_v37, %v10229_v36  ;;  %v10234_v58 = vor.u32 %v13293_v47, %v10231_v57  ;;  %v9941_v59 = vld [vmem:[%s20867_s1 + $0x148] sm:$0xf]  ;;  %v13221_v1 = vld [vmem:[%s20867_s1 + $0x14c] sm:$0xf] }
 0x1ef   :  { %v9943_v52 = vld [vmem:[%s20867_s1 + $0x168] sm:$0xf0]  ;;  %vm2123_vm14 = vcmp.eq.f32.partialorder %v2122_v51, 8.507059e+37  ;;  %v13265_v47 = vld [vmem:[%s20867_s1 + $0x2a4] sm:$0xf0] }
 0x1f0   :  { %v9946_v4 = vor.u32 %v13221_v1, %v9943_v52  ;;  %v9815_v1 = vld [vmem:[%s20867_s1 + $0x68] sm:$0xf0] }
 0x1f1   :  { %2958 = vmatpush.bf16.msra.mxu1 %v10062_v32  ;;  %2971 = vmatpush.bf16.msra.mxu2 %v9810_v34 }
 0x1f2   :  { %v15887_v28 = vpop.eup %13981  ;;  %2985 = vmatpush.bf16.msra.mxu3 %v10034_v15  ;;  %v13281_v15 = vld [vmem:[%s20867_s1 + $0x324] sm:$0xf0] }
 0x1f3   :  { %v2014_v6 = vpop.f32.mrf.mxu2  ;;  %v2027_v7 = vpop.f32.mrf.mxu3  ;;  %v2114_v40 = vmul.f32 %v15887_v28, %v15812_v54  ;;  %vm2119_vm11 = vweird.f32 %v15887_v28  ;;  %v10166_v56 = vor.u32 %v13281_v15, %v10165_v12 }
 0x1f4   :  { %v2124_v6 = vand.u32 2147483648, %v15812_v54  ;;  %v9774_v7 = vor.u32 %v13184_v3, %v9773_v2  ;;  %vm16023_vm13 = vmor %vm2118_vm12, %vm2119_vm11 }
 0x1f5   :  { %v2115_v60 = vsub.f32 1.0, %v2114_v40  ;;  %2959 = vmatpush.bf16.msra.mxu1 %v10030_v33  ;;  %2972 = vmatpush.bf16.msra.mxu2 %v9778_v14  ;;  %v1095_v40 = vunpack.c.h.bf16 %v15750_v10 }
 0x1f6   :  { %2946 = vmatpush.bf16.msra.mxu0 %v9774_v7  ;;  %3030 = vmatpush.bf16.msrb.mxu3 %v10266_v31  ;;  %v2125_v3 = vor.u32 1.1754944e-38, %v2124_v6  ;;  %v10199_v7 = vld [vmem:[%s20867_s1 + $0x368] sm:$0xf0]  ;;  %v9909_v6 = vld [vmem:[%s20867_s1 + $0x108] sm:$0xf] }
 0x1f7   :  { %v2116_v63 = vmul.f32 %v15887_v28, %v2115_v60  ;;  %v13225_v60 = vld [vmem:[%s20867_s1 + $0x164] sm:$0xf0]  ;;  %v9910_v14 = vor.u32 %v13217_v11, %v9909_v6  ;;  %v2144_v31 = vld [vmem:[#allocation3] sm:$0xf] }
 0x1f8   :  { %v9942_v43 = vor.u32 %v13225_v60, %v9941_v59  ;;  %v10103_v59 = vld [vmem:[%s20867_s1 + $0x2a8] sm:$0xf0] }
 0x1f9   :  { %v2117_v29 = vadd.f32 %v15887_v28, %v2116_v63  ;;  %3004 = vmatpush.bf16.msrb.mxu1 %v10262_v27  ;;  %3017 = vmatpush.bf16.msrb.mxu2 %v10010_v8  ;;  %v13273_v8 = vld [vmem:[%s20867_s1 + $0x2e4] sm:$0xf0]  ;;  %v13245_v6 = vld [vmem:[%s20867_s1 + $0x20c] sm:$0xf] }
 0x1fa   :  { %2991 = vmatpush.bf16.msrb.mxu0 %v10006_v19  ;;  %3031 = vmatpush.bf16.msrb.mxu3 %v10234_v58  ;;  %v10167_v19 = vld [vmem:[%s20867_s1 + $0x328] sm:$0xf0] }
 0x1fb   :  { %v2121_v34 = vsel %vm16023_vm13, %v15887_v28, %v2117_v29  ;;  %v13269_v29 = vld [vmem:[%s20867_s1 + $0x2cc] sm:$0xf] }
 0x1fc   :  { %v2126_v63 = vsel %vm2123_vm14, %v2125_v3, %v2121_v34  ;;  %v13261_v58 = vld [vmem:[%s20867_s1 + $0x28c] sm:$0xf] }
 0x1fd   :  { %3005 = vmatpush.bf16.msrb.mxu1 %v10230_v44  ;;  %3018 = vmatpush.bf16.msrb.mxu2 %v9978_v53  ;;  %v2146_v20 = vrot.slane %v2126_v63, 4  ;;  %v10101_v44 = vld [vmem:[%s20867_s1 + $0x288] sm:$0xf]  ;;  %v10106_v60 = vor.u32 %v13261_v58, %v10103_v59  ;;  %v13253_v3 = vld [vmem:[%s20867_s1 + $0x24c] sm:$0xf] }
 0x1fe   :  { %2992 = vmatpush.bf16.msrb.mxu0 %v9974_v41  ;;  %v13201_v41 = vld [vmem:[%s20867_s1 + $0xa4] sm:$0xf0]  ;;  %v10102_v53 = vor.u32 %v13265_v47, %v10101_v44  ;;  %v10039_v11 = vld [vmem:[%s20867_s1 + $0x228] sm:$0xf0]  ;;  %v10239_v58 = vld [vmem:[%s20867_s1 + $0x3b0] sm:$0xf0] }
 0x1ff   :  { %v2148_v36 = vmul.f32 %v2146_v20, %v2144_v31  ;;  %v10042_v55 = vor.u32 %v13245_v6, %v10039_v11  ;;  %v10271_v31 = vld [vmem:[%s20867_s1 + $0x3f0] sm:$0xf0] }
 0x200   :  { %v9919_v6 = vld [vmem:[%s20867_s1 + $0x130] sm:$0xf0] }
 0x201   :  { %3019 = vmatpush.bf16.msrb.mxu2 %v9946_v4  ;;  %v13278_v11 = vld [vmem:[%s20867_s1 + $0x314] sm:$0xf] }
 0x202   :  { %v2038_v61 = vpop.f32.mrf.mxu0  ;;  %v2051_v42 = vpop.f32.mrf.mxu1  ;;  %2993 = vmatpush.bf16.msrb.mxu0 %v9942_v43  ;;  %v13257_v43 = vld [vmem:[%s20867_s1 + $0x264] sm:$0xf0] }
 0x203   :  { %v2052_v17 = vadd.f32 %v2051_v42, %v2038_v61  ;;  %v10197_v61 = vld [vmem:[%s20867_s1 + $0x348] sm:$0xf]  ;;  %v2098_v42 = vsel %vm1026_vm1, %v2000_v24, %v2092_v5  ;;  %v13285_v5 = vld [vmem:[%s20867_s1 + $0x34c] sm:$0xf] }
 0x204   :  { %v10198_v28 = vor.u32 %v13289_v0, %v10197_v61  ;;  %v10202_v62 = vor.u32 %v13285_v5, %v10199_v7  ;;  %v9877_v24 = vld [vmem:[%s20867_s1 + $0xc8] sm:$0xf]  ;;  %v13189_v0 = vld [vmem:[%s20867_s1 + $0x4c] sm:$0xf] }
 0x205   :  { %v2093_v48 = vrot.slane %v2052_v17, 4  ;;  %v13277_v17 = vld [vmem:[%s20867_s1 + $0x30c] sm:$0xf]  ;;  %3020 = vmatpush.bf16.msrb.mxu2 %v9914_v50  ;;  %v9813_v61 = vld [vmem:[%s20867_s1 + $0x48] sm:$0xf] }
 0x206   :  { %3006 = vmatpush.bf16.msrb.mxu1 %v10198_v28  ;;  %3032 = vmatpush.bf16.msrb.mxu3 %v10202_v62  ;;  %v10170_v21 = vor.u32 %v13277_v17, %v10167_v19  ;;  %v10071_v28 = vld [vmem:[%s20867_s1 + $0x268] sm:$0xf0]  ;;  %v9781_v5 = vld [vmem:[%s20867_s1 + $0x8] sm:$0xf] }
 0x207   :  { %2994 = vmatpush.bf16.msrb.mxu0 %v9910_v14  ;;  %v10074_v4 = vor.u32 %v13253_v3, %v10071_v28  ;;  %v13185_v7 = vld [vmem:[%s20867_s1 + $0x24] sm:$0xf0]  ;;  %v10207_v3 = vld [vmem:[%s20867_s1 + $0x370] sm:$0xf0] }
 0x208   :  { %v13249_v62 = vld [vmem:[%s20867_s1 + $0x224] sm:$0xf0] }
 0x209   :  { %v2064_v25 = vpop.f32.mrf.mxu2  ;;  %v2077_v26 = vpop.f32.mrf.mxu3 }
 0x20a   :  { %v2078_v23 = vadd.f32 %v2077_v26, %v2064_v25  ;;  %v2040_v39 = vpop.f32.mrf.mxu0  ;;  %v2053_v30 = vpop.f32.mrf.mxu1  ;;  %v13209_v25 = vld [vmem:[%s20867_s1 + $0xe4] sm:$0xf0]  ;;  %3007 = vmatpush.bf16.msrb.mxu1 %v10166_v56  ;;  %3033 = vmatpush.bf16.msrb.mxu3 %v10170_v21 }
 0x20b   :  { %v10133_v26 = vld [vmem:[%s20867_s1 + $0x2c8] sm:$0xf]  ;;  %v9878_v27 = vor.u32 %v13209_v25, %v9877_v24  ;;  %v10135_v39 = vld [vmem:[%s20867_s1 + $0x2e8] sm:$0xf0] }
 0x20c   :  { %v2094_v49 = vrot.slane %v2078_v23, 2  ;;  %v10134_v22 = vor.u32 %v13273_v8, %v10133_v26  ;;  %v9882_v23 = vor.u32 %v13205_v18, %v9879_v38  ;;  %v10138_v35 = vor.u32 %v13269_v29, %v10135_v39  ;;  %v10013_v18 = vld [vmem:[%s20867_s1 + $0x1d0] sm:$0xf]  ;;  %v13238_v29 = vld [vmem:[%s20867_s1 + $0x1d4] sm:$0xf] }
 0x20d   :  { %2995 = vmatpush.bf16.msrb.mxu0 %v9878_v27  ;;  %v13242_v38 = vld [vmem:[%s20867_s1 + $0x1ec] sm:$0xf0]  ;;  %v10015_v39 = vld [vmem:[%s20867_s1 + $0x1f0] sm:$0xf0] }
 0x20e   :  { %v2099_v32 = vsel %vm1028_vm0, %v2093_v48, %v2094_v49  ;;  %v13197_v48 = vld [vmem:[%s20867_s1 + $0x8c] sm:$0xf]  ;;  %3008 = vmatpush.bf16.msrb.mxu1 %v10134_v22  ;;  %3021 = vmatpush.bf16.msrb.mxu2 %v9882_v23  ;;  %v10269_v22 = vld [vmem:[%s20867_s1 + $0x3d0] sm:$0xf]  ;;  %v10018_v47 = vor.u32 %v13238_v29, %v10015_v39  ;;  %v13198_v29 = vld [vmem:[%s20867_s1 + $0x94] sm:$0xf] }
 0x20f   :  { %v2100_v2 = vsel %vm1030_vm2, %v2098_v42, %v2099_v32  ;;  %v9847_v49 = vld [vmem:[%s20867_s1 + $0xa8] sm:$0xf0]  ;;  %3034 = vmatpush.bf16.msrb.mxu3 %v10138_v35  ;;  %v13193_v42 = vld [vmem:[%s20867_s1 + $0x64] sm:$0xf0]  ;;  %v13306_v23 = vld [vmem:[%s20867_s1 + $0x3ec] sm:$0xf0] }
 0x210   :  { %v2104_v9 = vadd.f32 %v2100_v2, %v1095_v40  ;;  %v9845_v40 = vld [vmem:[%s20867_s1 + $0x88] sm:$0xf]  ;;  %v9850_v57 = vor.u32 %v13197_v48, %v9847_v49  ;;  %v9814_v34 = vor.u32 %v13193_v42, %v9813_v61  ;;  %v9818_v2 = vor.u32 %v13189_v0, %v9815_v1  ;;  %v10237_v49 = vld [vmem:[%s20867_s1 + $0x390] sm:$0xf]  ;;  %v13222_v1 = vld [vmem:[%s20867_s1 + $0x154] sm:$0xf] }
 0x211   :  { %v2066_v33 = vpop.f32.mrf.mxu2  ;;  %v2079_v54 = vpop.f32.mrf.mxu3  ;;  %v9846_v46 = vor.u32 %v13201_v41, %v9845_v40  ;;  %v10069_v32 = vld [vmem:[%s20867_s1 + $0x248] sm:$0xf]  ;;  %v10014_v41 = vor.u32 %v13242_v38, %v10013_v18  ;;  %v10270_v44 = vor.u32 %v13306_v23, %v10269_v22  ;;  %v9949_v61 = vld [vmem:[%s20867_s1 + $0x150] sm:$0xf]  ;;  %v9855_v39 = vld [vmem:[%s20867_s1 + $0xb0] sm:$0xf0] }
 0x212   :  { %v9769_v13 = vmul.f32 -1.442695, %v2104_v9  ;;  %13983 = vtanh.f32 %v2104_v9  ;;  %3009 = vmatpush.bf16.msrb.mxu1 %v10102_v53  ;;  %3022 = vmatpush.bf16.msrb.mxu2 %v9850_v57  ;;  %v10070_v52 = vor.u32 %v13257_v43, %v10069_v32  ;;  %v10037_v9 = vld [vmem:[%s20867_s1 + $0x208] sm:$0xf]  ;;  %v9783_v33 = vld [vmem:[%s20867_s1 + $0x28] sm:$0xf0]  ;;  %v9782_v54 = vor.u32 %v13185_v7, %v9781_v5 }
 0x213   :  { %2996 = vmatpush.bf16.msrb.mxu0 %v9846_v46  ;;  %3035 = vmatpush.bf16.msrb.mxu3 %v10106_v60  ;;  %v13234_v46 = vld [vmem:[%s20867_s1 + $0x1ac] sm:$0xf0]  ;;  %v9983_v53 = vld [vmem:[%s20867_s1 + $0x1b0] sm:$0xf0] }
 0x214   :  { %13985 = vpow2.f32 %v9769_v13  ;;  %v10038_v13 = vor.u32 %v13249_v62, %v10037_v9  ;;  %v13294_v57 = vld [vmem:[%s20867_s1 + $0x394] sm:$0xf]  ;;  %v13226_v42 = vld [vmem:[%s20867_s1 + $0x16c] sm:$0xf0] }
 0x215   :  { %v10205_v43 = vld [vmem:[%s20867_s1 + $0x350] sm:$0xf]  ;;  %v9950_v28 = vor.u32 %v13226_v42, %v9949_v61 }
 0x216   :  { %3010 = vmatpush.bf16.msrb.mxu1 %v10070_v52  ;;  %3023 = vmatpush.bf16.msrb.mxu2 %v9818_v2  ;;  %v13290_v0 = vld [vmem:[%s20867_s1 + $0x36c] sm:$0xf0]  ;;  %v9951_v52 = vld [vmem:[%s20867_s1 + $0x170] sm:$0xf0] }
 0x217   :  { %2997 = vmatpush.bf16.msrb.mxu0 %v9814_v34  ;;  %3036 = vmatpush.bf16.msrb.mxu3 %v10074_v4  ;;  %v10242_v34 = vor.u32 %v13294_v57, %v10239_v58  ;;  %v13286_v2 = vld [vmem:[%s20867_s1 + $0x354] sm:$0xf]  ;;  %v10206_v4 = vor.u32 %v13290_v0, %v10205_v43  ;;  %v9917_v5 = vld [vmem:[%s20867_s1 + $0x110] sm:$0xf]  ;;  %v9954_v9 = vor.u32 %v13222_v1, %v9951_v52 }
 0x218   :  { %v13984_v30 = vpop.eup %13983  ;;  %v13218_v7 = vld [vmem:[%s20867_s1 + $0x12c] sm:$0xf0]  ;;  %v10210_v62 = vor.u32 %v13286_v2, %v10207_v3  ;;  %v13182_v43 = vld [vmem:[%s20867_s1 + $0x14] sm:$0xf]  ;;  %v10021_v2 = vld [vmem:[%s20867_s1 + $0x1d8] sm:$0xf] }
 0x219   :  { %v2149_v37 = vmul.f32 %v13984_v30, %v2126_v63  ;;  %v13181_v63 = vld [vmem:[%s20867_s1 + $0xc] sm:$0xf]  ;;  %v13302_v30 = vld [vmem:[%s20867_s1 + $0x3d4] sm:$0xf]  ;;  %v10109_v22 = vld [vmem:[%s20867_s1 + $0x290] sm:$0xf] }
 0x21a   :  { %v13986_v45 = vpop.eup %13985  ;;  %v9786_v14 = vor.u32 %v13181_v63, %v9783_v33  ;;  %3011 = vmatpush.bf16.msrb.mxu1 %v10038_v13  ;;  %v10274_v48 = vor.u32 %v13302_v30, %v10271_v31  ;;  %v10173_v63 = vld [vmem:[%s20867_s1 + $0x310] sm:$0xf]  ;;  %v9918_v13 = vor.u32 %v13218_v7, %v9917_v5  ;;  %v13262_v30 = vld [vmem:[%s20867_s1 + $0x294] sm:$0xf]  ;;  %v13243_v3 = vld [vmem:[%s20867_s1 + $0x1f4] sm:$0xf0] }
 0x21b   :  { %v2112_v10 = vadd.f32 1.0, %v13986_v45  ;;  %v2150_v51 = vadd.f32 %v2149_v37, %v2148_v36  ;;  %2998 = vmatpush.bf16.msrb.mxu0 %v9782_v54  ;;  %3037 = vmatpush.bf16.msrb.mxu3 %v10042_v55  ;;  %v9981_v45 = vld [vmem:[%s20867_s1 + $0x190] sm:$0xf]  ;;  %v13214_v54 = vld [vmem:[%s20867_s1 + $0x114] sm:$0xf] }
 0x21c   :  { %3024 = vmatpush.bf16.msrb.mxu2 %v9786_v14  ;;  %v9982_v59 = vor.u32 %v13234_v46, %v9981_v45  ;;  %v13282_v33 = vld [vmem:[%s20867_s1 + $0x32c] sm:$0xf0]  ;;  %v10111_v31 = vld [vmem:[%s20867_s1 + $0x2b0] sm:$0xf0]  ;;  %v9858_v45 = vor.u32 %v13198_v29, %v9855_v39  ;;  %v13239_v5 = vld [vmem:[%s20867_s1 + $0x1dc] sm:$0xf] }
 0x21d   :  { %13987 = vrcp.f32 %v2112_v10  ;;  %2151 = vst [vmem:[#allocation3] sm:$0xf] %v2150_v51  ;;  %v2139_v16 = vand.u32 2147483648, %v2112_v10  ;;  %v2137_v19 = vand.u32 2147483647, %v2112_v10  ;;  %vm2133_vm3 = vweird.f32 %v2112_v10 }
 0x21e   :  { %13989 = vtanh.f32 %v2150_v51  ;;  %v13230_v51 = vld [vmem:[%s20867_s1 + $0x194] sm:$0xf]  ;;  %v10174_v14 = vor.u32 %v13282_v33, %v10173_v63  ;;  %v13210_v55 = vld [vmem:[%s20867_s1 + $0xec] sm:$0xf0]  ;;  %v10114_v46 = vor.u32 %v13262_v30, %v10111_v31  ;;  %v13303_v63 = vld [vmem:[%s20867_s1 + $0x3dc] sm:$0xf] }
 0x21f   :  { %v2140_v50 = vor.u32 1.1754944e-38, %v2139_v16  ;;  %vm2138_vm5 = vcmp.eq.f32.partialorder %v2137_v19, 8.507059e+37  ;;  %v9986_v32 = vor.u32 %v13230_v51, %v9983_v53  ;;  %v13274_v19 = vld [vmem:[%s20867_s1 + $0x2ec] sm:$0xf0]  ;;  %v13254_v51 = vld [vmem:[%s20867_s1 + $0x254] sm:$0xf] }
 0x220   :  { %v13266_v23 = vld [vmem:[%s20867_s1 + $0x2ac] sm:$0xf0]  ;;  %v10079_v53 = vld [vmem:[%s20867_s1 + $0x270] sm:$0xf0]  ;;  %v10279_v33 = vld [vmem:[%s20867_s1 + $0x3f8] sm:$0xf0] }
 0x221   :  { %v9789_v57 = vld [vmem:[%s20867_s1 + $0x10] sm:$0xf]  ;;  %v9791_v0 = vld [vmem:[%s20867_s1 + $0x30] sm:$0xf0]  ;;  %v13287_v29 = vld [vmem:[%s20867_s1 + $0x35c] sm:$0xf] }
 0x222   :  { %v10045_v61 = vld [vmem:[%s20867_s1 + $0x210] sm:$0xf]  ;;  %v13246_v1 = vld [vmem:[%s20867_s1 + $0x214] sm:$0xf]  ;;  %v10215_v39 = vld [vmem:[%s20867_s1 + $0x378] sm:$0xf0] }
 0x223   :  { %v13988_v12 = vpop.eup %13987  ;;  %v13250_v42 = vld [vmem:[%s20867_s1 + $0x22c] sm:$0xf0]  ;;  %v10047_v52 = vld [vmem:[%s20867_s1 + $0x230] sm:$0xf0] }
 0x224   :  { %v2129_v15 = vmul.f32 %v13988_v12, %v2112_v10  ;;  %vm2134_vm15 = vweird.f32 %v13988_v12  ;;  %v13990_v26 = vpop.eup %13989  ;;  %v13298_v10 = vld [vmem:[%s20867_s1 + $0x3ac] sm:$0xf0] }
 0x225   :  { %vm2135_vm4 = vmor %vm2133_vm3, %vm2134_vm15  ;;  %v10238_v60 = vor.u32 %v13298_v10, %v10237_v49  ;;  %v13190_v49 = vld [vmem:[%s20867_s1 + $0x54] sm:$0xf] }
 0x226   :  { %v2130_v56 = vsub.f32 1.0, %v2129_v15  ;;  %v9885_v15 = vld [vmem:[%s20867_s1 + $0xd0] sm:$0xf]  ;;  %v9823_v10 = vld [vmem:[%s20867_s1 + $0x70] sm:$0xf0] }
 0x228   :  { %v2131_v17 = vmul.f32 %v13988_v12, %v2130_v56  ;;  %v9922_v56 = vor.u32 %v13214_v54, %v9919_v6  ;;  %v9794_v54 = vor.u32 %v13182_v43, %v9791_v0  ;;  %v10050_v6 = vor.u32 %v13246_v1, %v10047_v52  ;;  %v13271_v43 = vld [vmem:[%s20867_s1 + $0x2dc] sm:$0xf] }
 0x229   :  { %v10151_v0 = vld [vmem:[%s20867_s1 + $0x2f8] sm:$0xf0] }
 0x22a   :  { %v2132_v20 = vadd.f32 %v13988_v12, %v2131_v17  ;;  %v10141_v17 = vld [vmem:[%s20867_s1 + $0x2d0] sm:$0xf] }
 0x22c   :  { %v2136_v21 = vsel %vm2135_vm4, %v13988_v12, %v2132_v20  ;;  %v10175_v12 = vld [vmem:[%s20867_s1 + $0x330] sm:$0xf0] }
 0x22d   :  { %v2141_v24 = vsel %vm2138_vm5, %v2140_v50, %v2136_v21  ;;  %v10178_v16 = vor.u32 %v13278_v11, %v10175_v12  ;;  %v13206_v20 = vld [vmem:[%s20867_s1 + $0xd4] sm:$0xf]  ;;  %v10022_v11 = vor.u32 %v13243_v3, %v10021_v2  ;;  %v9861_v2 = vld [vmem:[%s20867_s1 + $0x98] sm:$0xf] }
 0x22e   :  { %v2154_v25 = vrot.slane %v2141_v24, 4  ;;  %v9887_v50 = vld [vmem:[%s20867_s1 + $0xf0] sm:$0xf0]  ;;  %v13203_v3 = vld [vmem:[%s20867_s1 + $0xb4] sm:$0xf0] }
 0x22f   :  { %v13270_v21 = vld [vmem:[%s20867_s1 + $0x2d4] sm:$0xf]  ;;  %v9890_v18 = vor.u32 %v13206_v20, %v9887_v50  ;;  %v13295_v20 = vld [vmem:[%s20867_s1 + $0x39c] sm:$0xf] }
 0x230   :  { %v2156_v27 = vmul.f32 %v13990_v26, %v2154_v25  ;;  %v10143_v24 = vld [vmem:[%s20867_s1 + $0x2f0] sm:$0xf0]  ;;  %v9886_v25 = vor.u32 %v13210_v55, %v9885_v15  ;;  %v10142_v26 = vor.u32 %v13274_v19, %v10141_v17  ;;  %v10282_v55 = vor.u32 %v13303_v63, %v10279_v33  ;;  %v13231_v17 = vld [vmem:[%s20867_s1 + $0x19c] sm:$0xf] }
 0x231   :  { %v10146_v38 = vor.u32 %v13270_v21, %v10143_v24  ;;  %v9991_v19 = vld [vmem:[%s20867_s1 + $0x1b8] sm:$0xf0] }
 0x232   :  { %2157 = vst [vmem:[#allocation2] sm:$0xf] %v2156_v27  ;;  %v9853_v27 = vld [vmem:[%s20867_s1 + $0x90] sm:$0xf]  ;;  %v10247_v50 = vld [vmem:[%s20867_s1 + $0x3b8] sm:$0xf0] }
 0x233   :  { %v13263_v63 = vld [vmem:[%s20867_s1 + $0x29c] sm:$0xf] }
 0x234   :  { %v10119_v33 = vld [vmem:[%s20867_s1 + $0x2b8] sm:$0xf0] }
 0x239   :  { %v2162_v8 = vld [vmem:[#allocation2] sm:$0xf] }
 0x23a   :  { %2164 = vst [vmem:[#allocation1] ss:$4 sm:$0xff] %v2162_v8  ;;  %v13202_v8 = vld [vmem:[%s20867_s1 + $0xac] sm:$0xf0] }
 0x241   :  { %v2165_v35 = vld.sshfl [vmem:[#allocation1] sm:$0xff pattern:$0x73625140]  ;;  %v2166_v36 = vld.sshfl [vmem:[#allocation1 + $0x8] sm:$0xff pattern:$0x73625140] }
 0x242   :  { %v16209_v37 = vpack.c.bf16 %v2165_v35, %v2165_v35  ;;  %v16211_v40 = vpack.c.bf16 %v2166_v36, %v2166_v36  ;;  %v9854_v35 = vor.u32 %v13202_v8, %v9853_v27  ;;  %v10110_v36 = vor.u32 %v13266_v23, %v10109_v22  ;;  %v13223_v22 = vld [vmem:[%s20867_s1 + $0x15c] sm:$0xf] }
 0x243   :  { %v9994_v27 = vor.u32 %v13231_v17, %v9991_v19  ;;  %v10250_v8 = vor.u32 %v13295_v20, %v10247_v50  ;;  %v9959_v23 = vld [vmem:[%s20867_s1 + $0x178] sm:$0xf0] }
 0x244   :  { %2947 = vmatmul.bf16.vlgmr.msra.gmra.mxu0 %v16209_v37  ;;  %2960 = vmatmul.bf16.vlgmr.msra.gmra.mxu1 %v16211_v40  ;;  %v13255_v17 = vld [vmem:[%s20867_s1 + $0x25c] sm:$0xf] }
 0x245   :  { %2973 = vmatmul.bf16.vlgmr.msra.gmra.mxu2 %v16209_v37  ;;  %2986 = vmatmul.bf16.vlgmr.msra.gmra.mxu3 %v16211_v40  ;;  %v10087_v19 = vld [vmem:[%s20867_s1 + $0x278] sm:$0xf0] }
 0x246   :  { %3043 = vmatpush.bf16.msra.mxu0 %v10014_v41  ;;  %3056 = vmatpush.bf16.msra.mxu1 %v10270_v44  ;;  %v9821_v41 = vld [vmem:[%s20867_s1 + $0x50] sm:$0xf] }
 0x247   :  { %3069 = vmatpush.bf16.msra.mxu2 %v10018_v47  ;;  %3082 = vmatpush.bf16.msra.mxu3 %v10274_v48  ;;  %v13194_v44 = vld [vmem:[%s20867_s1 + $0x6c] sm:$0xf0] }
 0x248   :  { %v10077_v47 = vld [vmem:[%s20867_s1 + $0x250] sm:$0xf]  ;;  %v9822_v58 = vor.u32 %v13194_v44, %v9821_v41  ;;  %v9962_v41 = vor.u32 %v13223_v22, %v9959_v23  ;;  %v10218_v44 = vor.u32 %v13287_v29, %v10215_v39  ;;  %v13247_v22 = vld [vmem:[%s20867_s1 + $0x21c] sm:$0xf] }
 0x249   :  { %v13258_v48 = vld [vmem:[%s20867_s1 + $0x26c] sm:$0xf0]  ;;  %v10055_v23 = vld [vmem:[%s20867_s1 + $0x238] sm:$0xf0] }
 0x24a   :  { %3044 = vmatpush.bf16.msra.mxu0 %v9982_v59  ;;  %3057 = vmatpush.bf16.msra.mxu1 %v10238_v60  ;;  %v10078_v59 = vor.u32 %v13258_v48, %v10077_v47  ;;  %v13186_v60 = vld [vmem:[%s20867_s1 + $0x2c] sm:$0xf0]  ;;  %v13215_v47 = vld [vmem:[%s20867_s1 + $0x11c] sm:$0xf] }
 0x24b   :  { %3070 = vmatpush.bf16.msra.mxu2 %v9986_v32  ;;  %3083 = vmatpush.bf16.msra.mxu3 %v10242_v34  ;;  %v9826_v32 = vor.u32 %v13190_v49, %v9823_v10  ;;  %v10082_v34 = vor.u32 %v13254_v51, %v10079_v53  ;;  %v9790_v7 = vor.u32 %v13186_v60, %v9789_v57  ;;  %v9927_v48 = vld [vmem:[%s20867_s1 + $0x138] sm:$0xf0]  ;;  %v9893_v57 = vld [vmem:[%s20867_s1 + $0xd8] sm:$0xf] }
 0x24c   :  { %v13279_v49 = vld [vmem:[%s20867_s1 + $0x31c] sm:$0xf] }
 0x24d   :  { %v10183_v10 = vld [vmem:[%s20867_s1 + $0x338] sm:$0xf0] }
 0x24e   :  { %3045 = vmatpush.bf16.msra.mxu0 %v9950_v28  ;;  %3058 = vmatpush.bf16.msra.mxu1 %v10206_v4  ;;  %v10277_v28 = vld [vmem:[%s20867_s1 + $0x3d8] sm:$0xf]  ;;  %v10186_v60 = vor.u32 %v13279_v49, %v10183_v10 }
 0x24f   :  { %3071 = vmatpush.bf16.msra.mxu2 %v9954_v9  ;;  %3084 = vmatpush.bf16.msra.mxu3 %v10210_v62  ;;  %v13307_v4 = vld [vmem:[%s20867_s1 + $0x3f4] sm:$0xf0]  ;;  %v10046_v9 = vor.u32 %v13250_v42, %v10045_v61  ;;  %v10023_v62 = vld [vmem:[%s20867_s1 + $0x1f8] sm:$0xf0] }
 0x250   :  { %v10278_v12 = vor.u32 %v13307_v4, %v10277_v28  ;;  %v10026_v15 = vor.u32 %v13239_v5, %v10023_v62  ;;  %v10149_v61 = vld [vmem:[%s20867_s1 + $0x2d8] sm:$0xf]  ;;  %v10154_v4 = vor.u32 %v13271_v43, %v10151_v0  ;;  %v9863_v62 = vld [vmem:[%s20867_s1 + $0xb8] sm:$0xf0] }
 0x251   :  { %v13275_v42 = vld [vmem:[%s20867_s1 + $0x2f4] sm:$0xf0] }
 0x252   :  { %3046 = vmatpush.bf16.msra.mxu0 %v9918_v13  ;;  %3059 = vmatpush.bf16.msra.mxu1 %v10174_v14  ;;  %v9989_v13 = vld [vmem:[%s20867_s1 + $0x198] sm:$0xf]  ;;  %v10150_v52 = vor.u32 %v13275_v42, %v10149_v61 }
 0x253   :  { %3072 = vmatpush.bf16.msra.mxu2 %v9922_v56  ;;  %3085 = vmatpush.bf16.msra.mxu3 %v10178_v16  ;;  %v13235_v14 = vld [vmem:[%s20867_s1 + $0x1b4] sm:$0xf0] }
 0x254   :  { %2999 = vmatmul.bf16.vlgmr.msrb.gmra.mxu0 %v16209_v37  ;;  %3012 = vmatmul.bf16.vlgmr.msrb.gmra.mxu1 %v16211_v40  ;;  %v10245_v56 = vld [vmem:[%s20867_s1 + $0x398] sm:$0xf]  ;;  %v9990_v21 = vor.u32 %v13235_v14, %v9989_v13  ;;  %v10122_v14 = vor.u32 %v13263_v63, %v10119_v33  ;;  %v10768_v63 = vld [vmem:[%s20867_s1 + $0x3c0] sm:$0xf] }
 0x255   :  { %3025 = vmatmul.bf16.vlgmr.msrb.gmra.mxu2 %v16209_v37  ;;  %3038 = vmatmul.bf16.vlgmr.msrb.gmra.mxu3 %v16211_v40  ;;  %v13299_v16 = vld [vmem:[%s20867_s1 + $0x3b4] sm:$0xf0] }
 0x256   :  { %3047 = vmatpush.bf16.msra.mxu0 %v9886_v25  ;;  %3060 = vmatpush.bf16.msra.mxu1 %v10142_v26  ;;  %v10246_v24 = vor.u32 %v13299_v16, %v10245_v56  ;;  %v9957_v25 = vld [vmem:[%s20867_s1 + $0x158] sm:$0xf]  ;;  %v13191_v56 = vld [vmem:[%s20867_s1 + $0x5c] sm:$0xf] }
 0x257   :  { %3073 = vmatpush.bf16.msra.mxu2 %v9890_v18  ;;  %3086 = vmatpush.bf16.msra.mxu3 %v10146_v38  ;;  %v13227_v26 = vld [vmem:[%s20867_s1 + $0x174] sm:$0xf0]  ;;  %v9831_v16 = vld [vmem:[%s20867_s1 + $0x78] sm:$0xf0] }
 0x258   :  { %v10213_v18 = vld [vmem:[%s20867_s1 + $0x358] sm:$0xf]  ;;  %v9958_v30 = vor.u32 %v13227_v26, %v9957_v25  ;;  %v9834_v25 = vor.u32 %v13191_v56, %v9831_v16  ;;  %v10090_v26 = vor.u32 %v13255_v17, %v10087_v19  ;;  %v10480_v17 = vld [vmem:[%s20867_s1 + $0x180] sm:$0xf] }
 0x259   :  { %v13291_v38 = vld [vmem:[%s20867_s1 + $0x374] sm:$0xf0]  ;;  %v13360_v19 = vld [vmem:[%s20867_s1 + $0x19c] sm:$0xf0] }
 0x25a   :  { %3048 = vmatpush.bf16.msra.mxu0 %v9854_v35  ;;  %3061 = vmatpush.bf16.msra.mxu1 %v10110_v36  ;;  %v10214_v31 = vor.u32 %v13291_v38, %v10213_v18  ;;  %v9925_v35 = vld [vmem:[%s20867_s1 + $0x118] sm:$0xf]  ;;  %v13183_v18 = vld [vmem:[%s20867_s1 + $0x1c] sm:$0xf] }
 0x25b   :  { %3074 = vmatpush.bf16.msra.mxu2 %v9858_v45  ;;  %3087 = vmatpush.bf16.msra.mxu3 %v10114_v46  ;;  %v13219_v36 = vld [vmem:[%s20867_s1 + $0x134] sm:$0xf0]  ;;  %v9799_v38 = vld [vmem:[%s20867_s1 + $0x38] sm:$0xf0] }
 0x25c   :  { %v10181_v45 = vld [vmem:[%s20867_s1 + $0x318] sm:$0xf]  ;;  %v9926_v51 = vor.u32 %v13219_v36, %v9925_v35 }
 0x25d   :  { %v13283_v46 = vld [vmem:[%s20867_s1 + $0x334] sm:$0xf0] }
 0x25e   :  { %3049 = vmatpush.bf16.msra.mxu0 %v9822_v58  ;;  %3062 = vmatpush.bf16.msra.mxu1 %v10078_v59  ;;  %v10182_v53 = vor.u32 %v13283_v46, %v10181_v45  ;;  %v13211_v58 = vld [vmem:[%s20867_s1 + $0xf4] sm:$0xf0]  ;;  %v9930_v59 = vor.u32 %v13215_v47, %v9927_v48 }
 0x25f   :  { %3075 = vmatpush.bf16.msra.mxu2 %v9826_v32  ;;  %3088 = vmatpush.bf16.msra.mxu3 %v10082_v34  ;;  %v13207_v32 = vld [vmem:[%s20867_s1 + $0xdc] sm:$0xf]  ;;  %v9894_v1 = vor.u32 %v13211_v58, %v9893_v57  ;;  %v10117_v5 = vld [vmem:[%s20867_s1 + $0x298] sm:$0xf]  ;;  %v16592_v58 = vld [vmem:[%s20866_s0 + $0x10] sm:$0xff] }
 0x260   :  { %v9895_v34 = vld [vmem:[%s20867_s1 + $0xf8] sm:$0xf0] }
 0x261   :  { %v9898_v28 = vor.u32 %v13207_v32, %v9895_v34  ;;  %v2160_v34 = vunpack.c.l.bf16 %v16592_v58 }
 0x262   :  { %3050 = vmatpush.bf16.msra.mxu0 %v9790_v7  ;;  %3063 = vmatpush.bf16.msra.mxu1 %v10046_v9  ;;  %v13267_v7 = vld [vmem:[%s20867_s1 + $0x2b4] sm:$0xf0]  ;;  %v13199_v9 = vld [vmem:[%s20867_s1 + $0x9c] sm:$0xf] }
 0x263   :  { %3076 = vmatpush.bf16.msra.mxu2 %v9794_v54  ;;  %3089 = vmatpush.bf16.msra.mxu3 %v10050_v6  ;;  %v9862_v54 = vor.u32 %v13203_v3, %v9861_v2  ;;  %v10118_v6 = vor.u32 %v13267_v7, %v10117_v5  ;;  %v9866_v13 = vor.u32 %v13199_v9, %v9863_v62  ;;  %v10512_v9 = vld [vmem:[%s20867_s1 + $0x1c0] sm:$0xf] }
 0x264   :  { %v13368_v62 = vld [vmem:[%s20867_s1 + $0x1dc] sm:$0xf0] }
 0x265   :  { %3051 = vmatmul.bf16.vlgmr.msra.gmra.mxu0 %v16209_v37  ;;  %3064 = vmatmul.bf16.vlgmr.msra.gmra.mxu1 %v16211_v40  ;;  %v10513_v33 = vor.u32 %v13368_v62, %v10512_v9  ;;  %v13332_v9 = vld [vmem:[%s20867_s1 + $0xc4] sm:$0xf] }
 0x266   :  { %3095 = vmatpush.bf16.msrb.mxu0 %v10022_v11  ;;  %3108 = vmatpush.bf16.msrb.mxu1 %v10278_v12  ;;  %v9829_v11 = vld [vmem:[%s20867_s1 + $0x58] sm:$0xf]  ;;  %v10386_v62 = vld [vmem:[%s20867_s1 + $0xe0] sm:$0xf0] }
 0x267   :  { %3121 = vmatpush.bf16.msrb.mxu2 %v10026_v15  ;;  %3134 = vmatpush.bf16.msrb.mxu3 %v10282_v55  ;;  %v13195_v12 = vld [vmem:[%s20867_s1 + $0x74] sm:$0xf0] }
 0x268   :  { %3077 = vmatmul.bf16.vlgmr.msra.gmra.mxu2 %v16209_v37  ;;  %3090 = vmatmul.bf16.vlgmr.msra.gmra.mxu3 %v16211_v40  ;;  %v10085_v15 = vld [vmem:[%s20867_s1 + $0x258] sm:$0xf]  ;;  %v9830_v20 = vor.u32 %v13195_v12, %v9829_v11  ;;  %v10514_v11 = vld [vmem:[%s20867_s1 + $0x1e0] sm:$0xf0] }
 0x269   :  { %v13259_v55 = vld [vmem:[%s20867_s1 + $0x274] sm:$0xf0] }
 0x26a   :  { %3096 = vmatpush.bf16.msrb.mxu0 %v9990_v21  ;;  %3109 = vmatpush.bf16.msrb.mxu1 %v10246_v24  ;;  %v10086_v50 = vor.u32 %v13259_v55, %v10085_v15  ;;  %v9797_v21 = vld [vmem:[%s20867_s1 + $0x18] sm:$0xf]  ;;  %v10770_v15 = vld [vmem:[%s20867_s1 + $0x3e0] sm:$0xf0] }
 0x26b   :  { %3122 = vmatpush.bf16.msrb.mxu2 %v9994_v27  ;;  %3135 = vmatpush.bf16.msrb.mxu3 %v10250_v8  ;;  %v13187_v24 = vld [vmem:[%s20867_s1 + $0x34] sm:$0xf0] }
 0x26c   :  { %v10053_v27 = vld [vmem:[%s20867_s1 + $0x218] sm:$0xf]  ;;  %v9798_v29 = vor.u32 %v13187_v24, %v9797_v21  ;;  %v10481_v24 = vor.u32 %v13360_v19, %v10480_v17  ;;  %v13392_v17 = vld [vmem:[%s20867_s1 + $0x29c] sm:$0xf0]  ;;  %v13324_v19 = vld [vmem:[%s20867_s1 + $0x84] sm:$0xf] }
 0x26d   :  { %v13251_v8 = vld [vmem:[%s20867_s1 + $0x234] sm:$0xf0] }
 0x26e   :  { %3097 = vmatpush.bf16.msrb.mxu0 %v9958_v30  ;;  %3110 = vmatpush.bf16.msrb.mxu1 %v10214_v31  ;;  %v10054_v39 = vor.u32 %v13251_v8, %v10053_v27  ;;  %v9802_v30 = vor.u32 %v13183_v18, %v9799_v38  ;;  %v10058_v31 = vor.u32 %v13247_v22, %v10055_v23  ;;  %v13356_v27 = vld [vmem:[%s20867_s1 + $0x184] sm:$0xf] }
 0x26f   :  { %3123 = vmatpush.bf16.msrb.mxu2 %v9962_v41  ;;  %3136 = vmatpush.bf16.msrb.mxu3 %v10218_v44  ;;  %v10482_v8 = vld [vmem:[%s20867_s1 + $0x1a0] sm:$0xf0] }
 0x270   :  { %v10485_v38 = vor.u32 %v13356_v27, %v10482_v8  ;;  %v13420_v22 = vld [vmem:[%s20867_s1 + $0x384] sm:$0xf]  ;;  %v10320_v8 = vld [vmem:[%s20867_s1 + $0x40] sm:$0xf] }
 0x271   :  { %v10738_v23 = vld [vmem:[%s20867_s1 + $0x3a0] sm:$0xf0] }
 0x272   :  { %3098 = vmatpush.bf16.msrb.mxu0 %v9926_v51  ;;  %3111 = vmatpush.bf16.msrb.mxu1 %v10182_v53 }
 0x273   :  { %3124 = vmatpush.bf16.msrb.mxu2 %v9930_v59  ;;  %3137 = vmatpush.bf16.msrb.mxu3 %v10186_v60 }
 0x276   :  { %3099 = vmatpush.bf16.msrb.mxu0 %v9894_v1  ;;  %3112 = vmatpush.bf16.msrb.mxu1 %v10150_v52 }
 0x277   :  { %3125 = vmatpush.bf16.msrb.mxu2 %v9898_v28  ;;  %3138 = vmatpush.bf16.msrb.mxu3 %v10154_v4 }
 0x27a   :  { %3100 = vmatpush.bf16.msrb.mxu0 %v9862_v54  ;;  %3113 = vmatpush.bf16.msrb.mxu1 %v10118_v6  ;;  %v13432_v54 = vld [vmem:[%s20867_s1 + $0x3dc] sm:$0xf0]  ;;  %v13364_v6 = vld [vmem:[%s20867_s1 + $0x1c4] sm:$0xf] }
 0x27b   :  { %3126 = vmatpush.bf16.msrb.mxu2 %v9866_v13  ;;  %3139 = vmatpush.bf16.msrb.mxu3 %v10122_v14  ;;  %v10769_v12 = vor.u32 %v13432_v54, %v10768_v63  ;;  %v10517_v13 = vor.u32 %v13364_v6, %v10514_v11  ;;  %v13428_v14 = vld [vmem:[%s20867_s1 + $0x3c4] sm:$0xf] }
 0x27c   :  { %v10773_v55 = vor.u32 %v13428_v14, %v10770_v15  ;;  %v13396_v54 = vld [vmem:[%s20867_s1 + $0x2c4] sm:$0xf]  ;;  %v13328_v14 = vld [vmem:[%s20867_s1 + $0x9c] sm:$0xf0] }
 0x27d   :  { %v10642_v6 = vld [vmem:[%s20867_s1 + $0x2e0] sm:$0xf0]  ;;  %v10608_v15 = vld [vmem:[%s20867_s1 + $0x280] sm:$0xf] }
 0x27e   :  { %3101 = vmatpush.bf16.msrb.mxu0 %v9830_v20  ;;  %3114 = vmatpush.bf16.msrb.mxu1 %v10086_v50 }
 0x27f   :  { %3127 = vmatpush.bf16.msrb.mxu2 %v9834_v25  ;;  %3140 = vmatpush.bf16.msrb.mxu3 %v10090_v26  ;;  %v10736_v25 = vld [vmem:[%s20867_s1 + $0x380] sm:$0xf] }
 0x280   :  { %v13424_v26 = vld [vmem:[%s20867_s1 + $0x39c] sm:$0xf0] }
 0x281   :  { %v10737_v18 = vor.u32 %v13424_v26, %v10736_v25  ;;  %v13388_v25 = vld [vmem:[%s20867_s1 + $0x284] sm:$0xf] }
 0x282   :  { %3102 = vmatpush.bf16.msrb.mxu0 %v9798_v29  ;;  %3115 = vmatpush.bf16.msrb.mxu1 %v10054_v39  ;;  %v10741_v39 = vor.u32 %v13420_v22, %v10738_v23  ;;  %v10610_v26 = vld [vmem:[%s20867_s1 + $0x2a0] sm:$0xf0] }
 0x283   :  { %3128 = vmatpush.bf16.msrb.mxu2 %v9802_v30  ;;  %3141 = vmatpush.bf16.msrb.mxu3 %v10058_v31  ;;  %v10448_v30 = vld [vmem:[%s20867_s1 + $0x140] sm:$0xf]  ;;  %v10613_v27 = vor.u32 %v13388_v25, %v10610_v26  ;;  %v13357_v25 = vld [vmem:[%s20867_s1 + $0x18c] sm:$0xf] }
 0x284   :  { %v13352_v31 = vld [vmem:[%s20867_s1 + $0x15c] sm:$0xf0]  ;;  %v10490_v26 = vld [vmem:[%s20867_s1 + $0x1a8] sm:$0xf0] }
 0x285   :  { %3103 = vmatmul.bf16.vlgmr.msrb.gmra.mxu0 %v16209_v37  ;;  %3116 = vmatmul.bf16.vlgmr.msrb.gmra.mxu1 %v16211_v40 }
 0x286   :  { %3129 = vmatmul.bf16.vlgmr.msrb.gmra.mxu2 %v16209_v37  ;;  %3142 = vmatmul.bf16.vlgmr.msrb.gmra.mxu3 %v16211_v40 }
 0x287   :  { %4005 = vmatpush.bf16.msra.mxu0 %v10513_v33  ;;  %4018 = vmatpush.bf16.msra.mxu1 %v10769_v12  ;;  %v10389_v33 = vor.u32 %v13332_v9, %v10386_v62  ;;  %v10645_v12 = vor.u32 %v13396_v54, %v10642_v6  ;;  %v13429_v6 = vld [vmem:[%s20867_s1 + $0x3cc] sm:$0xf] }
 0x288   :  { %4031 = vmatpush.bf16.msra.mxu2 %v10517_v13  ;;  %4044 = vmatpush.bf16.msra.mxu3 %v10773_v55  ;;  %v10352_v13 = vld [vmem:[%s20867_s1 + $0x80] sm:$0xf] }
 0x289   :  { %v10353_v55 = vor.u32 %v13328_v14, %v10352_v13 }
 0x28b   :  { %4006 = vmatpush.bf16.msra.mxu0 %v10481_v24  ;;  %4019 = vmatpush.bf16.msra.mxu1 %v10737_v18  ;;  %v13320_v18 = vld [vmem:[%s20867_s1 + $0x5c] sm:$0xf0] }
 0x28c   :  { %4032 = vmatpush.bf16.msra.mxu2 %v10485_v38  ;;  %4045 = vmatpush.bf16.msra.mxu3 %v10741_v39  ;;  %v10576_v38 = vld [vmem:[%s20867_s1 + $0x240] sm:$0xf]  ;;  %v10321_v23 = vor.u32 %v13320_v18, %v10320_v8 }
 0x28d   :  { %v13384_v39 = vld [vmem:[%s20867_s1 + $0x25c] sm:$0xf0] }
 0x2c1   :  { %v2948_v35 = vpop.f32.mrf.mxu0  ;;  %v2961_v36 = vpop.f32.mrf.mxu1 }
 0x2c2   :  { %v2962_v42 = vadd.f32 %v2961_v36, %v2948_v35  ;;  %v10449_v35 = vor.u32 %v13352_v31, %v10448_v30  ;;  %v10704_v36 = vld [vmem:[%s20867_s1 + $0x340] sm:$0xf]  ;;  %v13316_v30 = vld [vmem:[%s20867_s1 + $0x44] sm:$0xf] }
 0x2c3   :  { %v10322_v31 = vld [vmem:[%s20867_s1 + $0x60] sm:$0xf0] }
 0x2c4   :  { %4007 = vmatpush.bf16.msra.mxu0 %v10449_v35 }
 0x2c8   :  { %v2974_v41 = vpop.f32.mrf.mxu2  ;;  %v2987_v44 = vpop.f32.mrf.mxu3 }
 0x2c9   :  { %v2950_v45 = vpop.f32.mrf.mxu0  ;;  %v2963_v46 = vpop.f32.mrf.mxu1  ;;  %v2988_v51 = vadd.f32 %v2987_v44, %v2974_v41  ;;  %v13416_v41 = vld [vmem:[%s20867_s1 + $0x35c] sm:$0xf0]  ;;  %v13348_v44 = vld [vmem:[%s20867_s1 + $0x144] sm:$0xf] }
 0x2ca   :  { %v10705_v45 = vor.u32 %v13416_v41, %v10704_v36  ;;  %v10450_v46 = vld [vmem:[%s20867_s1 + $0x160] sm:$0xf0] }
 0x2cb   :  { %v3155_v40 = vrot.slane %v2988_v51, 6 }
 0x2cc   :  { %4020 = vmatpush.bf16.msra.mxu1 %v10705_v45  ;;  %v10578_v45 = vld [vmem:[%s20867_s1 + $0x260] sm:$0xf0] }
 0x2cd   :  { %v3161_v0 = vsel %vm1026_vm1, %v2962_v42, %v3155_v40  ;;  %v10672_v40 = vld [vmem:[%s20867_s1 + $0x300] sm:$0xf]  ;;  %v10418_v42 = vld [vmem:[%s20867_s1 + $0x120] sm:$0xf0] }
 0x2d0   :  { %v2976_v47 = vpop.f32.mrf.mxu2  ;;  %v2989_v48 = vpop.f32.mrf.mxu3 }
 0x2d1   :  { %v3000_v49 = vpop.f32.mrf.mxu0  ;;  %v3013_v10 = vpop.f32.mrf.mxu1  ;;  %v13412_v47 = vld [vmem:[%s20867_s1 + $0x344] sm:$0xf] }
 0x2d2   :  { %v3014_v53 = vadd.f32 %v3013_v10, %v3000_v49  ;;  %v10706_v48 = vld [vmem:[%s20867_s1 + $0x360] sm:$0xf0]  ;;  %v10453_v49 = vor.u32 %v13348_v44, %v10450_v46 }
 0x2d3   :  { %v10709_v10 = vor.u32 %v13412_v47, %v10706_v48  ;;  %v13380_v44 = vld [vmem:[%s20867_s1 + $0x244] sm:$0xf]  ;;  %v10288_v47 = vld [vmem:[%s20867_s1] sm:$0xf] }
 0x2d4   :  { %v3156_v32 = vrot.slane %v3014_v53, 4  ;;  %4033 = vmatpush.bf16.msra.mxu2 %v10453_v49  ;;  %v10581_v46 = vor.u32 %v13380_v44, %v10578_v45  ;;  %v13312_v48 = vld [vmem:[%s20867_s1 + $0x1c] sm:$0xf0]  ;;  %v13417_v45 = vld [vmem:[%s20867_s1 + $0x364] sm:$0xf0] }
 0x2d5   :  { %4046 = vmatpush.bf16.msra.mxu3 %v10709_v10  ;;  %v10544_v49 = vld [vmem:[%s20867_s1 + $0x200] sm:$0xf] }
 0x2d8   :  { %v3026_v57 = vpop.f32.mrf.mxu2  ;;  %v3039_v37 = vpop.f32.mrf.mxu3 }
 0x2d9   :  { %v3040_v59 = vadd.f32 %v3039_v37, %v3026_v57  ;;  %v3002_v60 = vpop.f32.mrf.mxu0  ;;  %v3015_v61 = vpop.f32.mrf.mxu1  ;;  %v10416_v57 = vld [vmem:[%s20867_s1 + $0x100] sm:$0xf] }
 0x2da   :  { %v13344_v37 = vld [vmem:[%s20867_s1 + $0x11c] sm:$0xf0]  ;;  %v13340_v61 = vld [vmem:[%s20867_s1 + $0x104] sm:$0xf] }
 0x2db   :  { %v3157_v43 = vrot.slane %v3040_v59, 2  ;;  %v10417_v59 = vor.u32 %v13344_v37, %v10416_v57  ;;  %v13408_v60 = vld [vmem:[%s20867_s1 + $0x31c] sm:$0xf0]  ;;  %v13308_v37 = vld [vmem:[%s20867_s1 + $0x4] sm:$0xf] }
 0x2dc   :  { %v13376_v57 = vld [vmem:[%s20867_s1 + $0x21c] sm:$0xf0] }
 0x2dd   :  { %v3162_v1 = vsel %vm1028_vm0, %v3156_v32, %v3157_v43  ;;  %v10673_v32 = vor.u32 %v13408_v60, %v10672_v40  ;;  %v13404_v43 = vld [vmem:[%s20867_s1 + $0x304] sm:$0xf]  ;;  %4008 = vmatpush.bf16.msra.mxu0 %v10417_v59  ;;  %v10545_v59 = vor.u32 %v13376_v57, %v10544_v49 }
 0x2de   :  { %v3163_v52 = vsel %vm1030_vm2, %v3161_v0, %v3162_v1  ;;  %v10674_v0 = vld [vmem:[%s20867_s1 + $0x320] sm:$0xf0] }
 0x2df   :  { %v3169_v2 = vadd.f32 %v3163_v52, %v2160_v34  ;;  %v10421_v34 = vor.u32 %v13340_v61, %v10418_v42  ;;  %v10677_v1 = vor.u32 %v13404_v43, %v10674_v0  ;;  %v10384_v52 = vld [vmem:[%s20867_s1 + $0xc0] sm:$0xf]  ;;  %4021 = vmatpush.bf16.msra.mxu1 %v10673_v32  ;;  %v10290_v60 = vld [vmem:[%s20867_s1 + $0x20] sm:$0xf0]  ;;  %v10520_v43 = vld [vmem:[%s20867_s1 + $0x1c8] sm:$0xf] }
 0x2e0   :  { %v3028_v3 = vpop.f32.mrf.mxu2  ;;  %v3041_v28 = vpop.f32.mrf.mxu3  ;;  %v13372_v61 = vld [vmem:[%s20867_s1 + $0x204] sm:$0xf]  ;;  %v10293_v32 = vor.u32 %v13308_v37, %v10290_v60  ;;  %v13369_v0 = vld [vmem:[%s20867_s1 + $0x1e4] sm:$0xf0] }
 0x2e1   :  { %v10283_v4 = vmul.f32 -1.442695, %v3169_v2  ;;  %v13336_v2 = vld [vmem:[%s20867_s1 + $0xdc] sm:$0xf0]  ;;  %4034 = vmatpush.bf16.msra.mxu2 %v10421_v34  ;;  %4047 = vmatpush.bf16.msra.mxu3 %v10677_v1  ;;  %v10546_v42 = vld [vmem:[%s20867_s1 + $0x220] sm:$0xf0] }
 0x2e2   :  { %v16598_v5 = vpop.f32.mrf.mxu0  ;;  %v16600_v7 = vpop.f32.mrf.mxu1  ;;  %v10640_v3 = vld [vmem:[%s20867_s1 + $0x2c0] sm:$0xf]  ;;  %v10385_v28 = vor.u32 %v13336_v2, %v10384_v52  ;;  %v10549_v34 = vor.u32 %v13372_v61, %v10546_v42  ;;  %v10776_v1 = vld [vmem:[%s20867_s1 + $0x3c8] sm:$0xf]  ;;  %v10521_v2 = vor.u32 %v13369_v0, %v10520_v43  ;;  %v13341_v43 = vld [vmem:[%s20867_s1 + $0x10c] sm:$0xf] }
 0x2e3   :  { %13991 = vpow2.f32 %v10283_v4  ;;  %v13400_v4 = vld [vmem:[%s20867_s1 + $0x2dc] sm:$0xf0]  ;;  %v3066_v9 = vadd.f32 %v16600_v7, %v16598_v5  ;;  %v10488_v5 = vld [vmem:[%s20867_s1 + $0x188] sm:$0xf] }
 0x2e4   :  { %v10641_v63 = vor.u32 %v13400_v4, %v10640_v3  ;;  %4009 = vmatpush.bf16.msra.mxu0 %v10385_v28  ;;  %v13433_v3 = vld [vmem:[%s20867_s1 + $0x3e4] sm:$0xf0]  ;;  %v13365_v28 = vld [vmem:[%s20867_s1 + $0x1cc] sm:$0xf] }
 0x2e5   :  { %4035 = vmatpush.bf16.msra.mxu2 %v10389_v33  ;;  %4048 = vmatpush.bf16.msra.mxu3 %v10645_v12  ;;  %v10522_v4 = vld [vmem:[%s20867_s1 + $0x1e8] sm:$0xf0]  ;;  %v10777_v33 = vor.u32 %v13433_v3, %v10776_v1  ;;  %v13345_v60 = vld [vmem:[%s20867_s1 + $0x124] sm:$0xf0] }
 0x2e6   :  { %4022 = vmatpush.bf16.msra.mxu1 %v10641_v63  ;;  %v10525_v54 = vor.u32 %v13365_v28, %v10522_v4  ;;  %v10778_v12 = vld [vmem:[%s20867_s1 + $0x3e8] sm:$0xf0]  ;;  %v10680_v61 = vld [vmem:[%s20867_s1 + $0x308] sm:$0xf] }
 0x2e7   :  { %v10426_v1 = vld [vmem:[%s20867_s1 + $0x128] sm:$0xf0] }
 0x2e8   :  { %4010 = vmatpush.bf16.msra.mxu0 %v10353_v55  ;;  %v10781_v55 = vor.u32 %v13429_v6, %v10778_v12  ;;  %v10429_v28 = vor.u32 %v13341_v43, %v10426_v1  ;;  %v13333_v6 = vld [vmem:[%s20867_s1 + $0xcc] sm:$0xf] }
 0x2e9   :  { %v13992_v20 = vpop.eup %13991  ;;  %4049 = vmatpush.bf16.msra.mxu3 %v10613_v27  ;;  %v13421_v27 = vld [vmem:[%s20867_s1 + $0x38c] sm:$0xf] }
 0x2ea   :  { %v3054_v50 = vpop.f32.mrf.mxu0  ;;  %v3067_v21 = vpop.f32.mrf.mxu1  ;;  %v16654_v29 = vadd.f32 1.0, %v13992_v20  ;;  %v10354_v20 = vld [vmem:[%s20867_s1 + $0xa0] sm:$0xf0]  ;;  %v10394_v12 = vld [vmem:[%s20867_s1 + $0xe8] sm:$0xf0] }
 0x2eb   :  { %v16626_v56 = vpop.f32.mrf.mxu2  ;;  %v16628_v16 = vpop.f32.mrf.mxu3  ;;  %v10609_v21 = vor.u32 %v13392_v17, %v10608_v15  ;;  %v10357_v24 = vor.u32 %v13324_v19, %v10354_v20  ;;  %v13361_v17 = vld [vmem:[%s20867_s1 + $0x1a4] sm:$0xf0] }
 0x2ec   :  { %13993 = vrcp.f32 %v16654_v29  ;;  %v16768_v22 = vadd.f32 %v16628_v16, %v16626_v56  ;;  %v10577_v56 = vor.u32 %v13384_v39, %v10576_v38  ;;  %v10325_v16 = vor.u32 %v13316_v30, %v10322_v31  ;;  %4011 = vmatpush.bf16.msra.mxu0 %v10321_v23  ;;  %v10744_v19 = vld [vmem:[%s20867_s1 + $0x388] sm:$0xf]  ;;  %v10746_v39 = vld [vmem:[%s20867_s1 + $0x3a8] sm:$0xf0] }
 0x2ed   :  { %4023 = vmatpush.bf16.msra.mxu1 %v10609_v21  ;;  %4036 = vmatpush.bf16.msra.mxu2 %v10357_v24  ;;  %v13425_v20 = vld [vmem:[%s20867_s1 + $0x3a4] sm:$0xf0]  ;;  %vm3184_vm7 = vweird.f32 %v16654_v29  ;;  %v10489_v21 = vor.u32 %v13361_v17, %v10488_v5  ;;  %v3188_v38 = vand.u32 2147483647, %v16654_v29  ;;  %v10493_v23 = vor.u32 %v13357_v25, %v10490_v26 }
 0x2ee   :  { %v3158_v10 = vrot.slane %v16768_v22, 6  ;;  %4050 = vmatpush.bf16.msra.mxu3 %v10581_v46  ;;  %v10745_v24 = vor.u32 %v13425_v20, %v10744_v19  ;;  %v10749_v30 = vor.u32 %v13421_v27, %v10746_v39  ;;  %v10456_v31 = vld [vmem:[%s20867_s1 + $0x148] sm:$0xf]  ;;  %v13349_v46 = vld [vmem:[%s20867_s1 + $0x14c] sm:$0xf] }
 0x2ef   :  { %v10458_v22 = vld [vmem:[%s20867_s1 + $0x168] sm:$0xf0]  ;;  %vm3189_vm9 = vcmp.eq.f32.partialorder %v3188_v38, 8.507059e+37  ;;  %v13393_v27 = vld [vmem:[%s20867_s1 + $0x2a4] sm:$0xf0] }
 0x2f0   :  { %v10461_v49 = vor.u32 %v13349_v46, %v10458_v22  ;;  %v10330_v46 = vld [vmem:[%s20867_s1 + $0x68] sm:$0xf0] }
 0x2f1   :  { %4024 = vmatpush.bf16.msra.mxu1 %v10577_v56  ;;  %4037 = vmatpush.bf16.msra.mxu2 %v10325_v16 }
 0x2f2   :  { %v16729_v11 = vpop.eup %13993  ;;  %4051 = vmatpush.bf16.msra.mxu3 %v10549_v34  ;;  %v13409_v34 = vld [vmem:[%s20867_s1 + $0x324] sm:$0xf0] }
 0x2f3   :  { %v3080_v51 = vpop.f32.mrf.mxu2  ;;  %v3093_v53 = vpop.f32.mrf.mxu3  ;;  %v3180_v50 = vmul.f32 %v16729_v11, %v16654_v29  ;;  %vm3185_vm6 = vweird.f32 %v16729_v11  ;;  %v10681_v0 = vor.u32 %v13409_v34, %v10680_v61 }
 0x2f4   :  { %v3190_v51 = vand.u32 2147483648, %v16654_v29  ;;  %v10289_v53 = vor.u32 %v13312_v48, %v10288_v47  ;;  %vm16865_vm8 = vmor %vm3184_vm7, %vm3185_vm6 }
 0x2f5   :  { %v3181_v35 = vsub.f32 1.0, %v3180_v50  ;;  %4025 = vmatpush.bf16.msra.mxu1 %v10545_v59  ;;  %4038 = vmatpush.bf16.msra.mxu2 %v10293_v32  ;;  %v2161_v50 = vunpack.c.h.bf16 %v16592_v58 }
 0x2f6   :  { %4012 = vmatpush.bf16.msra.mxu0 %v10289_v53  ;;  %4096 = vmatpush.bf16.msrb.mxu3 %v10781_v55  ;;  %v3191_v48 = vor.u32 1.1754944e-38, %v3190_v51  ;;  %v10714_v53 = vld [vmem:[%s20867_s1 + $0x368] sm:$0xf0]  ;;  %v10424_v51 = vld [vmem:[%s20867_s1 + $0x108] sm:$0xf] }
 0x2f7   :  { %v3182_v40 = vmul.f32 %v16729_v11, %v3181_v35  ;;  %v13353_v35 = vld [vmem:[%s20867_s1 + $0x164] sm:$0xf0]  ;;  %v10425_v32 = vor.u32 %v13345_v60, %v10424_v51  ;;  %v3210_v55 = vld [vmem:[#allocation3] sm:$0xf] }
 0x2f8   :  { %v10457_v44 = vor.u32 %v13353_v35, %v10456_v31  ;;  %v10618_v31 = vld [vmem:[%s20867_s1 + $0x2a8] sm:$0xf0] }
 0x2f9   :  { %v3183_v13 = vadd.f32 %v16729_v11, %v3182_v40  ;;  %4070 = vmatpush.bf16.msrb.mxu1 %v10777_v33  ;;  %4083 = vmatpush.bf16.msrb.mxu2 %v10525_v54  ;;  %v13401_v54 = vld [vmem:[%s20867_s1 + $0x2e4] sm:$0xf0]  ;;  %v13373_v51 = vld [vmem:[%s20867_s1 + $0x20c] sm:$0xf] }
 0x2fa   :  { %4057 = vmatpush.bf16.msrb.mxu0 %v10521_v2  ;;  %4097 = vmatpush.bf16.msrb.mxu3 %v10749_v30  ;;  %v10682_v2 = vld [vmem:[%s20867_s1 + $0x328] sm:$0xf0] }
 0x2fb   :  { %v3187_v16 = vsel %vm16865_vm8, %v16729_v11, %v3183_v13  ;;  %v13397_v13 = vld [vmem:[%s20867_s1 + $0x2cc] sm:$0xf] }
 0x2fc   :  { %v3192_v40 = vsel %vm3189_vm9, %v3191_v48, %v3187_v16  ;;  %v13389_v30 = vld [vmem:[%s20867_s1 + $0x28c] sm:$0xf] }
 0x2fd   :  { %4071 = vmatpush.bf16.msrb.mxu1 %v10745_v24  ;;  %4084 = vmatpush.bf16.msrb.mxu2 %v10493_v23  ;;  %v3212_v3 = vrot.slane %v3192_v40, 4  ;;  %v10616_v24 = vld [vmem:[%s20867_s1 + $0x288] sm:$0xf]  ;;  %v10621_v35 = vor.u32 %v13389_v30, %v10618_v31  ;;  %v13381_v48 = vld [vmem:[%s20867_s1 + $0x24c] sm:$0xf] }
 0x2fe   :  { %4058 = vmatpush.bf16.msrb.mxu0 %v10489_v21  ;;  %v13329_v21 = vld [vmem:[%s20867_s1 + $0xa4] sm:$0xf0]  ;;  %v10617_v23 = vor.u32 %v13393_v27, %v10616_v24  ;;  %v10554_v60 = vld [vmem:[%s20867_s1 + $0x228] sm:$0xf0]  ;;  %v10754_v30 = vld [vmem:[%s20867_s1 + $0x3b0] sm:$0xf0] }
 0x2ff   :  { %v3214_v19 = vmul.f32 %v3212_v3, %v3210_v55  ;;  %v10557_v43 = vor.u32 %v13373_v51, %v10554_v60  ;;  %v10786_v55 = vld [vmem:[%s20867_s1 + $0x3f0] sm:$0xf0] }
 0x300   :  { %v10434_v51 = vld [vmem:[%s20867_s1 + $0x130] sm:$0xf0] }
 0x301   :  { %4085 = vmatpush.bf16.msrb.mxu2 %v10461_v49  ;;  %v13406_v60 = vld [vmem:[%s20867_s1 + $0x314] sm:$0xf] }
 0x302   :  { %v3104_v36 = vpop.f32.mrf.mxu0  ;;  %v3117_v41 = vpop.f32.mrf.mxu1  ;;  %4059 = vmatpush.bf16.msrb.mxu0 %v10457_v44  ;;  %v13385_v44 = vld [vmem:[%s20867_s1 + $0x264] sm:$0xf0] }
 0x303   :  { %v3118_v52 = vadd.f32 %v3117_v41, %v3104_v36  ;;  %v10712_v36 = vld [vmem:[%s20867_s1 + $0x348] sm:$0xf]  ;;  %v3164_v41 = vsel %vm1026_vm1, %v3066_v9, %v3158_v10  ;;  %v13413_v10 = vld [vmem:[%s20867_s1 + $0x34c] sm:$0xf] }
 0x304   :  { %v10713_v11 = vor.u32 %v13417_v45, %v10712_v36  ;;  %v10717_v37 = vor.u32 %v13413_v10, %v10714_v53  ;;  %v10392_v9 = vld [vmem:[%s20867_s1 + $0xc8] sm:$0xf]  ;;  %v13317_v45 = vld [vmem:[%s20867_s1 + $0x4c] sm:$0xf] }
 0x305   :  { %v3159_v8 = vrot.slane %v3118_v52, 4  ;;  %v13405_v52 = vld [vmem:[%s20867_s1 + $0x30c] sm:$0xf]  ;;  %4086 = vmatpush.bf16.msrb.mxu2 %v10429_v28  ;;  %v10328_v36 = vld [vmem:[%s20867_s1 + $0x48] sm:$0xf] }
 0x306   :  { %4072 = vmatpush.bf16.msrb.mxu1 %v10713_v11  ;;  %4098 = vmatpush.bf16.msrb.mxu3 %v10717_v37  ;;  %v10685_v4 = vor.u32 %v13405_v52, %v10682_v2  ;;  %v10586_v11 = vld [vmem:[%s20867_s1 + $0x268] sm:$0xf0]  ;;  %v10296_v10 = vld [vmem:[%s20867_s1 + $0x8] sm:$0xf] }
 0x307   :  { %4060 = vmatpush.bf16.msrb.mxu0 %v10425_v32  ;;  %v10589_v49 = vor.u32 %v13381_v48, %v10586_v11  ;;  %v13313_v53 = vld [vmem:[%s20867_s1 + $0x24] sm:$0xf0]  ;;  %v10722_v48 = vld [vmem:[%s20867_s1 + $0x370] sm:$0xf0] }
 0x308   :  { %v13377_v37 = vld [vmem:[%s20867_s1 + $0x224] sm:$0xf0] }
 0x309   :  { %v3130_v62 = vpop.f32.mrf.mxu2  ;;  %v3143_v63 = vpop.f32.mrf.mxu3 }
 0x30a   :  { %v3144_v7 = vadd.f32 %v3143_v63, %v3130_v62  ;;  %v3106_v14 = vpop.f32.mrf.mxu0  ;;  %v3119_v15 = vpop.f32.mrf.mxu1  ;;  %v13337_v62 = vld [vmem:[%s20867_s1 + $0xe4] sm:$0xf0]  ;;  %4073 = vmatpush.bf16.msrb.mxu1 %v10681_v0  ;;  %4099 = vmatpush.bf16.msrb.mxu3 %v10685_v4 }
 0x30b   :  { %v10648_v63 = vld [vmem:[%s20867_s1 + $0x2c8] sm:$0xf]  ;;  %v10393_v33 = vor.u32 %v13337_v62, %v10392_v9  ;;  %v10650_v14 = vld [vmem:[%s20867_s1 + $0x2e8] sm:$0xf0] }
 0x30c   :  { %v3160_v18 = vrot.slane %v3144_v7, 2  ;;  %v10649_v5 = vor.u32 %v13401_v54, %v10648_v63  ;;  %v10397_v7 = vor.u32 %v13333_v6, %v10394_v12  ;;  %v10653_v17 = vor.u32 %v13397_v13, %v10650_v14  ;;  %v10528_v6 = vld [vmem:[%s20867_s1 + $0x1d0] sm:$0xf]  ;;  %v13366_v13 = vld [vmem:[%s20867_s1 + $0x1d4] sm:$0xf] }
 0x30d   :  { %4061 = vmatpush.bf16.msrb.mxu0 %v10393_v33  ;;  %v13370_v12 = vld [vmem:[%s20867_s1 + $0x1ec] sm:$0xf0]  ;;  %v10530_v14 = vld [vmem:[%s20867_s1 + $0x1f0] sm:$0xf0] }
 0x30e   :  { %v3165_v56 = vsel %vm1028_vm0, %v3159_v8, %v3160_v18  ;;  %v13325_v8 = vld [vmem:[%s20867_s1 + $0x8c] sm:$0xf]  ;;  %4074 = vmatpush.bf16.msrb.mxu1 %v10649_v5  ;;  %4087 = vmatpush.bf16.msrb.mxu2 %v10397_v7  ;;  %v10784_v5 = vld [vmem:[%s20867_s1 + $0x3d0] sm:$0xf]  ;;  %v10533_v27 = vor.u32 %v13366_v13, %v10530_v14  ;;  %v13326_v13 = vld [vmem:[%s20867_s1 + $0x94] sm:$0xf] }
 0x30f   :  { %v3166_v47 = vsel %vm1030_vm2, %v3164_v41, %v3165_v56  ;;  %v10362_v18 = vld [vmem:[%s20867_s1 + $0xa8] sm:$0xf0]  ;;  %4100 = vmatpush.bf16.msrb.mxu3 %v10653_v17  ;;  %v13321_v41 = vld [vmem:[%s20867_s1 + $0x64] sm:$0xf0]  ;;  %v13434_v7 = vld [vmem:[%s20867_s1 + $0x3ec] sm:$0xf0] }
 0x310   :  { %v3170_v57 = vadd.f32 %v3166_v47, %v2161_v50  ;;  %v10360_v50 = vld [vmem:[%s20867_s1 + $0x88] sm:$0xf]  ;;  %v10365_v39 = vor.u32 %v13325_v8, %v10362_v18  ;;  %v10329_v16 = vor.u32 %v13321_v41, %v10328_v36  ;;  %v10333_v47 = vor.u32 %v13317_v45, %v10330_v46  ;;  %v10752_v18 = vld [vmem:[%s20867_s1 + $0x390] sm:$0xf]  ;;  %v13350_v46 = vld [vmem:[%s20867_s1 + $0x154] sm:$0xf] }
 0x311   :  { %v3132_v59 = vpop.f32.mrf.mxu2  ;;  %v3145_v29 = vpop.f32.mrf.mxu3  ;;  %v10361_v26 = vor.u32 %v13329_v21, %v10360_v50  ;;  %v10584_v56 = vld [vmem:[%s20867_s1 + $0x248] sm:$0xf]  ;;  %v10529_v21 = vor.u32 %v13370_v12, %v10528_v6  ;;  %v10785_v24 = vor.u32 %v13434_v7, %v10784_v5  ;;  %v10464_v36 = vld [vmem:[%s20867_s1 + $0x150] sm:$0xf]  ;;  %v10370_v14 = vld [vmem:[%s20867_s1 + $0xb0] sm:$0xf0] }
 0x312   :  { %v10284_v42 = vmul.f32 -1.442695, %v3170_v57  ;;  %13995 = vtanh.f32 %v3170_v57  ;;  %4075 = vmatpush.bf16.msrb.mxu1 %v10617_v23  ;;  %4088 = vmatpush.bf16.msrb.mxu2 %v10365_v39  ;;  %v10585_v22 = vor.u32 %v13385_v44, %v10584_v56  ;;  %v10552_v57 = vld [vmem:[%s20867_s1 + $0x208] sm:$0xf]  ;;  %v10298_v59 = vld [vmem:[%s20867_s1 + $0x28] sm:$0xf0]  ;;  %v10297_v29 = vor.u32 %v13313_v53, %v10296_v10 }
 0x313   :  { %4062 = vmatpush.bf16.msrb.mxu0 %v10361_v26  ;;  %4101 = vmatpush.bf16.msrb.mxu3 %v10621_v35  ;;  %v13362_v26 = vld [vmem:[%s20867_s1 + $0x1ac] sm:$0xf0]  ;;  %v10498_v23 = vld [vmem:[%s20867_s1 + $0x1b0] sm:$0xf0] }
 0x314   :  { %13997 = vpow2.f32 %v10284_v42  ;;  %v10553_v42 = vor.u32 %v13377_v37, %v10552_v57  ;;  %v13422_v39 = vld [vmem:[%s20867_s1 + $0x394] sm:$0xf]  ;;  %v13354_v41 = vld [vmem:[%s20867_s1 + $0x16c] sm:$0xf0] }
 0x315   :  { %v10720_v44 = vld [vmem:[%s20867_s1 + $0x350] sm:$0xf]  ;;  %v10465_v11 = vor.u32 %v13354_v41, %v10464_v36 }
 0x316   :  { %4076 = vmatpush.bf16.msrb.mxu1 %v10585_v22  ;;  %4089 = vmatpush.bf16.msrb.mxu2 %v10333_v47  ;;  %v13418_v45 = vld [vmem:[%s20867_s1 + $0x36c] sm:$0xf0]  ;;  %v10466_v22 = vld [vmem:[%s20867_s1 + $0x170] sm:$0xf0] }
 0x317   :  { %4063 = vmatpush.bf16.msrb.mxu0 %v10329_v16  ;;  %4102 = vmatpush.bf16.msrb.mxu3 %v10589_v49  ;;  %v10757_v16 = vor.u32 %v13422_v39, %v10754_v30  ;;  %v13414_v47 = vld [vmem:[%s20867_s1 + $0x354] sm:$0xf]  ;;  %v10721_v49 = vor.u32 %v13418_v45, %v10720_v44  ;;  %v10432_v10 = vld [vmem:[%s20867_s1 + $0x110] sm:$0xf]  ;;  %v10469_v57 = vor.u32 %v13350_v46, %v10466_v22 }
 0x318   :  { %v13996_v15 = vpop.eup %13995  ;;  %v13346_v53 = vld [vmem:[%s20867_s1 + $0x12c] sm:$0xf0]  ;;  %v10725_v37 = vor.u32 %v13414_v47, %v10722_v48  ;;  %v13310_v44 = vld [vmem:[%s20867_s1 + $0x14] sm:$0xf]  ;;  %v10536_v47 = vld [vmem:[%s20867_s1 + $0x1d8] sm:$0xf] }
 0x319   :  { %v3215_v20 = vmul.f32 %v13996_v15, %v3192_v40  ;;  %v13309_v40 = vld [vmem:[%s20867_s1 + $0xc] sm:$0xf]  ;;  %v13430_v15 = vld [vmem:[%s20867_s1 + $0x3d4] sm:$0xf]  ;;  %v10624_v5 = vld [vmem:[%s20867_s1 + $0x290] sm:$0xf] }
 0x31a   :  { %v13998_v25 = vpop.eup %13997  ;;  %v10301_v32 = vor.u32 %v13309_v40, %v10298_v59  ;;  %4077 = vmatpush.bf16.msrb.mxu1 %v10553_v42  ;;  %v10789_v8 = vor.u32 %v13430_v15, %v10786_v55  ;;  %v10688_v40 = vld [vmem:[%s20867_s1 + $0x310] sm:$0xf]  ;;  %v10433_v42 = vor.u32 %v13346_v53, %v10432_v10  ;;  %v13390_v15 = vld [vmem:[%s20867_s1 + $0x294] sm:$0xf]  ;;  %v13371_v48 = vld [vmem:[%s20867_s1 + $0x1f4] sm:$0xf0] }
 0x31b   :  { %v3178_v58 = vadd.f32 1.0, %v13998_v25  ;;  %v3216_v38 = vadd.f32 %v3215_v20, %v3214_v19  ;;  %4064 = vmatpush.bf16.msrb.mxu0 %v10297_v29  ;;  %4103 = vmatpush.bf16.msrb.mxu3 %v10557_v43  ;;  %v10496_v25 = vld [vmem:[%s20867_s1 + $0x190] sm:$0xf]  ;;  %v13342_v29 = vld [vmem:[%s20867_s1 + $0x114] sm:$0xf] }
 0x31c   :  { %4090 = vmatpush.bf16.msrb.mxu2 %v10301_v32  ;;  %v10497_v31 = vor.u32 %v13362_v26, %v10496_v25  ;;  %v13410_v59 = vld [vmem:[%s20867_s1 + $0x32c] sm:$0xf0]  ;;  %v10626_v55 = vld [vmem:[%s20867_s1 + $0x2b0] sm:$0xf0]  ;;  %v10373_v25 = vor.u32 %v13326_v13, %v10370_v14  ;;  %v13367_v10 = vld [vmem:[%s20867_s1 + $0x1dc] sm:$0xf] }
 0x31d   :  { %13999 = vrcp.f32 %v3178_v58  ;;  %3217 = vst [vmem:[#allocation3] sm:$0xf] %v3216_v38  ;;  %v3205_v1 = vand.u32 2147483648, %v3178_v58  ;;  %v3203_v2 = vand.u32 2147483647, %v3178_v58  ;;  %vm3199_vm11 = vweird.f32 %v3178_v58 }
 0x31e   :  { %14001 = vtanh.f32 %v3216_v38  ;;  %v13358_v38 = vld [vmem:[%s20867_s1 + $0x194] sm:$0xf]  ;;  %v10689_v32 = vor.u32 %v13410_v59, %v10688_v40  ;;  %v13338_v43 = vld [vmem:[%s20867_s1 + $0xec] sm:$0xf0]  ;;  %v10629_v26 = vor.u32 %v13390_v15, %v10626_v55  ;;  %v13431_v40 = vld [vmem:[%s20867_s1 + $0x3dc] sm:$0xf] }
 0x31f   :  { %v3206_v28 = vor.u32 1.1754944e-38, %v3205_v1  ;;  %vm3204_vm13 = vcmp.eq.f32.partialorder %v3203_v2, 8.507059e+37  ;;  %v10501_v56 = vor.u32 %v13358_v38, %v10498_v23  ;;  %v13402_v2 = vld [vmem:[%s20867_s1 + $0x2ec] sm:$0xf0]  ;;  %v13382_v38 = vld [vmem:[%s20867_s1 + $0x254] sm:$0xf] }
 0x320   :  { %v13394_v7 = vld [vmem:[%s20867_s1 + $0x2ac] sm:$0xf0]  ;;  %v10594_v23 = vld [vmem:[%s20867_s1 + $0x270] sm:$0xf0]  ;;  %v10794_v59 = vld [vmem:[%s20867_s1 + $0x3f8] sm:$0xf0] }
 0x321   :  { %v10304_v39 = vld [vmem:[%s20867_s1 + $0x10] sm:$0xf]  ;;  %v10306_v45 = vld [vmem:[%s20867_s1 + $0x30] sm:$0xf0]  ;;  %v13415_v13 = vld [vmem:[%s20867_s1 + $0x35c] sm:$0xf] }
 0x322   :  { %v10560_v36 = vld [vmem:[%s20867_s1 + $0x210] sm:$0xf]  ;;  %v13374_v46 = vld [vmem:[%s20867_s1 + $0x214] sm:$0xf]  ;;  %v10730_v14 = vld [vmem:[%s20867_s1 + $0x378] sm:$0xf0] }
 0x323   :  { %v14000_v61 = vpop.eup %13999  ;;  %v13378_v41 = vld [vmem:[%s20867_s1 + $0x22c] sm:$0xf0]  ;;  %v10562_v22 = vld [vmem:[%s20867_s1 + $0x230] sm:$0xf0] }
 0x324   :  { %v3195_v34 = vmul.f32 %v14000_v61, %v3178_v58  ;;  %vm3200_vm10 = vweird.f32 %v14000_v61  ;;  %v14002_v63 = vpop.eup %14001  ;;  %v13426_v58 = vld [vmem:[%s20867_s1 + $0x3ac] sm:$0xf0] }
 0x325   :  { %vm3201_vm12 = vmor %vm3199_vm11, %vm3200_vm10  ;;  %v10753_v35 = vor.u32 %v13426_v58, %v10752_v18  ;;  %v13318_v18 = vld [vmem:[%s20867_s1 + $0x54] sm:$0xf] }
 0x326   :  { %v3196_v0 = vsub.f32 1.0, %v3195_v34  ;;  %v10400_v34 = vld [vmem:[%s20867_s1 + $0xd0] sm:$0xf]  ;;  %v10338_v58 = vld [vmem:[%s20867_s1 + $0x70] sm:$0xf0] }
 0x328   :  { %v3197_v52 = vmul.f32 %v14000_v61, %v3196_v0  ;;  %v10437_v0 = vor.u32 %v13342_v29, %v10434_v51  ;;  %v10309_v29 = vor.u32 %v13310_v44, %v10306_v45  ;;  %v10565_v51 = vor.u32 %v13374_v46, %v10562_v22  ;;  %v13399_v44 = vld [vmem:[%s20867_s1 + $0x2dc] sm:$0xf] }
 0x329   :  { %v10666_v45 = vld [vmem:[%s20867_s1 + $0x2f8] sm:$0xf0] }
 0x32a   :  { %v3198_v3 = vadd.f32 %v14000_v61, %v3197_v52  ;;  %v10656_v52 = vld [vmem:[%s20867_s1 + $0x2d0] sm:$0xf] }
 0x32c   :  { %v3202_v4 = vsel %vm3201_vm12, %v14000_v61, %v3198_v3  ;;  %v10690_v61 = vld [vmem:[%s20867_s1 + $0x330] sm:$0xf0] }
 0x32d   :  { %v3207_v9 = vsel %vm3204_vm13, %v3206_v28, %v3202_v4  ;;  %v10693_v1 = vor.u32 %v13406_v60, %v10690_v61  ;;  %v13334_v3 = vld [vmem:[%s20867_s1 + $0xd4] sm:$0xf]  ;;  %v10537_v60 = vor.u32 %v13371_v48, %v10536_v47  ;;  %v10376_v47 = vld [vmem:[%s20867_s1 + $0x98] sm:$0xf] }
 0x32e   :  { %v3220_v62 = vrot.slane %v3207_v9, 4  ;;  %v10402_v28 = vld [vmem:[%s20867_s1 + $0xf0] sm:$0xf0]  ;;  %v13331_v48 = vld [vmem:[%s20867_s1 + $0xb4] sm:$0xf0] }
 0x32f   :  { %v13398_v4 = vld [vmem:[%s20867_s1 + $0x2d4] sm:$0xf]  ;;  %v10405_v6 = vor.u32 %v13334_v3, %v10402_v28  ;;  %v13423_v3 = vld [vmem:[%s20867_s1 + $0x39c] sm:$0xf] }
 0x330   :  { %v3222_v33 = vmul.f32 %v14002_v63, %v3220_v62  ;;  %v10658_v9 = vld [vmem:[%s20867_s1 + $0x2f0] sm:$0xf0]  ;;  %v10401_v62 = vor.u32 %v13338_v43, %v10400_v34  ;;  %v10657_v63 = vor.u32 %v13402_v2, %v10656_v52  ;;  %v10797_v43 = vor.u32 %v13431_v40, %v10794_v59  ;;  %v13359_v52 = vld [vmem:[%s20867_s1 + $0x19c] sm:$0xf] }
 0x331   :  { %v10661_v12 = vor.u32 %v13398_v4, %v10658_v9  ;;  %v10506_v2 = vld [vmem:[%s20867_s1 + $0x1b8] sm:$0xf0] }
 0x332   :  { %3223 = vst [vmem:[#allocation2] sm:$0xf] %v3222_v33  ;;  %v10368_v33 = vld [vmem:[%s20867_s1 + $0x90] sm:$0xf]  ;;  %v10762_v28 = vld [vmem:[%s20867_s1 + $0x3b8] sm:$0xf0] }
 0x333   :  { %v13391_v40 = vld [vmem:[%s20867_s1 + $0x29c] sm:$0xf] }
 0x334   :  { %v10634_v59 = vld [vmem:[%s20867_s1 + $0x2b8] sm:$0xf0] }
 0x339   :  { %v3228_v54 = vld [vmem:[#allocation2] sm:$0xf] }
 0x33a   :  { %3230 = vst [vmem:[#allocation1] ss:$4 sm:$0xff] %v3228_v54  ;;  %v13330_v54 = vld [vmem:[%s20867_s1 + $0xac] sm:$0xf0] }
 0x341   :  { %v3231_v17 = vld.sshfl [vmem:[#allocation1] sm:$0xff pattern:$0x73625140]  ;;  %v3232_v19 = vld.sshfl [vmem:[#allocation1 + $0x8] sm:$0xff pattern:$0x73625140] }
 0x342   :  { %v17051_v20 = vpack.c.bf16 %v3231_v17, %v3231_v17  ;;  %v17053_v50 = vpack.c.bf16 %v3232_v19, %v3232_v19  ;;  %v10369_v17 = vor.u32 %v13330_v54, %v10368_v33  ;;  %v10625_v19 = vor.u32 %v13394_v7, %v10624_v5  ;;  %v13351_v5 = vld [vmem:[%s20867_s1 + $0x15c] sm:$0xf] }
 0x343   :  { %v10509_v33 = vor.u32 %v13359_v52, %v10506_v2  ;;  %v10765_v54 = vor.u32 %v13423_v3, %v10762_v28  ;;  %v10474_v7 = vld [vmem:[%s20867_s1 + $0x178] sm:$0xf0] }
 0x344   :  { %4013 = vmatmul.bf16.vlgmr.msra.gmra.mxu0 %v17051_v20  ;;  %4026 = vmatmul.bf16.vlgmr.msra.gmra.mxu1 %v17053_v50  ;;  %v13383_v52 = vld [vmem:[%s20867_s1 + $0x25c] sm:$0xf] }
 0x345   :  { %4039 = vmatmul.bf16.vlgmr.msra.gmra.mxu2 %v17051_v20  ;;  %4052 = vmatmul.bf16.vlgmr.msra.gmra.mxu3 %v17053_v50  ;;  %v10602_v2 = vld [vmem:[%s20867_s1 + $0x278] sm:$0xf0] }
 0x346   :  { %4109 = vmatpush.bf16.msra.mxu0 %v10529_v21  ;;  %4122 = vmatpush.bf16.msra.mxu1 %v10785_v24  ;;  %v10336_v21 = vld [vmem:[%s20867_s1 + $0x50] sm:$0xf] }
 0x347   :  { %4135 = vmatpush.bf16.msra.mxu2 %v10533_v27  ;;  %4148 = vmatpush.bf16.msra.mxu3 %v10789_v8  ;;  %v13322_v24 = vld [vmem:[%s20867_s1 + $0x6c] sm:$0xf0] }
 0x348   :  { %v10592_v27 = vld [vmem:[%s20867_s1 + $0x250] sm:$0xf]  ;;  %v10337_v30 = vor.u32 %v13322_v24, %v10336_v21  ;;  %v10477_v21 = vor.u32 %v13351_v5, %v10474_v7  ;;  %v10733_v24 = vor.u32 %v13415_v13, %v10730_v14  ;;  %v13375_v5 = vld [vmem:[%s20867_s1 + $0x21c] sm:$0xf] }
 0x349   :  { %v13386_v8 = vld [vmem:[%s20867_s1 + $0x26c] sm:$0xf0]  ;;  %v10570_v7 = vld [vmem:[%s20867_s1 + $0x238] sm:$0xf0] }
 0x34a   :  { %4110 = vmatpush.bf16.msra.mxu0 %v10497_v31  ;;  %4123 = vmatpush.bf16.msra.mxu1 %v10753_v35  ;;  %v10593_v31 = vor.u32 %v13386_v8, %v10592_v27  ;;  %v13314_v35 = vld [vmem:[%s20867_s1 + $0x2c] sm:$0xf0]  ;;  %v13343_v27 = vld [vmem:[%s20867_s1 + $0x11c] sm:$0xf] }
 0x34b   :  { %4136 = vmatpush.bf16.msra.mxu2 %v10501_v56  ;;  %4149 = vmatpush.bf16.msra.mxu3 %v10757_v16  ;;  %v10341_v56 = vor.u32 %v13318_v18, %v10338_v58  ;;  %v10597_v16 = vor.u32 %v13382_v38, %v10594_v23  ;;  %v10305_v53 = vor.u32 %v13314_v35, %v10304_v39  ;;  %v10442_v8 = vld [vmem:[%s20867_s1 + $0x138] sm:$0xf0]  ;;  %v10408_v39 = vld [vmem:[%s20867_s1 + $0xd8] sm:$0xf] }
 0x34c   :  { %v13407_v18 = vld [vmem:[%s20867_s1 + $0x31c] sm:$0xf] }
 0x34d   :  { %v10698_v58 = vld [vmem:[%s20867_s1 + $0x338] sm:$0xf0] }
 0x34e   :  { %4111 = vmatpush.bf16.msra.mxu0 %v10465_v11  ;;  %4124 = vmatpush.bf16.msra.mxu1 %v10721_v49  ;;  %v10792_v11 = vld [vmem:[%s20867_s1 + $0x3d8] sm:$0xf]  ;;  %v10701_v35 = vor.u32 %v13407_v18, %v10698_v58 }
 0x34f   :  { %4137 = vmatpush.bf16.msra.mxu2 %v10469_v57  ;;  %4150 = vmatpush.bf16.msra.mxu3 %v10725_v37  ;;  %v13435_v49 = vld [vmem:[%s20867_s1 + $0x3f4] sm:$0xf0]  ;;  %v10561_v57 = vor.u32 %v13378_v41, %v10560_v36  ;;  %v10538_v37 = vld [vmem:[%s20867_s1 + $0x1f8] sm:$0xf0] }
 0x350   :  { %v10793_v61 = vor.u32 %v13435_v49, %v10792_v11  ;;  %v10541_v34 = vor.u32 %v13367_v10, %v10538_v37  ;;  %v10664_v36 = vld [vmem:[%s20867_s1 + $0x2d8] sm:$0xf]  ;;  %v10669_v49 = vor.u32 %v13399_v44, %v10666_v45  ;;  %v10378_v37 = vld [vmem:[%s20867_s1 + $0xb8] sm:$0xf0] }
 0x351   :  { %v13403_v41 = vld [vmem:[%s20867_s1 + $0x2f4] sm:$0xf0] }
 0x352   :  { %4112 = vmatpush.bf16.msra.mxu0 %v10433_v42  ;;  %4125 = vmatpush.bf16.msra.mxu1 %v10689_v32  ;;  %v10504_v42 = vld [vmem:[%s20867_s1 + $0x198] sm:$0xf]  ;;  %v10665_v22 = vor.u32 %v13403_v41, %v10664_v36 }
 0x353   :  { %4138 = vmatpush.bf16.msra.mxu2 %v10437_v0  ;;  %4151 = vmatpush.bf16.msra.mxu3 %v10693_v1  ;;  %v13363_v32 = vld [vmem:[%s20867_s1 + $0x1b4] sm:$0xf0] }
 0x354   :  { %4065 = vmatmul.bf16.vlgmr.msrb.gmra.mxu0 %v17051_v20  ;;  %4078 = vmatmul.bf16.vlgmr.msrb.gmra.mxu1 %v17053_v50  ;;  %v10760_v0 = vld [vmem:[%s20867_s1 + $0x398] sm:$0xf]  ;;  %v10505_v4 = vor.u32 %v13363_v32, %v10504_v42  ;;  %v10637_v32 = vor.u32 %v13391_v40, %v10634_v59  ;;  %v11283_v40 = vld [vmem:[%s20867_s1 + $0x3c0] sm:$0xf] }
 0x355   :  { %4091 = vmatmul.bf16.vlgmr.msrb.gmra.mxu2 %v17051_v20  ;;  %4104 = vmatmul.bf16.vlgmr.msrb.gmra.mxu3 %v17053_v50  ;;  %v13427_v1 = vld [vmem:[%s20867_s1 + $0x3b4] sm:$0xf0] }
 0x356   :  { %4113 = vmatpush.bf16.msra.mxu0 %v10401_v62  ;;  %4126 = vmatpush.bf16.msra.mxu1 %v10657_v63  ;;  %v10761_v9 = vor.u32 %v13427_v1, %v10760_v0  ;;  %v10472_v62 = vld [vmem:[%s20867_s1 + $0x158] sm:$0xf]  ;;  %v13319_v0 = vld [vmem:[%s20867_s1 + $0x5c] sm:$0xf] }
 0x357   :  { %4139 = vmatpush.bf16.msra.mxu2 %v10405_v6  ;;  %4152 = vmatpush.bf16.msra.mxu3 %v10661_v12  ;;  %v13355_v63 = vld [vmem:[%s20867_s1 + $0x174] sm:$0xf0]  ;;  %v10346_v1 = vld [vmem:[%s20867_s1 + $0x78] sm:$0xf0] }
 0x358   :  { %v10728_v6 = vld [vmem:[%s20867_s1 + $0x358] sm:$0xf]  ;;  %v10473_v15 = vor.u32 %v13355_v63, %v10472_v62  ;;  %v10349_v62 = vor.u32 %v13319_v0, %v10346_v1  ;;  %v10605_v63 = vor.u32 %v13383_v52, %v10602_v2  ;;  %v10995_v52 = vld [vmem:[%s20867_s1 + $0x180] sm:$0xf] }
 0x359   :  { %v13419_v12 = vld [vmem:[%s20867_s1 + $0x374] sm:$0xf0]  ;;  %v13488_v2 = vld [vmem:[%s20867_s1 + $0x19c] sm:$0xf0] }
 0x35a   :  { %4114 = vmatpush.bf16.msra.mxu0 %v10369_v17  ;;  %4127 = vmatpush.bf16.msra.mxu1 %v10625_v19  ;;  %v10729_v55 = vor.u32 %v13419_v12, %v10728_v6  ;;  %v10440_v17 = vld [vmem:[%s20867_s1 + $0x118] sm:$0xf]  ;;  %v13311_v6 = vld [vmem:[%s20867_s1 + $0x1c] sm:$0xf] }
 0x35b   :  { %4140 = vmatpush.bf16.msra.mxu2 %v10373_v25  ;;  %4153 = vmatpush.bf16.msra.mxu3 %v10629_v26  ;;  %v13347_v19 = vld [vmem:[%s20867_s1 + $0x134] sm:$0xf0]  ;;  %v10314_v12 = vld [vmem:[%s20867_s1 + $0x38] sm:$0xf0] }
 0x35c   :  { %v10696_v25 = vld [vmem:[%s20867_s1 + $0x318] sm:$0xf]  ;;  %v10441_v38 = vor.u32 %v13347_v19, %v10440_v17 }
 0x35d   :  { %v13411_v26 = vld [vmem:[%s20867_s1 + $0x334] sm:$0xf0] }
 0x35e   :  { %4115 = vmatpush.bf16.msra.mxu0 %v10337_v30  ;;  %4128 = vmatpush.bf16.msra.mxu1 %v10593_v31  ;;  %v10697_v23 = vor.u32 %v13411_v26, %v10696_v25  ;;  %v13339_v30 = vld [vmem:[%s20867_s1 + $0xf4] sm:$0xf0]  ;;  %v10445_v31 = vor.u32 %v13343_v27, %v10442_v8 }
 0x35f   :  { %4141 = vmatpush.bf16.msra.mxu2 %v10341_v56  ;;  %4154 = vmatpush.bf16.msra.mxu3 %v10597_v16  ;;  %v13335_v56 = vld [vmem:[%s20867_s1 + $0xdc] sm:$0xf]  ;;  %v10409_v46 = vor.u32 %v13339_v30, %v10408_v39  ;;  %v10632_v10 = vld [vmem:[%s20867_s1 + $0x298] sm:$0xf] }
 0x360   :  { %v10410_v16 = vld [vmem:[%s20867_s1 + $0xf8] sm:$0xf0] }
 0x361   :  { %v10413_v11 = vor.u32 %v13335_v56, %v10410_v16  ;;  %v17434_v30 = vld [vmem:[%s20866_s0 + $0x18] sm:$0xff] }
 0x362   :  { %4116 = vmatpush.bf16.msra.mxu0 %v10305_v53  ;;  %4129 = vmatpush.bf16.msra.mxu1 %v10561_v57  ;;  %v13395_v53 = vld [vmem:[%s20867_s1 + $0x2b4] sm:$0xf0]  ;;  %v13327_v57 = vld [vmem:[%s20867_s1 + $0x9c] sm:$0xf]  ;;  %v3226_v16 = vunpack.c.l.bf16 %v17434_v30 }
 0x363   :  { %4142 = vmatpush.bf16.msra.mxu2 %v10309_v29  ;;  %4155 = vmatpush.bf16.msra.mxu3 %v10565_v51  ;;  %v10377_v29 = vor.u32 %v13331_v48, %v10376_v47  ;;  %v10633_v51 = vor.u32 %v13395_v53, %v10632_v10  ;;  %v10381_v42 = vor.u32 %v13327_v57, %v10378_v37  ;;  %v11027_v57 = vld [vmem:[%s20867_s1 + $0x1c0] sm:$0xf] }
 0x364   :  { %v13496_v37 = vld [vmem:[%s20867_s1 + $0x1dc] sm:$0xf0] }
 0x365   :  { %4117 = vmatmul.bf16.vlgmr.msra.gmra.mxu0 %v17051_v20  ;;  %4130 = vmatmul.bf16.vlgmr.msra.gmra.mxu1 %v17053_v50  ;;  %v11028_v59 = vor.u32 %v13496_v37, %v11027_v57  ;;  %v13460_v57 = vld [vmem:[%s20867_s1 + $0xc4] sm:$0xf] }
 0x366   :  { %4161 = vmatpush.bf16.msrb.mxu0 %v10537_v60  ;;  %4174 = vmatpush.bf16.msrb.mxu1 %v10793_v61  ;;  %v10344_v60 = vld [vmem:[%s20867_s1 + $0x58] sm:$0xf]  ;;  %v10901_v37 = vld [vmem:[%s20867_s1 + $0xe0] sm:$0xf0] }
 0x367   :  { %4187 = vmatpush.bf16.msrb.mxu2 %v10541_v34  ;;  %4200 = vmatpush.bf16.msrb.mxu3 %v10797_v43  ;;  %v13323_v61 = vld [vmem:[%s20867_s1 + $0x74] sm:$0xf0] }
 0x368   :  { %4143 = vmatmul.bf16.vlgmr.msra.gmra.mxu2 %v17051_v20  ;;  %4156 = vmatmul.bf16.vlgmr.msra.gmra.mxu3 %v17053_v50  ;;  %v10600_v34 = vld [vmem:[%s20867_s1 + $0x258] sm:$0xf]  ;;  %v10345_v3 = vor.u32 %v13323_v61, %v10344_v60  ;;  %v11029_v60 = vld [vmem:[%s20867_s1 + $0x1e0] sm:$0xf0] }
 0x369   :  { %v13387_v43 = vld [vmem:[%s20867_s1 + $0x274] sm:$0xf0] }
 0x36a   :  { %4162 = vmatpush.bf16.msrb.mxu0 %v10505_v4  ;;  %4175 = vmatpush.bf16.msrb.mxu1 %v10761_v9  ;;  %v10601_v28 = vor.u32 %v13387_v43, %v10600_v34  ;;  %v10312_v4 = vld [vmem:[%s20867_s1 + $0x18] sm:$0xf]  ;;  %v11285_v34 = vld [vmem:[%s20867_s1 + $0x3e0] sm:$0xf0] }
 0x36b   :  { %4188 = vmatpush.bf16.msrb.mxu2 %v10509_v33  ;;  %4201 = vmatpush.bf16.msrb.mxu3 %v10765_v54  ;;  %v13315_v9 = vld [vmem:[%s20867_s1 + $0x34] sm:$0xf0] }
 0x36c   :  { %v10568_v33 = vld [vmem:[%s20867_s1 + $0x218] sm:$0xf]  ;;  %v10313_v13 = vor.u32 %v13315_v9, %v10312_v4  ;;  %v10996_v9 = vor.u32 %v13488_v2, %v10995_v52  ;;  %v13520_v52 = vld [vmem:[%s20867_s1 + $0x29c] sm:$0xf0]  ;;  %v13452_v2 = vld [vmem:[%s20867_s1 + $0x84] sm:$0xf] }
 0x36d   :  { %v13379_v54 = vld [vmem:[%s20867_s1 + $0x234] sm:$0xf0] }
 0x36e   :  { %4163 = vmatpush.bf16.msrb.mxu0 %v10473_v15  ;;  %4176 = vmatpush.bf16.msrb.mxu1 %v10729_v55  ;;  %v10569_v14 = vor.u32 %v13379_v54, %v10568_v33  ;;  %v10317_v15 = vor.u32 %v13311_v6, %v10314_v12  ;;  %v10573_v55 = vor.u32 %v13375_v5, %v10570_v7  ;;  %v13484_v33 = vld [vmem:[%s20867_s1 + $0x184] sm:$0xf] }
 0x36f   :  { %4189 = vmatpush.bf16.msrb.mxu2 %v10477_v21  ;;  %4202 = vmatpush.bf16.msrb.mxu3 %v10733_v24  ;;  %v10997_v54 = vld [vmem:[%s20867_s1 + $0x1a0] sm:$0xf0] }
 0x370   :  { %v11000_v12 = vor.u32 %v13484_v33, %v10997_v54  ;;  %v13548_v5 = vld [vmem:[%s20867_s1 + $0x384] sm:$0xf]  ;;  %v10835_v54 = vld [vmem:[%s20867_s1 + $0x40] sm:$0xf] }
 0x371   :  { %v11253_v7 = vld [vmem:[%s20867_s1 + $0x3a0] sm:$0xf0] }
 0x372   :  { %4164 = vmatpush.bf16.msrb.mxu0 %v10441_v38  ;;  %4177 = vmatpush.bf16.msrb.mxu1 %v10697_v23 }
 0x373   :  { %4190 = vmatpush.bf16.msrb.mxu2 %v10445_v31  ;;  %4203 = vmatpush.bf16.msrb.mxu3 %v10701_v35 }
 0x376   :  { %4165 = vmatpush.bf16.msrb.mxu0 %v10409_v46  ;;  %4178 = vmatpush.bf16.msrb.mxu1 %v10665_v22 }
 0x377   :  { %4191 = vmatpush.bf16.msrb.mxu2 %v10413_v11  ;;  %4204 = vmatpush.bf16.msrb.mxu3 %v10669_v49 }
 0x37a   :  { %4166 = vmatpush.bf16.msrb.mxu0 %v10377_v29  ;;  %4179 = vmatpush.bf16.msrb.mxu1 %v10633_v51  ;;  %v13560_v29 = vld [vmem:[%s20867_s1 + $0x3dc] sm:$0xf0]  ;;  %v13492_v51 = vld [vmem:[%s20867_s1 + $0x1c4] sm:$0xf] }
 0x37b   :  { %4192 = vmatpush.bf16.msrb.mxu2 %v10381_v42  ;;  %4205 = vmatpush.bf16.msrb.mxu3 %v10637_v32  ;;  %v11284_v61 = vor.u32 %v13560_v29, %v11283_v40  ;;  %v11032_v42 = vor.u32 %v13492_v51, %v11029_v60  ;;  %v13556_v32 = vld [vmem:[%s20867_s1 + $0x3c4] sm:$0xf] }
 0x37c   :  { %v11288_v43 = vor.u32 %v13556_v32, %v11285_v34  ;;  %v13524_v29 = vld [vmem:[%s20867_s1 + $0x2c4] sm:$0xf]  ;;  %v13456_v32 = vld [vmem:[%s20867_s1 + $0x9c] sm:$0xf0] }
 0x37d   :  { %v11157_v51 = vld [vmem:[%s20867_s1 + $0x2e0] sm:$0xf0]  ;;  %v11123_v34 = vld [vmem:[%s20867_s1 + $0x280] sm:$0xf] }
 0x37e   :  { %4167 = vmatpush.bf16.msrb.mxu0 %v10345_v3  ;;  %4180 = vmatpush.bf16.msrb.mxu1 %v10601_v28 }
 0x37f   :  { %4193 = vmatpush.bf16.msrb.mxu2 %v10349_v62  ;;  %4206 = vmatpush.bf16.msrb.mxu3 %v10605_v63  ;;  %v11251_v62 = vld [vmem:[%s20867_s1 + $0x380] sm:$0xf] }
 0x380   :  { %v13552_v63 = vld [vmem:[%s20867_s1 + $0x39c] sm:$0xf0] }
 0x381   :  { %v11252_v6 = vor.u32 %v13552_v63, %v11251_v62  ;;  %v13516_v62 = vld [vmem:[%s20867_s1 + $0x284] sm:$0xf] }
 0x382   :  { %4168 = vmatpush.bf16.msrb.mxu0 %v10313_v13  ;;  %4181 = vmatpush.bf16.msrb.mxu1 %v10569_v14  ;;  %v11256_v14 = vor.u32 %v13548_v5, %v11253_v7  ;;  %v11125_v63 = vld [vmem:[%s20867_s1 + $0x2a0] sm:$0xf0] }
 0x383   :  { %4194 = vmatpush.bf16.msrb.mxu2 %v10317_v15  ;;  %4207 = vmatpush.bf16.msrb.mxu3 %v10573_v55  ;;  %v10963_v15 = vld [vmem:[%s20867_s1 + $0x140] sm:$0xf]  ;;  %v11128_v33 = vor.u32 %v13516_v62, %v11125_v63  ;;  %v13485_v62 = vld [vmem:[%s20867_s1 + $0x18c] sm:$0xf] }
 0x384   :  { %v13480_v55 = vld [vmem:[%s20867_s1 + $0x15c] sm:$0xf0]  ;;  %v11005_v63 = vld [vmem:[%s20867_s1 + $0x1a8] sm:$0xf0] }
 0x385   :  { %4169 = vmatmul.bf16.vlgmr.msrb.gmra.mxu0 %v17051_v20  ;;  %4182 = vmatmul.bf16.vlgmr.msrb.gmra.mxu1 %v17053_v50 }
 0x386   :  { %4195 = vmatmul.bf16.vlgmr.msrb.gmra.mxu2 %v17051_v20  ;;  %4208 = vmatmul.bf16.vlgmr.msrb.gmra.mxu3 %v17053_v50 }
 0x387   :  { %5071 = vmatpush.bf16.msra.mxu0 %v11028_v59  ;;  %5084 = vmatpush.bf16.msra.mxu1 %v11284_v61  ;;  %v10904_v59 = vor.u32 %v13460_v57, %v10901_v37  ;;  %v11160_v61 = vor.u32 %v13524_v29, %v11157_v51  ;;  %v13557_v51 = vld [vmem:[%s20867_s1 + $0x3cc] sm:$0xf] }
 0x388   :  { %5097 = vmatpush.bf16.msra.mxu2 %v11032_v42  ;;  %5110 = vmatpush.bf16.msra.mxu3 %v11288_v43  ;;  %v10867_v42 = vld [vmem:[%s20867_s1 + $0x80] sm:$0xf] }
 0x389   :  { %v10868_v43 = vor.u32 %v13456_v32, %v10867_v42 }
 0x38b   :  { %5072 = vmatpush.bf16.msra.mxu0 %v10996_v9  ;;  %5085 = vmatpush.bf16.msra.mxu1 %v11252_v6  ;;  %v13448_v6 = vld [vmem:[%s20867_s1 + $0x5c] sm:$0xf0] }
 0x38c   :  { %5098 = vmatpush.bf16.msra.mxu2 %v11000_v12  ;;  %5111 = vmatpush.bf16.msra.mxu3 %v11256_v14  ;;  %v11091_v12 = vld [vmem:[%s20867_s1 + $0x240] sm:$0xf]  ;;  %v10836_v7 = vor.u32 %v13448_v6, %v10835_v54 }
 0x38d   :  { %v13512_v14 = vld [vmem:[%s20867_s1 + $0x25c] sm:$0xf0] }
 0x3c1   :  { %v4014_v17 = vpop.f32.mrf.mxu0  ;;  %v4027_v19 = vpop.f32.mrf.mxu1 }
 0x3c2   :  { %v4028_v41 = vadd.f32 %v4027_v19, %v4014_v17  ;;  %v10964_v17 = vor.u32 %v13480_v55, %v10963_v15  ;;  %v11219_v19 = vld [vmem:[%s20867_s1 + $0x340] sm:$0xf]  ;;  %v13444_v15 = vld [vmem:[%s20867_s1 + $0x44] sm:$0xf] }
 0x3c3   :  { %v10837_v55 = vld [vmem:[%s20867_s1 + $0x60] sm:$0xf0] }
 0x3c4   :  { %5073 = vmatpush.bf16.msra.mxu0 %v10964_v17 }
 0x3c8   :  { %v4040_v21 = vpop.f32.mrf.mxu2  ;;  %v4053_v24 = vpop.f32.mrf.mxu3 }
 0x3c9   :  { %v4016_v25 = vpop.f32.mrf.mxu0  ;;  %v4029_v26 = vpop.f32.mrf.mxu1  ;;  %v4054_v38 = vadd.f32 %v4053_v24, %v4040_v21  ;;  %v13544_v21 = vld [vmem:[%s20867_s1 + $0x35c] sm:$0xf0]  ;;  %v13476_v24 = vld [vmem:[%s20867_s1 + $0x144] sm:$0xf] }
 0x3ca   :  { %v11220_v25 = vor.u32 %v13544_v21, %v11219_v19  ;;  %v10965_v26 = vld [vmem:[%s20867_s1 + $0x160] sm:$0xf0] }
 0x3cb   :  { %v4221_v50 = vrot.slane %v4054_v38, 6 }
 0x3cc   :  { %5086 = vmatpush.bf16.msra.mxu1 %v11220_v25  ;;  %v11093_v25 = vld [vmem:[%s20867_s1 + $0x260] sm:$0xf0] }
 0x3cd   :  { %v4227_v45 = vsel %vm1026_vm1, %v4028_v41, %v4221_v50  ;;  %v11187_v50 = vld [vmem:[%s20867_s1 + $0x300] sm:$0xf]  ;;  %v10933_v41 = vld [vmem:[%s20867_s1 + $0x120] sm:$0xf0] }
 0x3d0   :  { %v4042_v27 = vpop.f32.mrf.mxu2  ;;  %v4055_v8 = vpop.f32.mrf.mxu3 }
 0x3d1   :  { %v4066_v18 = vpop.f32.mrf.mxu0  ;;  %v4079_v58 = vpop.f32.mrf.mxu1  ;;  %v13540_v27 = vld [vmem:[%s20867_s1 + $0x344] sm:$0xf] }
 0x3d2   :  { %v4080_v23 = vadd.f32 %v4079_v58, %v4066_v18  ;;  %v11221_v8 = vld [vmem:[%s20867_s1 + $0x360] sm:$0xf0]  ;;  %v10968_v18 = vor.u32 %v13476_v24, %v10965_v26 }
 0x3d3   :  { %v11224_v58 = vor.u32 %v13540_v27, %v11221_v8  ;;  %v13508_v24 = vld [vmem:[%s20867_s1 + $0x244] sm:$0xf]  ;;  %v10803_v27 = vld [vmem:[%s20867_s1] sm:$0xf] }
 0x3d4   :  { %v4222_v56 = vrot.slane %v4080_v23, 4  ;;  %5099 = vmatpush.bf16.msra.mxu2 %v10968_v18  ;;  %v11096_v26 = vor.u32 %v13508_v24, %v11093_v25  ;;  %v13440_v8 = vld [vmem:[%s20867_s1 + $0x1c] sm:$0xf0]  ;;  %v13545_v25 = vld [vmem:[%s20867_s1 + $0x364] sm:$0xf0] }
 0x3d5   :  { %5112 = vmatpush.bf16.msra.mxu3 %v11224_v58  ;;  %v11059_v18 = vld [vmem:[%s20867_s1 + $0x200] sm:$0xf] }
 0x3d8   :  { %v4092_v39 = vpop.f32.mrf.mxu2  ;;  %v4105_v20 = vpop.f32.mrf.mxu3 }
 0x3d9   :  { %v4106_v31 = vadd.f32 %v4105_v20, %v4092_v39  ;;  %v4068_v35 = vpop.f32.mrf.mxu0  ;;  %v4081_v36 = vpop.f32.mrf.mxu1  ;;  %v10931_v39 = vld [vmem:[%s20867_s1 + $0x100] sm:$0xf] }
 0x3da   :  { %v13472_v20 = vld [vmem:[%s20867_s1 + $0x11c] sm:$0xf0]  ;;  %v13468_v36 = vld [vmem:[%s20867_s1 + $0x104] sm:$0xf] }
 0x3db   :  { %v4223_v44 = vrot.slane %v4106_v31, 2  ;;  %v10932_v31 = vor.u32 %v13472_v20, %v10931_v39  ;;  %v13536_v35 = vld [vmem:[%s20867_s1 + $0x31c] sm:$0xf0]  ;;  %v13436_v20 = vld [vmem:[%s20867_s1 + $0x4] sm:$0xf] }
 0x3dc   :  { %v13504_v39 = vld [vmem:[%s20867_s1 + $0x21c] sm:$0xf0] }
 0x3dd   :  { %v4228_v46 = vsel %vm1028_vm0, %v4222_v56, %v4223_v44  ;;  %v11188_v56 = vor.u32 %v13536_v35, %v11187_v50  ;;  %v13532_v44 = vld [vmem:[%s20867_s1 + $0x304] sm:$0xf]  ;;  %5074 = vmatpush.bf16.msra.mxu0 %v10932_v31  ;;  %v11060_v31 = vor.u32 %v13504_v39, %v11059_v18 }
 0x3de   :  { %v4229_v22 = vsel %vm1030_vm2, %v4227_v45, %v4228_v46  ;;  %v11189_v45 = vld [vmem:[%s20867_s1 + $0x320] sm:$0xf0] }
 0x3df   :  { %v4235_v47 = vadd.f32 %v4229_v22, %v3226_v16  ;;  %v10936_v16 = vor.u32 %v13468_v36, %v10933_v41  ;;  %v11192_v46 = vor.u32 %v13532_v44, %v11189_v45  ;;  %v10899_v22 = vld [vmem:[%s20867_s1 + $0xc0] sm:$0xf]  ;;  %5087 = vmatpush.bf16.msra.mxu1 %v11188_v56  ;;  %v10805_v35 = vld [vmem:[%s20867_s1 + $0x20] sm:$0xf0]  ;;  %v11035_v44 = vld [vmem:[%s20867_s1 + $0x1c8] sm:$0xf] }
 0x3e0   :  { %v4094_v48 = vpop.f32.mrf.mxu2  ;;  %v4107_v11 = vpop.f32.mrf.mxu3  ;;  %v13500_v36 = vld [vmem:[%s20867_s1 + $0x204] sm:$0xf]  ;;  %v10808_v56 = vor.u32 %v13436_v20, %v10805_v35  ;;  %v13497_v45 = vld [vmem:[%s20867_s1 + $0x1e4] sm:$0xf0] }
 0x3e1   :  { %v10798_v49 = vmul.f32 -1.442695, %v4235_v47  ;;  %v13464_v47 = vld [vmem:[%s20867_s1 + $0xdc] sm:$0xf0]  ;;  %5100 = vmatpush.bf16.msra.mxu2 %v10936_v16  ;;  %5113 = vmatpush.bf16.msra.mxu3 %v11192_v46  ;;  %v11061_v41 = vld [vmem:[%s20867_s1 + $0x220] sm:$0xf0] }
 0x3e2   :  { %v17440_v10 = vpop.f32.mrf.mxu0  ;;  %v17442_v53 = vpop.f32.mrf.mxu1  ;;  %v11155_v48 = vld [vmem:[%s20867_s1 + $0x2c0] sm:$0xf]  ;;  %v10900_v11 = vor.u32 %v13464_v47, %v10899_v22  ;;  %v11064_v16 = vor.u32 %v13500_v36, %v11061_v41  ;;  %v11291_v46 = vld [vmem:[%s20867_s1 + $0x3c8] sm:$0xf]  ;;  %v11036_v47 = vor.u32 %v13497_v45, %v11035_v44  ;;  %v13469_v44 = vld [vmem:[%s20867_s1 + $0x10c] sm:$0xf] }
 0x3e3   :  { %14003 = vpow2.f32 %v10798_v49  ;;  %v13528_v49 = vld [vmem:[%s20867_s1 + $0x2dc] sm:$0xf0]  ;;  %v4132_v57 = vadd.f32 %v17442_v53, %v17440_v10  ;;  %v11003_v10 = vld [vmem:[%s20867_s1 + $0x188] sm:$0xf] }
 0x3e4   :  { %v11156_v40 = vor.u32 %v13528_v49, %v11155_v48  ;;  %5075 = vmatpush.bf16.msra.mxu0 %v10900_v11  ;;  %v13561_v48 = vld [vmem:[%s20867_s1 + $0x3e4] sm:$0xf0]  ;;  %v13493_v11 = vld [vmem:[%s20867_s1 + $0x1cc] sm:$0xf] }
 0x3e5   :  { %5101 = vmatpush.bf16.msra.mxu2 %v10904_v59  ;;  %5114 = vmatpush.bf16.msra.mxu3 %v11160_v61  ;;  %v11037_v49 = vld [vmem:[%s20867_s1 + $0x1e8] sm:$0xf0]  ;;  %v11292_v59 = vor.u32 %v13561_v48, %v11291_v46  ;;  %v13473_v35 = vld [vmem:[%s20867_s1 + $0x124] sm:$0xf0] }
 0x3e6   :  { %5088 = vmatpush.bf16.msra.mxu1 %v11156_v40  ;;  %v11040_v29 = vor.u32 %v13493_v11, %v11037_v49  ;;  %v11293_v61 = vld [vmem:[%s20867_s1 + $0x3e8] sm:$0xf0]  ;;  %v11195_v36 = vld [vmem:[%s20867_s1 + $0x308] sm:$0xf] }
 0x3e7   :  { %v10941_v46 = vld [vmem:[%s20867_s1 + $0x128] sm:$0xf0] }
 0x3e8   :  { %5076 = vmatpush.bf16.msra.mxu0 %v10868_v43  ;;  %v11296_v43 = vor.u32 %v13557_v51, %v11293_v61  ;;  %v10944_v11 = vor.u32 %v13469_v44, %v10941_v46  ;;  %v13461_v51 = vld [vmem:[%s20867_s1 + $0xcc] sm:$0xf] }
 0x3e9   :  { %v14004_v3 = vpop.eup %14003  ;;  %5115 = vmatpush.bf16.msra.mxu3 %v11128_v33  ;;  %v13549_v33 = vld [vmem:[%s20867_s1 + $0x38c] sm:$0xf] }
 0x3ea   :  { %v4120_v28 = vpop.f32.mrf.mxu0  ;;  %v4133_v4 = vpop.f32.mrf.mxu1  ;;  %v17496_v13 = vadd.f32 1.0, %v14004_v3  ;;  %v10869_v3 = vld [vmem:[%s20867_s1 + $0xa0] sm:$0xf0]  ;;  %v10909_v61 = vld [vmem:[%s20867_s1 + $0xe8] sm:$0xf0] }
 0x3eb   :  { %v17468_v0 = vpop.f32.mrf.mxu2  ;;  %v17470_v1 = vpop.f32.mrf.mxu3  ;;  %v11124_v4 = vor.u32 %v13520_v52, %v11123_v34  ;;  %v10872_v9 = vor.u32 %v13452_v2, %v10869_v3  ;;  %v13489_v52 = vld [vmem:[%s20867_s1 + $0x1a4] sm:$0xf0] }
 0x3ec   :  { %14005 = vrcp.f32 %v17496_v13  ;;  %v17610_v5 = vadd.f32 %v17470_v1, %v17468_v0  ;;  %v11092_v0 = vor.u32 %v13512_v14, %v11091_v12  ;;  %v10840_v1 = vor.u32 %v13444_v15, %v10837_v55  ;;  %5077 = vmatpush.bf16.msra.mxu0 %v10836_v7  ;;  %v11259_v2 = vld [vmem:[%s20867_s1 + $0x388] sm:$0xf]  ;;  %v11261_v14 = vld [vmem:[%s20867_s1 + $0x3a8] sm:$0xf0] }
 0x3ed   :  { %5089 = vmatpush.bf16.msra.mxu1 %v11124_v4  ;;  %5102 = vmatpush.bf16.msra.mxu2 %v10872_v9  ;;  %v13553_v3 = vld [vmem:[%s20867_s1 + $0x3a4] sm:$0xf0]  ;;  %vm4250_vm15 = vweird.f32 %v17496_v13  ;;  %v11004_v4 = vor.u32 %v13489_v52, %v11003_v10  ;;  %v4254_v12 = vand.u32 2147483647, %v17496_v13  ;;  %v11008_v7 = vor.u32 %v13485_v62, %v11005_v63 }
 0x3ee   :  { %v4224_v58 = vrot.slane %v17610_v5, 6  ;;  %5116 = vmatpush.bf16.msra.mxu3 %v11096_v26  ;;  %v11260_v9 = vor.u32 %v13553_v3, %v11259_v2  ;;  %v11264_v15 = vor.u32 %v13549_v33, %v11261_v14  ;;  %v10971_v55 = vld [vmem:[%s20867_s1 + $0x148] sm:$0xf]  ;;  %v13477_v26 = vld [vmem:[%s20867_s1 + $0x14c] sm:$0xf] }
 0x3ef   :  { %v10973_v5 = vld [vmem:[%s20867_s1 + $0x168] sm:$0xf0]  ;;  %vm4255_vm4 = vcmp.eq.f32.partialorder %v4254_v12, 8.507059e+37  ;;  %v13521_v33 = vld [vmem:[%s20867_s1 + $0x2a4] sm:$0xf0] }
 0x3f0   :  { %v10976_v18 = vor.u32 %v13477_v26, %v10973_v5  ;;  %v10845_v26 = vld [vmem:[%s20867_s1 + $0x68] sm:$0xf0] }
 0x3f1   :  { %5090 = vmatpush.bf16.msra.mxu1 %v11092_v0  ;;  %5103 = vmatpush.bf16.msra.mxu2 %v10840_v1 }
 0x3f2   :  { %v17571_v60 = vpop.eup %14005  ;;  %5117 = vmatpush.bf16.msra.mxu3 %v11064_v16  ;;  %v13537_v16 = vld [vmem:[%s20867_s1 + $0x324] sm:$0xf0] }
 0x3f3   :  { %v4146_v38 = vpop.f32.mrf.mxu2  ;;  %v4159_v23 = vpop.f32.mrf.mxu3  ;;  %v4246_v28 = vmul.f32 %v17571_v60, %v17496_v13  ;;  %vm4251_vm14 = vweird.f32 %v17571_v60  ;;  %v11196_v45 = vor.u32 %v13537_v16, %v11195_v36 }
 0x3f4   :  { %v4256_v38 = vand.u32 2147483648, %v17496_v13  ;;  %v10804_v23 = vor.u32 %v13440_v8, %v10803_v27  ;;  %vm17707_vm3 = vmor %vm4250_vm15, %vm4251_vm14 }
 0x3f5   :  { %v4247_v17 = vsub.f32 1.0, %v4246_v28  ;;  %5091 = vmatpush.bf16.msra.mxu1 %v11060_v31  ;;  %5104 = vmatpush.bf16.msra.mxu2 %v10808_v56  ;;  %v3227_v28 = vunpack.c.h.bf16 %v17434_v30 }
 0x3f6   :  { %5078 = vmatpush.bf16.msra.mxu0 %v10804_v23  ;;  %5162 = vmatpush.bf16.msrb.mxu3 %v11296_v43  ;;  %v4257_v8 = vor.u32 1.1754944e-38, %v4256_v38  ;;  %v11229_v23 = vld [vmem:[%s20867_s1 + $0x368] sm:$0xf0]  ;;  %v10939_v38 = vld [vmem:[%s20867_s1 + $0x108] sm:$0xf] }
 0x3f7   :  { %v4248_v50 = vmul.f32 %v17571_v60, %v4247_v17  ;;  %v13481_v17 = vld [vmem:[%s20867_s1 + $0x164] sm:$0xf0]  ;;  %v10940_v56 = vor.u32 %v13473_v35, %v10939_v38  ;;  %v4276_v43 = vld [vmem:[#allocation3] sm:$0xf] }
 0x3f8   :  { %v10972_v24 = vor.u32 %v13481_v17, %v10971_v55  ;;  %v11133_v55 = vld [vmem:[%s20867_s1 + $0x2a8] sm:$0xf0] }
 0x3f9   :  { %v4249_v42 = vadd.f32 %v17571_v60, %v4248_v50  ;;  %5136 = vmatpush.bf16.msrb.mxu1 %v11292_v59  ;;  %5149 = vmatpush.bf16.msrb.mxu2 %v11040_v29  ;;  %v13529_v29 = vld [vmem:[%s20867_s1 + $0x2e4] sm:$0xf0]  ;;  %v13501_v38 = vld [vmem:[%s20867_s1 + $0x20c] sm:$0xf] }
 0x3fa   :  { %5123 = vmatpush.bf16.msrb.mxu0 %v11036_v47  ;;  %5163 = vmatpush.bf16.msrb.mxu3 %v11264_v15  ;;  %v11197_v47 = vld [vmem:[%s20867_s1 + $0x328] sm:$0xf0] }
 0x3fb   :  { %v4253_v1 = vsel %vm17707_vm3, %v17571_v60, %v4249_v42  ;;  %v13525_v42 = vld [vmem:[%s20867_s1 + $0x2cc] sm:$0xf] }
 0x3fc   :  { %v4258_v50 = vsel %vm4255_vm4, %v4257_v8, %v4253_v1  ;;  %v13517_v15 = vld [vmem:[%s20867_s1 + $0x28c] sm:$0xf] }
 0x3fd   :  { %5137 = vmatpush.bf16.msrb.mxu1 %v11260_v9  ;;  %5150 = vmatpush.bf16.msrb.mxu2 %v11008_v7  ;;  %v4278_v48 = vrot.slane %v4258_v50, 4  ;;  %v11131_v9 = vld [vmem:[%s20867_s1 + $0x288] sm:$0xf]  ;;  %v11136_v17 = vor.u32 %v13517_v15, %v11133_v55  ;;  %v13509_v8 = vld [vmem:[%s20867_s1 + $0x24c] sm:$0xf] }
 0x3fe   :  { %5124 = vmatpush.bf16.msrb.mxu0 %v11004_v4  ;;  %v13457_v4 = vld [vmem:[%s20867_s1 + $0xa4] sm:$0xf0]  ;;  %v11132_v7 = vor.u32 %v13521_v33, %v11131_v9  ;;  %v11069_v35 = vld [vmem:[%s20867_s1 + $0x228] sm:$0xf0]  ;;  %v11269_v15 = vld [vmem:[%s20867_s1 + $0x3b0] sm:$0xf0] }
 0x3ff   :  { %v4280_v2 = vmul.f32 %v4278_v48, %v4276_v43  ;;  %v11072_v44 = vor.u32 %v13501_v38, %v11069_v35  ;;  %v11301_v43 = vld [vmem:[%s20867_s1 + $0x3f0] sm:$0xf0] }
 0x400   :  { %v10949_v38 = vld [vmem:[%s20867_s1 + $0x130] sm:$0xf0] }
 0x401   :  { %5151 = vmatpush.bf16.msrb.mxu2 %v10976_v18  ;;  %v13534_v35 = vld [vmem:[%s20867_s1 + $0x314] sm:$0xf] }
 0x402   :  { %v4170_v19 = vpop.f32.mrf.mxu0  ;;  %v4183_v21 = vpop.f32.mrf.mxu1  ;;  %5125 = vmatpush.bf16.msrb.mxu0 %v10972_v24  ;;  %v13513_v24 = vld [vmem:[%s20867_s1 + $0x264] sm:$0xf0] }
 0x403   :  { %v4184_v22 = vadd.f32 %v4183_v21, %v4170_v19  ;;  %v11227_v19 = vld [vmem:[%s20867_s1 + $0x348] sm:$0xf]  ;;  %v4230_v21 = vsel %vm1026_vm1, %v4132_v57, %v4224_v58  ;;  %v13541_v58 = vld [vmem:[%s20867_s1 + $0x34c] sm:$0xf] }
 0x404   :  { %v11228_v60 = vor.u32 %v13545_v25, %v11227_v19  ;;  %v11232_v20 = vor.u32 %v13541_v58, %v11229_v23  ;;  %v10907_v57 = vld [vmem:[%s20867_s1 + $0xc8] sm:$0xf]  ;;  %v13445_v25 = vld [vmem:[%s20867_s1 + $0x4c] sm:$0xf] }
 0x405   :  { %v4225_v54 = vrot.slane %v4184_v22, 4  ;;  %v13533_v22 = vld [vmem:[%s20867_s1 + $0x30c] sm:$0xf]  ;;  %5152 = vmatpush.bf16.msrb.mxu2 %v10944_v11  ;;  %v10843_v19 = vld [vmem:[%s20867_s1 + $0x48] sm:$0xf] }
 0x406   :  { %5138 = vmatpush.bf16.msrb.mxu1 %v11228_v60  ;;  %5164 = vmatpush.bf16.msrb.mxu3 %v11232_v20  ;;  %v11200_v49 = vor.u32 %v13533_v22, %v11197_v47  ;;  %v11101_v60 = vld [vmem:[%s20867_s1 + $0x268] sm:$0xf0]  ;;  %v10811_v58 = vld [vmem:[%s20867_s1 + $0x8] sm:$0xf] }
 0x407   :  { %5126 = vmatpush.bf16.msrb.mxu0 %v10940_v56  ;;  %v11104_v18 = vor.u32 %v13509_v8, %v11101_v60  ;;  %v13441_v23 = vld [vmem:[%s20867_s1 + $0x24] sm:$0xf0]  ;;  %v11237_v8 = vld [vmem:[%s20867_s1 + $0x370] sm:$0xf0] }
 0x408   :  { %v13505_v20 = vld [vmem:[%s20867_s1 + $0x224] sm:$0xf0] }
 0x409   :  { %v4196_v37 = vpop.f32.mrf.mxu2  ;;  %v4209_v40 = vpop.f32.mrf.mxu3 }
 0x40a   :  { %v4210_v53 = vadd.f32 %v4209_v40, %v4196_v37  ;;  %v4172_v32 = vpop.f32.mrf.mxu0  ;;  %v4185_v34 = vpop.f32.mrf.mxu1  ;;  %v13465_v37 = vld [vmem:[%s20867_s1 + $0xe4] sm:$0xf0]  ;;  %5139 = vmatpush.bf16.msrb.mxu1 %v11196_v45  ;;  %5165 = vmatpush.bf16.msrb.mxu3 %v11200_v49 }
 0x40b   :  { %v11163_v40 = vld [vmem:[%s20867_s1 + $0x2c8] sm:$0xf]  ;;  %v10908_v59 = vor.u32 %v13465_v37, %v10907_v57  ;;  %v11165_v32 = vld [vmem:[%s20867_s1 + $0x2e8] sm:$0xf0] }
 0x40c   :  { %v4226_v6 = vrot.slane %v4210_v53, 2  ;;  %v11164_v10 = vor.u32 %v13529_v29, %v11163_v40  ;;  %v10912_v53 = vor.u32 %v13461_v51, %v10909_v61  ;;  %v11168_v52 = vor.u32 %v13525_v42, %v11165_v32  ;;  %v11043_v51 = vld [vmem:[%s20867_s1 + $0x1d0] sm:$0xf]  ;;  %v13494_v42 = vld [vmem:[%s20867_s1 + $0x1d4] sm:$0xf] }
 0x40d   :  { %5127 = vmatpush.bf16.msrb.mxu0 %v10908_v59  ;;  %v13498_v61 = vld [vmem:[%s20867_s1 + $0x1ec] sm:$0xf0]  ;;  %v11045_v32 = vld [vmem:[%s20867_s1 + $0x1f0] sm:$0xf0] }
 0x40e   :  { %v4231_v0 = vsel %vm1028_vm0, %v4225_v54, %v4226_v6  ;;  %v13453_v54 = vld [vmem:[%s20867_s1 + $0x8c] sm:$0xf]  ;;  %5140 = vmatpush.bf16.msrb.mxu1 %v11164_v10  ;;  %5153 = vmatpush.bf16.msrb.mxu2 %v10912_v53  ;;  %v11299_v10 = vld [vmem:[%s20867_s1 + $0x3d0] sm:$0xf]  ;;  %v11048_v33 = vor.u32 %v13494_v42, %v11045_v32  ;;  %v13454_v42 = vld [vmem:[%s20867_s1 + $0x94] sm:$0xf] }
 0x40f   :  { %v4232_v27 = vsel %vm1030_vm2, %v4230_v21, %v4231_v0  ;;  %v10877_v6 = vld [vmem:[%s20867_s1 + $0xa8] sm:$0xf0]  ;;  %5166 = vmatpush.bf16.msrb.mxu3 %v11168_v52  ;;  %v13449_v21 = vld [vmem:[%s20867_s1 + $0x64] sm:$0xf0]  ;;  %v13562_v53 = vld [vmem:[%s20867_s1 + $0x3ec] sm:$0xf0] }
 0x410   :  { %v4236_v39 = vadd.f32 %v4232_v27, %v3227_v28  ;;  %v10875_v28 = vld [vmem:[%s20867_s1 + $0x88] sm:$0xf]  ;;  %v10880_v14 = vor.u32 %v13453_v54, %v10877_v6  ;;  %v10844_v1 = vor.u32 %v13449_v21, %v10843_v19  ;;  %v10848_v27 = vor.u32 %v13445_v25, %v10845_v26  ;;  %v11267_v6 = vld [vmem:[%s20867_s1 + $0x390] sm:$0xf]  ;;  %v13478_v26 = vld [vmem:[%s20867_s1 + $0x154] sm:$0xf] }
 0x411   :  { %v4198_v31 = vpop.f32.mrf.mxu2  ;;  %v4211_v13 = vpop.f32.mrf.mxu3  ;;  %v10876_v63 = vor.u32 %v13457_v4, %v10875_v28  ;;  %v11099_v0 = vld [vmem:[%s20867_s1 + $0x248] sm:$0xf]  ;;  %v11044_v4 = vor.u32 %v13498_v61, %v11043_v51  ;;  %v11300_v9 = vor.u32 %v13562_v53, %v11299_v10  ;;  %v10979_v19 = vld [vmem:[%s20867_s1 + $0x150] sm:$0xf]  ;;  %v10885_v32 = vld [vmem:[%s20867_s1 + $0xb0] sm:$0xf0] }
 0x412   :  { %v10799_v41 = vmul.f32 -1.442695, %v4236_v39  ;;  %14007 = vtanh.f32 %v4236_v39  ;;  %5141 = vmatpush.bf16.msrb.mxu1 %v11132_v7  ;;  %5154 = vmatpush.bf16.msrb.mxu2 %v10880_v14  ;;  %v11100_v5 = vor.u32 %v13513_v24, %v11099_v0  ;;  %v11067_v39 = vld [vmem:[%s20867_s1 + $0x208] sm:$0xf]  ;;  %v10813_v31 = vld [vmem:[%s20867_s1 + $0x28] sm:$0xf0]  ;;  %v10812_v13 = vor.u32 %v13441_v23, %v10811_v58 }
 0x413   :  { %5128 = vmatpush.bf16.msrb.mxu0 %v10876_v63  ;;  %5167 = vmatpush.bf16.msrb.mxu3 %v11136_v17  ;;  %v13490_v63 = vld [vmem:[%s20867_s1 + $0x1ac] sm:$0xf0]  ;;  %v11013_v7 = vld [vmem:[%s20867_s1 + $0x1b0] sm:$0xf0] }
 0x414   :  { %14009 = vpow2.f32 %v10799_v41  ;;  %v11068_v41 = vor.u32 %v13505_v20, %v11067_v39  ;;  %v13550_v14 = vld [vmem:[%s20867_s1 + $0x394] sm:$0xf]  ;;  %v13482_v21 = vld [vmem:[%s20867_s1 + $0x16c] sm:$0xf0] }
 0x415   :  { %v11235_v24 = vld [vmem:[%s20867_s1 + $0x350] sm:$0xf]  ;;  %v10980_v60 = vor.u32 %v13482_v21, %v10979_v19 }
 0x416   :  { %5142 = vmatpush.bf16.msrb.mxu1 %v11100_v5  ;;  %5155 = vmatpush.bf16.msrb.mxu2 %v10848_v27  ;;  %v13546_v25 = vld [vmem:[%s20867_s1 + $0x36c] sm:$0xf0]  ;;  %v10981_v5 = vld [vmem:[%s20867_s1 + $0x170] sm:$0xf0] }
 0x417   :  { %5129 = vmatpush.bf16.msrb.mxu0 %v10844_v1  ;;  %5168 = vmatpush.bf16.msrb.mxu3 %v11104_v18  ;;  %v11272_v1 = vor.u32 %v13550_v14, %v11269_v15  ;;  %v13542_v27 = vld [vmem:[%s20867_s1 + $0x354] sm:$0xf]  ;;  %v11236_v18 = vor.u32 %v13546_v25, %v11235_v24  ;;  %v10947_v58 = vld [vmem:[%s20867_s1 + $0x110] sm:$0xf]  ;;  %v10984_v39 = vor.u32 %v13478_v26, %v10981_v5 }
 0x418   :  { %v14008_v34 = vpop.eup %14007  ;;  %v13474_v23 = vld [vmem:[%s20867_s1 + $0x12c] sm:$0xf0]  ;;  %v11240_v20 = vor.u32 %v13542_v27, %v11237_v8  ;;  %v13438_v24 = vld [vmem:[%s20867_s1 + $0x14] sm:$0xf]  ;;  %v11051_v27 = vld [vmem:[%s20867_s1 + $0x1d8] sm:$0xf] }
 0x419   :  { %v4281_v3 = vmul.f32 %v14008_v34, %v4258_v50  ;;  %v13437_v50 = vld [vmem:[%s20867_s1 + $0xc] sm:$0xf]  ;;  %v13558_v34 = vld [vmem:[%s20867_s1 + $0x3d4] sm:$0xf]  ;;  %v11139_v10 = vld [vmem:[%s20867_s1 + $0x290] sm:$0xf] }
 0x41a   :  { %v14010_v62 = vpop.eup %14009  ;;  %v10816_v56 = vor.u32 %v13437_v50, %v10813_v31  ;;  %5143 = vmatpush.bf16.msrb.mxu1 %v11068_v41  ;;  %v11304_v54 = vor.u32 %v13558_v34, %v11301_v43  ;;  %v11203_v50 = vld [vmem:[%s20867_s1 + $0x310] sm:$0xf]  ;;  %v10948_v41 = vor.u32 %v13474_v23, %v10947_v58  ;;  %v13518_v34 = vld [vmem:[%s20867_s1 + $0x294] sm:$0xf]  ;;  %v13499_v8 = vld [vmem:[%s20867_s1 + $0x1f4] sm:$0xf0] }
 0x41b   :  { %v4244_v30 = vadd.f32 1.0, %v14010_v62  ;;  %v4282_v12 = vadd.f32 %v4281_v3, %v4280_v2  ;;  %5130 = vmatpush.bf16.msrb.mxu0 %v10812_v13  ;;  %5169 = vmatpush.bf16.msrb.mxu3 %v11072_v44  ;;  %v11011_v62 = vld [vmem:[%s20867_s1 + $0x190] sm:$0xf]  ;;  %v13470_v13 = vld [vmem:[%s20867_s1 + $0x114] sm:$0xf] }
 0x41c   :  { %5156 = vmatpush.bf16.msrb.mxu2 %v10816_v56  ;;  %v11012_v55 = vor.u32 %v13490_v63, %v11011_v62  ;;  %v13538_v31 = vld [vmem:[%s20867_s1 + $0x32c] sm:$0xf0]  ;;  %v11141_v43 = vld [vmem:[%s20867_s1 + $0x2b0] sm:$0xf0]  ;;  %v10888_v62 = vor.u32 %v13454_v42, %v10885_v32  ;;  %v13495_v58 = vld [vmem:[%s20867_s1 + $0x1dc] sm:$0xf] }
 0x41d   :  { %14011 = vrcp.f32 %v4244_v30  ;;  %4283 = vst [vmem:[#allocation3] sm:$0xf] %v4282_v12  ;;  %v4271_v46 = vand.u32 2147483648, %v4244_v30  ;;  %v4269_v47 = vand.u32 2147483647, %v4244_v30  ;;  %vm4265_vm6 = vweird.f32 %v4244_v30 }
 0x41e   :  { %14013 = vtanh.f32 %v4282_v12  ;;  %v13486_v12 = vld [vmem:[%s20867_s1 + $0x194] sm:$0xf]  ;;  %v11204_v56 = vor.u32 %v13538_v31, %v11203_v50  ;;  %v13466_v44 = vld [vmem:[%s20867_s1 + $0xec] sm:$0xf0]  ;;  %v11144_v63 = vor.u32 %v13518_v34, %v11141_v43  ;;  %v13559_v50 = vld [vmem:[%s20867_s1 + $0x3dc] sm:$0xf] }
 0x41f   :  { %v4272_v11 = vor.u32 1.1754944e-38, %v4271_v46  ;;  %vm4270_vm8 = vcmp.eq.f32.partialorder %v4269_v47, 8.507059e+37  ;;  %v11016_v0 = vor.u32 %v13486_v12, %v11013_v7  ;;  %v13530_v47 = vld [vmem:[%s20867_s1 + $0x2ec] sm:$0xf0]  ;;  %v13510_v12 = vld [vmem:[%s20867_s1 + $0x254] sm:$0xf] }
 0x420   :  { %v13522_v53 = vld [vmem:[%s20867_s1 + $0x2ac] sm:$0xf0]  ;;  %v11109_v7 = vld [vmem:[%s20867_s1 + $0x270] sm:$0xf0]  ;;  %v11309_v31 = vld [vmem:[%s20867_s1 + $0x3f8] sm:$0xf0] }
 0x421   :  { %v10819_v14 = vld [vmem:[%s20867_s1 + $0x10] sm:$0xf]  ;;  %v10821_v25 = vld [vmem:[%s20867_s1 + $0x30] sm:$0xf0]  ;;  %v13543_v42 = vld [vmem:[%s20867_s1 + $0x35c] sm:$0xf] }
 0x422   :  { %v11075_v19 = vld [vmem:[%s20867_s1 + $0x210] sm:$0xf]  ;;  %v13502_v26 = vld [vmem:[%s20867_s1 + $0x214] sm:$0xf]  ;;  %v11245_v32 = vld [vmem:[%s20867_s1 + $0x378] sm:$0xf0] }
 0x423   :  { %v14012_v36 = vpop.eup %14011  ;;  %v13506_v21 = vld [vmem:[%s20867_s1 + $0x22c] sm:$0xf0]  ;;  %v11077_v5 = vld [vmem:[%s20867_s1 + $0x230] sm:$0xf0] }
 0x424   :  { %v4261_v16 = vmul.f32 %v14012_v36, %v4244_v30  ;;  %vm4266_vm5 = vweird.f32 %v14012_v36  ;;  %v14014_v40 = vpop.eup %14013  ;;  %v13554_v30 = vld [vmem:[%s20867_s1 + $0x3ac] sm:$0xf0] }
 0x425   :  { %vm4267_vm7 = vmor %vm4265_vm6, %vm4266_vm5  ;;  %v11268_v17 = vor.u32 %v13554_v30, %v11267_v6  ;;  %v13446_v6 = vld [vmem:[%s20867_s1 + $0x54] sm:$0xf] }
 0x426   :  { %v4262_v45 = vsub.f32 1.0, %v4261_v16  ;;  %v10915_v16 = vld [vmem:[%s20867_s1 + $0xd0] sm:$0xf]  ;;  %v10853_v30 = vld [vmem:[%s20867_s1 + $0x70] sm:$0xf0] }
 0x428   :  { %v4263_v22 = vmul.f32 %v14012_v36, %v4262_v45  ;;  %v10952_v45 = vor.u32 %v13470_v13, %v10949_v38  ;;  %v10824_v13 = vor.u32 %v13438_v24, %v10821_v25  ;;  %v11080_v38 = vor.u32 %v13502_v26, %v11077_v5  ;;  %v13527_v24 = vld [vmem:[%s20867_s1 + $0x2dc] sm:$0xf] }
 0x429   :  { %v11181_v25 = vld [vmem:[%s20867_s1 + $0x2f8] sm:$0xf0] }
 0x42a   :  { %v4264_v48 = vadd.f32 %v14012_v36, %v4263_v22  ;;  %v11171_v22 = vld [vmem:[%s20867_s1 + $0x2d0] sm:$0xf] }
 0x42c   :  { %v4268_v49 = vsel %vm4267_vm7, %v14012_v36, %v4264_v48  ;;  %v11205_v36 = vld [vmem:[%s20867_s1 + $0x330] sm:$0xf0] }
 0x42d   :  { %v4273_v57 = vsel %vm4270_vm8, %v4272_v11, %v4268_v49  ;;  %v11208_v46 = vor.u32 %v13534_v35, %v11205_v36  ;;  %v13462_v48 = vld [vmem:[%s20867_s1 + $0xd4] sm:$0xf]  ;;  %v11052_v35 = vor.u32 %v13499_v8, %v11051_v27  ;;  %v10891_v27 = vld [vmem:[%s20867_s1 + $0x98] sm:$0xf] }
 0x42e   :  { %v4286_v37 = vrot.slane %v4273_v57, 4  ;;  %v10917_v11 = vld [vmem:[%s20867_s1 + $0xf0] sm:$0xf0]  ;;  %v13459_v8 = vld [vmem:[%s20867_s1 + $0xb4] sm:$0xf0] }
 0x42f   :  { %v13526_v49 = vld [vmem:[%s20867_s1 + $0x2d4] sm:$0xf]  ;;  %v10920_v51 = vor.u32 %v13462_v48, %v10917_v11  ;;  %v13551_v48 = vld [vmem:[%s20867_s1 + $0x39c] sm:$0xf] }
 0x430   :  { %v4288_v59 = vmul.f32 %v14014_v40, %v4286_v37  ;;  %v11173_v57 = vld [vmem:[%s20867_s1 + $0x2f0] sm:$0xf0]  ;;  %v10916_v37 = vor.u32 %v13466_v44, %v10915_v16  ;;  %v11172_v40 = vor.u32 %v13530_v47, %v11171_v22  ;;  %v11312_v44 = vor.u32 %v13559_v50, %v11309_v31  ;;  %v13487_v22 = vld [vmem:[%s20867_s1 + $0x19c] sm:$0xf] }
 0x431   :  { %v11176_v61 = vor.u32 %v13526_v49, %v11173_v57  ;;  %v11021_v47 = vld [vmem:[%s20867_s1 + $0x1b8] sm:$0xf0] }
 0x432   :  { %4289 = vst [vmem:[#allocation2] sm:$0xf] %v4288_v59  ;;  %v10883_v59 = vld [vmem:[%s20867_s1 + $0x90] sm:$0xf]  ;;  %v11277_v11 = vld [vmem:[%s20867_s1 + $0x3b8] sm:$0xf0] }
 0x433   :  { %v13519_v50 = vld [vmem:[%s20867_s1 + $0x29c] sm:$0xf] }
 0x434   :  { %v11149_v31 = vld [vmem:[%s20867_s1 + $0x2b8] sm:$0xf0] }
 0x439   :  { %v4294_v29 = vld [vmem:[#allocation2] sm:$0xf] }
 0x43a   :  { %4296 = vst [vmem:[#allocation1] ss:$4 sm:$0xff] %v4294_v29  ;;  %v13458_v29 = vld [vmem:[%s20867_s1 + $0xac] sm:$0xf0] }
 0x441   :  { %v4297_v52 = vld.sshfl [vmem:[#allocation1] sm:$0xff pattern:$0x73625140]  ;;  %v4298_v2 = vld.sshfl [vmem:[#allocation1 + $0x8] sm:$0xff pattern:$0x73625140] }
 0x442   :  { %v17893_v3 = vpack.c.bf16 %v4297_v52, %v4297_v52  ;;  %v17895_v28 = vpack.c.bf16 %v4298_v2, %v4298_v2  ;;  %v10884_v52 = vor.u32 %v13458_v29, %v10883_v59  ;;  %v11140_v2 = vor.u32 %v13522_v53, %v11139_v10  ;;  %v13479_v10 = vld [vmem:[%s20867_s1 + $0x15c] sm:$0xf] }
 0x443   :  { %v11024_v59 = vor.u32 %v13487_v22, %v11021_v47  ;;  %v11280_v29 = vor.u32 %v13551_v48, %v11277_v11  ;;  %v10989_v53 = vld [vmem:[%s20867_s1 + $0x178] sm:$0xf0] }
 0x444   :  { %5079 = vmatmul.bf16.vlgmr.msra.gmra.mxu0 %v17893_v3  ;;  %5092 = vmatmul.bf16.vlgmr.msra.gmra.mxu1 %v17895_v28  ;;  %v13511_v22 = vld [vmem:[%s20867_s1 + $0x25c] sm:$0xf] }
 0x445   :  { %5105 = vmatmul.bf16.vlgmr.msra.gmra.mxu2 %v17893_v3  ;;  %5118 = vmatmul.bf16.vlgmr.msra.gmra.mxu3 %v17895_v28  ;;  %v11117_v47 = vld [vmem:[%s20867_s1 + $0x278] sm:$0xf0] }
 0x446   :  { %5175 = vmatpush.bf16.msra.mxu0 %v11044_v4  ;;  %5188 = vmatpush.bf16.msra.mxu1 %v11300_v9  ;;  %v10851_v4 = vld [vmem:[%s20867_s1 + $0x50] sm:$0xf] }
 0x447   :  { %5201 = vmatpush.bf16.msra.mxu2 %v11048_v33  ;;  %5214 = vmatpush.bf16.msra.mxu3 %v11304_v54  ;;  %v13450_v9 = vld [vmem:[%s20867_s1 + $0x6c] sm:$0xf0] }
 0x448   :  { %v11107_v33 = vld [vmem:[%s20867_s1 + $0x250] sm:$0xf]  ;;  %v10852_v15 = vor.u32 %v13450_v9, %v10851_v4  ;;  %v10992_v4 = vor.u32 %v13479_v10, %v10989_v53  ;;  %v11248_v9 = vor.u32 %v13543_v42, %v11245_v32  ;;  %v13503_v10 = vld [vmem:[%s20867_s1 + $0x21c] sm:$0xf] }
 0x449   :  { %v13514_v54 = vld [vmem:[%s20867_s1 + $0x26c] sm:$0xf0]  ;;  %v11085_v53 = vld [vmem:[%s20867_s1 + $0x238] sm:$0xf0] }
 0x44a   :  { %5176 = vmatpush.bf16.msra.mxu0 %v11012_v55  ;;  %5189 = vmatpush.bf16.msra.mxu1 %v11268_v17  ;;  %v11108_v55 = vor.u32 %v13514_v54, %v11107_v33  ;;  %v13442_v17 = vld [vmem:[%s20867_s1 + $0x2c] sm:$0xf0]  ;;  %v13471_v33 = vld [vmem:[%s20867_s1 + $0x11c] sm:$0xf] }
 0x44b   :  { %5202 = vmatpush.bf16.msra.mxu2 %v11016_v0  ;;  %5215 = vmatpush.bf16.msra.mxu3 %v11272_v1  ;;  %v10856_v0 = vor.u32 %v13446_v6, %v10853_v30  ;;  %v11112_v1 = vor.u32 %v13510_v12, %v11109_v7  ;;  %v10820_v23 = vor.u32 %v13442_v17, %v10819_v14  ;;  %v10957_v54 = vld [vmem:[%s20867_s1 + $0x138] sm:$0xf0]  ;;  %v10923_v14 = vld [vmem:[%s20867_s1 + $0xd8] sm:$0xf] }
 0x44c   :  { %v13535_v6 = vld [vmem:[%s20867_s1 + $0x31c] sm:$0xf] }
 0x44d   :  { %v11213_v30 = vld [vmem:[%s20867_s1 + $0x338] sm:$0xf0] }
 0x44e   :  { %5177 = vmatpush.bf16.msra.mxu0 %v10980_v60  ;;  %5190 = vmatpush.bf16.msra.mxu1 %v11236_v18  ;;  %v11307_v60 = vld [vmem:[%s20867_s1 + $0x3d8] sm:$0xf]  ;;  %v11216_v17 = vor.u32 %v13535_v6, %v11213_v30 }
 0x44f   :  { %5203 = vmatpush.bf16.msra.mxu2 %v10984_v39  ;;  %5216 = vmatpush.bf16.msra.mxu3 %v11240_v20  ;;  %v13563_v18 = vld [vmem:[%s20867_s1 + $0x3f4] sm:$0xf0]  ;;  %v11076_v39 = vor.u32 %v13506_v21, %v11075_v19  ;;  %v11053_v20 = vld [vmem:[%s20867_s1 + $0x1f8] sm:$0xf0] }
 0x450   :  { %v11308_v36 = vor.u32 %v13563_v18, %v11307_v60  ;;  %v11056_v16 = vor.u32 %v13495_v58, %v11053_v20  ;;  %v11179_v19 = vld [vmem:[%s20867_s1 + $0x2d8] sm:$0xf]  ;;  %v11184_v18 = vor.u32 %v13527_v24, %v11181_v25  ;;  %v10893_v20 = vld [vmem:[%s20867_s1 + $0xb8] sm:$0xf0] }
 0x451   :  { %v13531_v21 = vld [vmem:[%s20867_s1 + $0x2f4] sm:$0xf0] }
 0x452   :  { %5178 = vmatpush.bf16.msra.mxu0 %v10948_v41  ;;  %5191 = vmatpush.bf16.msra.mxu1 %v11204_v56  ;;  %v11019_v41 = vld [vmem:[%s20867_s1 + $0x198] sm:$0xf]  ;;  %v11180_v5 = vor.u32 %v13531_v21, %v11179_v19 }
 0x453   :  { %5204 = vmatpush.bf16.msra.mxu2 %v10952_v45  ;;  %5217 = vmatpush.bf16.msra.mxu3 %v11208_v46  ;;  %v13491_v56 = vld [vmem:[%s20867_s1 + $0x1b4] sm:$0xf0] }
 0x454   :  { %5131 = vmatmul.bf16.vlgmr.msrb.gmra.mxu0 %v17893_v3  ;;  %5144 = vmatmul.bf16.vlgmr.msrb.gmra.mxu1 %v17895_v28  ;;  %v11275_v45 = vld [vmem:[%s20867_s1 + $0x398] sm:$0xf]  ;;  %v11020_v49 = vor.u32 %v13491_v56, %v11019_v41  ;;  %v11152_v56 = vor.u32 %v13519_v50, %v11149_v31  ;;  %v11798_v50 = vld [vmem:[%s20867_s1 + $0x3c0] sm:$0xf] }
 0x455   :  { %5157 = vmatmul.bf16.vlgmr.msrb.gmra.mxu2 %v17893_v3  ;;  %5170 = vmatmul.bf16.vlgmr.msrb.gmra.mxu3 %v17895_v28  ;;  %v13555_v46 = vld [vmem:[%s20867_s1 + $0x3b4] sm:$0xf0] }
 0x456   :  { %5179 = vmatpush.bf16.msra.mxu0 %v10916_v37  ;;  %5192 = vmatpush.bf16.msra.mxu1 %v11172_v40  ;;  %v11276_v57 = vor.u32 %v13555_v46, %v11275_v45  ;;  %v10987_v37 = vld [vmem:[%s20867_s1 + $0x158] sm:$0xf]  ;;  %v13447_v45 = vld [vmem:[%s20867_s1 + $0x5c] sm:$0xf] }
 0x457   :  { %5205 = vmatpush.bf16.msra.mxu2 %v10920_v51  ;;  %5218 = vmatpush.bf16.msra.mxu3 %v11176_v61  ;;  %v13483_v40 = vld [vmem:[%s20867_s1 + $0x174] sm:$0xf0]  ;;  %v10861_v46 = vld [vmem:[%s20867_s1 + $0x78] sm:$0xf0] }
 0x458   :  { %v11243_v51 = vld [vmem:[%s20867_s1 + $0x358] sm:$0xf]  ;;  %v10988_v34 = vor.u32 %v13483_v40, %v10987_v37  ;;  %v10864_v37 = vor.u32 %v13447_v45, %v10861_v46  ;;  %v11120_v40 = vor.u32 %v13511_v22, %v11117_v47  ;;  %v11510_v22 = vld [vmem:[%s20867_s1 + $0x180] sm:$0xf] }
 0x459   :  { %v13547_v61 = vld [vmem:[%s20867_s1 + $0x374] sm:$0xf0]  ;;  %v13616_v47 = vld [vmem:[%s20867_s1 + $0x19c] sm:$0xf0] }
 0x45a   :  { %5180 = vmatpush.bf16.msra.mxu0 %v10884_v52  ;;  %5193 = vmatpush.bf16.msra.mxu1 %v11140_v2  ;;  %v11244_v43 = vor.u32 %v13547_v61, %v11243_v51  ;;  %v10955_v52 = vld [vmem:[%s20867_s1 + $0x118] sm:$0xf]  ;;  %v13439_v51 = vld [vmem:[%s20867_s1 + $0x1c] sm:$0xf] }
 0x45b   :  { %5206 = vmatpush.bf16.msra.mxu2 %v10888_v62  ;;  %5219 = vmatpush.bf16.msra.mxu3 %v11144_v63  ;;  %v13475_v2 = vld [vmem:[%s20867_s1 + $0x134] sm:$0xf0]  ;;  %v10829_v61 = vld [vmem:[%s20867_s1 + $0x38] sm:$0xf0] }
 0x45c   :  { %v11211_v62 = vld [vmem:[%s20867_s1 + $0x318] sm:$0xf]  ;;  %v10956_v12 = vor.u32 %v13475_v2, %v10955_v52 }
 0x45d   :  { %v13539_v63 = vld [vmem:[%s20867_s1 + $0x334] sm:$0xf0] }
 0x45e   :  { %5181 = vmatpush.bf16.msra.mxu0 %v10852_v15  ;;  %5194 = vmatpush.bf16.msra.mxu1 %v11108_v55  ;;  %v11212_v7 = vor.u32 %v13539_v63, %v11211_v62  ;;  %v13467_v15 = vld [vmem:[%s20867_s1 + $0xf4] sm:$0xf0]  ;;  %v10960_v55 = vor.u32 %v13471_v33, %v10957_v54 }
 0x45f   :  { %5207 = vmatpush.bf16.msra.mxu2 %v10856_v0  ;;  %5220 = vmatpush.bf16.msra.mxu3 %v11112_v1  ;;  %v13463_v0 = vld [vmem:[%s20867_s1 + $0xdc] sm:$0xf]  ;;  %v10924_v26 = vor.u32 %v13467_v15, %v10923_v14  ;;  %v11147_v58 = vld [vmem:[%s20867_s1 + $0x298] sm:$0xf]  ;;  %v18276_v15 = vld [vmem:[%s20866_s0 + $0x20] sm:$0xff] }
 0x460   :  { %v10925_v1 = vld [vmem:[%s20867_s1 + $0xf8] sm:$0xf0] }
 0x461   :  { %v10928_v60 = vor.u32 %v13463_v0, %v10925_v1  ;;  %v4292_v1 = vunpack.c.l.bf16 %v18276_v15 }
 0x462   :  { %5182 = vmatpush.bf16.msra.mxu0 %v10820_v23  ;;  %5195 = vmatpush.bf16.msra.mxu1 %v11076_v39  ;;  %v13523_v23 = vld [vmem:[%s20867_s1 + $0x2b4] sm:$0xf0]  ;;  %v13455_v39 = vld [vmem:[%s20867_s1 + $0x9c] sm:$0xf] }
 0x463   :  { %5208 = vmatpush.bf16.msra.mxu2 %v10824_v13  ;;  %5221 = vmatpush.bf16.msra.mxu3 %v11080_v38  ;;  %v10892_v13 = vor.u32 %v13459_v8, %v10891_v27  ;;  %v11148_v38 = vor.u32 %v13523_v23, %v11147_v58  ;;  %v10896_v41 = vor.u32 %v13455_v39, %v10893_v20  ;;  %v11542_v39 = vld [vmem:[%s20867_s1 + $0x1c0] sm:$0xf] }
 0x464   :  { %v13624_v20 = vld [vmem:[%s20867_s1 + $0x1dc] sm:$0xf0] }
 0x465   :  { %5183 = vmatmul.bf16.vlgmr.msra.gmra.mxu0 %v17893_v3  ;;  %5196 = vmatmul.bf16.vlgmr.msra.gmra.mxu1 %v17895_v28  ;;  %v11543_v31 = vor.u32 %v13624_v20, %v11542_v39  ;;  %v13588_v39 = vld [vmem:[%s20867_s1 + $0xc4] sm:$0xf] }
 0x466   :  { %5227 = vmatpush.bf16.msrb.mxu0 %v11052_v35  ;;  %5240 = vmatpush.bf16.msrb.mxu1 %v11308_v36  ;;  %v10859_v35 = vld [vmem:[%s20867_s1 + $0x58] sm:$0xf]  ;;  %v11416_v20 = vld [vmem:[%s20867_s1 + $0xe0] sm:$0xf0] }
 0x467   :  { %5253 = vmatpush.bf16.msrb.mxu2 %v11056_v16  ;;  %5266 = vmatpush.bf16.msrb.mxu3 %v11312_v44  ;;  %v13451_v36 = vld [vmem:[%s20867_s1 + $0x74] sm:$0xf0] }
 0x468   :  { %5209 = vmatmul.bf16.vlgmr.msra.gmra.mxu2 %v17893_v3  ;;  %5222 = vmatmul.bf16.vlgmr.msra.gmra.mxu3 %v17895_v28  ;;  %v11115_v16 = vld [vmem:[%s20867_s1 + $0x258] sm:$0xf]  ;;  %v10860_v48 = vor.u32 %v13451_v36, %v10859_v35  ;;  %v11544_v35 = vld [vmem:[%s20867_s1 + $0x1e0] sm:$0xf0] }
 0x469   :  { %v13515_v44 = vld [vmem:[%s20867_s1 + $0x274] sm:$0xf0] }
 0x46a   :  { %5228 = vmatpush.bf16.msrb.mxu0 %v11020_v49  ;;  %5241 = vmatpush.bf16.msrb.mxu1 %v11276_v57  ;;  %v11116_v11 = vor.u32 %v13515_v44, %v11115_v16  ;;  %v10827_v49 = vld [vmem:[%s20867_s1 + $0x18] sm:$0xf]  ;;  %v11800_v16 = vld [vmem:[%s20867_s1 + $0x3e0] sm:$0xf0] }
 0x46b   :  { %5254 = vmatpush.bf16.msrb.mxu2 %v11024_v59  ;;  %5267 = vmatpush.bf16.msrb.mxu3 %v11280_v29  ;;  %v13443_v57 = vld [vmem:[%s20867_s1 + $0x34] sm:$0xf0] }
 0x46c   :  { %v11083_v59 = vld [vmem:[%s20867_s1 + $0x218] sm:$0xf]  ;;  %v10828_v42 = vor.u32 %v13443_v57, %v10827_v49  ;;  %v11511_v57 = vor.u32 %v13616_v47, %v11510_v22  ;;  %v13648_v22 = vld [vmem:[%s20867_s1 + $0x29c] sm:$0xf0]  ;;  %v13580_v47 = vld [vmem:[%s20867_s1 + $0x84] sm:$0xf] }
 0x46d   :  { %v13507_v29 = vld [vmem:[%s20867_s1 + $0x234] sm:$0xf0] }
 0x46e   :  { %5229 = vmatpush.bf16.msrb.mxu0 %v10988_v34  ;;  %5242 = vmatpush.bf16.msrb.mxu1 %v11244_v43  ;;  %v11084_v32 = vor.u32 %v13507_v29, %v11083_v59  ;;  %v10832_v34 = vor.u32 %v13439_v51, %v10829_v61  ;;  %v11088_v43 = vor.u32 %v13503_v10, %v11085_v53  ;;  %v13612_v59 = vld [vmem:[%s20867_s1 + $0x184] sm:$0xf] }
 0x46f   :  { %5255 = vmatpush.bf16.msrb.mxu2 %v10992_v4  ;;  %5268 = vmatpush.bf16.msrb.mxu3 %v11248_v9  ;;  %v11512_v29 = vld [vmem:[%s20867_s1 + $0x1a0] sm:$0xf0] }
 0x470   :  { %v11515_v61 = vor.u32 %v13612_v59, %v11512_v29  ;;  %v13676_v10 = vld [vmem:[%s20867_s1 + $0x384] sm:$0xf]  ;;  %v11350_v29 = vld [vmem:[%s20867_s1 + $0x40] sm:$0xf] }
 0x471   :  { %v11768_v53 = vld [vmem:[%s20867_s1 + $0x3a0] sm:$0xf0] }
 0x472   :  { %5230 = vmatpush.bf16.msrb.mxu0 %v10956_v12  ;;  %5243 = vmatpush.bf16.msrb.mxu1 %v11212_v7 }
 0x473   :  { %5256 = vmatpush.bf16.msrb.mxu2 %v10960_v55  ;;  %5269 = vmatpush.bf16.msrb.mxu3 %v11216_v17 }
 0x476   :  { %5231 = vmatpush.bf16.msrb.mxu0 %v10924_v26  ;;  %5244 = vmatpush.bf16.msrb.mxu1 %v11180_v5 }
 0x477   :  { %5257 = vmatpush.bf16.msrb.mxu2 %v10928_v60  ;;  %5270 = vmatpush.bf16.msrb.mxu3 %v11184_v18 }
 0x47a   :  { %5232 = vmatpush.bf16.msrb.mxu0 %v10892_v13  ;;  %5245 = vmatpush.bf16.msrb.mxu1 %v11148_v38  ;;  %v13688_v13 = vld [vmem:[%s20867_s1 + $0x3dc] sm:$0xf0]  ;;  %v13620_v38 = vld [vmem:[%s20867_s1 + $0x1c4] sm:$0xf] }
 0x47b   :  { %5258 = vmatpush.bf16.msrb.mxu2 %v10896_v41  ;;  %5271 = vmatpush.bf16.msrb.mxu3 %v11152_v56  ;;  %v11799_v36 = vor.u32 %v13688_v13, %v11798_v50  ;;  %v11547_v41 = vor.u32 %v13620_v38, %v11544_v35  ;;  %v13684_v56 = vld [vmem:[%s20867_s1 + $0x3c4] sm:$0xf] }
 0x47c   :  { %v11803_v44 = vor.u32 %v13684_v56, %v11800_v16  ;;  %v13652_v13 = vld [vmem:[%s20867_s1 + $0x2c4] sm:$0xf]  ;;  %v13584_v56 = vld [vmem:[%s20867_s1 + $0x9c] sm:$0xf0] }
 0x47d   :  { %v11672_v38 = vld [vmem:[%s20867_s1 + $0x2e0] sm:$0xf0]  ;;  %v11638_v16 = vld [vmem:[%s20867_s1 + $0x280] sm:$0xf] }
 0x47e   :  { %5233 = vmatpush.bf16.msrb.mxu0 %v10860_v48  ;;  %5246 = vmatpush.bf16.msrb.mxu1 %v11116_v11 }
 0x47f   :  { %5259 = vmatpush.bf16.msrb.mxu2 %v10864_v37  ;;  %5272 = vmatpush.bf16.msrb.mxu3 %v11120_v40  ;;  %v11766_v37 = vld [vmem:[%s20867_s1 + $0x380] sm:$0xf] }
 0x480   :  { %v13680_v40 = vld [vmem:[%s20867_s1 + $0x39c] sm:$0xf0] }
 0x481   :  { %v11767_v51 = vor.u32 %v13680_v40, %v11766_v37  ;;  %v13644_v37 = vld [vmem:[%s20867_s1 + $0x284] sm:$0xf] }
 0x482   :  { %5234 = vmatpush.bf16.msrb.mxu0 %v10828_v42  ;;  %5247 = vmatpush.bf16.msrb.mxu1 %v11084_v32  ;;  %v11771_v32 = vor.u32 %v13676_v10, %v11768_v53  ;;  %v11640_v40 = vld [vmem:[%s20867_s1 + $0x2a0] sm:$0xf0] }
 0x483   :  { %5260 = vmatpush.bf16.msrb.mxu2 %v10832_v34  ;;  %5273 = vmatpush.bf16.msrb.mxu3 %v11088_v43  ;;  %v11478_v34 = vld [vmem:[%s20867_s1 + $0x140] sm:$0xf]  ;;  %v11643_v59 = vor.u32 %v13644_v37, %v11640_v40  ;;  %v13613_v37 = vld [vmem:[%s20867_s1 + $0x18c] sm:$0xf] }
 0x484   :  { %v13608_v43 = vld [vmem:[%s20867_s1 + $0x15c] sm:$0xf0]  ;;  %v11520_v40 = vld [vmem:[%s20867_s1 + $0x1a8] sm:$0xf0] }
 0x485   :  { %5235 = vmatmul.bf16.vlgmr.msrb.gmra.mxu0 %v17893_v3  ;;  %5248 = vmatmul.bf16.vlgmr.msrb.gmra.mxu1 %v17895_v28 }
 0x486   :  { %5261 = vmatmul.bf16.vlgmr.msrb.gmra.mxu2 %v17893_v3  ;;  %5274 = vmatmul.bf16.vlgmr.msrb.gmra.mxu3 %v17895_v28 }
 0x487   :  { %6137 = vmatpush.bf16.msra.mxu0 %v11543_v31  ;;  %6150 = vmatpush.bf16.msra.mxu1 %v11799_v36  ;;  %v11419_v31 = vor.u32 %v13588_v39, %v11416_v20  ;;  %v11675_v36 = vor.u32 %v13652_v13, %v11672_v38  ;;  %v13685_v38 = vld [vmem:[%s20867_s1 + $0x3cc] sm:$0xf] }
 0x488   :  { %6163 = vmatpush.bf16.msra.mxu2 %v11547_v41  ;;  %6176 = vmatpush.bf16.msra.mxu3 %v11803_v44  ;;  %v11382_v41 = vld [vmem:[%s20867_s1 + $0x80] sm:$0xf] }
 0x489   :  { %v11383_v44 = vor.u32 %v13584_v56, %v11382_v41 }
 0x48b   :  { %6138 = vmatpush.bf16.msra.mxu0 %v11511_v57  ;;  %6151 = vmatpush.bf16.msra.mxu1 %v11767_v51  ;;  %v13576_v51 = vld [vmem:[%s20867_s1 + $0x5c] sm:$0xf0] }
 0x48c   :  { %6164 = vmatpush.bf16.msra.mxu2 %v11515_v61  ;;  %6177 = vmatpush.bf16.msra.mxu3 %v11771_v32  ;;  %v11606_v61 = vld [vmem:[%s20867_s1 + $0x240] sm:$0xf]  ;;  %v11351_v53 = vor.u32 %v13576_v51, %v11350_v29 }
 0x48d   :  { %v13640_v32 = vld [vmem:[%s20867_s1 + $0x25c] sm:$0xf0] }
 0x4c1   :  { %v5080_v52 = vpop.f32.mrf.mxu0  ;;  %v5093_v2 = vpop.f32.mrf.mxu1 }
 0x4c2   :  { %v5094_v21 = vadd.f32 %v5093_v2, %v5080_v52  ;;  %v11479_v52 = vor.u32 %v13608_v43, %v11478_v34  ;;  %v11734_v2 = vld [vmem:[%s20867_s1 + $0x340] sm:$0xf]  ;;  %v13572_v34 = vld [vmem:[%s20867_s1 + $0x44] sm:$0xf] }
 0x4c3   :  { %v11352_v43 = vld [vmem:[%s20867_s1 + $0x60] sm:$0xf0] }
 0x4c4   :  { %6139 = vmatpush.bf16.msra.mxu0 %v11479_v52 }
 0x4c8   :  { %v5106_v4 = vpop.f32.mrf.mxu2  ;;  %v5119_v9 = vpop.f32.mrf.mxu3 }
 0x4c9   :  { %v5082_v62 = vpop.f32.mrf.mxu0  ;;  %v5095_v63 = vpop.f32.mrf.mxu1  ;;  %v5120_v12 = vadd.f32 %v5119_v9, %v5106_v4  ;;  %v13672_v4 = vld [vmem:[%s20867_s1 + $0x35c] sm:$0xf0]  ;;  %v13604_v9 = vld [vmem:[%s20867_s1 + $0x144] sm:$0xf] }
 0x4ca   :  { %v11735_v62 = vor.u32 %v13672_v4, %v11734_v2  ;;  %v11480_v63 = vld [vmem:[%s20867_s1 + $0x160] sm:$0xf0] }
 0x4cb   :  { %v5287_v28 = vrot.slane %v5120_v12, 6 }
 0x4cc   :  { %6152 = vmatpush.bf16.msra.mxu1 %v11735_v62  ;;  %v11608_v62 = vld [vmem:[%s20867_s1 + $0x260] sm:$0xf0] }
 0x4cd   :  { %v5293_v25 = vsel %vm1026_vm1, %v5094_v21, %v5287_v28  ;;  %v11702_v28 = vld [vmem:[%s20867_s1 + $0x300] sm:$0xf]  ;;  %v11448_v21 = vld [vmem:[%s20867_s1 + $0x120] sm:$0xf0] }
 0x4d0   :  { %v5108_v33 = vpop.f32.mrf.mxu2  ;;  %v5121_v54 = vpop.f32.mrf.mxu3 }
 0x4d1   :  { %v5132_v6 = vpop.f32.mrf.mxu0  ;;  %v5145_v30 = vpop.f32.mrf.mxu1  ;;  %v13668_v33 = vld [vmem:[%s20867_s1 + $0x344] sm:$0xf] }
 0x4d2   :  { %v5146_v7 = vadd.f32 %v5145_v30, %v5132_v6  ;;  %v11736_v54 = vld [vmem:[%s20867_s1 + $0x360] sm:$0xf0]  ;;  %v11483_v6 = vor.u32 %v13604_v9, %v11480_v63 }
 0x4d3   :  { %v11739_v30 = vor.u32 %v13668_v33, %v11736_v54  ;;  %v13636_v9 = vld [vmem:[%s20867_s1 + $0x244] sm:$0xf]  ;;  %v11318_v33 = vld [vmem:[%s20867_s1] sm:$0xf] }
 0x4d4   :  { %v5288_v0 = vrot.slane %v5146_v7, 4  ;;  %6165 = vmatpush.bf16.msra.mxu2 %v11483_v6  ;;  %v11611_v63 = vor.u32 %v13636_v9, %v11608_v62  ;;  %v13568_v54 = vld [vmem:[%s20867_s1 + $0x1c] sm:$0xf0]  ;;  %v13673_v62 = vld [vmem:[%s20867_s1 + $0x364] sm:$0xf0] }
 0x4d5   :  { %6178 = vmatpush.bf16.msra.mxu3 %v11739_v30  ;;  %v11574_v6 = vld [vmem:[%s20867_s1 + $0x200] sm:$0xf] }
 0x4d8   :  { %v5158_v14 = vpop.f32.mrf.mxu2  ;;  %v5171_v3 = vpop.f32.mrf.mxu3 }
 0x4d9   :  { %v5172_v55 = vadd.f32 %v5171_v3, %v5158_v14  ;;  %v5134_v17 = vpop.f32.mrf.mxu0  ;;  %v5147_v19 = vpop.f32.mrf.mxu1  ;;  %v11446_v14 = vld [vmem:[%s20867_s1 + $0x100] sm:$0xf] }
 0x4da   :  { %v13600_v3 = vld [vmem:[%s20867_s1 + $0x11c] sm:$0xf0]  ;;  %v13596_v19 = vld [vmem:[%s20867_s1 + $0x104] sm:$0xf] }
 0x4db   :  { %v5289_v24 = vrot.slane %v5172_v55, 2  ;;  %v11447_v55 = vor.u32 %v13600_v3, %v11446_v14  ;;  %v13664_v17 = vld [vmem:[%s20867_s1 + $0x31c] sm:$0xf0]  ;;  %v13564_v3 = vld [vmem:[%s20867_s1 + $0x4] sm:$0xf] }
 0x4dc   :  { %v13632_v14 = vld [vmem:[%s20867_s1 + $0x21c] sm:$0xf0] }
 0x4dd   :  { %v5294_v26 = vsel %vm1028_vm0, %v5288_v0, %v5289_v24  ;;  %v11703_v0 = vor.u32 %v13664_v17, %v11702_v28  ;;  %v13660_v24 = vld [vmem:[%s20867_s1 + $0x304] sm:$0xf]  ;;  %6140 = vmatpush.bf16.msra.mxu0 %v11447_v55  ;;  %v11575_v55 = vor.u32 %v13632_v14, %v11574_v6 }
 0x4de   :  { %v5295_v5 = vsel %vm1030_vm2, %v5293_v25, %v5294_v26  ;;  %v11704_v25 = vld [vmem:[%s20867_s1 + $0x320] sm:$0xf0] }
 0x4df   :  { %v5301_v27 = vadd.f32 %v5295_v5, %v4292_v1  ;;  %v11451_v1 = vor.u32 %v13596_v19, %v11448_v21  ;;  %v11707_v26 = vor.u32 %v13660_v24, %v11704_v25  ;;  %v11414_v5 = vld [vmem:[%s20867_s1 + $0xc0] sm:$0xf]  ;;  %6153 = vmatpush.bf16.msra.mxu1 %v11703_v0  ;;  %v11320_v17 = vld [vmem:[%s20867_s1 + $0x20] sm:$0xf0]  ;;  %v11550_v24 = vld [vmem:[%s20867_s1 + $0x1c8] sm:$0xf] }
 0x4e0   :  { %v5160_v8 = vpop.f32.mrf.mxu2  ;;  %v5173_v60 = vpop.f32.mrf.mxu3  ;;  %v13628_v19 = vld [vmem:[%s20867_s1 + $0x204] sm:$0xf]  ;;  %v11323_v0 = vor.u32 %v13564_v3, %v11320_v17  ;;  %v13625_v25 = vld [vmem:[%s20867_s1 + $0x1e4] sm:$0xf0] }
 0x4e1   :  { %v11313_v18 = vmul.f32 -1.442695, %v5301_v27  ;;  %v13592_v27 = vld [vmem:[%s20867_s1 + $0xdc] sm:$0xf0]  ;;  %6166 = vmatpush.bf16.msra.mxu2 %v11451_v1  ;;  %6179 = vmatpush.bf16.msra.mxu3 %v11707_v26  ;;  %v11576_v21 = vld [vmem:[%s20867_s1 + $0x220] sm:$0xf0] }
 0x4e2   :  { %v18282_v58 = vpop.f32.mrf.mxu0  ;;  %v18284_v23 = vpop.f32.mrf.mxu1  ;;  %v11670_v8 = vld [vmem:[%s20867_s1 + $0x2c0] sm:$0xf]  ;;  %v11415_v60 = vor.u32 %v13592_v27, %v11414_v5  ;;  %v11579_v1 = vor.u32 %v13628_v19, %v11576_v21  ;;  %v11806_v26 = vld [vmem:[%s20867_s1 + $0x3c8] sm:$0xf]  ;;  %v11551_v27 = vor.u32 %v13625_v25, %v11550_v24  ;;  %v13597_v24 = vld [vmem:[%s20867_s1 + $0x10c] sm:$0xf] }
 0x4e3   :  { %14015 = vpow2.f32 %v11313_v18  ;;  %v13656_v18 = vld [vmem:[%s20867_s1 + $0x2dc] sm:$0xf0]  ;;  %v5198_v39 = vadd.f32 %v18284_v23, %v18282_v58  ;;  %v11518_v58 = vld [vmem:[%s20867_s1 + $0x188] sm:$0xf] }
 0x4e4   :  { %v11671_v50 = vor.u32 %v13656_v18, %v11670_v8  ;;  %6141 = vmatpush.bf16.msra.mxu0 %v11415_v60  ;;  %v13689_v8 = vld [vmem:[%s20867_s1 + $0x3e4] sm:$0xf0]  ;;  %v13621_v60 = vld [vmem:[%s20867_s1 + $0x1cc] sm:$0xf] }
 0x4e5   :  { %6167 = vmatpush.bf16.msra.mxu2 %v11419_v31  ;;  %6180 = vmatpush.bf16.msra.mxu3 %v11675_v36  ;;  %v11552_v18 = vld [vmem:[%s20867_s1 + $0x1e8] sm:$0xf0]  ;;  %v11807_v31 = vor.u32 %v13689_v8, %v11806_v26  ;;  %v13601_v17 = vld [vmem:[%s20867_s1 + $0x124] sm:$0xf0] }
 0x4e6   :  { %6154 = vmatpush.bf16.msra.mxu1 %v11671_v50  ;;  %v11555_v13 = vor.u32 %v13621_v60, %v11552_v18  ;;  %v11808_v36 = vld [vmem:[%s20867_s1 + $0x3e8] sm:$0xf0]  ;;  %v11710_v19 = vld [vmem:[%s20867_s1 + $0x308] sm:$0xf] }
 0x4e7   :  { %v11456_v26 = vld [vmem:[%s20867_s1 + $0x128] sm:$0xf0] }
 0x4e8   :  { %6142 = vmatpush.bf16.msra.mxu0 %v11383_v44  ;;  %v11811_v44 = vor.u32 %v13685_v38, %v11808_v36  ;;  %v11459_v60 = vor.u32 %v13597_v24, %v11456_v26  ;;  %v13589_v38 = vld [vmem:[%s20867_s1 + $0xcc] sm:$0xf] }
 0x4e9   :  { %v14016_v48 = vpop.eup %14015  ;;  %6181 = vmatpush.bf16.msra.mxu3 %v11643_v59  ;;  %v13677_v59 = vld [vmem:[%s20867_s1 + $0x38c] sm:$0xf] }
 0x4ea   :  { %v5186_v11 = vpop.f32.mrf.mxu0  ;;  %v5199_v49 = vpop.f32.mrf.mxu1  ;;  %v18338_v42 = vadd.f32 1.0, %v14016_v48  ;;  %v11384_v48 = vld [vmem:[%s20867_s1 + $0xa0] sm:$0xf0]  ;;  %v11424_v36 = vld [vmem:[%s20867_s1 + $0xe8] sm:$0xf0] }
 0x4eb   :  { %v18310_v45 = vpop.f32.mrf.mxu2  ;;  %v18312_v46 = vpop.f32.mrf.mxu3  ;;  %v11639_v49 = vor.u32 %v13648_v22, %v11638_v16  ;;  %v11387_v57 = vor.u32 %v13580_v47, %v11384_v48  ;;  %v13617_v22 = vld [vmem:[%s20867_s1 + $0x1a4] sm:$0xf0] }
 0x4ec   :  { %14017 = vrcp.f32 %v18338_v42  ;;  %v18452_v10 = vadd.f32 %v18312_v46, %v18310_v45  ;;  %v11607_v45 = vor.u32 %v13640_v32, %v11606_v61  ;;  %v11355_v46 = vor.u32 %v13572_v34, %v11352_v43  ;;  %6143 = vmatpush.bf16.msra.mxu0 %v11351_v53  ;;  %v11774_v47 = vld [vmem:[%s20867_s1 + $0x388] sm:$0xf]  ;;  %v11776_v32 = vld [vmem:[%s20867_s1 + $0x3a8] sm:$0xf0] }
 0x4ed   :  { %6155 = vmatpush.bf16.msra.mxu1 %v11639_v49  ;;  %6168 = vmatpush.bf16.msra.mxu2 %v11387_v57  ;;  %v13681_v48 = vld [vmem:[%s20867_s1 + $0x3a4] sm:$0xf0]  ;;  %vm5316_vm10 = vweird.f32 %v18338_v42  ;;  %v11519_v49 = vor.u32 %v13617_v22, %v11518_v58  ;;  %v5320_v61 = vand.u32 2147483647, %v18338_v42  ;;  %v11523_v53 = vor.u32 %v13613_v37, %v11520_v40 }
 0x4ee   :  { %v5290_v30 = vrot.slane %v18452_v10, 6  ;;  %6182 = vmatpush.bf16.msra.mxu3 %v11611_v63  ;;  %v11775_v57 = vor.u32 %v13681_v48, %v11774_v47  ;;  %v11779_v34 = vor.u32 %v13677_v59, %v11776_v32  ;;  %v11486_v43 = vld [vmem:[%s20867_s1 + $0x148] sm:$0xf]  ;;  %v13605_v63 = vld [vmem:[%s20867_s1 + $0x14c] sm:$0xf] }
 0x4ef   :  { %v11488_v10 = vld [vmem:[%s20867_s1 + $0x168] sm:$0xf0]  ;;  %vm5321_vm12 = vcmp.eq.f32.partialorder %v5320_v61, 8.507059e+37  ;;  %v13649_v59 = vld [vmem:[%s20867_s1 + $0x2a4] sm:$0xf0] }
 0x4f0   :  { %v11491_v6 = vor.u32 %v13605_v63, %v11488_v10  ;;  %v11360_v63 = vld [vmem:[%s20867_s1 + $0x68] sm:$0xf0] }
 0x4f1   :  { %6156 = vmatpush.bf16.msra.mxu1 %v11607_v45  ;;  %6169 = vmatpush.bf16.msra.mxu2 %v11355_v46 }
 0x4f2   :  { %v18413_v35 = vpop.eup %14017  ;;  %6183 = vmatpush.bf16.msra.mxu3 %v11579_v1  ;;  %v13665_v1 = vld [vmem:[%s20867_s1 + $0x324] sm:$0xf0] }
 0x4f3   :  { %v5212_v12 = vpop.f32.mrf.mxu2  ;;  %v5225_v7 = vpop.f32.mrf.mxu3  ;;  %v5312_v11 = vmul.f32 %v18413_v35, %v18338_v42  ;;  %vm5317_vm9 = vweird.f32 %v18413_v35  ;;  %v11711_v25 = vor.u32 %v13665_v1, %v11710_v19 }
 0x4f4   :  { %v5322_v12 = vand.u32 2147483648, %v18338_v42  ;;  %v11319_v7 = vor.u32 %v13568_v54, %v11318_v33  ;;  %vm18549_vm11 = vmor %vm5316_vm10, %vm5317_vm9 }
 0x4f5   :  { %v5313_v52 = vsub.f32 1.0, %v5312_v11  ;;  %6157 = vmatpush.bf16.msra.mxu1 %v11575_v55  ;;  %6170 = vmatpush.bf16.msra.mxu2 %v11323_v0  ;;  %v4293_v11 = vunpack.c.h.bf16 %v18276_v15 }
 0x4f6   :  { %6144 = vmatpush.bf16.msra.mxu0 %v11319_v7  ;;  %6228 = vmatpush.bf16.msrb.mxu3 %v11811_v44  ;;  %v5323_v54 = vor.u32 1.1754944e-38, %v5322_v12  ;;  %v11744_v7 = vld [vmem:[%s20867_s1 + $0x368] sm:$0xf0]  ;;  %v11454_v12 = vld [vmem:[%s20867_s1 + $0x108] sm:$0xf] }
 0x4f7   :  { %v5314_v28 = vmul.f32 %v18413_v35, %v5313_v52  ;;  %v13609_v52 = vld [vmem:[%s20867_s1 + $0x164] sm:$0xf0]  ;;  %v11455_v0 = vor.u32 %v13601_v17, %v11454_v12  ;;  %v5342_v44 = vld [vmem:[#allocation3] sm:$0xf] }
 0x4f8   :  { %v11487_v9 = vor.u32 %v13609_v52, %v11486_v43  ;;  %v11648_v43 = vld [vmem:[%s20867_s1 + $0x2a8] sm:$0xf0] }
 0x4f9   :  { %v5315_v41 = vadd.f32 %v18413_v35, %v5314_v28  ;;  %6202 = vmatpush.bf16.msrb.mxu1 %v11807_v31  ;;  %6215 = vmatpush.bf16.msrb.mxu2 %v11555_v13  ;;  %v13657_v13 = vld [vmem:[%s20867_s1 + $0x2e4] sm:$0xf0]  ;;  %v13629_v12 = vld [vmem:[%s20867_s1 + $0x20c] sm:$0xf] }
 0x4fa   :  { %6189 = vmatpush.bf16.msrb.mxu0 %v11551_v27  ;;  %6229 = vmatpush.bf16.msrb.mxu3 %v11779_v34  ;;  %v11712_v27 = vld [vmem:[%s20867_s1 + $0x328] sm:$0xf0] }
 0x4fb   :  { %v5319_v46 = vsel %vm18549_vm11, %v18413_v35, %v5315_v41  ;;  %v13653_v41 = vld [vmem:[%s20867_s1 + $0x2cc] sm:$0xf] }
 0x4fc   :  { %v5324_v28 = vsel %vm5321_vm12, %v5323_v54, %v5319_v46  ;;  %v13645_v34 = vld [vmem:[%s20867_s1 + $0x28c] sm:$0xf] }
 0x4fd   :  { %6203 = vmatpush.bf16.msrb.mxu1 %v11775_v57  ;;  %6216 = vmatpush.bf16.msrb.mxu2 %v11523_v53  ;;  %v5344_v8 = vrot.slane %v5324_v28, 4  ;;  %v11646_v57 = vld [vmem:[%s20867_s1 + $0x288] sm:$0xf]  ;;  %v11651_v52 = vor.u32 %v13645_v34, %v11648_v43  ;;  %v13637_v54 = vld [vmem:[%s20867_s1 + $0x24c] sm:$0xf] }
 0x4fe   :  { %6190 = vmatpush.bf16.msrb.mxu0 %v11519_v49  ;;  %v13585_v49 = vld [vmem:[%s20867_s1 + $0xa4] sm:$0xf0]  ;;  %v11647_v53 = vor.u32 %v13649_v59, %v11646_v57  ;;  %v11584_v17 = vld [vmem:[%s20867_s1 + $0x228] sm:$0xf0]  ;;  %v11784_v34 = vld [vmem:[%s20867_s1 + $0x3b0] sm:$0xf0] }
 0x4ff   :  { %v5346_v47 = vmul.f32 %v5344_v8, %v5342_v44  ;;  %v11587_v24 = vor.u32 %v13629_v12, %v11584_v17  ;;  %v11816_v44 = vld [vmem:[%s20867_s1 + $0x3f0] sm:$0xf0] }
 0x500   :  { %v11464_v12 = vld [vmem:[%s20867_s1 + $0x130] sm:$0xf0] }
 0x501   :  { %6217 = vmatpush.bf16.msrb.mxu2 %v11491_v6  ;;  %v13662_v17 = vld [vmem:[%s20867_s1 + $0x314] sm:$0xf] }
 0x502   :  { %v5236_v2 = vpop.f32.mrf.mxu0  ;;  %v5249_v4 = vpop.f32.mrf.mxu1  ;;  %6191 = vmatpush.bf16.msrb.mxu0 %v11487_v9  ;;  %v13641_v9 = vld [vmem:[%s20867_s1 + $0x264] sm:$0xf0] }
 0x503   :  { %v5250_v5 = vadd.f32 %v5249_v4, %v5236_v2  ;;  %v11742_v2 = vld [vmem:[%s20867_s1 + $0x348] sm:$0xf]  ;;  %v5296_v4 = vsel %vm1026_vm1, %v5198_v39, %v5290_v30  ;;  %v13669_v30 = vld [vmem:[%s20867_s1 + $0x34c] sm:$0xf] }
 0x504   :  { %v11743_v35 = vor.u32 %v13673_v62, %v11742_v2  ;;  %v11747_v3 = vor.u32 %v13669_v30, %v11744_v7  ;;  %v11422_v39 = vld [vmem:[%s20867_s1 + $0xc8] sm:$0xf]  ;;  %v13573_v62 = vld [vmem:[%s20867_s1 + $0x4c] sm:$0xf] }
 0x505   :  { %v5291_v29 = vrot.slane %v5250_v5, 4  ;;  %v13661_v5 = vld [vmem:[%s20867_s1 + $0x30c] sm:$0xf]  ;;  %6218 = vmatpush.bf16.msrb.mxu2 %v11459_v60  ;;  %v11358_v2 = vld [vmem:[%s20867_s1 + $0x48] sm:$0xf] }
 0x506   :  { %6204 = vmatpush.bf16.msrb.mxu1 %v11743_v35  ;;  %6230 = vmatpush.bf16.msrb.mxu3 %v11747_v3  ;;  %v11715_v18 = vor.u32 %v13661_v5, %v11712_v27  ;;  %v11616_v35 = vld [vmem:[%s20867_s1 + $0x268] sm:$0xf0]  ;;  %v11326_v30 = vld [vmem:[%s20867_s1 + $0x8] sm:$0xf] }
 0x507   :  { %6192 = vmatpush.bf16.msrb.mxu0 %v11455_v0  ;;  %v11619_v6 = vor.u32 %v13637_v54, %v11616_v35  ;;  %v13569_v7 = vld [vmem:[%s20867_s1 + $0x24] sm:$0xf0]  ;;  %v11752_v54 = vld [vmem:[%s20867_s1 + $0x370] sm:$0xf0] }
 0x508   :  { %v13633_v3 = vld [vmem:[%s20867_s1 + $0x224] sm:$0xf0] }
 0x509   :  { %v5262_v20 = vpop.f32.mrf.mxu2  ;;  %v5275_v50 = vpop.f32.mrf.mxu3 }
 0x50a   :  { %v5276_v23 = vadd.f32 %v5275_v50, %v5262_v20  ;;  %v5238_v56 = vpop.f32.mrf.mxu0  ;;  %v5251_v16 = vpop.f32.mrf.mxu1  ;;  %v13593_v20 = vld [vmem:[%s20867_s1 + $0xe4] sm:$0xf0]  ;;  %6205 = vmatpush.bf16.msrb.mxu1 %v11711_v25  ;;  %6231 = vmatpush.bf16.msrb.mxu3 %v11715_v18 }
 0x50b   :  { %v11678_v50 = vld [vmem:[%s20867_s1 + $0x2c8] sm:$0xf]  ;;  %v11423_v31 = vor.u32 %v13593_v20, %v11422_v39  ;;  %v11680_v56 = vld [vmem:[%s20867_s1 + $0x2e8] sm:$0xf0] }
 0x50c   :  { %v5292_v51 = vrot.slane %v5276_v23, 2  ;;  %v11679_v58 = vor.u32 %v13657_v13, %v11678_v50  ;;  %v11427_v23 = vor.u32 %v13589_v38, %v11424_v36  ;;  %v11683_v22 = vor.u32 %v13653_v41, %v11680_v56  ;;  %v11558_v38 = vld [vmem:[%s20867_s1 + $0x1d0] sm:$0xf]  ;;  %v13622_v41 = vld [vmem:[%s20867_s1 + $0x1d4] sm:$0xf] }
 0x50d   :  { %6193 = vmatpush.bf16.msrb.mxu0 %v11423_v31  ;;  %v13626_v36 = vld [vmem:[%s20867_s1 + $0x1ec] sm:$0xf0]  ;;  %v11560_v56 = vld [vmem:[%s20867_s1 + $0x1f0] sm:$0xf0] }
 0x50e   :  { %v5297_v45 = vsel %vm1028_vm0, %v5291_v29, %v5292_v51  ;;  %v13581_v29 = vld [vmem:[%s20867_s1 + $0x8c] sm:$0xf]  ;;  %6206 = vmatpush.bf16.msrb.mxu1 %v11679_v58  ;;  %6219 = vmatpush.bf16.msrb.mxu2 %v11427_v23  ;;  %v11814_v58 = vld [vmem:[%s20867_s1 + $0x3d0] sm:$0xf]  ;;  %v11563_v59 = vor.u32 %v13622_v41, %v11560_v56  ;;  %v13582_v41 = vld [vmem:[%s20867_s1 + $0x94] sm:$0xf] }
 0x50f   :  { %v5298_v33 = vsel %vm1030_vm2, %v5296_v4, %v5297_v45  ;;  %v11392_v51 = vld [vmem:[%s20867_s1 + $0xa8] sm:$0xf0]  ;;  %6232 = vmatpush.bf16.msrb.mxu3 %v11683_v22  ;;  %v13577_v4 = vld [vmem:[%s20867_s1 + $0x64] sm:$0xf0]  ;;  %v13690_v23 = vld [vmem:[%s20867_s1 + $0x3ec] sm:$0xf0] }
 0x510   :  { %v5302_v14 = vadd.f32 %v5298_v33, %v4293_v11  ;;  %v11390_v11 = vld [vmem:[%s20867_s1 + $0x88] sm:$0xf]  ;;  %v11395_v32 = vor.u32 %v13581_v29, %v11392_v51  ;;  %v11359_v46 = vor.u32 %v13577_v4, %v11358_v2  ;;  %v11363_v33 = vor.u32 %v13573_v62, %v11360_v63  ;;  %v11782_v51 = vld [vmem:[%s20867_s1 + $0x390] sm:$0xf]  ;;  %v13606_v63 = vld [vmem:[%s20867_s1 + $0x154] sm:$0xf] }
 0x511   :  { %v5264_v55 = vpop.f32.mrf.mxu2  ;;  %v5277_v42 = vpop.f32.mrf.mxu3  ;;  %v11391_v40 = vor.u32 %v13585_v49, %v11390_v11  ;;  %v11614_v45 = vld [vmem:[%s20867_s1 + $0x248] sm:$0xf]  ;;  %v11559_v49 = vor.u32 %v13626_v36, %v11558_v38  ;;  %v11815_v57 = vor.u32 %v13690_v23, %v11814_v58  ;;  %v11494_v2 = vld [vmem:[%s20867_s1 + $0x150] sm:$0xf]  ;;  %v11400_v56 = vld [vmem:[%s20867_s1 + $0xb0] sm:$0xf0] }
 0x512   :  { %v11314_v21 = vmul.f32 -1.442695, %v5302_v14  ;;  %14019 = vtanh.f32 %v5302_v14  ;;  %6207 = vmatpush.bf16.msrb.mxu1 %v11647_v53  ;;  %6220 = vmatpush.bf16.msrb.mxu2 %v11395_v32  ;;  %v11615_v10 = vor.u32 %v13641_v9, %v11614_v45  ;;  %v11582_v14 = vld [vmem:[%s20867_s1 + $0x208] sm:$0xf]  ;;  %v11328_v55 = vld [vmem:[%s20867_s1 + $0x28] sm:$0xf0]  ;;  %v11327_v42 = vor.u32 %v13569_v7, %v11326_v30 }
 0x513   :  { %6194 = vmatpush.bf16.msrb.mxu0 %v11391_v40  ;;  %6233 = vmatpush.bf16.msrb.mxu3 %v11651_v52  ;;  %v13618_v40 = vld [vmem:[%s20867_s1 + $0x1ac] sm:$0xf0]  ;;  %v11528_v53 = vld [vmem:[%s20867_s1 + $0x1b0] sm:$0xf0] }
 0x514   :  { %14021 = vpow2.f32 %v11314_v21  ;;  %v11583_v21 = vor.u32 %v13633_v3, %v11582_v14  ;;  %v13678_v32 = vld [vmem:[%s20867_s1 + $0x394] sm:$0xf]  ;;  %v13610_v4 = vld [vmem:[%s20867_s1 + $0x16c] sm:$0xf0] }
 0x515   :  { %v11750_v9 = vld [vmem:[%s20867_s1 + $0x350] sm:$0xf]  ;;  %v11495_v35 = vor.u32 %v13610_v4, %v11494_v2 }
 0x516   :  { %6208 = vmatpush.bf16.msrb.mxu1 %v11615_v10  ;;  %6221 = vmatpush.bf16.msrb.mxu2 %v11363_v33  ;;  %v13674_v62 = vld [vmem:[%s20867_s1 + $0x36c] sm:$0xf0]  ;;  %v11496_v10 = vld [vmem:[%s20867_s1 + $0x170] sm:$0xf0] }
 0x517   :  { %6195 = vmatpush.bf16.msrb.mxu0 %v11359_v46  ;;  %6234 = vmatpush.bf16.msrb.mxu3 %v11619_v6  ;;  %v11787_v46 = vor.u32 %v13678_v32, %v11784_v34  ;;  %v13670_v33 = vld [vmem:[%s20867_s1 + $0x354] sm:$0xf]  ;;  %v11751_v6 = vor.u32 %v13674_v62, %v11750_v9  ;;  %v11462_v30 = vld [vmem:[%s20867_s1 + $0x110] sm:$0xf]  ;;  %v11499_v14 = vor.u32 %v13606_v63, %v11496_v10 }
 0x518   :  { %v14020_v16 = vpop.eup %14019  ;;  %v13602_v7 = vld [vmem:[%s20867_s1 + $0x12c] sm:$0xf0]  ;;  %v11755_v3 = vor.u32 %v13670_v33, %v11752_v54  ;;  %v13566_v9 = vld [vmem:[%s20867_s1 + $0x14] sm:$0xf]  ;;  %v11566_v33 = vld [vmem:[%s20867_s1 + $0x1d8] sm:$0xf] }
 0x519   :  { %v5347_v48 = vmul.f32 %v14020_v16, %v5324_v28  ;;  %v13565_v28 = vld [vmem:[%s20867_s1 + $0xc] sm:$0xf]  ;;  %v13686_v16 = vld [vmem:[%s20867_s1 + $0x3d4] sm:$0xf]  ;;  %v11654_v58 = vld [vmem:[%s20867_s1 + $0x290] sm:$0xf] }
 0x51a   :  { %v14022_v37 = vpop.eup %14021  ;;  %v11331_v0 = vor.u32 %v13565_v28, %v11328_v55  ;;  %6209 = vmatpush.bf16.msrb.mxu1 %v11583_v21  ;;  %v11819_v29 = vor.u32 %v13686_v16, %v11816_v44  ;;  %v11718_v28 = vld [vmem:[%s20867_s1 + $0x310] sm:$0xf]  ;;  %v11463_v21 = vor.u32 %v13602_v7, %v11462_v30  ;;  %v13646_v16 = vld [vmem:[%s20867_s1 + $0x294] sm:$0xf]  ;;  %v13627_v54 = vld [vmem:[%s20867_s1 + $0x1f4] sm:$0xf0] }
 0x51b   :  { %v5310_v15 = vadd.f32 1.0, %v14022_v37  ;;  %v5348_v61 = vadd.f32 %v5347_v48, %v5346_v47  ;;  %6196 = vmatpush.bf16.msrb.mxu0 %v11327_v42  ;;  %6235 = vmatpush.bf16.msrb.mxu3 %v11587_v24  ;;  %v11526_v37 = vld [vmem:[%s20867_s1 + $0x190] sm:$0xf]  ;;  %v13598_v42 = vld [vmem:[%s20867_s1 + $0x114] sm:$0xf] }
 0x51c   :  { %6222 = vmatpush.bf16.msrb.mxu2 %v11331_v0  ;;  %v11527_v43 = vor.u32 %v13618_v40, %v11526_v37  ;;  %v13666_v55 = vld [vmem:[%s20867_s1 + $0x32c] sm:$0xf0]  ;;  %v11656_v44 = vld [vmem:[%s20867_s1 + $0x2b0] sm:$0xf0]  ;;  %v11403_v37 = vor.u32 %v13582_v41, %v11400_v56  ;;  %v13623_v30 = vld [vmem:[%s20867_s1 + $0x1dc] sm:$0xf] }
 0x51d   :  { %14023 = vrcp.f32 %v5310_v15  ;;  %5349 = vst [vmem:[#allocation3] sm:$0xf] %v5348_v61  ;;  %v5337_v26 = vand.u32 2147483648, %v5310_v15  ;;  %v5335_v27 = vand.u32 2147483647, %v5310_v15  ;;  %vm5331_vm14 = vweird.f32 %v5310_v15 }
 0x51e   :  { %14025 = vtanh.f32 %v5348_v61  ;;  %v13614_v61 = vld [vmem:[%s20867_s1 + $0x194] sm:$0xf]  ;;  %v11719_v0 = vor.u32 %v13666_v55, %v11718_v28  ;;  %v13594_v24 = vld [vmem:[%s20867_s1 + $0xec] sm:$0xf0]  ;;  %v11659_v40 = vor.u32 %v13646_v16, %v11656_v44  ;;  %v13687_v28 = vld [vmem:[%s20867_s1 + $0x3dc] sm:$0xf] }
 0x51f   :  { %v5338_v60 = vor.u32 1.1754944e-38, %v5337_v26  ;;  %vm5336_vm3 = vcmp.eq.f32.partialorder %v5335_v27, 8.507059e+37  ;;  %v11531_v45 = vor.u32 %v13614_v61, %v11528_v53  ;;  %v13658_v27 = vld [vmem:[%s20867_s1 + $0x2ec] sm:$0xf0]  ;;  %v13638_v61 = vld [vmem:[%s20867_s1 + $0x254] sm:$0xf] }
 0x520   :  { %v13650_v23 = vld [vmem:[%s20867_s1 + $0x2ac] sm:$0xf0]  ;;  %v11624_v53 = vld [vmem:[%s20867_s1 + $0x270] sm:$0xf0]  ;;  %v11824_v55 = vld [vmem:[%s20867_s1 + $0x3f8] sm:$0xf0] }
 0x521   :  { %v11334_v32 = vld [vmem:[%s20867_s1 + $0x10] sm:$0xf]  ;;  %v11336_v62 = vld [vmem:[%s20867_s1 + $0x30] sm:$0xf0]  ;;  %v13671_v41 = vld [vmem:[%s20867_s1 + $0x35c] sm:$0xf] }
 0x522   :  { %v11590_v2 = vld [vmem:[%s20867_s1 + $0x210] sm:$0xf]  ;;  %v13630_v63 = vld [vmem:[%s20867_s1 + $0x214] sm:$0xf]  ;;  %v11760_v56 = vld [vmem:[%s20867_s1 + $0x378] sm:$0xf0] }
 0x523   :  { %v14024_v19 = vpop.eup %14023  ;;  %v13634_v4 = vld [vmem:[%s20867_s1 + $0x22c] sm:$0xf0]  ;;  %v11592_v10 = vld [vmem:[%s20867_s1 + $0x230] sm:$0xf0] }
 0x524   :  { %v5327_v1 = vmul.f32 %v14024_v19, %v5310_v15  ;;  %vm5332_vm13 = vweird.f32 %v14024_v19  ;;  %v14026_v50 = vpop.eup %14025  ;;  %v13682_v15 = vld [vmem:[%s20867_s1 + $0x3ac] sm:$0xf0] }
 0x525   :  { %vm5333_vm15 = vmor %vm5331_vm14, %vm5332_vm13  ;;  %v11783_v52 = vor.u32 %v13682_v15, %v11782_v51  ;;  %v13574_v51 = vld [vmem:[%s20867_s1 + $0x54] sm:$0xf] }
 0x526   :  { %v5328_v25 = vsub.f32 1.0, %v5327_v1  ;;  %v11430_v1 = vld [vmem:[%s20867_s1 + $0xd0] sm:$0xf]  ;;  %v11368_v15 = vld [vmem:[%s20867_s1 + $0x70] sm:$0xf0] }
 0x528   :  { %v5329_v5 = vmul.f32 %v14024_v19, %v5328_v25  ;;  %v11467_v25 = vor.u32 %v13598_v42, %v11464_v12  ;;  %v11339_v42 = vor.u32 %v13566_v9, %v11336_v62  ;;  %v11595_v12 = vor.u32 %v13630_v63, %v11592_v10  ;;  %v13655_v9 = vld [vmem:[%s20867_s1 + $0x2dc] sm:$0xf] }
 0x529   :  { %v11696_v62 = vld [vmem:[%s20867_s1 + $0x2f8] sm:$0xf0] }
 0x52a   :  { %v5330_v8 = vadd.f32 %v14024_v19, %v5329_v5  ;;  %v11686_v5 = vld [vmem:[%s20867_s1 + $0x2d0] sm:$0xf] }
 0x52c   :  { %v5334_v18 = vsel %vm5333_vm15, %v14024_v19, %v5330_v8  ;;  %v11720_v19 = vld [vmem:[%s20867_s1 + $0x330] sm:$0xf0] }
 0x52d   :  { %v5339_v39 = vsel %vm5336_vm3, %v5338_v60, %v5334_v18  ;;  %v11723_v26 = vor.u32 %v13662_v17, %v11720_v19  ;;  %v13590_v8 = vld [vmem:[%s20867_s1 + $0xd4] sm:$0xf]  ;;  %v11567_v17 = vor.u32 %v13627_v54, %v11566_v33  ;;  %v11406_v33 = vld [vmem:[%s20867_s1 + $0x98] sm:$0xf] }
 0x52e   :  { %v5352_v20 = vrot.slane %v5339_v39, 4  ;;  %v11432_v60 = vld [vmem:[%s20867_s1 + $0xf0] sm:$0xf0]  ;;  %v13587_v54 = vld [vmem:[%s20867_s1 + $0xb4] sm:$0xf0] }
 0x52f   :  { %v13654_v18 = vld [vmem:[%s20867_s1 + $0x2d4] sm:$0xf]  ;;  %v11435_v38 = vor.u32 %v13590_v8, %v11432_v60  ;;  %v13679_v8 = vld [vmem:[%s20867_s1 + $0x39c] sm:$0xf] }
 0x530   :  { %v5354_v31 = vmul.f32 %v14026_v50, %v5352_v20  ;;  %v11688_v39 = vld [vmem:[%s20867_s1 + $0x2f0] sm:$0xf0]  ;;  %v11431_v20 = vor.u32 %v13594_v24, %v11430_v1  ;;  %v11687_v50 = vor.u32 %v13658_v27, %v11686_v5  ;;  %v11827_v24 = vor.u32 %v13687_v28, %v11824_v55  ;;  %v13615_v5 = vld [vmem:[%s20867_s1 + $0x19c] sm:$0xf] }
 0x531   :  { %v11691_v36 = vor.u32 %v13654_v18, %v11688_v39  ;;  %v11536_v27 = vld [vmem:[%s20867_s1 + $0x1b8] sm:$0xf0] }
 0x532   :  { %5355 = vst [vmem:[#allocation2] sm:$0xf] %v5354_v31  ;;  %v11398_v31 = vld [vmem:[%s20867_s1 + $0x90] sm:$0xf]  ;;  %v11792_v60 = vld [vmem:[%s20867_s1 + $0x3b8] sm:$0xf0] }
 0x533   :  { %v13647_v28 = vld [vmem:[%s20867_s1 + $0x29c] sm:$0xf] }
 0x534   :  { %v11664_v55 = vld [vmem:[%s20867_s1 + $0x2b8] sm:$0xf0] }
 0x539   :  { %v5360_v13 = vld [vmem:[#allocation2] sm:$0xf] }
 0x53a   :  { %5362 = vst [vmem:[#allocation1] ss:$4 sm:$0xff] %v5360_v13  ;;  %v13586_v13 = vld [vmem:[%s20867_s1 + $0xac] sm:$0xf0] }
 0x541   :  { %v5363_v22 = vld.sshfl [vmem:[#allocation1] sm:$0xff pattern:$0x73625140]  ;;  %v5364_v47 = vld.sshfl [vmem:[#allocation1 + $0x8] sm:$0xff pattern:$0x73625140] }
 0x542   :  { %v18735_v48 = vpack.c.bf16 %v5363_v22, %v5363_v22  ;;  %v18737_v11 = vpack.c.bf16 %v5364_v47, %v5364_v47  ;;  %v11399_v22 = vor.u32 %v13586_v13, %v11398_v31  ;;  %v11655_v47 = vor.u32 %v13650_v23, %v11654_v58  ;;  %v13607_v58 = vld [vmem:[%s20867_s1 + $0x15c] sm:$0xf] }
 0x543   :  { %v11539_v31 = vor.u32 %v13615_v5, %v11536_v27  ;;  %v11795_v13 = vor.u32 %v13679_v8, %v11792_v60  ;;  %v11504_v23 = vld [vmem:[%s20867_s1 + $0x178] sm:$0xf0] }
 0x544   :  { %6145 = vmatmul.bf16.vlgmr.msra.gmra.mxu0 %v18735_v48  ;;  %6158 = vmatmul.bf16.vlgmr.msra.gmra.mxu1 %v18737_v11  ;;  %v13639_v5 = vld [vmem:[%s20867_s1 + $0x25c] sm:$0xf] }
 0x545   :  { %6171 = vmatmul.bf16.vlgmr.msra.gmra.mxu2 %v18735_v48  ;;  %6184 = vmatmul.bf16.vlgmr.msra.gmra.mxu3 %v18737_v11  ;;  %v11632_v27 = vld [vmem:[%s20867_s1 + $0x278] sm:$0xf0] }
 0x546   :  { %6241 = vmatpush.bf16.msra.mxu0 %v11559_v49  ;;  %6254 = vmatpush.bf16.msra.mxu1 %v11815_v57  ;;  %v11366_v49 = vld [vmem:[%s20867_s1 + $0x50] sm:$0xf] }
 0x547   :  { %6267 = vmatpush.bf16.msra.mxu2 %v11563_v59  ;;  %6280 = vmatpush.bf16.msra.mxu3 %v11819_v29  ;;  %v13578_v57 = vld [vmem:[%s20867_s1 + $0x6c] sm:$0xf0] }
 0x548   :  { %v11622_v59 = vld [vmem:[%s20867_s1 + $0x250] sm:$0xf]  ;;  %v11367_v34 = vor.u32 %v13578_v57, %v11366_v49  ;;  %v11507_v49 = vor.u32 %v13607_v58, %v11504_v23  ;;  %v11763_v57 = vor.u32 %v13671_v41, %v11760_v56  ;;  %v13631_v58 = vld [vmem:[%s20867_s1 + $0x21c] sm:$0xf] }
 0x549   :  { %v13642_v29 = vld [vmem:[%s20867_s1 + $0x26c] sm:$0xf0]  ;;  %v11600_v23 = vld [vmem:[%s20867_s1 + $0x238] sm:$0xf0] }
 0x54a   :  { %6242 = vmatpush.bf16.msra.mxu0 %v11527_v43  ;;  %6255 = vmatpush.bf16.msra.mxu1 %v11783_v52  ;;  %v11623_v43 = vor.u32 %v13642_v29, %v11622_v59  ;;  %v13570_v52 = vld [vmem:[%s20867_s1 + $0x2c] sm:$0xf0]  ;;  %v13599_v59 = vld [vmem:[%s20867_s1 + $0x11c] sm:$0xf] }
 0x54b   :  { %6268 = vmatpush.bf16.msra.mxu2 %v11531_v45  ;;  %6281 = vmatpush.bf16.msra.mxu3 %v11787_v46  ;;  %v11371_v45 = vor.u32 %v13574_v51, %v11368_v15  ;;  %v11627_v46 = vor.u32 %v13638_v61, %v11624_v53  ;;  %v11335_v7 = vor.u32 %v13570_v52, %v11334_v32  ;;  %v11472_v29 = vld [vmem:[%s20867_s1 + $0x138] sm:$0xf0]  ;;  %v11438_v32 = vld [vmem:[%s20867_s1 + $0xd8] sm:$0xf] }
 0x54c   :  { %v13663_v51 = vld [vmem:[%s20867_s1 + $0x31c] sm:$0xf] }
 0x54d   :  { %v11728_v15 = vld [vmem:[%s20867_s1 + $0x338] sm:$0xf0] }
 0x54e   :  { %6243 = vmatpush.bf16.msra.mxu0 %v11495_v35  ;;  %6256 = vmatpush.bf16.msra.mxu1 %v11751_v6  ;;  %v11822_v35 = vld [vmem:[%s20867_s1 + $0x3d8] sm:$0xf]  ;;  %v11731_v52 = vor.u32 %v13663_v51, %v11728_v15 }
 0x54f   :  { %6269 = vmatpush.bf16.msra.mxu2 %v11499_v14  ;;  %6282 = vmatpush.bf16.msra.mxu3 %v11755_v3  ;;  %v13691_v6 = vld [vmem:[%s20867_s1 + $0x3f4] sm:$0xf0]  ;;  %v11591_v14 = vor.u32 %v13634_v4, %v11590_v2  ;;  %v11568_v3 = vld [vmem:[%s20867_s1 + $0x1f8] sm:$0xf0] }
 0x550   :  { %v11823_v19 = vor.u32 %v13691_v6, %v11822_v35  ;;  %v11571_v1 = vor.u32 %v13623_v30, %v11568_v3  ;;  %v11694_v2 = vld [vmem:[%s20867_s1 + $0x2d8] sm:$0xf]  ;;  %v11699_v6 = vor.u32 %v13655_v9, %v11696_v62  ;;  %v11408_v3 = vld [vmem:[%s20867_s1 + $0xb8] sm:$0xf0] }
 0x551   :  { %v13659_v4 = vld [vmem:[%s20867_s1 + $0x2f4] sm:$0xf0] }
 0x552   :  { %6244 = vmatpush.bf16.msra.mxu0 %v11463_v21  ;;  %6257 = vmatpush.bf16.msra.mxu1 %v11719_v0  ;;  %v11534_v21 = vld [vmem:[%s20867_s1 + $0x198] sm:$0xf]  ;;  %v11695_v10 = vor.u32 %v13659_v4, %v11694_v2 }
 0x553   :  { %6270 = vmatpush.bf16.msra.mxu2 %v11467_v25  ;;  %6283 = vmatpush.bf16.msra.mxu3 %v11723_v26  ;;  %v13619_v0 = vld [vmem:[%s20867_s1 + $0x1b4] sm:$0xf0] }
 0x554   :  { %6197 = vmatmul.bf16.vlgmr.msrb.gmra.mxu0 %v18735_v48  ;;  %6210 = vmatmul.bf16.vlgmr.msrb.gmra.mxu1 %v18737_v11  ;;  %v11790_v25 = vld [vmem:[%s20867_s1 + $0x398] sm:$0xf]  ;;  %v11535_v18 = vor.u32 %v13619_v0, %v11534_v21  ;;  %v11667_v0 = vor.u32 %v13647_v28, %v11664_v55  ;;  %v12313_v28 = vld [vmem:[%s20867_s1 + $0x3c0] sm:$0xf] }
 0x555   :  { %6223 = vmatmul.bf16.vlgmr.msrb.gmra.mxu2 %v18735_v48  ;;  %6236 = vmatmul.bf16.vlgmr.msrb.gmra.mxu3 %v18737_v11  ;;  %v13683_v26 = vld [vmem:[%s20867_s1 + $0x3b4] sm:$0xf0] }
 0x556   :  { %6245 = vmatpush.bf16.msra.mxu0 %v11431_v20  ;;  %6258 = vmatpush.bf16.msra.mxu1 %v11687_v50  ;;  %v11791_v39 = vor.u32 %v13683_v26, %v11790_v25  ;;  %v11502_v20 = vld [vmem:[%s20867_s1 + $0x158] sm:$0xf]  ;;  %v13575_v25 = vld [vmem:[%s20867_s1 + $0x5c] sm:$0xf] }
 0x557   :  { %6271 = vmatpush.bf16.msra.mxu2 %v11435_v38  ;;  %6284 = vmatpush.bf16.msra.mxu3 %v11691_v36  ;;  %v13611_v50 = vld [vmem:[%s20867_s1 + $0x174] sm:$0xf0]  ;;  %v11376_v26 = vld [vmem:[%s20867_s1 + $0x78] sm:$0xf0] }
 0x558   :  { %v11758_v38 = vld [vmem:[%s20867_s1 + $0x358] sm:$0xf]  ;;  %v11503_v16 = vor.u32 %v13611_v50, %v11502_v20  ;;  %v11379_v20 = vor.u32 %v13575_v25, %v11376_v26  ;;  %v11635_v50 = vor.u32 %v13639_v5, %v11632_v27  ;;  %v12025_v5 = vld [vmem:[%s20867_s1 + $0x180] sm:$0xf] }
 0x559   :  { %v13675_v36 = vld [vmem:[%s20867_s1 + $0x374] sm:$0xf0]  ;;  %v13744_v27 = vld [vmem:[%s20867_s1 + $0x19c] sm:$0xf0] }
 0x55a   :  { %6246 = vmatpush.bf16.msra.mxu0 %v11399_v22  ;;  %6259 = vmatpush.bf16.msra.mxu1 %v11655_v47  ;;  %v11759_v44 = vor.u32 %v13675_v36, %v11758_v38  ;;  %v11470_v22 = vld [vmem:[%s20867_s1 + $0x118] sm:$0xf]  ;;  %v13567_v38 = vld [vmem:[%s20867_s1 + $0x1c] sm:$0xf] }
 0x55b   :  { %6272 = vmatpush.bf16.msra.mxu2 %v11403_v37  ;;  %6285 = vmatpush.bf16.msra.mxu3 %v11659_v40  ;;  %v13603_v47 = vld [vmem:[%s20867_s1 + $0x134] sm:$0xf0]  ;;  %v11344_v36 = vld [vmem:[%s20867_s1 + $0x38] sm:$0xf0] }
 0x55c   :  { %v11726_v37 = vld [vmem:[%s20867_s1 + $0x318] sm:$0xf]  ;;  %v11471_v61 = vor.u32 %v13603_v47, %v11470_v22 }
 0x55d   :  { %v13667_v40 = vld [vmem:[%s20867_s1 + $0x334] sm:$0xf0] }
 0x55e   :  { %6247 = vmatpush.bf16.msra.mxu0 %v11367_v34  ;;  %6260 = vmatpush.bf16.msra.mxu1 %v11623_v43  ;;  %v11727_v53 = vor.u32 %v13667_v40, %v11726_v37  ;;  %v13595_v34 = vld [vmem:[%s20867_s1 + $0xf4] sm:$0xf0]  ;;  %v11475_v43 = vor.u32 %v13599_v59, %v11472_v29 }
 0x55f   :  { %6273 = vmatpush.bf16.msra.mxu2 %v11371_v45  ;;  %6286 = vmatpush.bf16.msra.mxu3 %v11627_v46  ;;  %v13591_v45 = vld [vmem:[%s20867_s1 + $0xdc] sm:$0xf]  ;;  %v11439_v63 = vor.u32 %v13595_v34, %v11438_v32  ;;  %v11662_v30 = vld [vmem:[%s20867_s1 + $0x298] sm:$0xf]  ;;  %v19118_v34 = vld [vmem:[%s20866_s0 + $0x28] sm:$0xff] }
 0x560   :  { %v11440_v46 = vld [vmem:[%s20867_s1 + $0xf8] sm:$0xf0] }
 0x561   :  { %v11443_v35 = vor.u32 %v13591_v45, %v11440_v46  ;;  %v5358_v46 = vunpack.c.l.bf16 %v19118_v34 }
 0x562   :  { %6248 = vmatpush.bf16.msra.mxu0 %v11335_v7  ;;  %6261 = vmatpush.bf16.msra.mxu1 %v11591_v14  ;;  %v13651_v7 = vld [vmem:[%s20867_s1 + $0x2b4] sm:$0xf0]  ;;  %v13583_v14 = vld [vmem:[%s20867_s1 + $0x9c] sm:$0xf] }
 0x563   :  { %6274 = vmatpush.bf16.msra.mxu2 %v11339_v42  ;;  %6287 = vmatpush.bf16.msra.mxu3 %v11595_v12  ;;  %v11407_v42 = vor.u32 %v13587_v54, %v11406_v33  ;;  %v11663_v12 = vor.u32 %v13651_v7, %v11662_v30  ;;  %v11411_v21 = vor.u32 %v13583_v14, %v11408_v3  ;;  %v12057_v14 = vld [vmem:[%s20867_s1 + $0x1c0] sm:$0xf] }
 0x564   :  { %v13752_v3 = vld [vmem:[%s20867_s1 + $0x1dc] sm:$0xf0] }
 0x565   :  { %6249 = vmatmul.bf16.vlgmr.msra.gmra.mxu0 %v18735_v48  ;;  %6262 = vmatmul.bf16.vlgmr.msra.gmra.mxu1 %v18737_v11  ;;  %v12058_v55 = vor.u32 %v13752_v3, %v12057_v14  ;;  %v13716_v14 = vld [vmem:[%s20867_s1 + $0xc4] sm:$0xf] }
 0x566   :  { %6293 = vmatpush.bf16.msrb.mxu0 %v11567_v17  ;;  %6306 = vmatpush.bf16.msrb.mxu1 %v11823_v19  ;;  %v11374_v17 = vld [vmem:[%s20867_s1 + $0x58] sm:$0xf]  ;;  %v11931_v3 = vld [vmem:[%s20867_s1 + $0xe0] sm:$0xf0] }
 0x567   :  { %6319 = vmatpush.bf16.msrb.mxu2 %v11571_v1  ;;  %6332 = vmatpush.bf16.msrb.mxu3 %v11827_v24  ;;  %v13579_v19 = vld [vmem:[%s20867_s1 + $0x74] sm:$0xf0] }
 0x568   :  { %6275 = vmatmul.bf16.vlgmr.msra.gmra.mxu2 %v18735_v48  ;;  %6288 = vmatmul.bf16.vlgmr.msra.gmra.mxu3 %v18737_v11  ;;  %v11630_v1 = vld [vmem:[%s20867_s1 + $0x258] sm:$0xf]  ;;  %v11375_v8 = vor.u32 %v13579_v19, %v11374_v17  ;;  %v12059_v17 = vld [vmem:[%s20867_s1 + $0x1e0] sm:$0xf0] }
 0x569   :  { %v13643_v24 = vld [vmem:[%s20867_s1 + $0x274] sm:$0xf0] }
 0x56a   :  { %6294 = vmatpush.bf16.msrb.mxu0 %v11535_v18  ;;  %6307 = vmatpush.bf16.msrb.mxu1 %v11791_v39  ;;  %v11631_v60 = vor.u32 %v13643_v24, %v11630_v1  ;;  %v11342_v18 = vld [vmem:[%s20867_s1 + $0x18] sm:$0xf]  ;;  %v12315_v1 = vld [vmem:[%s20867_s1 + $0x3e0] sm:$0xf0] }
 0x56b   :  { %6320 = vmatpush.bf16.msrb.mxu2 %v11539_v31  ;;  %6333 = vmatpush.bf16.msrb.mxu3 %v11795_v13  ;;  %v13571_v39 = vld [vmem:[%s20867_s1 + $0x34] sm:$0xf0] }
 0x56c   :  { %v11598_v31 = vld [vmem:[%s20867_s1 + $0x218] sm:$0xf]  ;;  %v11343_v41 = vor.u32 %v13571_v39, %v11342_v18  ;;  %v12026_v39 = vor.u32 %v13744_v27, %v12025_v5  ;;  %v13776_v5 = vld [vmem:[%s20867_s1 + $0x29c] sm:$0xf0]  ;;  %v13708_v27 = vld [vmem:[%s20867_s1 + $0x84] sm:$0xf] }
 0x56d   :  { %v13635_v13 = vld [vmem:[%s20867_s1 + $0x234] sm:$0xf0] }
 0x56e   :  { %6295 = vmatpush.bf16.msrb.mxu0 %v11503_v16  ;;  %6308 = vmatpush.bf16.msrb.mxu1 %v11759_v44  ;;  %v11599_v56 = vor.u32 %v13635_v13, %v11598_v31  ;;  %v11347_v16 = vor.u32 %v13567_v38, %v11344_v36  ;;  %v11603_v44 = vor.u32 %v13631_v58, %v11600_v23  ;;  %v13740_v31 = vld [vmem:[%s20867_s1 + $0x184] sm:$0xf] }
 0x56f   :  { %6321 = vmatpush.bf16.msrb.mxu2 %v11507_v49  ;;  %6334 = vmatpush.bf16.msrb.mxu3 %v11763_v57  ;;  %v12027_v13 = vld [vmem:[%s20867_s1 + $0x1a0] sm:$0xf0] }
 0x570   :  { %v12030_v36 = vor.u32 %v13740_v31, %v12027_v13  ;;  %v13804_v58 = vld [vmem:[%s20867_s1 + $0x384] sm:$0xf]  ;;  %v11865_v13 = vld [vmem:[%s20867_s1 + $0x40] sm:$0xf] }
 0x571   :  { %v12283_v23 = vld [vmem:[%s20867_s1 + $0x3a0] sm:$0xf0] }
 0x572   :  { %6296 = vmatpush.bf16.msrb.mxu0 %v11471_v61  ;;  %6309 = vmatpush.bf16.msrb.mxu1 %v11727_v53 }
 0x573   :  { %6322 = vmatpush.bf16.msrb.mxu2 %v11475_v43  ;;  %6335 = vmatpush.bf16.msrb.mxu3 %v11731_v52 }
 0x576   :  { %6297 = vmatpush.bf16.msrb.mxu0 %v11439_v63  ;;  %6310 = vmatpush.bf16.msrb.mxu1 %v11695_v10 }
 0x577   :  { %6323 = vmatpush.bf16.msrb.mxu2 %v11443_v35  ;;  %6336 = vmatpush.bf16.msrb.mxu3 %v11699_v6 }
 0x57a   :  { %6298 = vmatpush.bf16.msrb.mxu0 %v11407_v42  ;;  %6311 = vmatpush.bf16.msrb.mxu1 %v11663_v12  ;;  %v13816_v42 = vld [vmem:[%s20867_s1 + $0x3dc] sm:$0xf0]  ;;  %v13748_v12 = vld [vmem:[%s20867_s1 + $0x1c4] sm:$0xf] }
 0x57b   :  { %6324 = vmatpush.bf16.msrb.mxu2 %v11411_v21  ;;  %6337 = vmatpush.bf16.msrb.mxu3 %v11667_v0  ;;  %v12314_v19 = vor.u32 %v13816_v42, %v12313_v28  ;;  %v12062_v21 = vor.u32 %v13748_v12, %v12059_v17  ;;  %v13812_v0 = vld [vmem:[%s20867_s1 + $0x3c4] sm:$0xf] }
 0x57c   :  { %v12318_v24 = vor.u32 %v13812_v0, %v12315_v1  ;;  %v13780_v42 = vld [vmem:[%s20867_s1 + $0x2c4] sm:$0xf]  ;;  %v13712_v0 = vld [vmem:[%s20867_s1 + $0x9c] sm:$0xf0] }
 0x57d   :  { %v12187_v12 = vld [vmem:[%s20867_s1 + $0x2e0] sm:$0xf0]  ;;  %v12153_v1 = vld [vmem:[%s20867_s1 + $0x280] sm:$0xf] }
 0x57e   :  { %6299 = vmatpush.bf16.msrb.mxu0 %v11375_v8  ;;  %6312 = vmatpush.bf16.msrb.mxu1 %v11631_v60 }
 0x57f   :  { %6325 = vmatpush.bf16.msrb.mxu2 %v11379_v20  ;;  %6338 = vmatpush.bf16.msrb.mxu3 %v11635_v50  ;;  %v12281_v20 = vld [vmem:[%s20867_s1 + $0x380] sm:$0xf] }
 0x580   :  { %v13808_v50 = vld [vmem:[%s20867_s1 + $0x39c] sm:$0xf0] }
 0x581   :  { %v12282_v38 = vor.u32 %v13808_v50, %v12281_v20  ;;  %v13772_v20 = vld [vmem:[%s20867_s1 + $0x284] sm:$0xf] }
 0x582   :  { %6300 = vmatpush.bf16.msrb.mxu0 %v11343_v41  ;;  %6313 = vmatpush.bf16.msrb.mxu1 %v11599_v56  ;;  %v12286_v56 = vor.u32 %v13804_v58, %v12283_v23  ;;  %v12155_v50 = vld [vmem:[%s20867_s1 + $0x2a0] sm:$0xf0] }
 0x583   :  { %6326 = vmatpush.bf16.msrb.mxu2 %v11347_v16  ;;  %6339 = vmatpush.bf16.msrb.mxu3 %v11603_v44  ;;  %v11993_v16 = vld [vmem:[%s20867_s1 + $0x140] sm:$0xf]  ;;  %v12158_v31 = vor.u32 %v13772_v20, %v12155_v50  ;;  %v13741_v20 = vld [vmem:[%s20867_s1 + $0x18c] sm:$0xf] }
 0x584   :  { %v13736_v44 = vld [vmem:[%s20867_s1 + $0x15c] sm:$0xf0]  ;;  %v12035_v50 = vld [vmem:[%s20867_s1 + $0x1a8] sm:$0xf0] }
 0x585   :  { %6301 = vmatmul.bf16.vlgmr.msrb.gmra.mxu0 %v18735_v48  ;;  %6314 = vmatmul.bf16.vlgmr.msrb.gmra.mxu1 %v18737_v11 }
 0x586   :  { %6327 = vmatmul.bf16.vlgmr.msrb.gmra.mxu2 %v18735_v48  ;;  %6340 = vmatmul.bf16.vlgmr.msrb.gmra.mxu3 %v18737_v11 }
 0x587   :  { %7203 = vmatpush.bf16.msra.mxu0 %v12058_v55  ;;  %7216 = vmatpush.bf16.msra.mxu1 %v12314_v19  ;;  %v11934_v55 = vor.u32 %v13716_v14, %v11931_v3  ;;  %v12190_v19 = vor.u32 %v13780_v42, %v12187_v12  ;;  %v13813_v12 = vld [vmem:[%s20867_s1 + $0x3cc] sm:$0xf] }
 0x588   :  { %7229 = vmatpush.bf16.msra.mxu2 %v12062_v21  ;;  %7242 = vmatpush.bf16.msra.mxu3 %v12318_v24  ;;  %v11897_v21 = vld [vmem:[%s20867_s1 + $0x80] sm:$0xf] }
 0x589   :  { %v11898_v24 = vor.u32 %v13712_v0, %v11897_v21 }
 0x58b   :  { %7204 = vmatpush.bf16.msra.mxu0 %v12026_v39  ;;  %7217 = vmatpush.bf16.msra.mxu1 %v12282_v38  ;;  %v13704_v38 = vld [vmem:[%s20867_s1 + $0x5c] sm:$0xf0] }
 0x58c   :  { %7230 = vmatpush.bf16.msra.mxu2 %v12030_v36  ;;  %7243 = vmatpush.bf16.msra.mxu3 %v12286_v56  ;;  %v12121_v36 = vld [vmem:[%s20867_s1 + $0x240] sm:$0xf]  ;;  %v11866_v23 = vor.u32 %v13704_v38, %v11865_v13 }
 0x58d   :  { %v13768_v56 = vld [vmem:[%s20867_s1 + $0x25c] sm:$0xf0] }
 0x5c1   :  { %v6146_v22 = vpop.f32.mrf.mxu0  ;;  %v6159_v47 = vpop.f32.mrf.mxu1 }
 0x5c2   :  { %v6160_v4 = vadd.f32 %v6159_v47, %v6146_v22  ;;  %v11994_v22 = vor.u32 %v13736_v44, %v11993_v16  ;;  %v12249_v47 = vld [vmem:[%s20867_s1 + $0x340] sm:$0xf]  ;;  %v13700_v16 = vld [vmem:[%s20867_s1 + $0x44] sm:$0xf] }
 0x5c3   :  { %v11867_v44 = vld [vmem:[%s20867_s1 + $0x60] sm:$0xf0] }
 0x5c4   :  { %7205 = vmatpush.bf16.msra.mxu0 %v11994_v22 }
 0x5c8   :  { %v6172_v49 = vpop.f32.mrf.mxu2  ;;  %v6185_v57 = vpop.f32.mrf.mxu3 }
 0x5c9   :  { %v6148_v37 = vpop.f32.mrf.mxu0  ;;  %v6161_v40 = vpop.f32.mrf.mxu1  ;;  %v6186_v61 = vadd.f32 %v6185_v57, %v6172_v49  ;;  %v13800_v49 = vld [vmem:[%s20867_s1 + $0x35c] sm:$0xf0]  ;;  %v13732_v57 = vld [vmem:[%s20867_s1 + $0x144] sm:$0xf] }
 0x5ca   :  { %v12250_v37 = vor.u32 %v13800_v49, %v12249_v47  ;;  %v11995_v40 = vld [vmem:[%s20867_s1 + $0x160] sm:$0xf0] }
 0x5cb   :  { %v6353_v11 = vrot.slane %v6186_v61, 6 }
 0x5cc   :  { %7218 = vmatpush.bf16.msra.mxu1 %v12250_v37  ;;  %v12123_v37 = vld [vmem:[%s20867_s1 + $0x260] sm:$0xf0] }
 0x5cd   :  { %v6359_v62 = vsel %vm1026_vm1, %v6160_v4, %v6353_v11  ;;  %v12217_v11 = vld [vmem:[%s20867_s1 + $0x300] sm:$0xf]  ;;  %v11963_v4 = vld [vmem:[%s20867_s1 + $0x120] sm:$0xf0] }
 0x5d0   :  { %v6174_v59 = vpop.f32.mrf.mxu2  ;;  %v6187_v29 = vpop.f32.mrf.mxu3 }
 0x5d1   :  { %v6198_v51 = vpop.f32.mrf.mxu0  ;;  %v6211_v15 = vpop.f32.mrf.mxu1  ;;  %v13796_v59 = vld [vmem:[%s20867_s1 + $0x344] sm:$0xf] }
 0x5d2   :  { %v6212_v53 = vadd.f32 %v6211_v15, %v6198_v51  ;;  %v12251_v29 = vld [vmem:[%s20867_s1 + $0x360] sm:$0xf0]  ;;  %v11998_v51 = vor.u32 %v13732_v57, %v11995_v40 }
 0x5d3   :  { %v12254_v15 = vor.u32 %v13796_v59, %v12251_v29  ;;  %v13764_v57 = vld [vmem:[%s20867_s1 + $0x244] sm:$0xf]  ;;  %v11833_v59 = vld [vmem:[%s20867_s1] sm:$0xf] }
 0x5d4   :  { %v6354_v45 = vrot.slane %v6212_v53, 4  ;;  %7231 = vmatpush.bf16.msra.mxu2 %v11998_v51  ;;  %v12126_v40 = vor.u32 %v13764_v57, %v12123_v37  ;;  %v13696_v29 = vld [vmem:[%s20867_s1 + $0x1c] sm:$0xf0]  ;;  %v13801_v37 = vld [vmem:[%s20867_s1 + $0x364] sm:$0xf0] }
 0x5d5   :  { %7244 = vmatpush.bf16.msra.mxu3 %v12254_v15  ;;  %v12089_v51 = vld [vmem:[%s20867_s1 + $0x200] sm:$0xf] }
 0x5d8   :  { %v6224_v32 = vpop.f32.mrf.mxu2  ;;  %v6237_v48 = vpop.f32.mrf.mxu3 }
 0x5d9   :  { %v6238_v43 = vadd.f32 %v6237_v48, %v6224_v32  ;;  %v6200_v52 = vpop.f32.mrf.mxu0  ;;  %v6213_v2 = vpop.f32.mrf.mxu1  ;;  %v11961_v32 = vld [vmem:[%s20867_s1 + $0x100] sm:$0xf] }
 0x5da   :  { %v13728_v48 = vld [vmem:[%s20867_s1 + $0x11c] sm:$0xf0]  ;;  %v13724_v2 = vld [vmem:[%s20867_s1 + $0x104] sm:$0xf] }
 0x5db   :  { %v6355_v9 = vrot.slane %v6238_v43, 2  ;;  %v11962_v43 = vor.u32 %v13728_v48, %v11961_v32  ;;  %v13792_v52 = vld [vmem:[%s20867_s1 + $0x31c] sm:$0xf0]  ;;  %v13692_v48 = vld [vmem:[%s20867_s1 + $0x4] sm:$0xf] }
 0x5dc   :  { %v13760_v32 = vld [vmem:[%s20867_s1 + $0x21c] sm:$0xf0] }
 0x5dd   :  { %v6360_v63 = vsel %vm1028_vm0, %v6354_v45, %v6355_v9  ;;  %v12218_v45 = vor.u32 %v13792_v52, %v12217_v11  ;;  %v13788_v9 = vld [vmem:[%s20867_s1 + $0x304] sm:$0xf]  ;;  %7206 = vmatpush.bf16.msra.mxu0 %v11962_v43  ;;  %v12090_v43 = vor.u32 %v13760_v32, %v12089_v51 }
 0x5de   :  { %v6361_v10 = vsel %vm1030_vm2, %v6359_v62, %v6360_v63  ;;  %v12219_v62 = vld [vmem:[%s20867_s1 + $0x320] sm:$0xf0] }
 0x5df   :  { %v6367_v33 = vadd.f32 %v6361_v10, %v5358_v46  ;;  %v11966_v46 = vor.u32 %v13724_v2, %v11963_v4  ;;  %v12222_v63 = vor.u32 %v13788_v9, %v12219_v62  ;;  %v11929_v10 = vld [vmem:[%s20867_s1 + $0xc0] sm:$0xf]  ;;  %7219 = vmatpush.bf16.msra.mxu1 %v12218_v45  ;;  %v11835_v52 = vld [vmem:[%s20867_s1 + $0x20] sm:$0xf0]  ;;  %v12065_v9 = vld [vmem:[%s20867_s1 + $0x1c8] sm:$0xf] }
 0x5e0   :  { %v6226_v54 = vpop.f32.mrf.mxu2  ;;  %v6239_v35 = vpop.f32.mrf.mxu3  ;;  %v13756_v2 = vld [vmem:[%s20867_s1 + $0x204] sm:$0xf]  ;;  %v11838_v45 = vor.u32 %v13692_v48, %v11835_v52  ;;  %v13753_v62 = vld [vmem:[%s20867_s1 + $0x1e4] sm:$0xf0] }
 0x5e1   :  { %v11828_v6 = vmul.f32 -1.442695, %v6367_v33  ;;  %v13720_v33 = vld [vmem:[%s20867_s1 + $0xdc] sm:$0xf0]  ;;  %7232 = vmatpush.bf16.msra.mxu2 %v11966_v46  ;;  %7245 = vmatpush.bf16.msra.mxu3 %v12222_v63  ;;  %v12091_v4 = vld [vmem:[%s20867_s1 + $0x220] sm:$0xf0] }
 0x5e2   :  { %v19124_v30 = vpop.f32.mrf.mxu0  ;;  %v19126_v7 = vpop.f32.mrf.mxu1  ;;  %v12185_v54 = vld [vmem:[%s20867_s1 + $0x2c0] sm:$0xf]  ;;  %v11930_v35 = vor.u32 %v13720_v33, %v11929_v10  ;;  %v12094_v46 = vor.u32 %v13756_v2, %v12091_v4  ;;  %v12321_v63 = vld [vmem:[%s20867_s1 + $0x3c8] sm:$0xf]  ;;  %v12066_v33 = vor.u32 %v13753_v62, %v12065_v9  ;;  %v13725_v9 = vld [vmem:[%s20867_s1 + $0x10c] sm:$0xf] }
 0x5e3   :  { %14027 = vpow2.f32 %v11828_v6  ;;  %v13784_v6 = vld [vmem:[%s20867_s1 + $0x2dc] sm:$0xf0]  ;;  %v6264_v14 = vadd.f32 %v19126_v7, %v19124_v30  ;;  %v12033_v30 = vld [vmem:[%s20867_s1 + $0x188] sm:$0xf] }
 0x5e4   :  { %v12186_v28 = vor.u32 %v13784_v6, %v12185_v54  ;;  %7207 = vmatpush.bf16.msra.mxu0 %v11930_v35  ;;  %v13817_v54 = vld [vmem:[%s20867_s1 + $0x3e4] sm:$0xf0]  ;;  %v13749_v35 = vld [vmem:[%s20867_s1 + $0x1cc] sm:$0xf] }
 0x5e5   :  { %7233 = vmatpush.bf16.msra.mxu2 %v11934_v55  ;;  %7246 = vmatpush.bf16.msra.mxu3 %v12190_v19  ;;  %v12067_v6 = vld [vmem:[%s20867_s1 + $0x1e8] sm:$0xf0]  ;;  %v12322_v55 = vor.u32 %v13817_v54, %v12321_v63  ;;  %v13729_v52 = vld [vmem:[%s20867_s1 + $0x124] sm:$0xf0] }
 0x5e6   :  { %7220 = vmatpush.bf16.msra.mxu1 %v12186_v28  ;;  %v12070_v42 = vor.u32 %v13749_v35, %v12067_v6  ;;  %v12323_v19 = vld [vmem:[%s20867_s1 + $0x3e8] sm:$0xf0]  ;;  %v12225_v2 = vld [vmem:[%s20867_s1 + $0x308] sm:$0xf] }
 0x5e7   :  { %v11971_v63 = vld [vmem:[%s20867_s1 + $0x128] sm:$0xf0] }
 0x5e8   :  { %7208 = vmatpush.bf16.msra.mxu0 %v11898_v24  ;;  %v12326_v24 = vor.u32 %v13813_v12, %v12323_v19  ;;  %v11974_v35 = vor.u32 %v13725_v9, %v11971_v63  ;;  %v13717_v12 = vld [vmem:[%s20867_s1 + $0xcc] sm:$0xf] }
 0x5e9   :  { %v14028_v8 = vpop.eup %14027  ;;  %7247 = vmatpush.bf16.msra.mxu3 %v12158_v31  ;;  %v13805_v31 = vld [vmem:[%s20867_s1 + $0x38c] sm:$0xf] }
 0x5ea   :  { %v6252_v60 = vpop.f32.mrf.mxu0  ;;  %v6265_v18 = vpop.f32.mrf.mxu1  ;;  %v19180_v41 = vadd.f32 1.0, %v14028_v8  ;;  %v11899_v8 = vld [vmem:[%s20867_s1 + $0xa0] sm:$0xf0]  ;;  %v11939_v19 = vld [vmem:[%s20867_s1 + $0xe8] sm:$0xf0] }
 0x5eb   :  { %v19152_v25 = vpop.f32.mrf.mxu2  ;;  %v19154_v26 = vpop.f32.mrf.mxu3  ;;  %v12154_v18 = vor.u32 %v13776_v5, %v12153_v1  ;;  %v11902_v39 = vor.u32 %v13708_v27, %v11899_v8  ;;  %v13745_v5 = vld [vmem:[%s20867_s1 + $0x1a4] sm:$0xf0] }
 0x5ec   :  { %14029 = vrcp.f32 %v19180_v41  ;;  %v19294_v58 = vadd.f32 %v19154_v26, %v19152_v25  ;;  %v12122_v25 = vor.u32 %v13768_v56, %v12121_v36  ;;  %v11870_v26 = vor.u32 %v13700_v16, %v11867_v44  ;;  %7209 = vmatpush.bf16.msra.mxu0 %v11866_v23  ;;  %v12289_v27 = vld [vmem:[%s20867_s1 + $0x388] sm:$0xf]  ;;  %v12291_v56 = vld [vmem:[%s20867_s1 + $0x3a8] sm:$0xf0] }
 0x5ed   :  { %7221 = vmatpush.bf16.msra.mxu1 %v12154_v18  ;;  %7234 = vmatpush.bf16.msra.mxu2 %v11902_v39  ;;  %v13809_v8 = vld [vmem:[%s20867_s1 + $0x3a4] sm:$0xf0]  ;;  %vm6382_vm5 = vweird.f32 %v19180_v41  ;;  %v12034_v18 = vor.u32 %v13745_v5, %v12033_v30  ;;  %v6386_v36 = vand.u32 2147483647, %v19180_v41  ;;  %v12038_v23 = vor.u32 %v13741_v20, %v12035_v50 }
 0x5ee   :  { %v6356_v15 = vrot.slane %v19294_v58, 6  ;;  %7248 = vmatpush.bf16.msra.mxu3 %v12126_v40  ;;  %v12290_v39 = vor.u32 %v13809_v8, %v12289_v27  ;;  %v12294_v16 = vor.u32 %v13805_v31, %v12291_v56  ;;  %v12001_v44 = vld [vmem:[%s20867_s1 + $0x148] sm:$0xf]  ;;  %v13733_v40 = vld [vmem:[%s20867_s1 + $0x14c] sm:$0xf] }
 0x5ef   :  { %v12003_v58 = vld [vmem:[%s20867_s1 + $0x168] sm:$0xf0]  ;;  %vm6387_vm7 = vcmp.eq.f32.partialorder %v6386_v36, 8.507059e+37  ;;  %v13777_v31 = vld [vmem:[%s20867_s1 + $0x2a4] sm:$0xf0] }
 0x5f0   :  { %v12006_v51 = vor.u32 %v13733_v40, %v12003_v58  ;;  %v11875_v40 = vld [vmem:[%s20867_s1 + $0x68] sm:$0xf0] }
 0x5f1   :  { %7222 = vmatpush.bf16.msra.mxu1 %v12122_v25  ;;  %7235 = vmatpush.bf16.msra.mxu2 %v11870_v26 }
 0x5f2   :  { %v19255_v17 = vpop.eup %14029  ;;  %7249 = vmatpush.bf16.msra.mxu3 %v12094_v46  ;;  %v13793_v46 = vld [vmem:[%s20867_s1 + $0x324] sm:$0xf0] }
 0x5f3   :  { %v6278_v61 = vpop.f32.mrf.mxu2  ;;  %v6291_v53 = vpop.f32.mrf.mxu3  ;;  %v6378_v60 = vmul.f32 %v19255_v17, %v19180_v41  ;;  %vm6383_vm4 = vweird.f32 %v19255_v17  ;;  %v12226_v62 = vor.u32 %v13793_v46, %v12225_v2 }
 0x5f4   :  { %v6388_v61 = vand.u32 2147483648, %v19180_v41  ;;  %v11834_v53 = vor.u32 %v13696_v29, %v11833_v59  ;;  %vm19391_vm6 = vmor %vm6382_vm5, %vm6383_vm4 }
 0x5f5   :  { %v6379_v22 = vsub.f32 1.0, %v6378_v60  ;;  %7223 = vmatpush.bf16.msra.mxu1 %v12090_v43  ;;  %7236 = vmatpush.bf16.msra.mxu2 %v11838_v45  ;;  %v5359_v60 = vunpack.c.h.bf16 %v19118_v34 }
 0x5f6   :  { %7210 = vmatpush.bf16.msra.mxu0 %v11834_v53  ;;  %7294 = vmatpush.bf16.msrb.mxu3 %v12326_v24  ;;  %v6389_v29 = vor.u32 1.1754944e-38, %v6388_v61  ;;  %v12259_v53 = vld [vmem:[%s20867_s1 + $0x368] sm:$0xf0]  ;;  %v11969_v61 = vld [vmem:[%s20867_s1 + $0x108] sm:$0xf] }
 0x5f7   :  { %v6380_v11 = vmul.f32 %v19255_v17, %v6379_v22  ;;  %v13737_v22 = vld [vmem:[%s20867_s1 + $0x164] sm:$0xf0]  ;;  %v11970_v45 = vor.u32 %v13729_v52, %v11969_v61  ;;  %v6408_v24 = vld [vmem:[#allocation3] sm:$0xf] }
 0x5f8   :  { %v12002_v57 = vor.u32 %v13737_v22, %v12001_v44  ;;  %v12163_v44 = vld [vmem:[%s20867_s1 + $0x2a8] sm:$0xf0] }
 0x5f9   :  { %v6381_v21 = vadd.f32 %v19255_v17, %v6380_v11  ;;  %7268 = vmatpush.bf16.msrb.mxu1 %v12322_v55  ;;  %7281 = vmatpush.bf16.msrb.mxu2 %v12070_v42  ;;  %v13785_v42 = vld [vmem:[%s20867_s1 + $0x2e4] sm:$0xf0]  ;;  %v13757_v61 = vld [vmem:[%s20867_s1 + $0x20c] sm:$0xf] }
 0x5fa   :  { %7255 = vmatpush.bf16.msrb.mxu0 %v12066_v33  ;;  %7295 = vmatpush.bf16.msrb.mxu3 %v12294_v16  ;;  %v12227_v33 = vld [vmem:[%s20867_s1 + $0x328] sm:$0xf0] }
 0x5fb   :  { %v6385_v26 = vsel %vm19391_vm6, %v19255_v17, %v6381_v21  ;;  %v13781_v21 = vld [vmem:[%s20867_s1 + $0x2cc] sm:$0xf] }
 0x5fc   :  { %v6390_v11 = vsel %vm6387_vm7, %v6389_v29, %v6385_v26  ;;  %v13773_v16 = vld [vmem:[%s20867_s1 + $0x28c] sm:$0xf] }
 0x5fd   :  { %7269 = vmatpush.bf16.msrb.mxu1 %v12290_v39  ;;  %7282 = vmatpush.bf16.msrb.mxu2 %v12038_v23  ;;  %v6410_v54 = vrot.slane %v6390_v11, 4  ;;  %v12161_v39 = vld [vmem:[%s20867_s1 + $0x288] sm:$0xf]  ;;  %v12166_v22 = vor.u32 %v13773_v16, %v12163_v44  ;;  %v13765_v29 = vld [vmem:[%s20867_s1 + $0x24c] sm:$0xf] }
 0x5fe   :  { %7256 = vmatpush.bf16.msrb.mxu0 %v12034_v18  ;;  %v13713_v18 = vld [vmem:[%s20867_s1 + $0xa4] sm:$0xf0]  ;;  %v12162_v23 = vor.u32 %v13777_v31, %v12161_v39  ;;  %v12099_v52 = vld [vmem:[%s20867_s1 + $0x228] sm:$0xf0]  ;;  %v12299_v16 = vld [vmem:[%s20867_s1 + $0x3b0] sm:$0xf0] }
 0x5ff   :  { %v6412_v27 = vmul.f32 %v6410_v54, %v6408_v24  ;;  %v12102_v9 = vor.u32 %v13757_v61, %v12099_v52  ;;  %v12331_v24 = vld [vmem:[%s20867_s1 + $0x3f0] sm:$0xf0] }
 0x600   :  { %v11979_v61 = vld [vmem:[%s20867_s1 + $0x130] sm:$0xf0] }
 0x601   :  { %7283 = vmatpush.bf16.msrb.mxu2 %v12006_v51  ;;  %v13790_v52 = vld [vmem:[%s20867_s1 + $0x314] sm:$0xf] }
 0x602   :  { %v6302_v47 = vpop.f32.mrf.mxu0  ;;  %v6315_v49 = vpop.f32.mrf.mxu1  ;;  %7257 = vmatpush.bf16.msrb.mxu0 %v12002_v57  ;;  %v13769_v57 = vld [vmem:[%s20867_s1 + $0x264] sm:$0xf0] }
 0x603   :  { %v6316_v10 = vadd.f32 %v6315_v49, %v6302_v47  ;;  %v12257_v47 = vld [vmem:[%s20867_s1 + $0x348] sm:$0xf]  ;;  %v6362_v49 = vsel %vm1026_vm1, %v6264_v14, %v6356_v15  ;;  %v13797_v15 = vld [vmem:[%s20867_s1 + $0x34c] sm:$0xf] }
 0x604   :  { %v12258_v17 = vor.u32 %v13801_v37, %v12257_v47  ;;  %v12262_v48 = vor.u32 %v13797_v15, %v12259_v53  ;;  %v11937_v14 = vld [vmem:[%s20867_s1 + $0xc8] sm:$0xf]  ;;  %v13701_v37 = vld [vmem:[%s20867_s1 + $0x4c] sm:$0xf] }
 0x605   :  { %v6357_v13 = vrot.slane %v6316_v10, 4  ;;  %v13789_v10 = vld [vmem:[%s20867_s1 + $0x30c] sm:$0xf]  ;;  %7284 = vmatpush.bf16.msrb.mxu2 %v11974_v35  ;;  %v11873_v47 = vld [vmem:[%s20867_s1 + $0x48] sm:$0xf] }
 0x606   :  { %7270 = vmatpush.bf16.msrb.mxu1 %v12258_v17  ;;  %7296 = vmatpush.bf16.msrb.mxu3 %v12262_v48  ;;  %v12230_v6 = vor.u32 %v13789_v10, %v12227_v33  ;;  %v12131_v17 = vld [vmem:[%s20867_s1 + $0x268] sm:$0xf0]  ;;  %v11841_v15 = vld [vmem:[%s20867_s1 + $0x8] sm:$0xf] }
 0x607   :  { %7258 = vmatpush.bf16.msrb.mxu0 %v11970_v45  ;;  %v12134_v51 = vor.u32 %v13765_v29, %v12131_v17  ;;  %v13697_v53 = vld [vmem:[%s20867_s1 + $0x24] sm:$0xf0]  ;;  %v12267_v29 = vld [vmem:[%s20867_s1 + $0x370] sm:$0xf0] }
 0x608   :  { %v13761_v48 = vld [vmem:[%s20867_s1 + $0x224] sm:$0xf0] }
 0x609   :  { %v6328_v3 = vpop.f32.mrf.mxu2  ;;  %v6341_v28 = vpop.f32.mrf.mxu3 }
 0x60a   :  { %v6342_v7 = vadd.f32 %v6341_v28, %v6328_v3  ;;  %v6304_v0 = vpop.f32.mrf.mxu0  ;;  %v6317_v1 = vpop.f32.mrf.mxu1  ;;  %v13721_v3 = vld [vmem:[%s20867_s1 + $0xe4] sm:$0xf0]  ;;  %7271 = vmatpush.bf16.msrb.mxu1 %v12226_v62  ;;  %7297 = vmatpush.bf16.msrb.mxu3 %v12230_v6 }
 0x60b   :  { %v12193_v28 = vld [vmem:[%s20867_s1 + $0x2c8] sm:$0xf]  ;;  %v11938_v55 = vor.u32 %v13721_v3, %v11937_v14  ;;  %v12195_v0 = vld [vmem:[%s20867_s1 + $0x2e8] sm:$0xf0] }
 0x60c   :  { %v6358_v38 = vrot.slane %v6342_v7, 2  ;;  %v12194_v30 = vor.u32 %v13785_v42, %v12193_v28  ;;  %v11942_v7 = vor.u32 %v13717_v12, %v11939_v19  ;;  %v12198_v5 = vor.u32 %v13781_v21, %v12195_v0  ;;  %v12073_v12 = vld [vmem:[%s20867_s1 + $0x1d0] sm:$0xf]  ;;  %v13750_v21 = vld [vmem:[%s20867_s1 + $0x1d4] sm:$0xf] }
 0x60d   :  { %7259 = vmatpush.bf16.msrb.mxu0 %v11938_v55  ;;  %v13754_v19 = vld [vmem:[%s20867_s1 + $0x1ec] sm:$0xf0]  ;;  %v12075_v0 = vld [vmem:[%s20867_s1 + $0x1f0] sm:$0xf0] }
 0x60e   :  { %v6363_v25 = vsel %vm1028_vm0, %v6357_v13, %v6358_v38  ;;  %v13709_v13 = vld [vmem:[%s20867_s1 + $0x8c] sm:$0xf]  ;;  %7272 = vmatpush.bf16.msrb.mxu1 %v12194_v30  ;;  %7285 = vmatpush.bf16.msrb.mxu2 %v11942_v7  ;;  %v12329_v30 = vld [vmem:[%s20867_s1 + $0x3d0] sm:$0xf]  ;;  %v12078_v31 = vor.u32 %v13750_v21, %v12075_v0  ;;  %v13710_v21 = vld [vmem:[%s20867_s1 + $0x94] sm:$0xf] }
 0x60f   :  { %v6364_v59 = vsel %vm1030_vm2, %v6362_v49, %v6363_v25  ;;  %v11907_v38 = vld [vmem:[%s20867_s1 + $0xa8] sm:$0xf0]  ;;  %7298 = vmatpush.bf16.msrb.mxu3 %v12198_v5  ;;  %v13705_v49 = vld [vmem:[%s20867_s1 + $0x64] sm:$0xf0]  ;;  %v13818_v7 = vld [vmem:[%s20867_s1 + $0x3ec] sm:$0xf0] }
 0x610   :  { %v6368_v32 = vadd.f32 %v6364_v59, %v5359_v60  ;;  %v11905_v60 = vld [vmem:[%s20867_s1 + $0x88] sm:$0xf]  ;;  %v11910_v56 = vor.u32 %v13709_v13, %v11907_v38  ;;  %v11874_v26 = vor.u32 %v13705_v49, %v11873_v47  ;;  %v11878_v59 = vor.u32 %v13701_v37, %v11875_v40  ;;  %v12297_v38 = vld [vmem:[%s20867_s1 + $0x390] sm:$0xf]  ;;  %v13734_v40 = vld [vmem:[%s20867_s1 + $0x154] sm:$0xf] }
 0x611   :  { %v6330_v43 = vpop.f32.mrf.mxu2  ;;  %v6343_v41 = vpop.f32.mrf.mxu3  ;;  %v11906_v50 = vor.u32 %v13713_v18, %v11905_v60  ;;  %v12129_v25 = vld [vmem:[%s20867_s1 + $0x248] sm:$0xf]  ;;  %v12074_v18 = vor.u32 %v13754_v19, %v12073_v12  ;;  %v12330_v39 = vor.u32 %v13818_v7, %v12329_v30  ;;  %v12009_v47 = vld [vmem:[%s20867_s1 + $0x150] sm:$0xf]  ;;  %v11915_v0 = vld [vmem:[%s20867_s1 + $0xb0] sm:$0xf0] }
 0x612   :  { %v11829_v4 = vmul.f32 -1.442695, %v6368_v32  ;;  %14031 = vtanh.f32 %v6368_v32  ;;  %7273 = vmatpush.bf16.msrb.mxu1 %v12162_v23  ;;  %7286 = vmatpush.bf16.msrb.mxu2 %v11910_v56  ;;  %v12130_v58 = vor.u32 %v13769_v57, %v12129_v25  ;;  %v12097_v32 = vld [vmem:[%s20867_s1 + $0x208] sm:$0xf]  ;;  %v11843_v43 = vld [vmem:[%s20867_s1 + $0x28] sm:$0xf0]  ;;  %v11842_v41 = vor.u32 %v13697_v53, %v11841_v15 }
 0x613   :  { %7260 = vmatpush.bf16.msrb.mxu0 %v11906_v50  ;;  %7299 = vmatpush.bf16.msrb.mxu3 %v12166_v22  ;;  %v13746_v50 = vld [vmem:[%s20867_s1 + $0x1ac] sm:$0xf0]  ;;  %v12043_v23 = vld [vmem:[%s20867_s1 + $0x1b0] sm:$0xf0] }
 0x614   :  { %14033 = vpow2.f32 %v11829_v4  ;;  %v12098_v4 = vor.u32 %v13761_v48, %v12097_v32  ;;  %v13806_v56 = vld [vmem:[%s20867_s1 + $0x394] sm:$0xf]  ;;  %v13738_v49 = vld [vmem:[%s20867_s1 + $0x16c] sm:$0xf0] }
 0x615   :  { %v12265_v57 = vld [vmem:[%s20867_s1 + $0x350] sm:$0xf]  ;;  %v12010_v17 = vor.u32 %v13738_v49, %v12009_v47 }
 0x616   :  { %7274 = vmatpush.bf16.msrb.mxu1 %v12130_v58  ;;  %7287 = vmatpush.bf16.msrb.mxu2 %v11878_v59  ;;  %v13802_v37 = vld [vmem:[%s20867_s1 + $0x36c] sm:$0xf0]  ;;  %v12011_v58 = vld [vmem:[%s20867_s1 + $0x170] sm:$0xf0] }
 0x617   :  { %7261 = vmatpush.bf16.msrb.mxu0 %v11874_v26  ;;  %7300 = vmatpush.bf16.msrb.mxu3 %v12134_v51  ;;  %v12302_v26 = vor.u32 %v13806_v56, %v12299_v16  ;;  %v13798_v59 = vld [vmem:[%s20867_s1 + $0x354] sm:$0xf]  ;;  %v12266_v51 = vor.u32 %v13802_v37, %v12265_v57  ;;  %v11977_v15 = vld [vmem:[%s20867_s1 + $0x110] sm:$0xf]  ;;  %v12014_v32 = vor.u32 %v13734_v40, %v12011_v58 }
 0x618   :  { %v14032_v1 = vpop.eup %14031  ;;  %v13730_v53 = vld [vmem:[%s20867_s1 + $0x12c] sm:$0xf0]  ;;  %v12270_v48 = vor.u32 %v13798_v59, %v12267_v29  ;;  %v13694_v57 = vld [vmem:[%s20867_s1 + $0x14] sm:$0xf]  ;;  %v12081_v59 = vld [vmem:[%s20867_s1 + $0x1d8] sm:$0xf] }
 0x619   :  { %v6413_v8 = vmul.f32 %v14032_v1, %v6390_v11  ;;  %v13693_v11 = vld [vmem:[%s20867_s1 + $0xc] sm:$0xf]  ;;  %v13814_v1 = vld [vmem:[%s20867_s1 + $0x3d4] sm:$0xf]  ;;  %v12169_v30 = vld [vmem:[%s20867_s1 + $0x290] sm:$0xf] }
 0x61a   :  { %v14034_v20 = vpop.eup %14033  ;;  %v11846_v45 = vor.u32 %v13693_v11, %v11843_v43  ;;  %7275 = vmatpush.bf16.msrb.mxu1 %v12098_v4  ;;  %v12334_v13 = vor.u32 %v13814_v1, %v12331_v24  ;;  %v12233_v11 = vld [vmem:[%s20867_s1 + $0x310] sm:$0xf]  ;;  %v11978_v4 = vor.u32 %v13730_v53, %v11977_v15  ;;  %v13774_v1 = vld [vmem:[%s20867_s1 + $0x294] sm:$0xf]  ;;  %v13755_v29 = vld [vmem:[%s20867_s1 + $0x1f4] sm:$0xf0] }
 0x61b   :  { %v6376_v34 = vadd.f32 1.0, %v14034_v20  ;;  %v6414_v36 = vadd.f32 %v6413_v8, %v6412_v27  ;;  %7262 = vmatpush.bf16.msrb.mxu0 %v11842_v41  ;;  %7301 = vmatpush.bf16.msrb.mxu3 %v12102_v9  ;;  %v12041_v20 = vld [vmem:[%s20867_s1 + $0x190] sm:$0xf]  ;;  %v13726_v41 = vld [vmem:[%s20867_s1 + $0x114] sm:$0xf] }
 0x61c   :  { %7288 = vmatpush.bf16.msrb.mxu2 %v11846_v45  ;;  %v12042_v44 = vor.u32 %v13746_v50, %v12041_v20  ;;  %v13794_v43 = vld [vmem:[%s20867_s1 + $0x32c] sm:$0xf0]  ;;  %v12171_v24 = vld [vmem:[%s20867_s1 + $0x2b0] sm:$0xf0]  ;;  %v11918_v20 = vor.u32 %v13710_v21, %v11915_v0  ;;  %v13751_v15 = vld [vmem:[%s20867_s1 + $0x1dc] sm:$0xf] }
 0x61d   :  { %14035 = vrcp.f32 %v6376_v34  ;;  %6415 = vst [vmem:[#allocation3] sm:$0xf] %v6414_v36  ;;  %v6403_v63 = vand.u32 2147483648, %v6376_v34  ;;  %v6401_v33 = vand.u32 2147483647, %v6376_v34  ;;  %vm6397_vm9 = vweird.f32 %v6376_v34 }
 0x61e   :  { %14037 = vtanh.f32 %v6414_v36  ;;  %v13742_v36 = vld [vmem:[%s20867_s1 + $0x194] sm:$0xf]  ;;  %v12234_v45 = vor.u32 %v13794_v43, %v12233_v11  ;;  %v13722_v9 = vld [vmem:[%s20867_s1 + $0xec] sm:$0xf0]  ;;  %v12174_v50 = vor.u32 %v13774_v1, %v12171_v24  ;;  %v13815_v11 = vld [vmem:[%s20867_s1 + $0x3dc] sm:$0xf] }
 0x61f   :  { %v6404_v35 = vor.u32 1.1754944e-38, %v6403_v63  ;;  %vm6402_vm11 = vcmp.eq.f32.partialorder %v6401_v33, 8.507059e+37  ;;  %v12046_v25 = vor.u32 %v13742_v36, %v12043_v23  ;;  %v13786_v33 = vld [vmem:[%s20867_s1 + $0x2ec] sm:$0xf0]  ;;  %v13766_v36 = vld [vmem:[%s20867_s1 + $0x254] sm:$0xf] }
 0x620   :  { %v13778_v7 = vld [vmem:[%s20867_s1 + $0x2ac] sm:$0xf0]  ;;  %v12139_v23 = vld [vmem:[%s20867_s1 + $0x270] sm:$0xf0]  ;;  %v12339_v43 = vld [vmem:[%s20867_s1 + $0x3f8] sm:$0xf0] }
 0x621   :  { %v11849_v56 = vld [vmem:[%s20867_s1 + $0x10] sm:$0xf]  ;;  %v11851_v37 = vld [vmem:[%s20867_s1 + $0x30] sm:$0xf0]  ;;  %v13799_v21 = vld [vmem:[%s20867_s1 + $0x35c] sm:$0xf] }
 0x622   :  { %v12105_v47 = vld [vmem:[%s20867_s1 + $0x210] sm:$0xf]  ;;  %v13758_v40 = vld [vmem:[%s20867_s1 + $0x214] sm:$0xf]  ;;  %v12275_v0 = vld [vmem:[%s20867_s1 + $0x378] sm:$0xf0] }
 0x623   :  { %v14036_v2 = vpop.eup %14035  ;;  %v13762_v49 = vld [vmem:[%s20867_s1 + $0x22c] sm:$0xf0]  ;;  %v12107_v58 = vld [vmem:[%s20867_s1 + $0x230] sm:$0xf0] }
 0x624   :  { %v6393_v46 = vmul.f32 %v14036_v2, %v6376_v34  ;;  %vm6398_vm8 = vweird.f32 %v14036_v2  ;;  %v14038_v28 = vpop.eup %14037  ;;  %v13810_v34 = vld [vmem:[%s20867_s1 + $0x3ac] sm:$0xf0] }
 0x625   :  { %vm6399_vm10 = vmor %vm6397_vm9, %vm6398_vm8  ;;  %v12298_v22 = vor.u32 %v13810_v34, %v12297_v38  ;;  %v13702_v38 = vld [vmem:[%s20867_s1 + $0x54] sm:$0xf] }
 0x626   :  { %v6394_v62 = vsub.f32 1.0, %v6393_v46  ;;  %v11945_v46 = vld [vmem:[%s20867_s1 + $0xd0] sm:$0xf]  ;;  %v11883_v34 = vld [vmem:[%s20867_s1 + $0x70] sm:$0xf0] }
 0x628   :  { %v6395_v10 = vmul.f32 %v14036_v2, %v6394_v62  ;;  %v11982_v62 = vor.u32 %v13726_v41, %v11979_v61  ;;  %v11854_v41 = vor.u32 %v13694_v57, %v11851_v37  ;;  %v12110_v61 = vor.u32 %v13758_v40, %v12107_v58  ;;  %v13783_v57 = vld [vmem:[%s20867_s1 + $0x2dc] sm:$0xf] }
 0x629   :  { %v12211_v37 = vld [vmem:[%s20867_s1 + $0x2f8] sm:$0xf0] }
 0x62a   :  { %v6396_v54 = vadd.f32 %v14036_v2, %v6395_v10  ;;  %v12201_v10 = vld [vmem:[%s20867_s1 + $0x2d0] sm:$0xf] }
 0x62c   :  { %v6400_v6 = vsel %vm6399_vm10, %v14036_v2, %v6396_v54  ;;  %v12235_v2 = vld [vmem:[%s20867_s1 + $0x330] sm:$0xf0] }
 0x62d   :  { %v6405_v14 = vsel %vm6402_vm11, %v6404_v35, %v6400_v6  ;;  %v12238_v63 = vor.u32 %v13790_v52, %v12235_v2  ;;  %v13718_v54 = vld [vmem:[%s20867_s1 + $0xd4] sm:$0xf]  ;;  %v12082_v52 = vor.u32 %v13755_v29, %v12081_v59  ;;  %v11921_v59 = vld [vmem:[%s20867_s1 + $0x98] sm:$0xf] }
 0x62e   :  { %v6418_v3 = vrot.slane %v6405_v14, 4  ;;  %v11947_v35 = vld [vmem:[%s20867_s1 + $0xf0] sm:$0xf0]  ;;  %v13715_v29 = vld [vmem:[%s20867_s1 + $0xb4] sm:$0xf0] }
 0x62f   :  { %v13782_v6 = vld [vmem:[%s20867_s1 + $0x2d4] sm:$0xf]  ;;  %v11950_v12 = vor.u32 %v13718_v54, %v11947_v35  ;;  %v13807_v54 = vld [vmem:[%s20867_s1 + $0x39c] sm:$0xf] }
 0x630   :  { %v6420_v55 = vmul.f32 %v14038_v28, %v6418_v3  ;;  %v12203_v14 = vld [vmem:[%s20867_s1 + $0x2f0] sm:$0xf0]  ;;  %v11946_v3 = vor.u32 %v13722_v9, %v11945_v46  ;;  %v12202_v28 = vor.u32 %v13786_v33, %v12201_v10  ;;  %v12342_v9 = vor.u32 %v13815_v11, %v12339_v43  ;;  %v13743_v10 = vld [vmem:[%s20867_s1 + $0x19c] sm:$0xf] }
 0x631   :  { %v12206_v19 = vor.u32 %v13782_v6, %v12203_v14  ;;  %v12051_v33 = vld [vmem:[%s20867_s1 + $0x1b8] sm:$0xf0] }
 0x632   :  { %6421 = vst [vmem:[#allocation2] sm:$0xf] %v6420_v55  ;;  %v11913_v55 = vld [vmem:[%s20867_s1 + $0x90] sm:$0xf]  ;;  %v12307_v35 = vld [vmem:[%s20867_s1 + $0x3b8] sm:$0xf0] }
 0x633   :  { %v13775_v11 = vld [vmem:[%s20867_s1 + $0x29c] sm:$0xf] }
 0x634   :  { %v12179_v43 = vld [vmem:[%s20867_s1 + $0x2b8] sm:$0xf0] }
 0x639   :  { %v6426_v42 = vld [vmem:[#allocation2] sm:$0xf] }
 0x63a   :  { %6428 = vst [vmem:[#allocation1] ss:$4 sm:$0xff] %v6426_v42  ;;  %v13714_v42 = vld [vmem:[%s20867_s1 + $0xac] sm:$0xf0] }
 0x641   :  { %v6429_v5 = vld.sshfl [vmem:[#allocation1] sm:$0xff pattern:$0x73625140]  ;;  %v6430_v27 = vld.sshfl [vmem:[#allocation1 + $0x8] sm:$0xff pattern:$0x73625140] }
 0x642   :  { %v19577_v8 = vpack.c.bf16 %v6429_v5, %v6429_v5  ;;  %v19579_v60 = vpack.c.bf16 %v6430_v27, %v6430_v27  ;;  %v11914_v5 = vor.u32 %v13714_v42, %v11913_v55  ;;  %v12170_v27 = vor.u32 %v13778_v7, %v12169_v30  ;;  %v13735_v30 = vld [vmem:[%s20867_s1 + $0x15c] sm:$0xf] }
 0x643   :  { %v12054_v55 = vor.u32 %v13743_v10, %v12051_v33  ;;  %v12310_v42 = vor.u32 %v13807_v54, %v12307_v35  ;;  %v12019_v7 = vld [vmem:[%s20867_s1 + $0x178] sm:$0xf0] }
 0x644   :  { %7211 = vmatmul.bf16.vlgmr.msra.gmra.mxu0 %v19577_v8  ;;  %7224 = vmatmul.bf16.vlgmr.msra.gmra.mxu1 %v19579_v60  ;;  %v13767_v10 = vld [vmem:[%s20867_s1 + $0x25c] sm:$0xf] }
 0x645   :  { %7237 = vmatmul.bf16.vlgmr.msra.gmra.mxu2 %v19577_v8  ;;  %7250 = vmatmul.bf16.vlgmr.msra.gmra.mxu3 %v19579_v60  ;;  %v12147_v33 = vld [vmem:[%s20867_s1 + $0x278] sm:$0xf0] }
 0x646   :  { %7307 = vmatpush.bf16.msra.mxu0 %v12074_v18  ;;  %7320 = vmatpush.bf16.msra.mxu1 %v12330_v39  ;;  %v11881_v18 = vld [vmem:[%s20867_s1 + $0x50] sm:$0xf] }
 0x647   :  { %7333 = vmatpush.bf16.msra.mxu2 %v12078_v31  ;;  %7346 = vmatpush.bf16.msra.mxu3 %v12334_v13  ;;  %v13706_v39 = vld [vmem:[%s20867_s1 + $0x6c] sm:$0xf0] }
 0x648   :  { %v12137_v31 = vld [vmem:[%s20867_s1 + $0x250] sm:$0xf]  ;;  %v11882_v16 = vor.u32 %v13706_v39, %v11881_v18  ;;  %v12022_v18 = vor.u32 %v13735_v30, %v12019_v7  ;;  %v12278_v39 = vor.u32 %v13799_v21, %v12275_v0  ;;  %v13759_v30 = vld [vmem:[%s20867_s1 + $0x21c] sm:$0xf] }
 0x649   :  { %v13770_v13 = vld [vmem:[%s20867_s1 + $0x26c] sm:$0xf0]  ;;  %v12115_v7 = vld [vmem:[%s20867_s1 + $0x238] sm:$0xf0] }
 0x64a   :  { %7308 = vmatpush.bf16.msra.mxu0 %v12042_v44  ;;  %7321 = vmatpush.bf16.msra.mxu1 %v12298_v22  ;;  %v12138_v44 = vor.u32 %v13770_v13, %v12137_v31  ;;  %v13698_v22 = vld [vmem:[%s20867_s1 + $0x2c] sm:$0xf0]  ;;  %v13727_v31 = vld [vmem:[%s20867_s1 + $0x11c] sm:$0xf] }
 0x64b   :  { %7334 = vmatpush.bf16.msra.mxu2 %v12046_v25  ;;  %7347 = vmatpush.bf16.msra.mxu3 %v12302_v26  ;;  %v11886_v25 = vor.u32 %v13702_v38, %v11883_v34  ;;  %v12142_v26 = vor.u32 %v13766_v36, %v12139_v23  ;;  %v11850_v53 = vor.u32 %v13698_v22, %v11849_v56  ;;  %v11987_v13 = vld [vmem:[%s20867_s1 + $0x138] sm:$0xf0]  ;;  %v11953_v56 = vld [vmem:[%s20867_s1 + $0xd8] sm:$0xf] }
 0x64c   :  { %v13791_v38 = vld [vmem:[%s20867_s1 + $0x31c] sm:$0xf] }
 0x64d   :  { %v12243_v34 = vld [vmem:[%s20867_s1 + $0x338] sm:$0xf0] }
 0x64e   :  { %7309 = vmatpush.bf16.msra.mxu0 %v12010_v17  ;;  %7322 = vmatpush.bf16.msra.mxu1 %v12266_v51  ;;  %v12337_v17 = vld [vmem:[%s20867_s1 + $0x3d8] sm:$0xf]  ;;  %v12246_v22 = vor.u32 %v13791_v38, %v12243_v34 }
 0x64f   :  { %7335 = vmatpush.bf16.msra.mxu2 %v12014_v32  ;;  %7348 = vmatpush.bf16.msra.mxu3 %v12270_v48  ;;  %v13819_v51 = vld [vmem:[%s20867_s1 + $0x3f4] sm:$0xf0]  ;;  %v12106_v32 = vor.u32 %v13762_v49, %v12105_v47  ;;  %v12083_v48 = vld [vmem:[%s20867_s1 + $0x1f8] sm:$0xf0] }
 0x650   :  { %v12338_v2 = vor.u32 %v13819_v51, %v12337_v17  ;;  %v12086_v46 = vor.u32 %v13751_v15, %v12083_v48  ;;  %v12209_v47 = vld [vmem:[%s20867_s1 + $0x2d8] sm:$0xf]  ;;  %v12214_v51 = vor.u32 %v13783_v57, %v12211_v37  ;;  %v11923_v48 = vld [vmem:[%s20867_s1 + $0xb8] sm:$0xf0] }
 0x651   :  { %v13787_v49 = vld [vmem:[%s20867_s1 + $0x2f4] sm:$0xf0] }
 0x652   :  { %7310 = vmatpush.bf16.msra.mxu0 %v11978_v4  ;;  %7323 = vmatpush.bf16.msra.mxu1 %v12234_v45  ;;  %v12049_v4 = vld [vmem:[%s20867_s1 + $0x198] sm:$0xf]  ;;  %v12210_v58 = vor.u32 %v13787_v49, %v12209_v47 }
 0x653   :  { %7336 = vmatpush.bf16.msra.mxu2 %v11982_v62  ;;  %7349 = vmatpush.bf16.msra.mxu3 %v12238_v63  ;;  %v13747_v45 = vld [vmem:[%s20867_s1 + $0x1b4] sm:$0xf0] }
 0x654   :  { %7263 = vmatmul.bf16.vlgmr.msrb.gmra.mxu0 %v19577_v8  ;;  %7276 = vmatmul.bf16.vlgmr.msrb.gmra.mxu1 %v19579_v60  ;;  %v12305_v62 = vld [vmem:[%s20867_s1 + $0x398] sm:$0xf]  ;;  %v12050_v6 = vor.u32 %v13747_v45, %v12049_v4  ;;  %v12182_v45 = vor.u32 %v13775_v11, %v12179_v43  ;;  %v12828_v11 = vld [vmem:[%s20867_s1 + $0x3c0] sm:$0xf] }
 0x655   :  { %7289 = vmatmul.bf16.vlgmr.msrb.gmra.mxu2 %v19577_v8  ;;  %7302 = vmatmul.bf16.vlgmr.msrb.gmra.mxu3 %v19579_v60  ;;  %v13811_v63 = vld [vmem:[%s20867_s1 + $0x3b4] sm:$0xf0] }
 0x656   :  { %7311 = vmatpush.bf16.msra.mxu0 %v11946_v3  ;;  %7324 = vmatpush.bf16.msra.mxu1 %v12202_v28  ;;  %v12306_v14 = vor.u32 %v13811_v63, %v12305_v62  ;;  %v12017_v3 = vld [vmem:[%s20867_s1 + $0x158] sm:$0xf]  ;;  %v13703_v62 = vld [vmem:[%s20867_s1 + $0x5c] sm:$0xf] }
 0x657   :  { %7337 = vmatpush.bf16.msra.mxu2 %v11950_v12  ;;  %7350 = vmatpush.bf16.msra.mxu3 %v12206_v19  ;;  %v13739_v28 = vld [vmem:[%s20867_s1 + $0x174] sm:$0xf0]  ;;  %v11891_v63 = vld [vmem:[%s20867_s1 + $0x78] sm:$0xf0] }
 0x658   :  { %v12273_v12 = vld [vmem:[%s20867_s1 + $0x358] sm:$0xf]  ;;  %v12018_v1 = vor.u32 %v13739_v28, %v12017_v3  ;;  %v11894_v3 = vor.u32 %v13703_v62, %v11891_v63  ;;  %v12150_v28 = vor.u32 %v13767_v10, %v12147_v33  ;;  %v12540_v10 = vld [vmem:[%s20867_s1 + $0x180] sm:$0xf] }
 0x659   :  { %v13803_v19 = vld [vmem:[%s20867_s1 + $0x374] sm:$0xf0]  ;;  %v13872_v33 = vld [vmem:[%s20867_s1 + $0x19c] sm:$0xf0] }
 0x65a   :  { %7312 = vmatpush.bf16.msra.mxu0 %v11914_v5  ;;  %7325 = vmatpush.bf16.msra.mxu1 %v12170_v27  ;;  %v12274_v24 = vor.u32 %v13803_v19, %v12273_v12  ;;  %v11985_v5 = vld [vmem:[%s20867_s1 + $0x118] sm:$0xf]  ;;  %v13695_v12 = vld [vmem:[%s20867_s1 + $0x1c] sm:$0xf] }
 0x65b   :  { %7338 = vmatpush.bf16.msra.mxu2 %v11918_v20  ;;  %7351 = vmatpush.bf16.msra.mxu3 %v12174_v50  ;;  %v13731_v27 = vld [vmem:[%s20867_s1 + $0x134] sm:$0xf0]  ;;  %v11859_v19 = vld [vmem:[%s20867_s1 + $0x38] sm:$0xf0] }
 0x65c   :  { %v12241_v20 = vld [vmem:[%s20867_s1 + $0x318] sm:$0xf]  ;;  %v11986_v36 = vor.u32 %v13731_v27, %v11985_v5 }
 0x65d   :  { %v13795_v50 = vld [vmem:[%s20867_s1 + $0x334] sm:$0xf0] }
 0x65e   :  { %7313 = vmatpush.bf16.msra.mxu0 %v11882_v16  ;;  %7326 = vmatpush.bf16.msra.mxu1 %v12138_v44  ;;  %v12242_v23 = vor.u32 %v13795_v50, %v12241_v20  ;;  %v13723_v16 = vld [vmem:[%s20867_s1 + $0xf4] sm:$0xf0]  ;;  %v11990_v44 = vor.u32 %v13727_v31, %v11987_v13 }
 0x65f   :  { %7339 = vmatpush.bf16.msra.mxu2 %v11886_v25  ;;  %7352 = vmatpush.bf16.msra.mxu3 %v12142_v26  ;;  %v13719_v25 = vld [vmem:[%s20867_s1 + $0xdc] sm:$0xf]  ;;  %v11954_v40 = vor.u32 %v13723_v16, %v11953_v56  ;;  %v12177_v15 = vld [vmem:[%s20867_s1 + $0x298] sm:$0xf]  ;;  %v19960_v16 = vld [vmem:[%s20866_s0 + $0x30] sm:$0xff] }
 0x660   :  { %v11955_v26 = vld [vmem:[%s20867_s1 + $0xf8] sm:$0xf0] }
 0x661   :  { %v11958_v17 = vor.u32 %v13719_v25, %v11955_v26  ;;  %v6424_v26 = vunpack.c.l.bf16 %v19960_v16 }
 0x662   :  { %7314 = vmatpush.bf16.msra.mxu0 %v11850_v53  ;;  %7327 = vmatpush.bf16.msra.mxu1 %v12106_v32  ;;  %v13779_v53 = vld [vmem:[%s20867_s1 + $0x2b4] sm:$0xf0]  ;;  %v13711_v32 = vld [vmem:[%s20867_s1 + $0x9c] sm:$0xf] }
 0x663   :  { %7340 = vmatpush.bf16.msra.mxu2 %v11854_v41  ;;  %7353 = vmatpush.bf16.msra.mxu3 %v12110_v61  ;;  %v11922_v41 = vor.u32 %v13715_v29, %v11921_v59  ;;  %v12178_v61 = vor.u32 %v13779_v53, %v12177_v15  ;;  %v11926_v4 = vor.u32 %v13711_v32, %v11923_v48  ;;  %v12572_v32 = vld [vmem:[%s20867_s1 + $0x1c0] sm:$0xf] }
 0x664   :  { %v13880_v48 = vld [vmem:[%s20867_s1 + $0x1dc] sm:$0xf0] }
 0x665   :  { %7315 = vmatmul.bf16.vlgmr.msra.gmra.mxu0 %v19577_v8  ;;  %7328 = vmatmul.bf16.vlgmr.msra.gmra.mxu1 %v19579_v60  ;;  %v12573_v43 = vor.u32 %v13880_v48, %v12572_v32  ;;  %v13844_v32 = vld [vmem:[%s20867_s1 + $0xc4] sm:$0xf] }
 0x666   :  { %7359 = vmatpush.bf16.msrb.mxu0 %v12082_v52  ;;  %7372 = vmatpush.bf16.msrb.mxu1 %v12338_v2  ;;  %v11889_v52 = vld [vmem:[%s20867_s1 + $0x58] sm:$0xf]  ;;  %v12446_v48 = vld [vmem:[%s20867_s1 + $0xe0] sm:$0xf0] }
 0x667   :  { %7385 = vmatpush.bf16.msrb.mxu2 %v12086_v46  ;;  %7398 = vmatpush.bf16.msrb.mxu3 %v12342_v9  ;;  %v13707_v2 = vld [vmem:[%s20867_s1 + $0x74] sm:$0xf0] }
 0x668   :  { %7341 = vmatmul.bf16.vlgmr.msra.gmra.mxu2 %v19577_v8  ;;  %7354 = vmatmul.bf16.vlgmr.msra.gmra.mxu3 %v19579_v60  ;;  %v12145_v46 = vld [vmem:[%s20867_s1 + $0x258] sm:$0xf]  ;;  %v11890_v54 = vor.u32 %v13707_v2, %v11889_v52  ;;  %v12574_v52 = vld [vmem:[%s20867_s1 + $0x1e0] sm:$0xf0] }
 0x669   :  { %v13771_v9 = vld [vmem:[%s20867_s1 + $0x274] sm:$0xf0] }
 0x66a   :  { %7360 = vmatpush.bf16.msrb.mxu0 %v12050_v6  ;;  %7373 = vmatpush.bf16.msrb.mxu1 %v12306_v14  ;;  %v12146_v35 = vor.u32 %v13771_v9, %v12145_v46  ;;  %v11857_v6 = vld [vmem:[%s20867_s1 + $0x18] sm:$0xf]  ;;  %v12830_v46 = vld [vmem:[%s20867_s1 + $0x3e0] sm:$0xf0] }
 0x66b   :  { %7386 = vmatpush.bf16.msrb.mxu2 %v12054_v55  ;;  %7399 = vmatpush.bf16.msrb.mxu3 %v12310_v42  ;;  %v13699_v14 = vld [vmem:[%s20867_s1 + $0x34] sm:$0xf0] }
 0x66c   :  { %v12113_v55 = vld [vmem:[%s20867_s1 + $0x218] sm:$0xf]  ;;  %v11858_v21 = vor.u32 %v13699_v14, %v11857_v6  ;;  %v12541_v14 = vor.u32 %v13872_v33, %v12540_v10  ;;  %v13904_v10 = vld [vmem:[%s20867_s1 + $0x29c] sm:$0xf0]  ;;  %v13836_v33 = vld [vmem:[%s20867_s1 + $0x84] sm:$0xf] }
 0x66d   :  { %v13763_v42 = vld [vmem:[%s20867_s1 + $0x234] sm:$0xf0] }
 0x66e   :  { %7361 = vmatpush.bf16.msrb.mxu0 %v12018_v1  ;;  %7374 = vmatpush.bf16.msrb.mxu1 %v12274_v24  ;;  %v12114_v0 = vor.u32 %v13763_v42, %v12113_v55  ;;  %v11862_v1 = vor.u32 %v13695_v12, %v11859_v19  ;;  %v12118_v24 = vor.u32 %v13759_v30, %v12115_v7  ;;  %v13868_v55 = vld [vmem:[%s20867_s1 + $0x184] sm:$0xf] }
 0x66f   :  { %7387 = vmatpush.bf16.msrb.mxu2 %v12022_v18  ;;  %7400 = vmatpush.bf16.msrb.mxu3 %v12278_v39  ;;  %v12542_v42 = vld [vmem:[%s20867_s1 + $0x1a0] sm:$0xf0] }
 0x670   :  { %v12545_v19 = vor.u32 %v13868_v55, %v12542_v42  ;;  %v13932_v30 = vld [vmem:[%s20867_s1 + $0x384] sm:$0xf]  ;;  %v12380_v42 = vld [vmem:[%s20867_s1 + $0x40] sm:$0xf] }
 0x671   :  { %v12798_v7 = vld [vmem:[%s20867_s1 + $0x3a0] sm:$0xf0] }
 0x672   :  { %7362 = vmatpush.bf16.msrb.mxu0 %v11986_v36  ;;  %7375 = vmatpush.bf16.msrb.mxu1 %v12242_v23 }
 0x673   :  { %7388 = vmatpush.bf16.msrb.mxu2 %v11990_v44  ;;  %7401 = vmatpush.bf16.msrb.mxu3 %v12246_v22 }
 0x676   :  { %7363 = vmatpush.bf16.msrb.mxu0 %v11954_v40  ;;  %7376 = vmatpush.bf16.msrb.mxu1 %v12210_v58 }
 0x677   :  { %7389 = vmatpush.bf16.msrb.mxu2 %v11958_v17  ;;  %7402 = vmatpush.bf16.msrb.mxu3 %v12214_v51 }
 0x67a   :  { %7364 = vmatpush.bf16.msrb.mxu0 %v11922_v41  ;;  %7377 = vmatpush.bf16.msrb.mxu1 %v12178_v61  ;;  %v13944_v41 = vld [vmem:[%s20867_s1 + $0x3dc] sm:$0xf0]  ;;  %v13876_v61 = vld [vmem:[%s20867_s1 + $0x1c4] sm:$0xf] }
 0x67b   :  { %7390 = vmatpush.bf16.msrb.mxu2 %v11926_v4  ;;  %7403 = vmatpush.bf16.msrb.mxu3 %v12182_v45  ;;  %v12829_v2 = vor.u32 %v13944_v41, %v12828_v11  ;;  %v12577_v4 = vor.u32 %v13876_v61, %v12574_v52  ;;  %v13940_v45 = vld [vmem:[%s20867_s1 + $0x3c4] sm:$0xf] }
 0x67c   :  { %v12833_v9 = vor.u32 %v13940_v45, %v12830_v46  ;;  %v13908_v41 = vld [vmem:[%s20867_s1 + $0x2c4] sm:$0xf]  ;;  %v13840_v45 = vld [vmem:[%s20867_s1 + $0x9c] sm:$0xf0] }
 0x67d   :  { %v12702_v61 = vld [vmem:[%s20867_s1 + $0x2e0] sm:$0xf0]  ;;  %v12668_v46 = vld [vmem:[%s20867_s1 + $0x280] sm:$0xf] }
 0x67e   :  { %7365 = vmatpush.bf16.msrb.mxu0 %v11890_v54  ;;  %7378 = vmatpush.bf16.msrb.mxu1 %v12146_v35 }
 0x67f   :  { %7391 = vmatpush.bf16.msrb.mxu2 %v11894_v3  ;;  %7404 = vmatpush.bf16.msrb.mxu3 %v12150_v28  ;;  %v12796_v3 = vld [vmem:[%s20867_s1 + $0x380] sm:$0xf] }
 0x680   :  { %v13936_v28 = vld [vmem:[%s20867_s1 + $0x39c] sm:$0xf0] }
 0x681   :  { %v12797_v12 = vor.u32 %v13936_v28, %v12796_v3  ;;  %v13900_v3 = vld [vmem:[%s20867_s1 + $0x284] sm:$0xf] }
 0x682   :  { %7366 = vmatpush.bf16.msrb.mxu0 %v11858_v21  ;;  %7379 = vmatpush.bf16.msrb.mxu1 %v12114_v0  ;;  %v12801_v0 = vor.u32 %v13932_v30, %v12798_v7  ;;  %v12670_v28 = vld [vmem:[%s20867_s1 + $0x2a0] sm:$0xf0] }
 0x683   :  { %7392 = vmatpush.bf16.msrb.mxu2 %v11862_v1  ;;  %7405 = vmatpush.bf16.msrb.mxu3 %v12118_v24  ;;  %v12508_v1 = vld [vmem:[%s20867_s1 + $0x140] sm:$0xf]  ;;  %v12673_v55 = vor.u32 %v13900_v3, %v12670_v28  ;;  %v13869_v3 = vld [vmem:[%s20867_s1 + $0x18c] sm:$0xf] }
 0x684   :  { %v13864_v24 = vld [vmem:[%s20867_s1 + $0x15c] sm:$0xf0]  ;;  %v12550_v28 = vld [vmem:[%s20867_s1 + $0x1a8] sm:$0xf0] }
 0x685   :  { %7367 = vmatmul.bf16.vlgmr.msrb.gmra.mxu0 %v19577_v8  ;;  %7380 = vmatmul.bf16.vlgmr.msrb.gmra.mxu1 %v19579_v60 }
 0x686   :  { %7393 = vmatmul.bf16.vlgmr.msrb.gmra.mxu2 %v19577_v8  ;;  %7406 = vmatmul.bf16.vlgmr.msrb.gmra.mxu3 %v19579_v60 }
 0x687   :  { %8269 = vmatpush.bf16.msra.mxu0 %v12573_v43  ;;  %8282 = vmatpush.bf16.msra.mxu1 %v12829_v2  ;;  %v12449_v43 = vor.u32 %v13844_v32, %v12446_v48  ;;  %v12705_v2 = vor.u32 %v13908_v41, %v12702_v61  ;;  %v13941_v61 = vld [vmem:[%s20867_s1 + $0x3cc] sm:$0xf] }
 0x688   :  { %8295 = vmatpush.bf16.msra.mxu2 %v12577_v4  ;;  %8308 = vmatpush.bf16.msra.mxu3 %v12833_v9  ;;  %v12412_v4 = vld [vmem:[%s20867_s1 + $0x80] sm:$0xf] }
 0x689   :  { %v12413_v9 = vor.u32 %v13840_v45, %v12412_v4 }
 0x68b   :  { %8270 = vmatpush.bf16.msra.mxu0 %v12541_v14  ;;  %8283 = vmatpush.bf16.msra.mxu1 %v12797_v12  ;;  %v13832_v12 = vld [vmem:[%s20867_s1 + $0x5c] sm:$0xf0] }
 0x68c   :  { %8296 = vmatpush.bf16.msra.mxu2 %v12545_v19  ;;  %8309 = vmatpush.bf16.msra.mxu3 %v12801_v0  ;;  %v12636_v19 = vld [vmem:[%s20867_s1 + $0x240] sm:$0xf]  ;;  %v12381_v7 = vor.u32 %v13832_v12, %v12380_v42 }
 0x68d   :  { %v13896_v0 = vld [vmem:[%s20867_s1 + $0x25c] sm:$0xf0] }
 0x6c1   :  { %v7212_v5 = vpop.f32.mrf.mxu0  ;;  %v7225_v27 = vpop.f32.mrf.mxu1 }
 0x6c2   :  { %v7226_v49 = vadd.f32 %v7225_v27, %v7212_v5  ;;  %v12509_v5 = vor.u32 %v13864_v24, %v12508_v1  ;;  %v12764_v27 = vld [vmem:[%s20867_s1 + $0x340] sm:$0xf]  ;;  %v13828_v1 = vld [vmem:[%s20867_s1 + $0x44] sm:$0xf] }
 0x6c3   :  { %v12382_v24 = vld [vmem:[%s20867_s1 + $0x60] sm:$0xf0] }
 0x6c4   :  { %8271 = vmatpush.bf16.msra.mxu0 %v12509_v5 }
 0x6c8   :  { %v7238_v18 = vpop.f32.mrf.mxu2  ;;  %v7251_v39 = vpop.f32.mrf.mxu3 }
 0x6c9   :  { %v7214_v20 = vpop.f32.mrf.mxu0  ;;  %v7227_v50 = vpop.f32.mrf.mxu1  ;;  %v7252_v36 = vadd.f32 %v7251_v39, %v7238_v18  ;;  %v13928_v18 = vld [vmem:[%s20867_s1 + $0x35c] sm:$0xf0]  ;;  %v13860_v39 = vld [vmem:[%s20867_s1 + $0x144] sm:$0xf] }
 0x6ca   :  { %v12765_v20 = vor.u32 %v13928_v18, %v12764_v27  ;;  %v12510_v50 = vld [vmem:[%s20867_s1 + $0x160] sm:$0xf0] }
 0x6cb   :  { %v7419_v60 = vrot.slane %v7252_v36, 6 }
 0x6cc   :  { %8284 = vmatpush.bf16.msra.mxu1 %v12765_v20  ;;  %v12638_v20 = vld [vmem:[%s20867_s1 + $0x260] sm:$0xf0] }
 0x6cd   :  { %v7425_v37 = vsel %vm1026_vm1, %v7226_v49, %v7419_v60  ;;  %v12732_v60 = vld [vmem:[%s20867_s1 + $0x300] sm:$0xf]  ;;  %v12478_v49 = vld [vmem:[%s20867_s1 + $0x120] sm:$0xf0] }
 0x6d0   :  { %v7240_v31 = vpop.f32.mrf.mxu2  ;;  %v7253_v13 = vpop.f32.mrf.mxu3 }
 0x6d1   :  { %v7264_v38 = vpop.f32.mrf.mxu0  ;;  %v7277_v34 = vpop.f32.mrf.mxu1  ;;  %v13924_v31 = vld [vmem:[%s20867_s1 + $0x344] sm:$0xf] }
 0x6d2   :  { %v7278_v23 = vadd.f32 %v7277_v34, %v7264_v38  ;;  %v12766_v13 = vld [vmem:[%s20867_s1 + $0x360] sm:$0xf0]  ;;  %v12513_v38 = vor.u32 %v13860_v39, %v12510_v50 }
 0x6d3   :  { %v12769_v34 = vor.u32 %v13924_v31, %v12766_v13  ;;  %v13892_v39 = vld [vmem:[%s20867_s1 + $0x244] sm:$0xf]  ;;  %v12348_v31 = vld [vmem:[%s20867_s1] sm:$0xf] }
 0x6d4   :  { %v7420_v25 = vrot.slane %v7278_v23, 4  ;;  %8297 = vmatpush.bf16.msra.mxu2 %v12513_v38  ;;  %v12641_v50 = vor.u32 %v13892_v39, %v12638_v20  ;;  %v13824_v13 = vld [vmem:[%s20867_s1 + $0x1c] sm:$0xf0]  ;;  %v13929_v20 = vld [vmem:[%s20867_s1 + $0x364] sm:$0xf0] }
 0x6d5   :  { %8310 = vmatpush.bf16.msra.mxu3 %v12769_v34  ;;  %v12604_v38 = vld [vmem:[%s20867_s1 + $0x200] sm:$0xf] }
 0x6d8   :  { %v7290_v56 = vpop.f32.mrf.mxu2  ;;  %v7303_v8 = vpop.f32.mrf.mxu3 }
 0x6d9   :  { %v7304_v44 = vadd.f32 %v7303_v8, %v7290_v56  ;;  %v7266_v22 = vpop.f32.mrf.mxu0  ;;  %v7279_v47 = vpop.f32.mrf.mxu1  ;;  %v12476_v56 = vld [vmem:[%s20867_s1 + $0x100] sm:$0xf] }
 0x6da   :  { %v13856_v8 = vld [vmem:[%s20867_s1 + $0x11c] sm:$0xf0]  ;;  %v13852_v47 = vld [vmem:[%s20867_s1 + $0x104] sm:$0xf] }
 0x6db   :  { %v7421_v57 = vrot.slane %v7304_v44, 2  ;;  %v12477_v44 = vor.u32 %v13856_v8, %v12476_v56  ;;  %v13920_v22 = vld [vmem:[%s20867_s1 + $0x31c] sm:$0xf0]  ;;  %v13820_v8 = vld [vmem:[%s20867_s1 + $0x4] sm:$0xf] }
 0x6dc   :  { %v13888_v56 = vld [vmem:[%s20867_s1 + $0x21c] sm:$0xf0] }
 0x6dd   :  { %v7426_v40 = vsel %vm1028_vm0, %v7420_v25, %v7421_v57  ;;  %v12733_v25 = vor.u32 %v13920_v22, %v12732_v60  ;;  %v13916_v57 = vld [vmem:[%s20867_s1 + $0x304] sm:$0xf]  ;;  %8272 = vmatpush.bf16.msra.mxu0 %v12477_v44  ;;  %v12605_v44 = vor.u32 %v13888_v56, %v12604_v38 }
 0x6de   :  { %v7427_v58 = vsel %vm1030_vm2, %v7425_v37, %v7426_v40  ;;  %v12734_v37 = vld [vmem:[%s20867_s1 + $0x320] sm:$0xf0] }
 0x6df   :  { %v7433_v59 = vadd.f32 %v7427_v58, %v6424_v26  ;;  %v12481_v26 = vor.u32 %v13852_v47, %v12478_v49  ;;  %v12737_v40 = vor.u32 %v13916_v57, %v12734_v37  ;;  %v12444_v58 = vld [vmem:[%s20867_s1 + $0xc0] sm:$0xf]  ;;  %8285 = vmatpush.bf16.msra.mxu1 %v12733_v25  ;;  %v12350_v22 = vld [vmem:[%s20867_s1 + $0x20] sm:$0xf0]  ;;  %v12580_v57 = vld [vmem:[%s20867_s1 + $0x1c8] sm:$0xf] }
 0x6e0   :  { %v7292_v29 = vpop.f32.mrf.mxu2  ;;  %v7305_v17 = vpop.f32.mrf.mxu3  ;;  %v13884_v47 = vld [vmem:[%s20867_s1 + $0x204] sm:$0xf]  ;;  %v12353_v25 = vor.u32 %v13820_v8, %v12350_v22  ;;  %v13881_v37 = vld [vmem:[%s20867_s1 + $0x1e4] sm:$0xf0] }
 0x6e1   :  { %v12343_v51 = vmul.f32 -1.442695, %v7433_v59  ;;  %v13848_v59 = vld [vmem:[%s20867_s1 + $0xdc] sm:$0xf0]  ;;  %8298 = vmatpush.bf16.msra.mxu2 %v12481_v26  ;;  %8311 = vmatpush.bf16.msra.mxu3 %v12737_v40  ;;  %v12606_v49 = vld [vmem:[%s20867_s1 + $0x220] sm:$0xf0] }
 0x6e2   :  { %v19966_v15 = vpop.f32.mrf.mxu0  ;;  %v19968_v53 = vpop.f32.mrf.mxu1  ;;  %v12700_v29 = vld [vmem:[%s20867_s1 + $0x2c0] sm:$0xf]  ;;  %v12445_v17 = vor.u32 %v13848_v59, %v12444_v58  ;;  %v12609_v26 = vor.u32 %v13884_v47, %v12606_v49  ;;  %v12836_v40 = vld [vmem:[%s20867_s1 + $0x3c8] sm:$0xf]  ;;  %v12581_v59 = vor.u32 %v13881_v37, %v12580_v57  ;;  %v13853_v57 = vld [vmem:[%s20867_s1 + $0x10c] sm:$0xf] }
 0x6e3   :  { %14039 = vpow2.f32 %v12343_v51  ;;  %v13912_v51 = vld [vmem:[%s20867_s1 + $0x2dc] sm:$0xf0]  ;;  %v7330_v32 = vadd.f32 %v19968_v53, %v19966_v15  ;;  %v12548_v15 = vld [vmem:[%s20867_s1 + $0x188] sm:$0xf] }
 0x6e4   :  { %v12701_v11 = vor.u32 %v13912_v51, %v12700_v29  ;;  %8273 = vmatpush.bf16.msra.mxu0 %v12445_v17  ;;  %v13945_v29 = vld [vmem:[%s20867_s1 + $0x3e4] sm:$0xf0]  ;;  %v13877_v17 = vld [vmem:[%s20867_s1 + $0x1cc] sm:$0xf] }
 0x6e5   :  { %8299 = vmatpush.bf16.msra.mxu2 %v12449_v43  ;;  %8312 = vmatpush.bf16.msra.mxu3 %v12705_v2  ;;  %v12582_v51 = vld [vmem:[%s20867_s1 + $0x1e8] sm:$0xf0]  ;;  %v12837_v43 = vor.u32 %v13945_v29, %v12836_v40  ;;  %v13857_v22 = vld [vmem:[%s20867_s1 + $0x124] sm:$0xf0] }
 0x6e6   :  { %8286 = vmatpush.bf16.msra.mxu1 %v12701_v11  ;;  %v12585_v41 = vor.u32 %v13877_v17, %v12582_v51  ;;  %v12838_v2 = vld [vmem:[%s20867_s1 + $0x3e8] sm:$0xf0]  ;;  %v12740_v47 = vld [vmem:[%s20867_s1 + $0x308] sm:$0xf] }
 0x6e7   :  { %v12486_v40 = vld [vmem:[%s20867_s1 + $0x128] sm:$0xf0] }
 0x6e8   :  { %8274 = vmatpush.bf16.msra.mxu0 %v12413_v9  ;;  %v12841_v9 = vor.u32 %v13941_v61, %v12838_v2  ;;  %v12489_v17 = vor.u32 %v13853_v57, %v12486_v40  ;;  %v13845_v61 = vld [vmem:[%s20867_s1 + $0xcc] sm:$0xf] }
 0x6e9   :  { %v14040_v54 = vpop.eup %14039  ;;  %8313 = vmatpush.bf16.msra.mxu3 %v12673_v55  ;;  %v13933_v55 = vld [vmem:[%s20867_s1 + $0x38c] sm:$0xf] }
 0x6ea   :  { %v7318_v35 = vpop.f32.mrf.mxu0  ;;  %v7331_v6 = vpop.f32.mrf.mxu1  ;;  %v20022_v21 = vadd.f32 1.0, %v14040_v54  ;;  %v12414_v54 = vld [vmem:[%s20867_s1 + $0xa0] sm:$0xf0]  ;;  %v12454_v2 = vld [vmem:[%s20867_s1 + $0xe8] sm:$0xf0] }
 0x6eb   :  { %v19994_v62 = vpop.f32.mrf.mxu2  ;;  %v19996_v63 = vpop.f32.mrf.mxu3  ;;  %v12669_v6 = vor.u32 %v13904_v10, %v12668_v46  ;;  %v12417_v14 = vor.u32 %v13836_v33, %v12414_v54  ;;  %v13873_v10 = vld [vmem:[%s20867_s1 + $0x1a4] sm:$0xf0] }
 0x6ec   :  { %14041 = vrcp.f32 %v20022_v21  ;;  %v20136_v30 = vadd.f32 %v19996_v63, %v19994_v62  ;;  %v12637_v62 = vor.u32 %v13896_v0, %v12636_v19  ;;  %v12385_v63 = vor.u32 %v13828_v1, %v12382_v24  ;;  %8275 = vmatpush.bf16.msra.mxu0 %v12381_v7  ;;  %v12804_v33 = vld [vmem:[%s20867_s1 + $0x388] sm:$0xf]  ;;  %v12806_v0 = vld [vmem:[%s20867_s1 + $0x3a8] sm:$0xf0] }
 0x6ed   :  { %8287 = vmatpush.bf16.msra.mxu1 %v12669_v6  ;;  %8300 = vmatpush.bf16.msra.mxu2 %v12417_v14  ;;  %v13937_v54 = vld [vmem:[%s20867_s1 + $0x3a4] sm:$0xf0]  ;;  %vm7448_vm13 = vweird.f32 %v20022_v21  ;;  %v12549_v6 = vor.u32 %v13873_v10, %v12548_v15  ;;  %v7452_v19 = vand.u32 2147483647, %v20022_v21  ;;  %v12553_v7 = vor.u32 %v13869_v3, %v12550_v28 }
 0x6ee   :  { %v7422_v34 = vrot.slane %v20136_v30, 6  ;;  %8314 = vmatpush.bf16.msra.mxu3 %v12641_v50  ;;  %v12805_v14 = vor.u32 %v13937_v54, %v12804_v33  ;;  %v12809_v1 = vor.u32 %v13933_v55, %v12806_v0  ;;  %v12516_v24 = vld [vmem:[%s20867_s1 + $0x148] sm:$0xf]  ;;  %v13861_v50 = vld [vmem:[%s20867_s1 + $0x14c] sm:$0xf] }
 0x6ef   :  { %v12518_v30 = vld [vmem:[%s20867_s1 + $0x168] sm:$0xf0]  ;;  %vm7453_vm15 = vcmp.eq.f32.partialorder %v7452_v19, 8.507059e+37  ;;  %v13905_v55 = vld [vmem:[%s20867_s1 + $0x2a4] sm:$0xf0] }
 0x6f0   :  { %v12521_v38 = vor.u32 %v13861_v50, %v12518_v30  ;;  %v12390_v50 = vld [vmem:[%s20867_s1 + $0x68] sm:$0xf0] }
 0x6f1   :  { %8288 = vmatpush.bf16.msra.mxu1 %v12637_v62  ;;  %8301 = vmatpush.bf16.msra.mxu2 %v12385_v63 }
 0x6f2   :  { %v20097_v52 = vpop.eup %14041  ;;  %8315 = vmatpush.bf16.msra.mxu3 %v12609_v26  ;;  %v13921_v26 = vld [vmem:[%s20867_s1 + $0x324] sm:$0xf0] }
 0x6f3   :  { %v7344_v36 = vpop.f32.mrf.mxu2  ;;  %v7357_v23 = vpop.f32.mrf.mxu3  ;;  %v7444_v35 = vmul.f32 %v20097_v52, %v20022_v21  ;;  %vm7449_vm12 = vweird.f32 %v20097_v52  ;;  %v12741_v37 = vor.u32 %v13921_v26, %v12740_v47 }
 0x6f4   :  { %v7454_v36 = vand.u32 2147483648, %v20022_v21  ;;  %v12349_v23 = vor.u32 %v13824_v13, %v12348_v31  ;;  %vm20233_vm14 = vmor %vm7448_vm13, %vm7449_vm12 }
 0x6f5   :  { %v7445_v5 = vsub.f32 1.0, %v7444_v35  ;;  %8289 = vmatpush.bf16.msra.mxu1 %v12605_v44  ;;  %8302 = vmatpush.bf16.msra.mxu2 %v12353_v25  ;;  %v6425_v35 = vunpack.c.h.bf16 %v19960_v16 }
 0x6f6   :  { %8276 = vmatpush.bf16.msra.mxu0 %v12349_v23  ;;  %8360 = vmatpush.bf16.msrb.mxu3 %v12841_v9  ;;  %v7455_v13 = vor.u32 1.1754944e-38, %v7454_v36  ;;  %v12774_v23 = vld [vmem:[%s20867_s1 + $0x368] sm:$0xf0]  ;;  %v12484_v36 = vld [vmem:[%s20867_s1 + $0x108] sm:$0xf] }
 0x6f7   :  { %v7446_v60 = vmul.f32 %v20097_v52, %v7445_v5  ;;  %v13865_v5 = vld [vmem:[%s20867_s1 + $0x164] sm:$0xf0]  ;;  %v12485_v25 = vor.u32 %v13857_v22, %v12484_v36  ;;  %v7474_v9 = vld [vmem:[#allocation3] sm:$0xf] }
 0x6f8   :  { %v12517_v39 = vor.u32 %v13865_v5, %v12516_v24  ;;  %v12678_v24 = vld [vmem:[%s20867_s1 + $0x2a8] sm:$0xf0] }
 0x6f9   :  { %v7447_v4 = vadd.f32 %v20097_v52, %v7446_v60  ;;  %8334 = vmatpush.bf16.msrb.mxu1 %v12837_v43  ;;  %8347 = vmatpush.bf16.msrb.mxu2 %v12585_v41  ;;  %v13913_v41 = vld [vmem:[%s20867_s1 + $0x2e4] sm:$0xf0]  ;;  %v13885_v36 = vld [vmem:[%s20867_s1 + $0x20c] sm:$0xf] }
 0x6fa   :  { %8321 = vmatpush.bf16.msrb.mxu0 %v12581_v59  ;;  %8361 = vmatpush.bf16.msrb.mxu3 %v12809_v1  ;;  %v12742_v59 = vld [vmem:[%s20867_s1 + $0x328] sm:$0xf0] }
 0x6fb   :  { %v7451_v63 = vsel %vm20233_vm14, %v20097_v52, %v7447_v4  ;;  %v13909_v4 = vld [vmem:[%s20867_s1 + $0x2cc] sm:$0xf] }
 0x6fc   :  { %v7456_v60 = vsel %vm7453_vm15, %v7455_v13, %v7451_v63  ;;  %v13901_v1 = vld [vmem:[%s20867_s1 + $0x28c] sm:$0xf] }
 0x6fd   :  { %8335 = vmatpush.bf16.msrb.mxu1 %v12805_v14  ;;  %8348 = vmatpush.bf16.msrb.mxu2 %v12553_v7  ;;  %v7476_v29 = vrot.slane %v7456_v60, 4  ;;  %v12676_v14 = vld [vmem:[%s20867_s1 + $0x288] sm:$0xf]  ;;  %v12681_v5 = vor.u32 %v13901_v1, %v12678_v24  ;;  %v13893_v13 = vld [vmem:[%s20867_s1 + $0x24c] sm:$0xf] }
 0x6fe   :  { %8322 = vmatpush.bf16.msrb.mxu0 %v12549_v6  ;;  %v13841_v6 = vld [vmem:[%s20867_s1 + $0xa4] sm:$0xf0]  ;;  %v12677_v7 = vor.u32 %v13905_v55, %v12676_v14  ;;  %v12614_v22 = vld [vmem:[%s20867_s1 + $0x228] sm:$0xf0]  ;;  %v12814_v1 = vld [vmem:[%s20867_s1 + $0x3b0] sm:$0xf0] }
 0x6ff   :  { %v7478_v33 = vmul.f32 %v7476_v29, %v7474_v9  ;;  %v12617_v57 = vor.u32 %v13885_v36, %v12614_v22  ;;  %v12846_v9 = vld [vmem:[%s20867_s1 + $0x3f0] sm:$0xf0] }
 0x700   :  { %v12494_v36 = vld [vmem:[%s20867_s1 + $0x130] sm:$0xf0] }
 0x701   :  { %8349 = vmatpush.bf16.msrb.mxu2 %v12521_v38  ;;  %v13918_v22 = vld [vmem:[%s20867_s1 + $0x314] sm:$0xf] }
 0x702   :  { %v7368_v27 = vpop.f32.mrf.mxu0  ;;  %v7381_v18 = vpop.f32.mrf.mxu1  ;;  %8323 = vmatpush.bf16.msrb.mxu0 %v12517_v39  ;;  %v13897_v39 = vld [vmem:[%s20867_s1 + $0x264] sm:$0xf0] }
 0x703   :  { %v7382_v58 = vadd.f32 %v7381_v18, %v7368_v27  ;;  %v12772_v27 = vld [vmem:[%s20867_s1 + $0x348] sm:$0xf]  ;;  %v7428_v18 = vsel %vm1026_vm1, %v7330_v32, %v7422_v34  ;;  %v13925_v34 = vld [vmem:[%s20867_s1 + $0x34c] sm:$0xf] }
 0x704   :  { %v12773_v52 = vor.u32 %v13929_v20, %v12772_v27  ;;  %v12777_v8 = vor.u32 %v13925_v34, %v12774_v23  ;;  %v12452_v32 = vld [vmem:[%s20867_s1 + $0xc8] sm:$0xf]  ;;  %v13829_v20 = vld [vmem:[%s20867_s1 + $0x4c] sm:$0xf] }
 0x705   :  { %v7423_v42 = vrot.slane %v7382_v58, 4  ;;  %v13917_v58 = vld [vmem:[%s20867_s1 + $0x30c] sm:$0xf]  ;;  %8350 = vmatpush.bf16.msrb.mxu2 %v12489_v17  ;;  %v12388_v27 = vld [vmem:[%s20867_s1 + $0x48] sm:$0xf] }
 0x706   :  { %8336 = vmatpush.bf16.msrb.mxu1 %v12773_v52  ;;  %8362 = vmatpush.bf16.msrb.mxu3 %v12777_v8  ;;  %v12745_v51 = vor.u32 %v13917_v58, %v12742_v59  ;;  %v12646_v52 = vld [vmem:[%s20867_s1 + $0x268] sm:$0xf0]  ;;  %v12356_v34 = vld [vmem:[%s20867_s1 + $0x8] sm:$0xf] }
 0x707   :  { %8324 = vmatpush.bf16.msrb.mxu0 %v12485_v25  ;;  %v12649_v38 = vor.u32 %v13893_v13, %v12646_v52  ;;  %v13825_v23 = vld [vmem:[%s20867_s1 + $0x24] sm:$0xf0]  ;;  %v12782_v13 = vld [vmem:[%s20867_s1 + $0x370] sm:$0xf0] }
 0x708   :  { %v13889_v8 = vld [vmem:[%s20867_s1 + $0x224] sm:$0xf0] }
 0x709   :  { %v7394_v48 = vpop.f32.mrf.mxu2  ;;  %v7407_v11 = vpop.f32.mrf.mxu3 }
 0x70a   :  { %v7408_v53 = vadd.f32 %v7407_v11, %v7394_v48  ;;  %v7370_v45 = vpop.f32.mrf.mxu0  ;;  %v7383_v46 = vpop.f32.mrf.mxu1  ;;  %v13849_v48 = vld [vmem:[%s20867_s1 + $0xe4] sm:$0xf0]  ;;  %8337 = vmatpush.bf16.msrb.mxu1 %v12741_v37  ;;  %8363 = vmatpush.bf16.msrb.mxu3 %v12745_v51 }
 0x70b   :  { %v12708_v11 = vld [vmem:[%s20867_s1 + $0x2c8] sm:$0xf]  ;;  %v12453_v43 = vor.u32 %v13849_v48, %v12452_v32  ;;  %v12710_v45 = vld [vmem:[%s20867_s1 + $0x2e8] sm:$0xf0] }
 0x70c   :  { %v7424_v12 = vrot.slane %v7408_v53, 2  ;;  %v12709_v15 = vor.u32 %v13913_v41, %v12708_v11  ;;  %v12457_v53 = vor.u32 %v13845_v61, %v12454_v2  ;;  %v12713_v10 = vor.u32 %v13909_v4, %v12710_v45  ;;  %v12588_v61 = vld [vmem:[%s20867_s1 + $0x1d0] sm:$0xf]  ;;  %v13878_v4 = vld [vmem:[%s20867_s1 + $0x1d4] sm:$0xf] }
 0x70d   :  { %8325 = vmatpush.bf16.msrb.mxu0 %v12453_v43  ;;  %v13882_v2 = vld [vmem:[%s20867_s1 + $0x1ec] sm:$0xf0]  ;;  %v12590_v45 = vld [vmem:[%s20867_s1 + $0x1f0] sm:$0xf0] }
 0x70e   :  { %v7429_v62 = vsel %vm1028_vm0, %v7423_v42, %v7424_v12  ;;  %v13837_v42 = vld [vmem:[%s20867_s1 + $0x8c] sm:$0xf]  ;;  %8338 = vmatpush.bf16.msrb.mxu1 %v12709_v15  ;;  %8351 = vmatpush.bf16.msrb.mxu2 %v12457_v53  ;;  %v12844_v15 = vld [vmem:[%s20867_s1 + $0x3d0] sm:$0xf]  ;;  %v12593_v55 = vor.u32 %v13878_v4, %v12590_v45  ;;  %v13838_v4 = vld [vmem:[%s20867_s1 + $0x94] sm:$0xf] }
 0x70f   :  { %v7430_v31 = vsel %vm1030_vm2, %v7428_v18, %v7429_v62  ;;  %v12422_v12 = vld [vmem:[%s20867_s1 + $0xa8] sm:$0xf0]  ;;  %8364 = vmatpush.bf16.msrb.mxu3 %v12713_v10  ;;  %v13833_v18 = vld [vmem:[%s20867_s1 + $0x64] sm:$0xf0]  ;;  %v13946_v53 = vld [vmem:[%s20867_s1 + $0x3ec] sm:$0xf0] }
 0x710   :  { %v7434_v56 = vadd.f32 %v7430_v31, %v6425_v35  ;;  %v12420_v35 = vld [vmem:[%s20867_s1 + $0x88] sm:$0xf]  ;;  %v12425_v0 = vor.u32 %v13837_v42, %v12422_v12  ;;  %v12389_v63 = vor.u32 %v13833_v18, %v12388_v27  ;;  %v12393_v31 = vor.u32 %v13829_v20, %v12390_v50  ;;  %v12812_v12 = vld [vmem:[%s20867_s1 + $0x390] sm:$0xf]  ;;  %v13862_v50 = vld [vmem:[%s20867_s1 + $0x154] sm:$0xf] }
 0x711   :  { %v7396_v44 = vpop.f32.mrf.mxu2  ;;  %v7409_v21 = vpop.f32.mrf.mxu3  ;;  %v12421_v28 = vor.u32 %v13841_v6, %v12420_v35  ;;  %v12644_v62 = vld [vmem:[%s20867_s1 + $0x248] sm:$0xf]  ;;  %v12589_v6 = vor.u32 %v13882_v2, %v12588_v61  ;;  %v12845_v14 = vor.u32 %v13946_v53, %v12844_v15  ;;  %v12524_v27 = vld [vmem:[%s20867_s1 + $0x150] sm:$0xf]  ;;  %v12430_v45 = vld [vmem:[%s20867_s1 + $0xb0] sm:$0xf0] }
 0x712   :  { %v12344_v49 = vmul.f32 -1.442695, %v7434_v56  ;;  %14043 = vtanh.f32 %v7434_v56  ;;  %8339 = vmatpush.bf16.msrb.mxu1 %v12677_v7  ;;  %8352 = vmatpush.bf16.msrb.mxu2 %v12425_v0  ;;  %v12645_v30 = vor.u32 %v13897_v39, %v12644_v62  ;;  %v12612_v56 = vld [vmem:[%s20867_s1 + $0x208] sm:$0xf]  ;;  %v12358_v44 = vld [vmem:[%s20867_s1 + $0x28] sm:$0xf0]  ;;  %v12357_v21 = vor.u32 %v13825_v23, %v12356_v34 }
 0x713   :  { %8326 = vmatpush.bf16.msrb.mxu0 %v12421_v28  ;;  %8365 = vmatpush.bf16.msrb.mxu3 %v12681_v5  ;;  %v13874_v28 = vld [vmem:[%s20867_s1 + $0x1ac] sm:$0xf0]  ;;  %v12558_v7 = vld [vmem:[%s20867_s1 + $0x1b0] sm:$0xf0] }
 0x714   :  { %14045 = vpow2.f32 %v12344_v49  ;;  %v12613_v49 = vor.u32 %v13889_v8, %v12612_v56  ;;  %v13934_v0 = vld [vmem:[%s20867_s1 + $0x394] sm:$0xf]  ;;  %v13866_v18 = vld [vmem:[%s20867_s1 + $0x16c] sm:$0xf0] }
 0x715   :  { %v12780_v39 = vld [vmem:[%s20867_s1 + $0x350] sm:$0xf]  ;;  %v12525_v52 = vor.u32 %v13866_v18, %v12524_v27 }
 0x716   :  { %8340 = vmatpush.bf16.msrb.mxu1 %v12645_v30  ;;  %8353 = vmatpush.bf16.msrb.mxu2 %v12393_v31  ;;  %v13930_v20 = vld [vmem:[%s20867_s1 + $0x36c] sm:$0xf0]  ;;  %v12526_v30 = vld [vmem:[%s20867_s1 + $0x170] sm:$0xf0] }
 0x717   :  { %8327 = vmatpush.bf16.msrb.mxu0 %v12389_v63  ;;  %8366 = vmatpush.bf16.msrb.mxu3 %v12649_v38  ;;  %v12817_v63 = vor.u32 %v13934_v0, %v12814_v1  ;;  %v13926_v31 = vld [vmem:[%s20867_s1 + $0x354] sm:$0xf]  ;;  %v12781_v38 = vor.u32 %v13930_v20, %v12780_v39  ;;  %v12492_v34 = vld [vmem:[%s20867_s1 + $0x110] sm:$0xf]  ;;  %v12529_v56 = vor.u32 %v13862_v50, %v12526_v30 }
 0x718   :  { %v14044_v46 = vpop.eup %14043  ;;  %v13858_v23 = vld [vmem:[%s20867_s1 + $0x12c] sm:$0xf0]  ;;  %v12785_v8 = vor.u32 %v13926_v31, %v12782_v13  ;;  %v13822_v39 = vld [vmem:[%s20867_s1 + $0x14] sm:$0xf]  ;;  %v12596_v31 = vld [vmem:[%s20867_s1 + $0x1d8] sm:$0xf] }
 0x719   :  { %v7479_v54 = vmul.f32 %v14044_v46, %v7456_v60  ;;  %v13821_v60 = vld [vmem:[%s20867_s1 + $0xc] sm:$0xf]  ;;  %v13942_v46 = vld [vmem:[%s20867_s1 + $0x3d4] sm:$0xf]  ;;  %v12684_v15 = vld [vmem:[%s20867_s1 + $0x290] sm:$0xf] }
 0x71a   :  { %v14046_v3 = vpop.eup %14045  ;;  %v12361_v25 = vor.u32 %v13821_v60, %v12358_v44  ;;  %8341 = vmatpush.bf16.msrb.mxu1 %v12613_v49  ;;  %v12849_v42 = vor.u32 %v13942_v46, %v12846_v9  ;;  %v12748_v60 = vld [vmem:[%s20867_s1 + $0x310] sm:$0xf]  ;;  %v12493_v49 = vor.u32 %v13858_v23, %v12492_v34  ;;  %v13902_v46 = vld [vmem:[%s20867_s1 + $0x294] sm:$0xf]  ;;  %v13883_v13 = vld [vmem:[%s20867_s1 + $0x1f4] sm:$0xf0] }
 0x71b   :  { %v7442_v16 = vadd.f32 1.0, %v14046_v3  ;;  %v7480_v19 = vadd.f32 %v7479_v54, %v7478_v33  ;;  %8328 = vmatpush.bf16.msrb.mxu0 %v12357_v21  ;;  %8367 = vmatpush.bf16.msrb.mxu3 %v12617_v57  ;;  %v12556_v3 = vld [vmem:[%s20867_s1 + $0x190] sm:$0xf]  ;;  %v13854_v21 = vld [vmem:[%s20867_s1 + $0x114] sm:$0xf] }
 0x71c   :  { %8354 = vmatpush.bf16.msrb.mxu2 %v12361_v25  ;;  %v12557_v24 = vor.u32 %v13874_v28, %v12556_v3  ;;  %v13922_v44 = vld [vmem:[%s20867_s1 + $0x32c] sm:$0xf0]  ;;  %v12686_v9 = vld [vmem:[%s20867_s1 + $0x2b0] sm:$0xf0]  ;;  %v12433_v3 = vor.u32 %v13838_v4, %v12430_v45  ;;  %v13879_v34 = vld [vmem:[%s20867_s1 + $0x1dc] sm:$0xf] }
 0x71d   :  { %14047 = vrcp.f32 %v7442_v16  ;;  %7481 = vst [vmem:[#allocation3] sm:$0xf] %v7480_v19  ;;  %v7469_v40 = vand.u32 2147483648, %v7442_v16  ;;  %v7467_v59 = vand.u32 2147483647, %v7442_v16  ;;  %vm7463_vm4 = vweird.f32 %v7442_v16 }
 0x71e   :  { %14049 = vtanh.f32 %v7480_v19  ;;  %v13870_v19 = vld [vmem:[%s20867_s1 + $0x194] sm:$0xf]  ;;  %v12749_v25 = vor.u32 %v13922_v44, %v12748_v60  ;;  %v13850_v57 = vld [vmem:[%s20867_s1 + $0xec] sm:$0xf0]  ;;  %v12689_v28 = vor.u32 %v13902_v46, %v12686_v9  ;;  %v13943_v60 = vld [vmem:[%s20867_s1 + $0x3dc] sm:$0xf] }
 0x71f   :  { %v7470_v17 = vor.u32 1.1754944e-38, %v7469_v40  ;;  %vm7468_vm6 = vcmp.eq.f32.partialorder %v7467_v59, 8.507059e+37  ;;  %v12561_v62 = vor.u32 %v13870_v19, %v12558_v7  ;;  %v13914_v59 = vld [vmem:[%s20867_s1 + $0x2ec] sm:$0xf0]  ;;  %v13894_v19 = vld [vmem:[%s20867_s1 + $0x254] sm:$0xf] }
 0x720   :  { %v13906_v53 = vld [vmem:[%s20867_s1 + $0x2ac] sm:$0xf0]  ;;  %v12654_v7 = vld [vmem:[%s20867_s1 + $0x270] sm:$0xf0]  ;;  %v12854_v44 = vld [vmem:[%s20867_s1 + $0x3f8] sm:$0xf0] }
 0x721   :  { %v12364_v0 = vld [vmem:[%s20867_s1 + $0x10] sm:$0xf]  ;;  %v12366_v20 = vld [vmem:[%s20867_s1 + $0x30] sm:$0xf0]  ;;  %v13927_v4 = vld [vmem:[%s20867_s1 + $0x35c] sm:$0xf] }
 0x722   :  { %v12620_v27 = vld [vmem:[%s20867_s1 + $0x210] sm:$0xf]  ;;  %v13886_v50 = vld [vmem:[%s20867_s1 + $0x214] sm:$0xf]  ;;  %v12790_v45 = vld [vmem:[%s20867_s1 + $0x378] sm:$0xf0] }
 0x723   :  { %v14048_v47 = vpop.eup %14047  ;;  %v13890_v18 = vld [vmem:[%s20867_s1 + $0x22c] sm:$0xf0]  ;;  %v12622_v30 = vld [vmem:[%s20867_s1 + $0x230] sm:$0xf0] }
 0x724   :  { %v7459_v26 = vmul.f32 %v14048_v47, %v7442_v16  ;;  %vm7464_vm3 = vweird.f32 %v14048_v47  ;;  %v14050_v11 = vpop.eup %14049  ;;  %v13938_v16 = vld [vmem:[%s20867_s1 + $0x3ac] sm:$0xf0] }
 0x725   :  { %vm7465_vm5 = vmor %vm7463_vm4, %vm7464_vm3  ;;  %v12813_v5 = vor.u32 %v13938_v16, %v12812_v12  ;;  %v13830_v12 = vld [vmem:[%s20867_s1 + $0x54] sm:$0xf] }
 0x726   :  { %v7460_v37 = vsub.f32 1.0, %v7459_v26  ;;  %v12460_v26 = vld [vmem:[%s20867_s1 + $0xd0] sm:$0xf]  ;;  %v12398_v16 = vld [vmem:[%s20867_s1 + $0x70] sm:$0xf0] }
 0x728   :  { %v7461_v58 = vmul.f32 %v14048_v47, %v7460_v37  ;;  %v12497_v37 = vor.u32 %v13854_v21, %v12494_v36  ;;  %v12369_v21 = vor.u32 %v13822_v39, %v12366_v20  ;;  %v12625_v36 = vor.u32 %v13886_v50, %v12622_v30  ;;  %v13911_v39 = vld [vmem:[%s20867_s1 + $0x2dc] sm:$0xf] }
 0x729   :  { %v12726_v20 = vld [vmem:[%s20867_s1 + $0x2f8] sm:$0xf0] }
 0x72a   :  { %v7462_v29 = vadd.f32 %v14048_v47, %v7461_v58  ;;  %v12716_v58 = vld [vmem:[%s20867_s1 + $0x2d0] sm:$0xf] }
 0x72c   :  { %v7466_v51 = vsel %vm7465_vm5, %v14048_v47, %v7462_v29  ;;  %v12750_v47 = vld [vmem:[%s20867_s1 + $0x330] sm:$0xf0] }
 0x72d   :  { %v7471_v32 = vsel %vm7468_vm6, %v7470_v17, %v7466_v51  ;;  %v12753_v40 = vor.u32 %v13918_v22, %v12750_v47  ;;  %v13846_v29 = vld [vmem:[%s20867_s1 + $0xd4] sm:$0xf]  ;;  %v12597_v22 = vor.u32 %v13883_v13, %v12596_v31  ;;  %v12436_v31 = vld [vmem:[%s20867_s1 + $0x98] sm:$0xf] }
 0x72e   :  { %v7484_v48 = vrot.slane %v7471_v32, 4  ;;  %v12462_v17 = vld [vmem:[%s20867_s1 + $0xf0] sm:$0xf0]  ;;  %v13843_v13 = vld [vmem:[%s20867_s1 + $0xb4] sm:$0xf0] }
 0x72f   :  { %v13910_v51 = vld [vmem:[%s20867_s1 + $0x2d4] sm:$0xf]  ;;  %v12465_v61 = vor.u32 %v13846_v29, %v12462_v17  ;;  %v13935_v29 = vld [vmem:[%s20867_s1 + $0x39c] sm:$0xf] }
 0x730   :  { %v7486_v43 = vmul.f32 %v14050_v11, %v7484_v48  ;;  %v12718_v32 = vld [vmem:[%s20867_s1 + $0x2f0] sm:$0xf0]  ;;  %v12461_v48 = vor.u32 %v13850_v57, %v12460_v26  ;;  %v12717_v11 = vor.u32 %v13914_v59, %v12716_v58  ;;  %v12857_v57 = vor.u32 %v13943_v60, %v12854_v44  ;;  %v13871_v58 = vld [vmem:[%s20867_s1 + $0x19c] sm:$0xf] }
 0x731   :  { %v12721_v2 = vor.u32 %v13910_v51, %v12718_v32  ;;  %v12566_v59 = vld [vmem:[%s20867_s1 + $0x1b8] sm:$0xf0] }
 0x732   :  { %7487 = vst [vmem:[#allocation2] sm:$0xf] %v7486_v43  ;;  %v12428_v43 = vld [vmem:[%s20867_s1 + $0x90] sm:$0xf]  ;;  %v12822_v17 = vld [vmem:[%s20867_s1 + $0x3b8] sm:$0xf0] }
 0x733   :  { %v13903_v60 = vld [vmem:[%s20867_s1 + $0x29c] sm:$0xf] }
 0x734   :  { %v12694_v44 = vld [vmem:[%s20867_s1 + $0x2b8] sm:$0xf0] }
 0x739   :  { %v7492_v41 = vld [vmem:[#allocation2] sm:$0xf] }
 0x73a   :  { %7494 = vst [vmem:[#allocation1] ss:$4 sm:$0xff] %v7492_v41  ;;  %v13842_v41 = vld [vmem:[%s20867_s1 + $0xac] sm:$0xf0] }
 0x741   :  { %v7495_v10 = vld.sshfl [vmem:[#allocation1] sm:$0xff pattern:$0x73625140]  ;;  %v7496_v33 = vld.sshfl [vmem:[#allocation1 + $0x8] sm:$0xff pattern:$0x73625140] }
 0x742   :  { %v20419_v54 = vpack.c.bf16 %v7495_v10, %v7495_v10  ;;  %v20421_v35 = vpack.c.bf16 %v7496_v33, %v7496_v33  ;;  %v12429_v10 = vor.u32 %v13842_v41, %v12428_v43  ;;  %v12685_v33 = vor.u32 %v13906_v53, %v12684_v15  ;;  %v13863_v15 = vld [vmem:[%s20867_s1 + $0x15c] sm:$0xf] }
 0x743   :  { %v12569_v43 = vor.u32 %v13871_v58, %v12566_v59  ;;  %v12825_v41 = vor.u32 %v13935_v29, %v12822_v17  ;;  %v12534_v53 = vld [vmem:[%s20867_s1 + $0x178] sm:$0xf0] }
 0x744   :  { %8277 = vmatmul.bf16.vlgmr.msra.gmra.mxu0 %v20419_v54  ;;  %8290 = vmatmul.bf16.vlgmr.msra.gmra.mxu1 %v20421_v35  ;;  %v13895_v58 = vld [vmem:[%s20867_s1 + $0x25c] sm:$0xf] }
 0x745   :  { %8303 = vmatmul.bf16.vlgmr.msra.gmra.mxu2 %v20419_v54  ;;  %8316 = vmatmul.bf16.vlgmr.msra.gmra.mxu3 %v20421_v35  ;;  %v12662_v59 = vld [vmem:[%s20867_s1 + $0x278] sm:$0xf0] }
 0x746   :  { %8373 = vmatpush.bf16.msra.mxu0 %v12589_v6  ;;  %8386 = vmatpush.bf16.msra.mxu1 %v12845_v14  ;;  %v12396_v6 = vld [vmem:[%s20867_s1 + $0x50] sm:$0xf] }
 0x747   :  { %8399 = vmatpush.bf16.msra.mxu2 %v12593_v55  ;;  %8412 = vmatpush.bf16.msra.mxu3 %v12849_v42  ;;  %v13834_v14 = vld [vmem:[%s20867_s1 + $0x6c] sm:$0xf0] }
 0x748   :  { %v12652_v55 = vld [vmem:[%s20867_s1 + $0x250] sm:$0xf]  ;;  %v12397_v1 = vor.u32 %v13834_v14, %v12396_v6  ;;  %v12537_v6 = vor.u32 %v13863_v15, %v12534_v53  ;;  %v12793_v14 = vor.u32 %v13927_v4, %v12790_v45  ;;  %v13887_v15 = vld [vmem:[%s20867_s1 + $0x21c] sm:$0xf] }
 0x749   :  { %v13898_v42 = vld [vmem:[%s20867_s1 + $0x26c] sm:$0xf0]  ;;  %v12630_v53 = vld [vmem:[%s20867_s1 + $0x238] sm:$0xf0] }
 0x74a   :  { %8374 = vmatpush.bf16.msra.mxu0 %v12557_v24  ;;  %8387 = vmatpush.bf16.msra.mxu1 %v12813_v5  ;;  %v12653_v24 = vor.u32 %v13898_v42, %v12652_v55  ;;  %v13826_v5 = vld [vmem:[%s20867_s1 + $0x2c] sm:$0xf0]  ;;  %v13855_v55 = vld [vmem:[%s20867_s1 + $0x11c] sm:$0xf] }
 0x74b   :  { %8400 = vmatpush.bf16.msra.mxu2 %v12561_v62  ;;  %8413 = vmatpush.bf16.msra.mxu3 %v12817_v63  ;;  %v12401_v62 = vor.u32 %v13830_v12, %v12398_v16  ;;  %v12657_v63 = vor.u32 %v13894_v19, %v12654_v7  ;;  %v12365_v23 = vor.u32 %v13826_v5, %v12364_v0  ;;  %v12502_v42 = vld [vmem:[%s20867_s1 + $0x138] sm:$0xf0]  ;;  %v12468_v0 = vld [vmem:[%s20867_s1 + $0xd8] sm:$0xf] }
 0x74c   :  { %v13919_v12 = vld [vmem:[%s20867_s1 + $0x31c] sm:$0xf] }
 0x74d   :  { %v12758_v16 = vld [vmem:[%s20867_s1 + $0x338] sm:$0xf0] }
 0x74e   :  { %8375 = vmatpush.bf16.msra.mxu0 %v12525_v52  ;;  %8388 = vmatpush.bf16.msra.mxu1 %v12781_v38  ;;  %v12852_v52 = vld [vmem:[%s20867_s1 + $0x3d8] sm:$0xf]  ;;  %v12761_v5 = vor.u32 %v13919_v12, %v12758_v16 }
 0x74f   :  { %8401 = vmatpush.bf16.msra.mxu2 %v12529_v56  ;;  %8414 = vmatpush.bf16.msra.mxu3 %v12785_v8  ;;  %v13947_v38 = vld [vmem:[%s20867_s1 + $0x3f4] sm:$0xf0]  ;;  %v12621_v56 = vor.u32 %v13890_v18, %v12620_v27  ;;  %v12598_v8 = vld [vmem:[%s20867_s1 + $0x1f8] sm:$0xf0] }
 0x750   :  { %v12853_v47 = vor.u32 %v13947_v38, %v12852_v52  ;;  %v12601_v26 = vor.u32 %v13879_v34, %v12598_v8  ;;  %v12724_v27 = vld [vmem:[%s20867_s1 + $0x2d8] sm:$0xf]  ;;  %v12729_v38 = vor.u32 %v13911_v39, %v12726_v20  ;;  %v12438_v8 = vld [vmem:[%s20867_s1 + $0xb8] sm:$0xf0] }
 0x751   :  { %v13915_v18 = vld [vmem:[%s20867_s1 + $0x2f4] sm:$0xf0] }
 0x752   :  { %8376 = vmatpush.bf16.msra.mxu0 %v12493_v49  ;;  %8389 = vmatpush.bf16.msra.mxu1 %v12749_v25  ;;  %v12564_v49 = vld [vmem:[%s20867_s1 + $0x198] sm:$0xf]  ;;  %v12725_v30 = vor.u32 %v13915_v18, %v12724_v27 }
 0x753   :  { %8402 = vmatpush.bf16.msra.mxu2 %v12497_v37  ;;  %8415 = vmatpush.bf16.msra.mxu3 %v12753_v40  ;;  %v13875_v25 = vld [vmem:[%s20867_s1 + $0x1b4] sm:$0xf0] }
 0x754   :  { %8329 = vmatmul.bf16.vlgmr.msrb.gmra.mxu0 %v20419_v54  ;;  %8342 = vmatmul.bf16.vlgmr.msrb.gmra.mxu1 %v20421_v35  ;;  %v12820_v37 = vld [vmem:[%s20867_s1 + $0x398] sm:$0xf]  ;;  %v12565_v51 = vor.u32 %v13875_v25, %v12564_v49  ;;  %v12697_v25 = vor.u32 %v13903_v60, %v12694_v44 }
 0x755   :  { %8355 = vmatmul.bf16.vlgmr.msrb.gmra.mxu2 %v20419_v54  ;;  %8368 = vmatmul.bf16.vlgmr.msrb.gmra.mxu3 %v20421_v35  ;;  %v13939_v40 = vld [vmem:[%s20867_s1 + $0x3b4] sm:$0xf0] }
 0x756   :  { %8377 = vmatpush.bf16.msra.mxu0 %v12461_v48  ;;  %8390 = vmatpush.bf16.msra.mxu1 %v12717_v11  ;;  %v12821_v32 = vor.u32 %v13939_v40, %v12820_v37  ;;  %v12532_v48 = vld [vmem:[%s20867_s1 + $0x158] sm:$0xf]  ;;  %v13831_v37 = vld [vmem:[%s20867_s1 + $0x5c] sm:$0xf] }
 0x757   :  { %8403 = vmatpush.bf16.msra.mxu2 %v12465_v61  ;;  %8416 = vmatpush.bf16.msra.mxu3 %v12721_v2  ;;  %v13867_v11 = vld [vmem:[%s20867_s1 + $0x174] sm:$0xf0]  ;;  %v12406_v40 = vld [vmem:[%s20867_s1 + $0x78] sm:$0xf0] }
 0x758   :  { %v12788_v61 = vld [vmem:[%s20867_s1 + $0x358] sm:$0xf]  ;;  %v12533_v46 = vor.u32 %v13867_v11, %v12532_v48  ;;  %v12409_v48 = vor.u32 %v13831_v37, %v12406_v40  ;;  %v12665_v11 = vor.u32 %v13895_v58, %v12662_v59 }
 0x759   :  { %v13931_v2 = vld [vmem:[%s20867_s1 + $0x374] sm:$0xf0] }
 0x75a   :  { %8378 = vmatpush.bf16.msra.mxu0 %v12429_v10  ;;  %8391 = vmatpush.bf16.msra.mxu1 %v12685_v33  ;;  %v12789_v9 = vor.u32 %v13931_v2, %v12788_v61  ;;  %v12500_v10 = vld [vmem:[%s20867_s1 + $0x118] sm:$0xf]  ;;  %v13823_v61 = vld [vmem:[%s20867_s1 + $0x1c] sm:$0xf] }
 0x75b   :  { %8404 = vmatpush.bf16.msra.mxu2 %v12433_v3  ;;  %8417 = vmatpush.bf16.msra.mxu3 %v12689_v28  ;;  %v13859_v33 = vld [vmem:[%s20867_s1 + $0x134] sm:$0xf0]  ;;  %v12374_v2 = vld [vmem:[%s20867_s1 + $0x38] sm:$0xf0] }
 0x75c   :  { %v12756_v3 = vld [vmem:[%s20867_s1 + $0x318] sm:$0xf]  ;;  %v12501_v19 = vor.u32 %v13859_v33, %v12500_v10 }
 0x75d   :  { %v13923_v28 = vld [vmem:[%s20867_s1 + $0x334] sm:$0xf0] }
 0x75e   :  { %8379 = vmatpush.bf16.msra.mxu0 %v12397_v1  ;;  %8392 = vmatpush.bf16.msra.mxu1 %v12653_v24  ;;  %v12757_v7 = vor.u32 %v13923_v28, %v12756_v3  ;;  %v13851_v1 = vld [vmem:[%s20867_s1 + $0xf4] sm:$0xf0]  ;;  %v12505_v24 = vor.u32 %v13855_v55, %v12502_v42 }
 0x75f   :  { %8405 = vmatpush.bf16.msra.mxu2 %v12401_v62  ;;  %8418 = vmatpush.bf16.msra.mxu3 %v12657_v63  ;;  %v13847_v62 = vld [vmem:[%s20867_s1 + $0xdc] sm:$0xf]  ;;  %v12469_v50 = vor.u32 %v13851_v1, %v12468_v0  ;;  %v12692_v34 = vld [vmem:[%s20867_s1 + $0x298] sm:$0xf] }
 0x760   :  { %v12470_v63 = vld [vmem:[%s20867_s1 + $0xf8] sm:$0xf0] }
 0x761   :  { %v12473_v52 = vor.u32 %v13847_v62, %v12470_v63  ;;  %v20802_v1 = vld [vmem:[%s20866_s0 + $0x38] sm:$0xff] }
 0x762   :  { %8380 = vmatpush.bf16.msra.mxu0 %v12365_v23  ;;  %8393 = vmatpush.bf16.msra.mxu1 %v12621_v56  ;;  %v13907_v23 = vld [vmem:[%s20867_s1 + $0x2b4] sm:$0xf0]  ;;  %v13839_v56 = vld [vmem:[%s20867_s1 + $0x9c] sm:$0xf]  ;;  %v7490_v63 = vunpack.c.l.bf16 %v20802_v1 }
 0x763   :  { %8406 = vmatpush.bf16.msra.mxu2 %v12369_v21  ;;  %8419 = vmatpush.bf16.msra.mxu3 %v12625_v36  ;;  %v12437_v21 = vor.u32 %v13843_v13, %v12436_v31  ;;  %v12693_v36 = vor.u32 %v13907_v23, %v12692_v34  ;;  %v12441_v49 = vor.u32 %v13839_v56, %v12438_v8  ;;  %v13955_v40 = vld [vmem:[%s20868_s2 + $0x38] sm:$0xff] }
 0x764   :  { %v13963_v58 = vld [vmem:[%s20868_s2 + $0x78] sm:$0xff] }
 0x765   :  { %8381 = vmatmul.bf16.vlgmr.msra.gmra.mxu0 %v20419_v54  ;;  %8394 = vmatmul.bf16.vlgmr.msra.gmra.mxu1 %v20421_v35 }
 0x766   :  { %8425 = vmatpush.bf16.msrb.mxu0 %v12597_v22  ;;  %8438 = vmatpush.bf16.msrb.mxu1 %v12853_v47  ;;  %v12404_v22 = vld [vmem:[%s20867_s1 + $0x58] sm:$0xf] }
 0x767   :  { %8451 = vmatpush.bf16.msrb.mxu2 %v12601_v26  ;;  %8464 = vmatpush.bf16.msrb.mxu3 %v12857_v57  ;;  %v13835_v47 = vld [vmem:[%s20867_s1 + $0x74] sm:$0xf0] }
 0x768   :  { %8407 = vmatmul.bf16.vlgmr.msra.gmra.mxu2 %v20419_v54  ;;  %8420 = vmatmul.bf16.vlgmr.msra.gmra.mxu3 %v20421_v35  ;;  %v12660_v26 = vld [vmem:[%s20867_s1 + $0x258] sm:$0xf]  ;;  %v12405_v29 = vor.u32 %v13835_v47, %v12404_v22 }
 0x769   :  { %v13899_v57 = vld [vmem:[%s20867_s1 + $0x274] sm:$0xf0] }
 0x76a   :  { %8426 = vmatpush.bf16.msrb.mxu0 %v12565_v51  ;;  %8439 = vmatpush.bf16.msrb.mxu1 %v12821_v32  ;;  %v12661_v17 = vor.u32 %v13899_v57, %v12660_v26  ;;  %v12372_v51 = vld [vmem:[%s20867_s1 + $0x18] sm:$0xf] }
 0x76b   :  { %8452 = vmatpush.bf16.msrb.mxu2 %v12569_v43  ;;  %8465 = vmatpush.bf16.msrb.mxu3 %v12825_v41  ;;  %v13827_v32 = vld [vmem:[%s20867_s1 + $0x34] sm:$0xf0] }
 0x76c   :  { %v12628_v43 = vld [vmem:[%s20867_s1 + $0x218] sm:$0xf]  ;;  %v12373_v4 = vor.u32 %v13827_v32, %v12372_v51  ;;  %v13954_v51 = vld [vmem:[%s20868_s2 + $0x30] sm:$0xff] }
 0x76d   :  { %v13891_v41 = vld [vmem:[%s20867_s1 + $0x234] sm:$0xf0]  ;;  %v13962_v32 = vld [vmem:[%s20868_s2 + $0x70] sm:$0xff] }
 0x76e   :  { %8427 = vmatpush.bf16.msrb.mxu0 %v12533_v46  ;;  %8440 = vmatpush.bf16.msrb.mxu1 %v12789_v9  ;;  %v12629_v45 = vor.u32 %v13891_v41, %v12628_v43  ;;  %v12377_v46 = vor.u32 %v13823_v61, %v12374_v2  ;;  %v12633_v9 = vor.u32 %v13887_v15, %v12630_v53 }
 0x76f   :  { %8453 = vmatpush.bf16.msrb.mxu2 %v12537_v6  ;;  %8466 = vmatpush.bf16.msrb.mxu3 %v12793_v14 }
 0x772   :  { %8428 = vmatpush.bf16.msrb.mxu0 %v12501_v19  ;;  %8441 = vmatpush.bf16.msrb.mxu1 %v12757_v7 }
 0x773   :  { %8454 = vmatpush.bf16.msrb.mxu2 %v12505_v24  ;;  %8467 = vmatpush.bf16.msrb.mxu3 %v12761_v5 }
 0x776   :  { %8429 = vmatpush.bf16.msrb.mxu0 %v12469_v50  ;;  %8442 = vmatpush.bf16.msrb.mxu1 %v12725_v30 }
 0x777   :  { %8455 = vmatpush.bf16.msrb.mxu2 %v12473_v52  ;;  %8468 = vmatpush.bf16.msrb.mxu3 %v12729_v38 }
 0x77a   :  { %8430 = vmatpush.bf16.msrb.mxu0 %v12437_v21  ;;  %8443 = vmatpush.bf16.msrb.mxu1 %v12693_v36 }
 0x77b   :  { %8456 = vmatpush.bf16.msrb.mxu2 %v12441_v49  ;;  %8469 = vmatpush.bf16.msrb.mxu3 %v12697_v25 }
 0x77e   :  { %8431 = vmatpush.bf16.msrb.mxu0 %v12405_v29  ;;  %8444 = vmatpush.bf16.msrb.mxu1 %v12661_v17 }
 0x77f   :  { %8457 = vmatpush.bf16.msrb.mxu2 %v12409_v48  ;;  %8470 = vmatpush.bf16.msrb.mxu3 %v12665_v11 }
 0x782   :  { %8432 = vmatpush.bf16.msrb.mxu0 %v12373_v4  ;;  %8445 = vmatpush.bf16.msrb.mxu1 %v12629_v45  ;;  %v7491_v45 = vunpack.c.h.bf16 %v20802_v1 }
 0x783   :  { %8458 = vmatpush.bf16.msrb.mxu2 %v12377_v46  ;;  %8471 = vmatpush.bf16.msrb.mxu3 %v12633_v9 }
 0x785   :  { %8433 = vmatmul.bf16.vlgmr.msrb.gmra.mxu0 %v20419_v54  ;;  %8446 = vmatmul.bf16.vlgmr.msrb.gmra.mxu1 %v20421_v35 }
 0x786   :  { %8459 = vmatmul.bf16.vlgmr.msrb.gmra.mxu2 %v20419_v54  ;;  %8472 = vmatmul.bf16.vlgmr.msrb.gmra.mxu3 %v20421_v35 }
 0x787   :  { %8698 = vmatpush.bf16.msra.mxu0 %v13955_v40  ;;  %8711 = vmatpush.bf16.msra.mxu1 %v13963_v58 }
 0x78b   :  { %8699 = vmatpush.bf16.msra.mxu0 %v13954_v51  ;;  %8712 = vmatpush.bf16.msra.mxu1 %v13962_v32 }
 0x7c1   :  { %v8278_v10 = vpop.f32.mrf.mxu0  ;;  %v8291_v33 = vpop.f32.mrf.mxu1 }
 0x7c2   :  { %v8292_v18 = vadd.f32 %v8291_v33, %v8278_v10  ;;  %v13953_v10 = vld [vmem:[%s20868_s2 + $0x28] sm:$0xff] }
 0x7c3   :  { %v13961_v33 = vld [vmem:[%s20868_s2 + $0x68] sm:$0xff]  ;;  %8700 = vmatpush.bf16.msra.mxu0 %v13953_v10 }
 0x7c4   :  { %8713 = vmatpush.bf16.msra.mxu1 %v13961_v33 }
 0x7c8   :  { %v8304_v6 = vpop.f32.mrf.mxu2  ;;  %v8317_v14 = vpop.f32.mrf.mxu3 }
 0x7c9   :  { %v8280_v3 = vpop.f32.mrf.mxu0  ;;  %v8293_v28 = vpop.f32.mrf.mxu1  ;;  %v8318_v19 = vadd.f32 %v8317_v14, %v8304_v6 }
 0x7cb   :  { %v8485_v35 = vrot.slane %v8318_v19, 6  ;;  %v13960_v19 = vld [vmem:[%s20868_s2 + $0x60] sm:$0xff] }
 0x7cc   :  { %8714 = vmatpush.bf16.msra.mxu1 %v13960_v19 }
 0x7cd   :  { %v8491_v20 = vsel %vm1026_vm1, %v8292_v18, %v8485_v35  ;;  %v13951_v35 = vld [vmem:[%s20868_s2 + $0x18] sm:$0xff]  ;;  %v8540_v18 = vld [vmem:[#allocation3] sm:$0xf] }
 0x7d0   :  { %v8306_v55 = vpop.f32.mrf.mxu2  ;;  %v8319_v42 = vpop.f32.mrf.mxu3 }
 0x7d1   :  { %v8330_v12 = vpop.f32.mrf.mxu0  ;;  %v8343_v16 = vpop.f32.mrf.mxu1 }
 0x7d2   :  { %v8344_v7 = vadd.f32 %v8343_v16, %v8330_v12  ;;  %v13952_v16 = vld [vmem:[%s20868_s2 + $0x20] sm:$0xff] }
 0x7d3   :  { %8701 = vmatpush.bf16.msra.mxu0 %v13952_v16 }
 0x7d4   :  { %v8486_v62 = vrot.slane %v8344_v7, 4 }
 0x7d7   :  { %8702 = vmatpush.bf16.msra.mxu0 %v13951_v35 }
 0x7d8   :  { %v8356_v0 = vpop.f32.mrf.mxu2  ;;  %v8369_v54 = vpop.f32.mrf.mxu3 }
 0x7d9   :  { %v8370_v24 = vadd.f32 %v8369_v54, %v8356_v0  ;;  %v8332_v5 = vpop.f32.mrf.mxu0  ;;  %v8345_v27 = vpop.f32.mrf.mxu1 }
 0x7db   :  { %v8487_v39 = vrot.slane %v8370_v24, 2  ;;  %v13959_v24 = vld [vmem:[%s20868_s2 + $0x58] sm:$0xff] }
 0x7dc   :  { %8715 = vmatpush.bf16.msra.mxu1 %v13959_v24 }
 0x7dd   :  { %v8492_v50 = vsel %vm1028_vm0, %v8486_v62, %v8487_v39  ;;  %v13950_v62 = vld [vmem:[%s20868_s2 + $0x10] sm:$0xff] }
 0x7de   :  { %v8493_v30 = vsel %vm1030_vm2, %v8491_v20, %v8492_v50  ;;  %8703 = vmatpush.bf16.msra.mxu0 %v13950_v62 }
 0x7df   :  { %v8499_v31 = vadd.f32 %v8493_v30, %v7490_v63  ;;  %v13958_v63 = vld [vmem:[%s20868_s2 + $0x50] sm:$0xff]  ;;  %v13949_v30 = vld [vmem:[%s20868_s2 + $0x8] sm:$0xff] }
 0x7e0   :  { %v8358_v13 = vpop.f32.mrf.mxu2  ;;  %v8371_v52 = vpop.f32.mrf.mxu3  ;;  %8716 = vmatpush.bf16.msra.mxu1 %v13958_v63 }
 0x7e1   :  { %v12858_v38 = vmul.f32 -1.442695, %v8499_v31  ;;  %v13957_v31 = vld [vmem:[%s20868_s2 + $0x48] sm:$0xff] }
 0x7e2   :  { %v8382_v34 = vpop.f32.mrf.mxu0  ;;  %v8395_v23 = vpop.f32.mrf.mxu1  ;;  %8704 = vmatpush.bf16.msra.mxu0 %v13949_v30 }
 0x7e3   :  { %14051 = vpow2.f32 %v12858_v38  ;;  %v8396_v15 = vadd.f32 %v8395_v23, %v8382_v34  ;;  %v13948_v38 = vld [vmem:[%s20868_s2] sm:$0xff] }
 0x7e4   :  { %8717 = vmatpush.bf16.msra.mxu1 %v13957_v31  ;;  %v13956_v34 = vld [vmem:[%s20868_s2 + $0x40] sm:$0xff] }
 0x7e6   :  { %8705 = vmatpush.bf16.msra.mxu0 %v13948_v38 }
 0x7e8   :  { %8718 = vmatpush.bf16.msra.mxu1 %v13956_v34 }
 0x7e9   :  { %v14052_v21 = vpop.eup %14051 }
 0x7ea   :  { %v8384_v60 = vpop.f32.mrf.mxu0  ;;  %v8397_v44 = vpop.f32.mrf.mxu1  ;;  %v8507_v36 = vadd.f32 1.0, %v14052_v21 }
 0x7eb   :  { %v8408_v56 = vpop.f32.mrf.mxu2  ;;  %v8421_v8 = vpop.f32.mrf.mxu3 }
 0x7ec   :  { %14053 = vrcp.f32 %v8507_v36  ;;  %v8422_v59 = vadd.f32 %v8421_v8, %v8408_v56  ;;  %v8520_v9 = vand.u32 2147483648, %v8507_v36  ;;  %vm8514_vm8 = vweird.f32 %v8507_v36 }
 0x7ed   :  { %v8518_v6 = vand.u32 2147483647, %v8507_v36 }
 0x7ee   :  { %v8488_v43 = vrot.slane %v8422_v59, 6  ;;  %v8521_v12 = vor.u32 1.1754944e-38, %v8520_v9 }
 0x7ef   :  { %vm8519_vm10 = vcmp.eq.f32.partialorder %v8518_v6, 8.507059e+37 }
 0x7f0   :  { %v8494_v14 = vsel %vm1026_vm1, %v8396_v15, %v8488_v43 }
 0x7f2   :  { %v14054_v49 = vpop.eup %14053 }
 0x7f3   :  { %v8410_v22 = vpop.f32.mrf.mxu2  ;;  %v8423_v47 = vpop.f32.mrf.mxu3  ;;  %v8510_v25 = vmul.f32 %v14054_v49, %v8507_v36  ;;  %vm8515_vm7 = vweird.f32 %v14054_v49 }
 0x7f4   :  { %vm8516_vm9 = vmor %vm8514_vm8, %vm8515_vm7 }
 0x7f5   :  { %v8511_v37 = vsub.f32 1.0, %v8510_v25 }
 0x7f7   :  { %v8512_v29 = vmul.f32 %v14054_v49, %v8511_v37 }
 0x7f9   :  { %v8513_v53 = vadd.f32 %v14054_v49, %v8512_v29 }
 0x7fb   :  { %v8517_v55 = vsel %vm8516_vm9, %v14054_v49, %v8513_v53 }
 0x7fc   :  { %v8522_v54 = vsel %vm8519_vm10, %v8521_v12, %v8517_v55 }
 0x7fd   :  { %v8542_v5 = vrot.slane %v8522_v54, 4 }
 0x7ff   :  { %v8544_v39 = vmul.f32 %v8542_v5, %v8540_v18 }
 0x802   :  { %v8434_v26 = vpop.f32.mrf.mxu0  ;;  %v8447_v57 = vpop.f32.mrf.mxu1 }
 0x803   :  { %v8448_v17 = vadd.f32 %v8447_v57, %v8434_v26 }
 0x805   :  { %v8489_v4 = vrot.slane %v8448_v17, 4  ;;  %v13966_v17 = vld [vmem:[%s20869_s3] ss:$0 sm:$0xff] }
 0x809   :  { %v8460_v48 = vpop.f32.mrf.mxu2  ;;  %v8473_v11 = vpop.f32.mrf.mxu3 }
 0x80a   :  { %v8474_v41 = vadd.f32 %v8473_v11, %v8460_v48  ;;  %v8436_v61 = vpop.f32.mrf.mxu0  ;;  %v8449_v2 = vpop.f32.mrf.mxu1 }
 0x80c   :  { %v8490_v46 = vrot.slane %v8474_v41, 2 }
 0x80e   :  { %v8495_v3 = vsel %vm1028_vm0, %v8489_v4, %v8490_v46 }
 0x80f   :  { %v8496_v28 = vsel %vm1030_vm2, %v8494_v14, %v8495_v3 }
 0x810   :  { %v8500_v42 = vadd.f32 %v8496_v28, %v7491_v45 }
 0x811   :  { %v8462_v7 = vpop.f32.mrf.mxu2  ;;  %v8475_v0 = vpop.f32.mrf.mxu3 }
 0x812   :  { %v12859_v1 = vmul.f32 -1.442695, %v8500_v42  ;;  %14055 = vtanh.f32 %v8500_v42 }
 0x814   :  { %14057 = vpow2.f32 %v12859_v1 }
 0x818   :  { %v14056_v27 = vpop.eup %14055 }
 0x819   :  { %v8545_v20 = vmul.f32 %v14056_v27, %v8522_v54 }
 0x81a   :  { %v14058_v50 = vpop.eup %14057 }
 0x81b   :  { %v8508_v13 = vadd.f32 1.0, %v14058_v50  ;;  %v8546_v52 = vadd.f32 %v8545_v20, %v8544_v39 }
 0x81d   :  { %14059 = vrcp.f32 %v8508_v13  ;;  %8547 = vst [vmem:[#allocation3] sm:$0xf] %v8546_v52  ;;  %v8535_v60 = vand.u32 2147483648, %v8508_v13  ;;  %v8533_v21 = vand.u32 2147483647, %v8508_v13  ;;  %vm8529_vm1 = vweird.f32 %v8508_v13 }
 0x81e   :  { %14061 = vtanh.f32 %v8546_v52 }
 0x81f   :  { %v8536_v22 = vor.u32 1.1754944e-38, %v8535_v60  ;;  %vm8534_vm11 = vcmp.eq.f32.partialorder %v8533_v21, 8.507059e+37 }
 0x823   :  { %v14060_v23 = vpop.eup %14059 }
 0x824   :  { %v8525_v56 = vmul.f32 %v14060_v23, %v8508_v13  ;;  %vm8530_vm0 = vweird.f32 %v14060_v23  ;;  %v14062_v26 = vpop.eup %14061 }
 0x825   :  { %vm8531_vm2 = vmor %vm8529_vm1, %vm8530_vm0 }
 0x826   :  { %v8526_v8 = vsub.f32 1.0, %v8525_v56 }
 0x828   :  { %v8527_v44 = vmul.f32 %v14060_v23, %v8526_v8 }
 0x82a   :  { %v8528_v36 = vadd.f32 %v14060_v23, %v8527_v44 }
 0x82c   :  { %v8532_v47 = vsel %vm8531_vm2, %v14060_v23, %v8528_v36 }
 0x82d   :  { %v8537_v49 = vsel %vm8534_vm11, %v8536_v22, %v8532_v47 }
 0x82e   :  { %v8550_v25 = vrot.slane %v8537_v49, 4 }
 0x830   :  { %v8552_v57 = vmul.f32 %v14062_v26, %v8550_v25 }
 0x832   :  { %8553 = vst [vmem:[#allocation2] sm:$0xf] %v8552_v57 }
 0x839   :  { %v8557_v37 = vld [vmem:[#allocation2] sm:$0xf] }
 0x83a   :  { %8559 = vst [vmem:[#allocation1] ss:$4 sm:$0xff] %v8557_v37 }
 0x841   :  { %v8560_v40 = vld.sshfl [vmem:[#allocation1] sm:$0xff pattern:$0x73625140]  ;;  %v8561_v58 = vld.sshfl [vmem:[#allocation1 + $0x8] sm:$0xff pattern:$0x73625140] }
 0x842   :  { %v8564_v59 = vpack.c.bf16 %v8560_v40, %v8560_v40  ;;  %v8565_v29 = vpack.c.bf16 %v8561_v58, %v8561_v58 }
 0x844   :  { %8706 = vmatmul.bf16.vlgmr.msra.gmra.mxu0 %v8564_v59  ;;  %8719 = vmatmul.bf16.vlgmr.msra.gmra.mxu1 %v8565_v29 }
 0x8c1   :  { %v8707_v51 = vpop.f32.mrf.mxu0  ;;  %v8720_v32 = vpop.f32.mrf.mxu1 }
 0x8c2   :  { %v8708_v48 = vadd.f32 %v13966_v17, %v8707_v51 }
 0x8c4   :  { %v8721_v11 = vadd.f32 %v8720_v32, %v8708_v48 }
 0x8c6   :  { %8724 = vst [vmem:[#allocation4] sm:$0x3] %v8721_v11 }
 0x8c7   :  { %8735 = dma.vmem_to_hbm [thread:$0]  %s8731_s23, 32, %s8733_s26, [#allocation5]  }
 0x8c9   :  { %v8709_v43 = vpop.f32.mrf.mxu0  ;;  %v8722_v41 = vpop.f32.mrf.mxu1 }
 0x8ca   :  { %14087 = dma.done.wait [#allocation5], 32  }
 0x8cb   :  { %14088 = vsyncadd [#allocation5], 4294967264 }
 0x8cc   :  { %8740 = vsyncpa [#allocation5], 1 }

</bundles_post_ra>
